<compile_context>
chip_gen: v7x
topology: tpu7x:2x2x1
jax: 0.10.0
libtpu: 0.0.40
codegen_flags: <defaults>
</compile_context>

<pallas_src>
import functools

import jax
import jax.numpy as jnp
import numpy as np
from jax.experimental import pallas as pl
from jax.experimental.pallas import tpu as pltpu


_CPAD = 128                     # lane padding for every channel / latent dim
_CIN0 = 8                       # the 1-channel spectrogram input -> 8 lanes
_LP = 128                       # padded latent width (mu | logvar = 2*_LP)
_VMEM_LIMIT = 32 * 1024 * 1024  # <= scoped default on all of v5e/v6e/v7x


def _round_up(x, m):
    return ((x + m - 1) // m) * m


# ----------------------------------------------------------------------------
# Host-side (numpy) construction of per-tap gather matrices and packed weights
# ----------------------------------------------------------------------------
def _conv_gather(h, w, k=3, stride=2, pad=1):
    """0/1 matrices G[t]: (Ho*Wo, H*W); Conv2d(k=3,s=2,p=1) tap gather."""
    ho = (h + 2 * pad - k) // stride + 1
    wo = (w + 2 * pad - k) // stride + 1
    g = np.zeros((k * k, ho * wo, h * w), np.float32)
    for ky in range(k):
        for kx in range(k):
            t = ky * k + kx
            for oy in range(ho):
                iy = oy * stride + ky - pad
                if iy < 0 or iy >= h:
                    continue
                for ox in range(wo):
                    ix = ox * stride + kx - pad
                    if ix < 0 or ix >= w:
                        continue
                    g[t, oy * wo + ox, iy * w + ix] = 1.0
    return g, ho, wo


def _deconv_gather(h, w, k=3, stride=2, pad=1, outpad=1):
    """0/1 matrices G[t]: (Ho*Wo, H*W); ConvTranspose2d(k=3,s=2,p=1,op=1)."""
    ho = (h - 1) * stride - 2 * pad + k + outpad
    wo = (w - 1) * stride - 2 * pad + k + outpad
    g = np.zeros((k * k, ho * wo, h * w), np.float32)
    for ky in range(k):
        for kx in range(k):
            t = ky * k + kx
            for iy in range(h):
                oy = iy * stride - pad + ky
                if oy < 0 or oy >= ho:
                    continue
                for ix in range(w):
                    ox = ix * stride - pad + kx
                    if ox < 0 or ox >= wo:
                        continue
                    g[t, oy * wo + ox, iy * w + ix] = 1.0
    return g, ho, wo


def _conv_taps(w, cin_pad, cout_pad):
    """PyTorch Conv2d weight (Cout, Cin, k, k) -> (k*k, cin_pad, cout_pad)."""
    co, ci, k, _ = w.shape
    t = np.zeros((k * k, cin_pad, cout_pad), np.float32)
    for ky in range(k):
        for kx in range(k):
            t[ky * k + kx, :ci, :co] = w[:, :, ky, kx].T
    return t


def _deconv_taps(w, cin_pad, cout_pad):
    """PyTorch ConvTranspose2d weight (Cin, Cout, k, k) -> (k*k, cin_pad, cout_pad)."""
    ci, co, k, _ = w.shape
    t = np.zeros((k * k, cin_pad, cout_pad), np.float32)
    for ky in range(k):
        for kx in range(k):
            t[ky * k + kx, :ci, :co] = w[:, :, ky, kx]
    return t


def _pad_bias(b, n):
    b = np.asarray(b, np.float32)
    return np.pad(b, (0, n - b.shape[0])).reshape(1, n)


# ----------------------------------------------------------------------------
# Fused Pallas kernel: one grid step == one sample's full VAE forward
# ----------------------------------------------------------------------------
def _vae_fused_kernel(
    x_ref,
    ge1_ref, we1_ref, be1_ref,
    ge2_ref, we2_ref, be2_ref,
    ge3_ref, we3_ref, be3_ref,
    wlat_ref, blat_ref, eps_ref,
    wdec_ref, bdec_ref,
    gd1_ref, wd1_ref, bd1_ref,
    gd2_ref, wd2_ref, bd2_ref,
    gd3_ref, wd3_ref, bd3_ref,
    out_ref, mu_ref, lv_ref,
    dsc_ref,
):
    f32 = jnp.float32
    bf16 = jnp.bfloat16

    def conv_block(act, g_ref, w_ref, b_ref, gather_first):
        """(rows_in, Cin) -> f32 (rows_out, Cout) = b + sum_t gather_t . W_t."""
        n_tap, r_out, _ = g_ref.shape
        c_out = w_ref.shape[2]
        acc = jnp.broadcast_to(b_ref[...], (r_out, c_out))   # bias seeds the acc
        for t in range(n_tap):
            g = g_ref[t]
            w = w_ref[t]
            if gather_first:     # encoder: rows shrink -> gather (cheap side) first
                gx = jnp.dot(g, act, preferred_element_type=f32).astype(bf16)
                acc = acc + jnp.dot(gx, w, preferred_element_type=f32)
            else:                # decoder: rows grow -> channel matmul first
                xw = jnp.dot(act, w, preferred_element_type=f32).astype(bf16)
                acc = acc + jnp.dot(g, xw, preferred_element_type=f32)
        return acc

    def relu_bf16(v):
        return jnp.maximum(v, 0.0).astype(bf16)

    # ---------------- encoder (3 strided convs, VMEM-resident) ----------------
    h = relu_bf16(conv_block(x_ref[0], ge1_ref, we1_ref, be1_ref, True))
    h = relu_bf16(conv_block(h, ge2_ref, we2_ref, be2_ref, True))
    h = relu_bf16(conv_block(h, ge3_ref, we3_ref, be3_ref, True))   # (s_enc, 128)

    # ------- fc_mu | fc_logvar (fused heads) + reparameterization -------
    s_enc = wlat_ref.shape[0]
    two_lp = wlat_ref.shape[2]
    lp = two_lp // 2
    mlv = blat_ref[...]                                             # (1, 2*Lp) f32
    for s in range(s_enc):                       # PyTorch NCHW flatten folded in
        mlv = mlv + jnp.dot(h[s:s + 1, :], wlat_ref[s],
                            preferred_element_type=f32)
    mu = mlv[:, :lp]
    lv = mlv[:, lp:]
    mu_ref[0] = mu
    lv_ref[0] = lv
    z = (mu + eps_ref[0] * jnp.exp(0.5 * lv)).astype(bf16)          # (1, Lp)

    # ------- fc_dec -> decoder input rows (NCHW .view folded in, VMEM scratch) -------
    for s in range(s_enc):
        dsc_ref[s:s + 1, :] = (jnp.dot(z, wdec_ref[s], preferred_element_type=f32)
                               + bdec_ref[s])
    d = dsc_ref[0:s_enc, :].astype(bf16)                            # (s_enc, 128)

    # ---------------- decoder (3 transposed convs) ----------------
    o = relu_bf16(conv_block(d, gd1_ref, wd1_ref, bd1_ref, False))
    o = relu_bf16(conv_block(o, gd2_ref, wd2_ref, bd2_ref, False))
    o = conv_block(o, gd3_ref, wd3_ref, bd3_ref, False)             # f32 pre-sigmoid
    out_ref[0] = 1.0 / (1.0 + jnp.exp(-o))                          # sigmoid (EUP exp)


# ----------------------------------------------------------------------------
# Parameter init (PyTorch-style U(-1/sqrt(fan_in), 1/sqrt(fan_in)))
# ----------------------------------------------------------------------------
def _uni(key, shape, fan_in):
    bound = 1.0 / jnp.sqrt(float(fan_in))
    return jax.random.uniform(key, shape, jnp.float32, -bound, bound)


def build_vae(key, freq_bins, time_frames, latent_dim):
    def conv_out(n):
        return (n + 2 * 1 - 3) // 2 + 1

    h1, w1 = conv_out(freq_bins), conv_out(time_frames)
    h2, w2 = conv_out(h1), conv_out(w1)
    h_enc, w_enc = conv_out(h2), conv_out(w2)
    flat_dim = 128 * h_enc * w_enc

    ks = jax.random.split(key, 18)
    p = {
        "ec1_w": _uni(ks[0], (32, 1, 3, 3), 1 * 9),    "ec1_b": _uni(ks[1], (32,), 1 * 9),
        "ec2_w": _uni(ks[2], (64, 32, 3, 3), 32 * 9),  "ec2_b": _uni(ks[3], (64,), 32 * 9),
        "ec3_w": _uni(ks[4], (128, 64, 3, 3), 64 * 9), "ec3_b": _uni(ks[5], (128,), 64 * 9),
        "fc_mu_w": _uni(ks[6], (flat_dim, latent_dim), flat_dim),
        "fc_mu_b": _uni(ks[7], (latent_dim,), flat_dim),
        "fc_lv_w": _uni(ks[8], (flat_dim, latent_dim), flat_dim),
        "fc_lv_b": _uni(ks[9], (latent_dim,), flat_dim),
        "fc_dec_w": _uni(ks[10], (latent_dim, flat_dim), latent_dim),
        "fc_dec_b": _uni(ks[11], (flat_dim,), latent_dim),
        "dc1_w": _uni(ks[12], (128, 64, 3, 3), 128 * 9), "dc1_b": _uni(ks[13], (64,), 128 * 9),
        "dc2_w": _uni(ks[14], (64, 32, 3, 3), 64 * 9),   "dc2_b": _uni(ks[15], (32,), 64 * 9),
        "dc3_w": _uni(ks[16], (32, 1, 3, 3), 32 * 9),    "dc3_b": _uni(ks[17], (1,), 32 * 9),
    }
    dims = dict(freq_bins=freq_bins, time_frames=time_frames,
                latent_dim=latent_dim, h_enc=h_enc, w_enc=w_enc, flat_dim=flat_dim)
    return p, dims


# ----------------------------------------------------------------------------
# Host-side preparation of kernel-ready (padded, lane-dense) operands
# ----------------------------------------------------------------------------
def prepare_fused(params, dims):
    pnp = {k: np.asarray(v, np.float32) for k, v in params.items()}
    F, T, L = dims["freq_bins"], dims["time_frames"], dims["latent_dim"]
    he, we = dims["h_enc"], dims["w_enc"]
    s_enc = he * we
    assert L <= _LP

    ge1, h1, w1 = _conv_gather(F, T)
    ge2, h2, w2 = _conv_gather(h1, w1)
    ge3, h3, w3 = _conv_gather(h2, w2)
    assert (h3, w3) == (he, we)
    gd1, dh1, dw1 = _deconv_gather(he, we)
    gd2, dh2, dw2 = _deconv_gather(dh1, dw1)
    gd3, dh3, dw3 = _deconv_gather(dh2, dw2)

    # latent heads decomposed over the h_enc*w_enc spatial positions so the
    # PyTorch NCHW flatten / view never materializes outside the kernel.
    w_mu_s = np.stack([pnp["fc_mu_w"][s::s_enc, :] for s in range(s_enc)])
    w_lv_s = np.stack([pnp["fc_lv_w"][s::s_enc, :] for s in range(s_enc)])
    c_enc = w_mu_s.shape[1]
    wlat = np.zeros((s_enc, _CPAD, 2 * _LP), np.float32)
    wlat[:, :c_enc, :L] = w_mu_s
    wlat[:, :c_enc, _LP:_LP + L] = w_lv_s
    blat = np.zeros((1, 2 * _LP), np.float32)
    blat[0, :L] = pnp["fc_mu_b"]
    blat[0, _LP:_LP + L] = pnp["fc_lv_b"]

    wdec = np.zeros((s_enc, _LP, _CPAD), np.float32)
    bdec = np.zeros((s_enc, 1, _CPAD), np.float32)
    for s in range(s_enc):
        wdec[s, :L, :c_enc] = pnp["fc_dec_w"][:, s::s_enc]
        bdec[s, 0, :c_enc] = pnp["fc_dec_b"][s::s_enc]

    bf = jnp.bfloat16
    prep = dict(
        ge1=jnp.asarray(ge1, bf), we1=jnp.asarray(_conv_taps(pnp["ec1_w"], _CIN0, _CPAD), bf),
        be1=jnp.asarray(_pad_bias(pnp["ec1_b"], _CPAD)),
        ge2=jnp.asarray(ge2, bf), we2=jnp.asarray(_conv_taps(pnp["ec2_w"], _CPAD, _CPAD), bf),
        be2=jnp.asarray(_pad_bias(pnp["ec2_b"], _CPAD)),
        ge3=jnp.asarray(ge3, bf), we3=jnp.asarray(_conv_taps(pnp["ec3_w"], _CPAD, _CPAD), bf),
        be3=jnp.asarray(_pad_bias(pnp["ec3_b"], _CPAD)),
        wlat=jnp.asarray(wlat, bf), blat=jnp.asarray(blat),
        wdec=jnp.asarray(wdec, bf), bdec=jnp.asarray(bdec),
        gd1=jnp.asarray(gd1, bf), wd1=jnp.asarray(_deconv_taps(pnp["dc1_w"], _CPAD, _CPAD), bf),
        bd1=jnp.asarray(_pad_bias(pnp["dc1_b"], _CPAD)),
        gd2=jnp.asarray(gd2, bf), wd2=jnp.asarray(_deconv_taps(pnp["dc2_w"], _CPAD, _CPAD), bf),
        bd2=jnp.asarray(_pad_bias(pnp["dc2_b"], _CPAD)),
        gd3=jnp.asarray(gd3, bf), wd3=jnp.asarray(_deconv_taps(pnp["dc3_w"], _CPAD, _CPAD), bf),
        bd3=jnp.asarray(_pad_bias(pnp["dc3_b"], _CPAD)),
    )
    # true (unpadded) per-sample work for the CostEstimate
    flops = (2 * 9 * (h1 * w1 * 1 * 32 + h2 * w2 * 32 * 64 + he * we * 64 * 128
                      + he * we * 128 * 64 + dh1 * dw1 * 64 * 32 + dh2 * dw2 * 32 * 1)
             + 2 * dims["flat_dim"] * L * 2 + 2 * L * dims["flat_dim"])
    meta = dict(dec_h=dh3, dec_w=dw3, s_enc=s_enc,
                flops=int(flops), transcendentals=int(dh3 * dw3 + L))
    return prep, meta


# ----------------------------------------------------------------------------
# Forward pass (matches SpectrogramVAE.forward)
# ----------------------------------------------------------------------------
def spectrogram_vae_forward(prep, meta, dims, x, eps_key):
    B = x.shape[0]
    F, T, L = dims["freq_bins"], dims["time_frames"], dims["latent_dim"]
    s0 = F * T
    dec_h, dec_w, s_enc = meta["dec_h"], meta["dec_w"], meta["s_enc"]
    dec_rows = dec_h * dec_w

    # NCHW (B,1,F,T) -> per-sample row-major pixel rows, channel padded to 8 lanes
    x_rows = jnp.pad(x.reshape(B, s0, 1),
                     ((0, 0), (0, 0), (0, _CIN0 - 1))).astype(jnp.bfloat16)
    eps = jax.random.normal(eps_key, (B, L), jnp.float32)       # torch.randn_like
    eps_p = jnp.zeros((B, 1, _LP), jnp.float32).at[:, 0, :L].set(eps)

    inputs = (
        x_rows,
        prep["ge1"], prep["we1"], prep["be1"],
        prep["ge2"], prep["we2"], prep["be2"],
        prep["ge3"], prep["we3"], prep["be3"],
        prep["wlat"], prep["blat"], eps_p,
        prep["wdec"], prep["bdec"],
        prep["gd1"], prep["wd1"], prep["bd1"],
        prep["gd2"], prep["wd2"], prep["bd2"],
        prep["gd3"], prep["wd3"], prep["bd3"],
    )

    def batched(a):
        nd = a.ndim
        return pl.BlockSpec((1,) + tuple(a.shape[1:]),
                            lambda b, _n=nd: (b,) + (0,) * (_n - 1))

    def shared(a):
        nd = a.ndim
        return pl.BlockSpec(tuple(a.shape), lambda b, _n=nd: (0,) * _n)

    in_specs = [batched(a) if i in (0, 12) else shared(a) for i, a in enumerate(inputs)]

    out_shape = (
        jax.ShapeDtypeStruct((B, dec_rows, _CPAD), jnp.float32),
        jax.ShapeDtypeStruct((B, 1, _LP), jnp.float32),
        jax.ShapeDtypeStruct((B, 1, _LP), jnp.float32),
    )
    out_specs = (
        pl.BlockSpec((1, dec_rows, _CPAD), lambda b: (b, 0, 0)),
        pl.BlockSpec((1, 1, _LP), lambda b: (b, 0, 0)),
        pl.BlockSpec((1, 1, _LP), lambda b: (b, 0, 0)),
    )

    in_bytes = sum(int(np.prod(a.shape)) * a.dtype.itemsize for a in inputs)
    out_bytes = sum(int(np.prod(s.shape)) * jnp.dtype(s.dtype).itemsize for s in out_shape)

    out_rows, mu_p, lv_p = pl.pallas_call(
        _vae_fused_kernel,
        grid=(B,),
        in_specs=in_specs,
        out_specs=out_specs,
        out_shape=out_shape,
        scratch_shapes=[pltpu.VMEM((_round_up(max(s_enc, 8), 8), _CPAD), jnp.float32)],
        compiler_params=pltpu.CompilerParams(
            dimension_semantics=("parallel",),
            vmem_limit_bytes=_VMEM_LIMIT,
        ),
        cost_estimate=pl.CostEstimate(
            flops=B * meta["flops"],
            transcendentals=B * meta["transcendentals"],
            bytes_accessed=in_bytes + out_bytes,
        ),
    )(*inputs)

    out = out_rows[:, :, 0].reshape(B, 1, dec_h, dec_w)
    mu = mu_p[:, 0, :L]
    logvar = lv_p[:, 0, :L]
    if (dec_h, dec_w) != (F, T):
        # TODO(synk): bilinear-resize fallback uses jax.image.resize (plain XLA,
        # not Pallas) and is not bit-identical to PyTorch F.interpolate.
        out = jax.image.resize(out, (B, 1, F, T), method="bilinear")
    return out, mu, logvar


# ----------------------------------------------------------------------------
if __name__ == "__main__":
    FREQ, TIME, LATENT, BATCH = 16, 16, 32, 2

    key = jax.random.PRNGKey(0)
    k_params, k_x, k_eps = jax.random.split(key, 3)

    params, dims = build_vae(k_params, FREQ, TIME, LATENT)
    prep, meta = prepare_fused(params, dims)
    x = jax.random.uniform(k_x, (BATCH, 1, FREQ, TIME), jnp.float32)  # spectrogram-like

    fwd = jax.jit(functools.partial(spectrogram_vae_forward, prep, meta, dims))
    out, mu, logvar = fwd(x, k_eps)
    jax.block_until_ready((out, mu, logvar))

    assert out.shape == (BATCH, 1, FREQ, TIME)
    assert mu.shape == (BATCH, LATENT) and logvar.shape == (BATCH, LATENT)
    assert bool(jnp.all(jnp.isfinite(out))) and bool(jnp.all((out >= 0) & (out <= 1)))
    print("KERNEL_OK")
</pallas_src>

<mosaic_0001>
module attributes {stable_mosaic.version = 11 : i64} {
  func.func @_vae_fused_kernel(%arg0: i32, %arg1: memref<1x256x8xbf16, #tpu.memory_space<vmem>>, %arg2: memref<9x64x256xbf16, #tpu.memory_space<vmem>>, %arg3: memref<9x8x128xbf16, #tpu.memory_space<vmem>>, %arg4: memref<1x128xf32, #tpu.memory_space<vmem>>, %arg5: memref<9x16x64xbf16, #tpu.memory_space<vmem>>, %arg6: memref<9x128x128xbf16, #tpu.memory_space<vmem>>, %arg7: memref<1x128xf32, #tpu.memory_space<vmem>>, %arg8: memref<9x4x16xbf16, #tpu.memory_space<vmem>>, %arg9: memref<9x128x128xbf16, #tpu.memory_space<vmem>>, %arg10: memref<1x128xf32, #tpu.memory_space<vmem>>, %arg11: memref<4x128x256xbf16, #tpu.memory_space<vmem>>, %arg12: memref<1x256xf32, #tpu.memory_space<vmem>>, %arg13: memref<1x1x128xf32, #tpu.memory_space<vmem>>, %arg14: memref<4x128x128xbf16, #tpu.memory_space<vmem>>, %arg15: memref<4x1x128xf32, #tpu.memory_space<vmem>>, %arg16: memref<9x16x4xbf16, #tpu.memory_space<vmem>>, %arg17: memref<9x128x128xbf16, #tpu.memory_space<vmem>>, %arg18: memref<1x128xf32, #tpu.memory_space<vmem>>, %arg19: memref<9x64x16xbf16, #tpu.memory_space<vmem>>, %arg20: memref<9x128x128xbf16, #tpu.memory_space<vmem>>, %arg21: memref<1x128xf32, #tpu.memory_space<vmem>>, %arg22: memref<9x256x64xbf16, #tpu.memory_space<vmem>>, %arg23: memref<9x128x128xbf16, #tpu.memory_space<vmem>>, %arg24: memref<1x128xf32, #tpu.memory_space<vmem>>, %arg25: memref<1x256x128xf32, #tpu.memory_space<vmem>>, %arg26: memref<1x1x128xf32, #tpu.memory_space<vmem>>, %arg27: memref<1x1x128xf32, #tpu.memory_space<vmem>>, %arg28: memref<8x128xf32, #tpu.memory_space<vmem>>) attributes {dimension_semantics = [#tpu.dimension_semantics<parallel>], iteration_bounds = array<i64: 2>, scalar_prefetch = 0 : i64, scratch_operands = 1 : i64, tpu.core_type = #tpu.core_type<tc>, window_params = [{transform_indices = @transform_0, window_bounds = array<i64: 1, 256, 8>}, {pipeline_mode = #tpu.pipeline_mode<synchronous>, transform_indices = @transform_1, window_bounds = array<i64: 9, 64, 256>}, {pipeline_mode = #tpu.pipeline_mode<synchronous>, transform_indices = @transform_2, window_bounds = array<i64: 9, 8, 128>}, {pipeline_mode = #tpu.pipeline_mode<synchronous>, transform_indices = @transform_3, window_bounds = array<i64: 1, 128>}, {pipeline_mode = #tpu.pipeline_mode<synchronous>, transform_indices = @transform_4, window_bounds = array<i64: 9, 16, 64>}, {pipeline_mode = #tpu.pipeline_mode<synchronous>, transform_indices = @transform_5, window_bounds = array<i64: 9, 128, 128>}, {pipeline_mode = #tpu.pipeline_mode<synchronous>, transform_indices = @transform_6, window_bounds = array<i64: 1, 128>}, {pipeline_mode = #tpu.pipeline_mode<synchronous>, transform_indices = @transform_7, window_bounds = array<i64: 9, 4, 16>}, {pipeline_mode = #tpu.pipeline_mode<synchronous>, transform_indices = @transform_8, window_bounds = array<i64: 9, 128, 128>}, {pipeline_mode = #tpu.pipeline_mode<synchronous>, transform_indices = @transform_9, window_bounds = array<i64: 1, 128>}, {pipeline_mode = #tpu.pipeline_mode<synchronous>, transform_indices = @transform_10, window_bounds = array<i64: 4, 128, 256>}, {pipeline_mode = #tpu.pipeline_mode<synchronous>, transform_indices = @transform_11, window_bounds = array<i64: 1, 256>}, {transform_indices = @transform_12, window_bounds = array<i64: 1, 1, 128>}, {pipeline_mode = #tpu.pipeline_mode<synchronous>, transform_indices = @transform_13, window_bounds = array<i64: 4, 128, 128>}, {pipeline_mode = #tpu.pipeline_mode<synchronous>, transform_indices = @transform_14, window_bounds = array<i64: 4, 1, 128>}, {pipeline_mode = #tpu.pipeline_mode<synchronous>, transform_indices = @transform_15, window_bounds = array<i64: 9, 16, 4>}, {pipeline_mode = #tpu.pipeline_mode<synchronous>, transform_indices = @transform_16, window_bounds = array<i64: 9, 128, 128>}, {pipeline_mode = #tpu.pipeline_mode<synchronous>, transform_indices = @transform_17, window_bounds = array<i64: 1, 128>}, {pipeline_mode = #tpu.pipeline_mode<synchronous>, transform_indices = @transform_18, window_bounds = array<i64: 9, 64, 16>}, {pipeline_mode = #tpu.pipeline_mode<synchronous>, transform_indices = @transform_19, window_bounds = array<i64: 9, 128, 128>}, {pipeline_mode = #tpu.pipeline_mode<synchronous>, transform_indices = @transform_20, window_bounds = array<i64: 1, 128>}, {pipeline_mode = #tpu.pipeline_mode<synchronous>, transform_indices = @transform_21, window_bounds = array<i64: 9, 256, 64>}, {pipeline_mode = #tpu.pipeline_mode<synchronous>, transform_indices = @transform_22, window_bounds = array<i64: 9, 128, 128>}, {pipeline_mode = #tpu.pipeline_mode<synchronous>, transform_indices = @transform_23, window_bounds = array<i64: 1, 128>}, {transform_indices = @transform_24, window_bounds = array<i64: 1, 256, 128>}, {transform_indices = @transform_25, window_bounds = array<i64: 1, 1, 128>}, {transform_indices = @transform_26, window_bounds = array<i64: 1, 1, 128>}]} {
    %c0 = arith.constant 0 : index
    %c0_0 = arith.constant 0 : index
    %c0_1 = arith.constant 0 : index
    %0 = vector.load %arg1[%c0, %c0_0, %c0_1] : memref<1x256x8xbf16, #tpu.memory_space<vmem>>, vector<1x256x8xbf16>
    %1 = vector.shape_cast %0 : vector<1x256x8xbf16> to vector<256x8xbf16>
    %c0_2 = arith.constant 0 : index
    %c0_3 = arith.constant 0 : index
    %2 = vector.load %arg4[%c0_2, %c0_3] : memref<1x128xf32, #tpu.memory_space<vmem>>, vector<1x128xf32>
    %3 = vector.shape_cast %2 : vector<1x128xf32> to vector<1x128xf32>
    %4 = vector.broadcast %3 : vector<1x128xf32> to vector<64x128xf32>
    %c0_4 = arith.constant 0 : index
    %c0_5 = arith.constant 0 : index
    %c0_6 = arith.constant 0 : index
    %5 = vector.load %arg2[%c0_4, %c0_5, %c0_6] : memref<9x64x256xbf16, #tpu.memory_space<vmem>>, vector<1x64x256xbf16>
    %6 = vector.shape_cast %5 : vector<1x64x256xbf16> to vector<64x256xbf16>
    %c0_7 = arith.constant 0 : index
    %c0_8 = arith.constant 0 : index
    %c0_9 = arith.constant 0 : index
    %7 = vector.load %arg3[%c0_7, %c0_8, %c0_9] : memref<9x8x128xbf16, #tpu.memory_space<vmem>>, vector<1x8x128xbf16>
    %8 = vector.shape_cast %7 : vector<1x8x128xbf16> to vector<8x128xbf16>
    %cst = arith.constant dense<0.000000e+00> : vector<64x8xf32>
    %9 = tpu.matmul %6, %1, %cst {dimension_numbers = #tpu.dot_dimension_numbers<[1], [0], [0], [1], [0, 0, 1, 1], [], []>} : vector<64x256xbf16>, vector<256x8xbf16>, vector<64x8xf32> -> vector<64x8xf32>
    %10 = arith.truncf %9 : vector<64x8xf32> to vector<64x8xbf16>
    %cst_10 = arith.constant dense<0.000000e+00> : vector<64x128xf32>
    %11 = tpu.matmul %10, %8, %cst_10 {dimension_numbers = #tpu.dot_dimension_numbers<[1], [0], [0], [1], [0, 0, 1, 1], [], []>} : vector<64x8xbf16>, vector<8x128xbf16>, vector<64x128xf32> -> vector<64x128xf32>
    %12 = arith.addf %4, %11 : vector<64x128xf32>
    %c1 = arith.constant 1 : index
    %c0_11 = arith.constant 0 : index
    %c0_12 = arith.constant 0 : index
    %13 = vector.load %arg2[%c1, %c0_11, %c0_12] : memref<9x64x256xbf16, #tpu.memory_space<vmem>>, vector<1x64x256xbf16>
    %14 = vector.shape_cast %13 : vector<1x64x256xbf16> to vector<64x256xbf16>
    %c1_13 = arith.constant 1 : index
    %c0_14 = arith.constant 0 : index
    %c0_15 = arith.constant 0 : index
    %15 = vector.load %arg3[%c1_13, %c0_14, %c0_15] : memref<9x8x128xbf16, #tpu.memory_space<vmem>>, vector<1x8x128xbf16>
    %16 = vector.shape_cast %15 : vector<1x8x128xbf16> to vector<8x128xbf16>
    %cst_16 = arith.constant dense<0.000000e+00> : vector<64x8xf32>
    %17 = tpu.matmul %14, %1, %cst_16 {dimension_numbers = #tpu.dot_dimension_numbers<[1], [0], [0], [1], [0, 0, 1, 1], [], []>} : vector<64x256xbf16>, vector<256x8xbf16>, vector<64x8xf32> -> vector<64x8xf32>
    %18 = arith.truncf %17 : vector<64x8xf32> to vector<64x8xbf16>
    %cst_17 = arith.constant dense<0.000000e+00> : vector<64x128xf32>
    %19 = tpu.matmul %18, %16, %cst_17 {dimension_numbers = #tpu.dot_dimension_numbers<[1], [0], [0], [1], [0, 0, 1, 1], [], []>} : vector<64x8xbf16>, vector<8x128xbf16>, vector<64x128xf32> -> vector<64x128xf32>
    %20 = arith.addf %12, %19 : vector<64x128xf32>
    %c2 = arith.constant 2 : index
    %c0_18 = arith.constant 0 : index
    %c0_19 = arith.constant 0 : index
    %21 = vector.load %arg2[%c2, %c0_18, %c0_19] : memref<9x64x256xbf16, #tpu.memory_space<vmem>>, vector<1x64x256xbf16>
    %22 = vector.shape_cast %21 : vector<1x64x256xbf16> to vector<64x256xbf16>
    %c2_20 = arith.constant 2 : index
    %c0_21 = arith.constant 0 : index
    %c0_22 = arith.constant 0 : index
    %23 = vector.load %arg3[%c2_20, %c0_21, %c0_22] : memref<9x8x128xbf16, #tpu.memory_space<vmem>>, vector<1x8x128xbf16>
    %24 = vector.shape_cast %23 : vector<1x8x128xbf16> to vector<8x128xbf16>
    %cst_23 = arith.constant dense<0.000000e+00> : vector<64x8xf32>
    %25 = tpu.matmul %22, %1, %cst_23 {dimension_numbers = #tpu.dot_dimension_numbers<[1], [0], [0], [1], [0, 0, 1, 1], [], []>} : vector<64x256xbf16>, vector<256x8xbf16>, vector<64x8xf32> -> vector<64x8xf32>
    %26 = arith.truncf %25 : vector<64x8xf32> to vector<64x8xbf16>
    %cst_24 = arith.constant dense<0.000000e+00> : vector<64x128xf32>
    %27 = tpu.matmul %26, %24, %cst_24 {dimension_numbers = #tpu.dot_dimension_numbers<[1], [0], [0], [1], [0, 0, 1, 1], [], []>} : vector<64x8xbf16>, vector<8x128xbf16>, vector<64x128xf32> -> vector<64x128xf32>
    %28 = arith.addf %20, %27 : vector<64x128xf32>
    %c3 = arith.constant 3 : index
    %c0_25 = arith.constant 0 : index
    %c0_26 = arith.constant 0 : index
    %29 = vector.load %arg2[%c3, %c0_25, %c0_26] : memref<9x64x256xbf16, #tpu.memory_space<vmem>>, vector<1x64x256xbf16>
    %30 = vector.shape_cast %29 : vector<1x64x256xbf16> to vector<64x256xbf16>
    %c3_27 = arith.constant 3 : index
    %c0_28 = arith.constant 0 : index
    %c0_29 = arith.constant 0 : index
    %31 = vector.load %arg3[%c3_27, %c0_28, %c0_29] : memref<9x8x128xbf16, #tpu.memory_space<vmem>>, vector<1x8x128xbf16>
    %32 = vector.shape_cast %31 : vector<1x8x128xbf16> to vector<8x128xbf16>
    %cst_30 = arith.constant dense<0.000000e+00> : vector<64x8xf32>
    %33 = tpu.matmul %30, %1, %cst_30 {dimension_numbers = #tpu.dot_dimension_numbers<[1], [0], [0], [1], [0, 0, 1, 1], [], []>} : vector<64x256xbf16>, vector<256x8xbf16>, vector<64x8xf32> -> vector<64x8xf32>
    %34 = arith.truncf %33 : vector<64x8xf32> to vector<64x8xbf16>
    %cst_31 = arith.constant dense<0.000000e+00> : vector<64x128xf32>
    %35 = tpu.matmul %34, %32, %cst_31 {dimension_numbers = #tpu.dot_dimension_numbers<[1], [0], [0], [1], [0, 0, 1, 1], [], []>} : vector<64x8xbf16>, vector<8x128xbf16>, vector<64x128xf32> -> vector<64x128xf32>
    %36 = arith.addf %28, %35 : vector<64x128xf32>
    %c4 = arith.constant 4 : index
    %c0_32 = arith.constant 0 : index
    %c0_33 = arith.constant 0 : index
    %37 = vector.load %arg2[%c4, %c0_32, %c0_33] : memref<9x64x256xbf16, #tpu.memory_space<vmem>>, vector<1x64x256xbf16>
    %38 = vector.shape_cast %37 : vector<1x64x256xbf16> to vector<64x256xbf16>
    %c4_34 = arith.constant 4 : index
    %c0_35 = arith.constant 0 : index
    %c0_36 = arith.constant 0 : index
    %39 = vector.load %arg3[%c4_34, %c0_35, %c0_36] : memref<9x8x128xbf16, #tpu.memory_space<vmem>>, vector<1x8x128xbf16>
    %40 = vector.shape_cast %39 : vector<1x8x128xbf16> to vector<8x128xbf16>
    %cst_37 = arith.constant dense<0.000000e+00> : vector<64x8xf32>
    %41 = tpu.matmul %38, %1, %cst_37 {dimension_numbers = #tpu.dot_dimension_numbers<[1], [0], [0], [1], [0, 0, 1, 1], [], []>} : vector<64x256xbf16>, vector<256x8xbf16>, vector<64x8xf32> -> vector<64x8xf32>
    %42 = arith.truncf %41 : vector<64x8xf32> to vector<64x8xbf16>
    %cst_38 = arith.constant dense<0.000000e+00> : vector<64x128xf32>
    %43 = tpu.matmul %42, %40, %cst_38 {dimension_numbers = #tpu.dot_dimension_numbers<[1], [0], [0], [1], [0, 0, 1, 1], [], []>} : vector<64x8xbf16>, vector<8x128xbf16>, vector<64x128xf32> -> vector<64x128xf32>
    %44 = arith.addf %36, %43 : vector<64x128xf32>
    %c5 = arith.constant 5 : index
    %c0_39 = arith.constant 0 : index
    %c0_40 = arith.constant 0 : index
    %45 = vector.load %arg2[%c5, %c0_39, %c0_40] : memref<9x64x256xbf16, #tpu.memory_space<vmem>>, vector<1x64x256xbf16>
    %46 = vector.shape_cast %45 : vector<1x64x256xbf16> to vector<64x256xbf16>
    %c5_41 = arith.constant 5 : index
    %c0_42 = arith.constant 0 : index
    %c0_43 = arith.constant 0 : index
    %47 = vector.load %arg3[%c5_41, %c0_42, %c0_43] : memref<9x8x128xbf16, #tpu.memory_space<vmem>>, vector<1x8x128xbf16>
    %48 = vector.shape_cast %47 : vector<1x8x128xbf16> to vector<8x128xbf16>
    %cst_44 = arith.constant dense<0.000000e+00> : vector<64x8xf32>
    %49 = tpu.matmul %46, %1, %cst_44 {dimension_numbers = #tpu.dot_dimension_numbers<[1], [0], [0], [1], [0, 0, 1, 1], [], []>} : vector<64x256xbf16>, vector<256x8xbf16>, vector<64x8xf32> -> vector<64x8xf32>
    %50 = arith.truncf %49 : vector<64x8xf32> to vector<64x8xbf16>
    %cst_45 = arith.constant dense<0.000000e+00> : vector<64x128xf32>
    %51 = tpu.matmul %50, %48, %cst_45 {dimension_numbers = #tpu.dot_dimension_numbers<[1], [0], [0], [1], [0, 0, 1, 1], [], []>} : vector<64x8xbf16>, vector<8x128xbf16>, vector<64x128xf32> -> vector<64x128xf32>
    %52 = arith.addf %44, %51 : vector<64x128xf32>
    %c6 = arith.constant 6 : index
    %c0_46 = arith.constant 0 : index
    %c0_47 = arith.constant 0 : index
    %53 = vector.load %arg2[%c6, %c0_46, %c0_47] : memref<9x64x256xbf16, #tpu.memory_space<vmem>>, vector<1x64x256xbf16>
    %54 = vector.shape_cast %53 : vector<1x64x256xbf16> to vector<64x256xbf16>
    %c6_48 = arith.constant 6 : index
    %c0_49 = arith.constant 0 : index
    %c0_50 = arith.constant 0 : index
    %55 = vector.load %arg3[%c6_48, %c0_49, %c0_50] : memref<9x8x128xbf16, #tpu.memory_space<vmem>>, vector<1x8x128xbf16>
    %56 = vector.shape_cast %55 : vector<1x8x128xbf16> to vector<8x128xbf16>
    %cst_51 = arith.constant dense<0.000000e+00> : vector<64x8xf32>
    %57 = tpu.matmul %54, %1, %cst_51 {dimension_numbers = #tpu.dot_dimension_numbers<[1], [0], [0], [1], [0, 0, 1, 1], [], []>} : vector<64x256xbf16>, vector<256x8xbf16>, vector<64x8xf32> -> vector<64x8xf32>
    %58 = arith.truncf %57 : vector<64x8xf32> to vector<64x8xbf16>
    %cst_52 = arith.constant dense<0.000000e+00> : vector<64x128xf32>
    %59 = tpu.matmul %58, %56, %cst_52 {dimension_numbers = #tpu.dot_dimension_numbers<[1], [0], [0], [1], [0, 0, 1, 1], [], []>} : vector<64x8xbf16>, vector<8x128xbf16>, vector<64x128xf32> -> vector<64x128xf32>
    %60 = arith.addf %52, %59 : vector<64x128xf32>
    %c7 = arith.constant 7 : index
    %c0_53 = arith.constant 0 : index
    %c0_54 = arith.constant 0 : index
    %61 = vector.load %arg2[%c7, %c0_53, %c0_54] : memref<9x64x256xbf16, #tpu.memory_space<vmem>>, vector<1x64x256xbf16>
    %62 = vector.shape_cast %61 : vector<1x64x256xbf16> to vector<64x256xbf16>
    %c7_55 = arith.constant 7 : index
    %c0_56 = arith.constant 0 : index
    %c0_57 = arith.constant 0 : index
    %63 = vector.load %arg3[%c7_55, %c0_56, %c0_57] : memref<9x8x128xbf16, #tpu.memory_space<vmem>>, vector<1x8x128xbf16>
    %64 = vector.shape_cast %63 : vector<1x8x128xbf16> to vector<8x128xbf16>
    %cst_58 = arith.constant dense<0.000000e+00> : vector<64x8xf32>
    %65 = tpu.matmul %62, %1, %cst_58 {dimension_numbers = #tpu.dot_dimension_numbers<[1], [0], [0], [1], [0, 0, 1, 1], [], []>} : vector<64x256xbf16>, vector<256x8xbf16>, vector<64x8xf32> -> vector<64x8xf32>
    %66 = arith.truncf %65 : vector<64x8xf32> to vector<64x8xbf16>
    %cst_59 = arith.constant dense<0.000000e+00> : vector<64x128xf32>
    %67 = tpu.matmul %66, %64, %cst_59 {dimension_numbers = #tpu.dot_dimension_numbers<[1], [0], [0], [1], [0, 0, 1, 1], [], []>} : vector<64x8xbf16>, vector<8x128xbf16>, vector<64x128xf32> -> vector<64x128xf32>
    %68 = arith.addf %60, %67 : vector<64x128xf32>
    %c8 = arith.constant 8 : index
    %c0_60 = arith.constant 0 : index
    %c0_61 = arith.constant 0 : index
    %69 = vector.load %arg2[%c8, %c0_60, %c0_61] : memref<9x64x256xbf16, #tpu.memory_space<vmem>>, vector<1x64x256xbf16>
    %70 = vector.shape_cast %69 : vector<1x64x256xbf16> to vector<64x256xbf16>
    %c8_62 = arith.constant 8 : index
    %c0_63 = arith.constant 0 : index
    %c0_64 = arith.constant 0 : index
    %71 = vector.load %arg3[%c8_62, %c0_63, %c0_64] : memref<9x8x128xbf16, #tpu.memory_space<vmem>>, vector<1x8x128xbf16>
    %72 = vector.shape_cast %71 : vector<1x8x128xbf16> to vector<8x128xbf16>
    %cst_65 = arith.constant dense<0.000000e+00> : vector<64x8xf32>
    %73 = tpu.matmul %70, %1, %cst_65 {dimension_numbers = #tpu.dot_dimension_numbers<[1], [0], [0], [1], [0, 0, 1, 1], [], []>} : vector<64x256xbf16>, vector<256x8xbf16>, vector<64x8xf32> -> vector<64x8xf32>
    %74 = arith.truncf %73 : vector<64x8xf32> to vector<64x8xbf16>
    %cst_66 = arith.constant dense<0.000000e+00> : vector<64x128xf32>
    %75 = tpu.matmul %74, %72, %cst_66 {dimension_numbers = #tpu.dot_dimension_numbers<[1], [0], [0], [1], [0, 0, 1, 1], [], []>} : vector<64x8xbf16>, vector<8x128xbf16>, vector<64x128xf32> -> vector<64x128xf32>
    %76 = arith.addf %68, %75 : vector<64x128xf32>
    %cst_67 = arith.constant 0.000000e+00 : f32
    %77 = vector.broadcast %cst_67 : f32 to vector<64x128xf32>
    %78 = arith.maximumf %76, %77 : vector<64x128xf32>
    %79 = arith.truncf %78 : vector<64x128xf32> to vector<64x128xbf16>
    %c0_68 = arith.constant 0 : index
    %c0_69 = arith.constant 0 : index
    %80 = vector.load %arg7[%c0_68, %c0_69] : memref<1x128xf32, #tpu.memory_space<vmem>>, vector<1x128xf32>
    %81 = vector.shape_cast %80 : vector<1x128xf32> to vector<1x128xf32>
    %82 = vector.broadcast %81 : vector<1x128xf32> to vector<16x128xf32>
    %c0_70 = arith.constant 0 : index
    %c0_71 = arith.constant 0 : index
    %c0_72 = arith.constant 0 : index
    %83 = vector.load %arg5[%c0_70, %c0_71, %c0_72] : memref<9x16x64xbf16, #tpu.memory_space<vmem>>, vector<1x16x64xbf16>
    %84 = vector.shape_cast %83 : vector<1x16x64xbf16> to vector<16x64xbf16>
    %c0_73 = arith.constant 0 : index
    %c0_74 = arith.constant 0 : index
    %c0_75 = arith.constant 0 : index
    %85 = vector.load %arg6[%c0_73, %c0_74, %c0_75] : memref<9x128x128xbf16, #tpu.memory_space<vmem>>, vector<1x128x128xbf16>
    %86 = vector.shape_cast %85 : vector<1x128x128xbf16> to vector<128x128xbf16>
    %cst_76 = arith.constant dense<0.000000e+00> : vector<16x128xf32>
    %87 = tpu.matmul %84, %79, %cst_76 {dimension_numbers = #tpu.dot_dimension_numbers<[1], [0], [0], [1], [0, 0, 1, 1], [], []>} : vector<16x64xbf16>, vector<64x128xbf16>, vector<16x128xf32> -> vector<16x128xf32>
    %88 = arith.truncf %87 : vector<16x128xf32> to vector<16x128xbf16>
    %cst_77 = arith.constant dense<0.000000e+00> : vector<16x128xf32>
    %89 = tpu.matmul %88, %86, %cst_77 {dimension_numbers = #tpu.dot_dimension_numbers<[1], [0], [0], [1], [0, 0, 1, 1], [], []>} : vector<16x128xbf16>, vector<128x128xbf16>, vector<16x128xf32> -> vector<16x128xf32>
    %90 = arith.addf %82, %89 : vector<16x128xf32>
    %c1_78 = arith.constant 1 : index
    %c0_79 = arith.constant 0 : index
    %c0_80 = arith.constant 0 : index
    %91 = vector.load %arg5[%c1_78, %c0_79, %c0_80] : memref<9x16x64xbf16, #tpu.memory_space<vmem>>, vector<1x16x64xbf16>
    %92 = vector.shape_cast %91 : vector<1x16x64xbf16> to vector<16x64xbf16>
    %c1_81 = arith.constant 1 : index
    %c0_82 = arith.constant 0 : index
    %c0_83 = arith.constant 0 : index
    %93 = vector.load %arg6[%c1_81, %c0_82, %c0_83] : memref<9x128x128xbf16, #tpu.memory_space<vmem>>, vector<1x128x128xbf16>
    %94 = vector.shape_cast %93 : vector<1x128x128xbf16> to vector<128x128xbf16>
    %cst_84 = arith.constant dense<0.000000e+00> : vector<16x128xf32>
    %95 = tpu.matmul %92, %79, %cst_84 {dimension_numbers = #tpu.dot_dimension_numbers<[1], [0], [0], [1], [0, 0, 1, 1], [], []>} : vector<16x64xbf16>, vector<64x128xbf16>, vector<16x128xf32> -> vector<16x128xf32>
    %96 = arith.truncf %95 : vector<16x128xf32> to vector<16x128xbf16>
    %cst_85 = arith.constant dense<0.000000e+00> : vector<16x128xf32>
    %97 = tpu.matmul %96, %94, %cst_85 {dimension_numbers = #tpu.dot_dimension_numbers<[1], [0], [0], [1], [0, 0, 1, 1], [], []>} : vector<16x128xbf16>, vector<128x128xbf16>, vector<16x128xf32> -> vector<16x128xf32>
    %98 = arith.addf %90, %97 : vector<16x128xf32>
    %c2_86 = arith.constant 2 : index
    %c0_87 = arith.constant 0 : index
    %c0_88 = arith.constant 0 : index
    %99 = vector.load %arg5[%c2_86, %c0_87, %c0_88] : memref<9x16x64xbf16, #tpu.memory_space<vmem>>, vector<1x16x64xbf16>
    %100 = vector.shape_cast %99 : vector<1x16x64xbf16> to vector<16x64xbf16>
    %c2_89 = arith.constant 2 : index
    %c0_90 = arith.constant 0 : index
    %c0_91 = arith.constant 0 : index
    %101 = vector.load %arg6[%c2_89, %c0_90, %c0_91] : memref<9x128x128xbf16, #tpu.memory_space<vmem>>, vector<1x128x128xbf16>
    %102 = vector.shape_cast %101 : vector<1x128x128xbf16> to vector<128x128xbf16>
    %cst_92 = arith.constant dense<0.000000e+00> : vector<16x128xf32>
    %103 = tpu.matmul %100, %79, %cst_92 {dimension_numbers = #tpu.dot_dimension_numbers<[1], [0], [0], [1], [0, 0, 1, 1], [], []>} : vector<16x64xbf16>, vector<64x128xbf16>, vector<16x128xf32> -> vector<16x128xf32>
    %104 = arith.truncf %103 : vector<16x128xf32> to vector<16x128xbf16>
    %cst_93 = arith.constant dense<0.000000e+00> : vector<16x128xf32>
    %105 = tpu.matmul %104, %102, %cst_93 {dimension_numbers = #tpu.dot_dimension_numbers<[1], [0], [0], [1], [0, 0, 1, 1], [], []>} : vector<16x128xbf16>, vector<128x128xbf16>, vector<16x128xf32> -> vector<16x128xf32>
    %106 = arith.addf %98, %105 : vector<16x128xf32>
    %c3_94 = arith.constant 3 : index
    %c0_95 = arith.constant 0 : index
    %c0_96 = arith.constant 0 : index
    %107 = vector.load %arg5[%c3_94, %c0_95, %c0_96] : memref<9x16x64xbf16, #tpu.memory_space<vmem>>, vector<1x16x64xbf16>
    %108 = vector.shape_cast %107 : vector<1x16x64xbf16> to vector<16x64xbf16>
    %c3_97 = arith.constant 3 : index
    %c0_98 = arith.constant 0 : index
    %c0_99 = arith.constant 0 : index
    %109 = vector.load %arg6[%c3_97, %c0_98, %c0_99] : memref<9x128x128xbf16, #tpu.memory_space<vmem>>, vector<1x128x128xbf16>
    %110 = vector.shape_cast %109 : vector<1x128x128xbf16> to vector<128x128xbf16>
    %cst_100 = arith.constant dense<0.000000e+00> : vector<16x128xf32>
    %111 = tpu.matmul %108, %79, %cst_100 {dimension_numbers = #tpu.dot_dimension_numbers<[1], [0], [0], [1], [0, 0, 1, 1], [], []>} : vector<16x64xbf16>, vector<64x128xbf16>, vector<16x128xf32> -> vector<16x128xf32>
    %112 = arith.truncf %111 : vector<16x128xf32> to vector<16x128xbf16>
    %cst_101 = arith.constant dense<0.000000e+00> : vector<16x128xf32>
    %113 = tpu.matmul %112, %110, %cst_101 {dimension_numbers = #tpu.dot_dimension_numbers<[1], [0], [0], [1], [0, 0, 1, 1], [], []>} : vector<16x128xbf16>, vector<128x128xbf16>, vector<16x128xf32> -> vector<16x128xf32>
    %114 = arith.addf %106, %113 : vector<16x128xf32>
    %c4_102 = arith.constant 4 : index
    %c0_103 = arith.constant 0 : index
    %c0_104 = arith.constant 0 : index
    %115 = vector.load %arg5[%c4_102, %c0_103, %c0_104] : memref<9x16x64xbf16, #tpu.memory_space<vmem>>, vector<1x16x64xbf16>
    %116 = vector.shape_cast %115 : vector<1x16x64xbf16> to vector<16x64xbf16>
    %c4_105 = arith.constant 4 : index
    %c0_106 = arith.constant 0 : index
    %c0_107 = arith.constant 0 : index
    %117 = vector.load %arg6[%c4_105, %c0_106, %c0_107] : memref<9x128x128xbf16, #tpu.memory_space<vmem>>, vector<1x128x128xbf16>
    %118 = vector.shape_cast %117 : vector<1x128x128xbf16> to vector<128x128xbf16>
    %cst_108 = arith.constant dense<0.000000e+00> : vector<16x128xf32>
    %119 = tpu.matmul %116, %79, %cst_108 {dimension_numbers = #tpu.dot_dimension_numbers<[1], [0], [0], [1], [0, 0, 1, 1], [], []>} : vector<16x64xbf16>, vector<64x128xbf16>, vector<16x128xf32> -> vector<16x128xf32>
    %120 = arith.truncf %119 : vector<16x128xf32> to vector<16x128xbf16>
    %cst_109 = arith.constant dense<0.000000e+00> : vector<16x128xf32>
    %121 = tpu.matmul %120, %118, %cst_109 {dimension_numbers = #tpu.dot_dimension_numbers<[1], [0], [0], [1], [0, 0, 1, 1], [], []>} : vector<16x128xbf16>, vector<128x128xbf16>, vector<16x128xf32> -> vector<16x128xf32>
    %122 = arith.addf %114, %121 : vector<16x128xf32>
    %c5_110 = arith.constant 5 : index
    %c0_111 = arith.constant 0 : index
    %c0_112 = arith.constant 0 : index
    %123 = vector.load %arg5[%c5_110, %c0_111, %c0_112] : memref<9x16x64xbf16, #tpu.memory_space<vmem>>, vector<1x16x64xbf16>
    %124 = vector.shape_cast %123 : vector<1x16x64xbf16> to vector<16x64xbf16>
    %c5_113 = arith.constant 5 : index
    %c0_114 = arith.constant 0 : index
    %c0_115 = arith.constant 0 : index
    %125 = vector.load %arg6[%c5_113, %c0_114, %c0_115] : memref<9x128x128xbf16, #tpu.memory_space<vmem>>, vector<1x128x128xbf16>
    %126 = vector.shape_cast %125 : vector<1x128x128xbf16> to vector<128x128xbf16>
    %cst_116 = arith.constant dense<0.000000e+00> : vector<16x128xf32>
    %127 = tpu.matmul %124, %79, %cst_116 {dimension_numbers = #tpu.dot_dimension_numbers<[1], [0], [0], [1], [0, 0, 1, 1], [], []>} : vector<16x64xbf16>, vector<64x128xbf16>, vector<16x128xf32> -> vector<16x128xf32>
    %128 = arith.truncf %127 : vector<16x128xf32> to vector<16x128xbf16>
    %cst_117 = arith.constant dense<0.000000e+00> : vector<16x128xf32>
    %129 = tpu.matmul %128, %126, %cst_117 {dimension_numbers = #tpu.dot_dimension_numbers<[1], [0], [0], [1], [0, 0, 1, 1], [], []>} : vector<16x128xbf16>, vector<128x128xbf16>, vector<16x128xf32> -> vector<16x128xf32>
    %130 = arith.addf %122, %129 : vector<16x128xf32>
    %c6_118 = arith.constant 6 : index
    %c0_119 = arith.constant 0 : index
    %c0_120 = arith.constant 0 : index
    %131 = vector.load %arg5[%c6_118, %c0_119, %c0_120] : memref<9x16x64xbf16, #tpu.memory_space<vmem>>, vector<1x16x64xbf16>
    %132 = vector.shape_cast %131 : vector<1x16x64xbf16> to vector<16x64xbf16>
    %c6_121 = arith.constant 6 : index
    %c0_122 = arith.constant 0 : index
    %c0_123 = arith.constant 0 : index
    %133 = vector.load %arg6[%c6_121, %c0_122, %c0_123] : memref<9x128x128xbf16, #tpu.memory_space<vmem>>, vector<1x128x128xbf16>
    %134 = vector.shape_cast %133 : vector<1x128x128xbf16> to vector<128x128xbf16>
    %cst_124 = arith.constant dense<0.000000e+00> : vector<16x128xf32>
    %135 = tpu.matmul %132, %79, %cst_124 {dimension_numbers = #tpu.dot_dimension_numbers<[1], [0], [0], [1], [0, 0, 1, 1], [], []>} : vector<16x64xbf16>, vector<64x128xbf16>, vector<16x128xf32> -> vector<16x128xf32>
    %136 = arith.truncf %135 : vector<16x128xf32> to vector<16x128xbf16>
    %cst_125 = arith.constant dense<0.000000e+00> : vector<16x128xf32>
    %137 = tpu.matmul %136, %134, %cst_125 {dimension_numbers = #tpu.dot_dimension_numbers<[1], [0], [0], [1], [0, 0, 1, 1], [], []>} : vector<16x128xbf16>, vector<128x128xbf16>, vector<16x128xf32> -> vector<16x128xf32>
    %138 = arith.addf %130, %137 : vector<16x128xf32>
    %c7_126 = arith.constant 7 : index
    %c0_127 = arith.constant 0 : index
    %c0_128 = arith.constant 0 : index
    %139 = vector.load %arg5[%c7_126, %c0_127, %c0_128] : memref<9x16x64xbf16, #tpu.memory_space<vmem>>, vector<1x16x64xbf16>
    %140 = vector.shape_cast %139 : vector<1x16x64xbf16> to vector<16x64xbf16>
    %c7_129 = arith.constant 7 : index
    %c0_130 = arith.constant 0 : index
    %c0_131 = arith.constant 0 : index
    %141 = vector.load %arg6[%c7_129, %c0_130, %c0_131] : memref<9x128x128xbf16, #tpu.memory_space<vmem>>, vector<1x128x128xbf16>
    %142 = vector.shape_cast %141 : vector<1x128x128xbf16> to vector<128x128xbf16>
    %cst_132 = arith.constant dense<0.000000e+00> : vector<16x128xf32>
    %143 = tpu.matmul %140, %79, %cst_132 {dimension_numbers = #tpu.dot_dimension_numbers<[1], [0], [0], [1], [0, 0, 1, 1], [], []>} : vector<16x64xbf16>, vector<64x128xbf16>, vector<16x128xf32> -> vector<16x128xf32>
    %144 = arith.truncf %143 : vector<16x128xf32> to vector<16x128xbf16>
    %cst_133 = arith.constant dense<0.000000e+00> : vector<16x128xf32>
    %145 = tpu.matmul %144, %142, %cst_133 {dimension_numbers = #tpu.dot_dimension_numbers<[1], [0], [0], [1], [0, 0, 1, 1], [], []>} : vector<16x128xbf16>, vector<128x128xbf16>, vector<16x128xf32> -> vector<16x128xf32>
    %146 = arith.addf %138, %145 : vector<16x128xf32>
    %c8_134 = arith.constant 8 : index
    %c0_135 = arith.constant 0 : index
    %c0_136 = arith.constant 0 : index
    %147 = vector.load %arg5[%c8_134, %c0_135, %c0_136] : memref<9x16x64xbf16, #tpu.memory_space<vmem>>, vector<1x16x64xbf16>
    %148 = vector.shape_cast %147 : vector<1x16x64xbf16> to vector<16x64xbf16>
    %c8_137 = arith.constant 8 : index
    %c0_138 = arith.constant 0 : index
    %c0_139 = arith.constant 0 : index
    %149 = vector.load %arg6[%c8_137, %c0_138, %c0_139] : memref<9x128x128xbf16, #tpu.memory_space<vmem>>, vector<1x128x128xbf16>
    %150 = vector.shape_cast %149 : vector<1x128x128xbf16> to vector<128x128xbf16>
    %cst_140 = arith.constant dense<0.000000e+00> : vector<16x128xf32>
    %151 = tpu.matmul %148, %79, %cst_140 {dimension_numbers = #tpu.dot_dimension_numbers<[1], [0], [0], [1], [0, 0, 1, 1], [], []>} : vector<16x64xbf16>, vector<64x128xbf16>, vector<16x128xf32> -> vector<16x128xf32>
    %152 = arith.truncf %151 : vector<16x128xf32> to vector<16x128xbf16>
    %cst_141 = arith.constant dense<0.000000e+00> : vector<16x128xf32>
    %153 = tpu.matmul %152, %150, %cst_141 {dimension_numbers = #tpu.dot_dimension_numbers<[1], [0], [0], [1], [0, 0, 1, 1], [], []>} : vector<16x128xbf16>, vector<128x128xbf16>, vector<16x128xf32> -> vector<16x128xf32>
    %154 = arith.addf %146, %153 : vector<16x128xf32>
    %cst_142 = arith.constant 0.000000e+00 : f32
    %155 = vector.broadcast %cst_142 : f32 to vector<16x128xf32>
    %156 = arith.maximumf %154, %155 : vector<16x128xf32>
    %157 = arith.truncf %156 : vector<16x128xf32> to vector<16x128xbf16>
    %c0_143 = arith.constant 0 : index
    %c0_144 = arith.constant 0 : index
    %158 = vector.load %arg10[%c0_143, %c0_144] : memref<1x128xf32, #tpu.memory_space<vmem>>, vector<1x128xf32>
    %159 = vector.shape_cast %158 : vector<1x128xf32> to vector<1x128xf32>
    %160 = vector.broadcast %159 : vector<1x128xf32> to vector<4x128xf32>
    %c0_145 = arith.constant 0 : index
    %c0_146 = arith.constant 0 : index
    %c0_147 = arith.constant 0 : index
    %161 = vector.load %arg8[%c0_145, %c0_146, %c0_147] : memref<9x4x16xbf16, #tpu.memory_space<vmem>>, vector<1x4x16xbf16>
    %162 = vector.shape_cast %161 : vector<1x4x16xbf16> to vector<4x16xbf16>
    %c0_148 = arith.constant 0 : index
    %c0_149 = arith.constant 0 : index
    %c0_150 = arith.constant 0 : index
    %163 = vector.load %arg9[%c0_148, %c0_149, %c0_150] : memref<9x128x128xbf16, #tpu.memory_space<vmem>>, vector<1x128x128xbf16>
    %164 = vector.shape_cast %163 : vector<1x128x128xbf16> to vector<128x128xbf16>
    %cst_151 = arith.constant dense<0.000000e+00> : vector<4x128xf32>
    %165 = tpu.matmul %162, %157, %cst_151 {dimension_numbers = #tpu.dot_dimension_numbers<[1], [0], [0], [1], [0, 0, 1, 1], [], []>} : vector<4x16xbf16>, vector<16x128xbf16>, vector<4x128xf32> -> vector<4x128xf32>
    %166 = arith.truncf %165 : vector<4x128xf32> to vector<4x128xbf16>
    %cst_152 = arith.constant dense<0.000000e+00> : vector<4x128xf32>
    %167 = tpu.matmul %166, %164, %cst_152 {dimension_numbers = #tpu.dot_dimension_numbers<[1], [0], [0], [1], [0, 0, 1, 1], [], []>} : vector<4x128xbf16>, vector<128x128xbf16>, vector<4x128xf32> -> vector<4x128xf32>
    %168 = arith.addf %160, %167 : vector<4x128xf32>
    %c1_153 = arith.constant 1 : index
    %c0_154 = arith.constant 0 : index
    %c0_155 = arith.constant 0 : index
    %169 = vector.load %arg8[%c1_153, %c0_154, %c0_155] : memref<9x4x16xbf16, #tpu.memory_space<vmem>>, vector<1x4x16xbf16>
    %170 = vector.shape_cast %169 : vector<1x4x16xbf16> to vector<4x16xbf16>
    %c1_156 = arith.constant 1 : index
    %c0_157 = arith.constant 0 : index
    %c0_158 = arith.constant 0 : index
    %171 = vector.load %arg9[%c1_156, %c0_157, %c0_158] : memref<9x128x128xbf16, #tpu.memory_space<vmem>>, vector<1x128x128xbf16>
    %172 = vector.shape_cast %171 : vector<1x128x128xbf16> to vector<128x128xbf16>
    %cst_159 = arith.constant dense<0.000000e+00> : vector<4x128xf32>
    %173 = tpu.matmul %170, %157, %cst_159 {dimension_numbers = #tpu.dot_dimension_numbers<[1], [0], [0], [1], [0, 0, 1, 1], [], []>} : vector<4x16xbf16>, vector<16x128xbf16>, vector<4x128xf32> -> vector<4x128xf32>
    %174 = arith.truncf %173 : vector<4x128xf32> to vector<4x128xbf16>
    %cst_160 = arith.constant dense<0.000000e+00> : vector<4x128xf32>
    %175 = tpu.matmul %174, %172, %cst_160 {dimension_numbers = #tpu.dot_dimension_numbers<[1], [0], [0], [1], [0, 0, 1, 1], [], []>} : vector<4x128xbf16>, vector<128x128xbf16>, vector<4x128xf32> -> vector<4x128xf32>
    %176 = arith.addf %168, %175 : vector<4x128xf32>
    %c2_161 = arith.constant 2 : index
    %c0_162 = arith.constant 0 : index
    %c0_163 = arith.constant 0 : index
    %177 = vector.load %arg8[%c2_161, %c0_162, %c0_163] : memref<9x4x16xbf16, #tpu.memory_space<vmem>>, vector<1x4x16xbf16>
    %178 = vector.shape_cast %177 : vector<1x4x16xbf16> to vector<4x16xbf16>
    %c2_164 = arith.constant 2 : index
    %c0_165 = arith.constant 0 : index
    %c0_166 = arith.constant 0 : index
    %179 = vector.load %arg9[%c2_164, %c0_165, %c0_166] : memref<9x128x128xbf16, #tpu.memory_space<vmem>>, vector<1x128x128xbf16>
    %180 = vector.shape_cast %179 : vector<1x128x128xbf16> to vector<128x128xbf16>
    %cst_167 = arith.constant dense<0.000000e+00> : vector<4x128xf32>
    %181 = tpu.matmul %178, %157, %cst_167 {dimension_numbers = #tpu.dot_dimension_numbers<[1], [0], [0], [1], [0, 0, 1, 1], [], []>} : vector<4x16xbf16>, vector<16x128xbf16>, vector<4x128xf32> -> vector<4x128xf32>
    %182 = arith.truncf %181 : vector<4x128xf32> to vector<4x128xbf16>
    %cst_168 = arith.constant dense<0.000000e+00> : vector<4x128xf32>
    %183 = tpu.matmul %182, %180, %cst_168 {dimension_numbers = #tpu.dot_dimension_numbers<[1], [0], [0], [1], [0, 0, 1, 1], [], []>} : vector<4x128xbf16>, vector<128x128xbf16>, vector<4x128xf32> -> vector<4x128xf32>
    %184 = arith.addf %176, %183 : vector<4x128xf32>
    %c3_169 = arith.constant 3 : index
    %c0_170 = arith.constant 0 : index
    %c0_171 = arith.constant 0 : index
    %185 = vector.load %arg8[%c3_169, %c0_170, %c0_171] : memref<9x4x16xbf16, #tpu.memory_space<vmem>>, vector<1x4x16xbf16>
    %186 = vector.shape_cast %185 : vector<1x4x16xbf16> to vector<4x16xbf16>
    %c3_172 = arith.constant 3 : index
    %c0_173 = arith.constant 0 : index
    %c0_174 = arith.constant 0 : index
    %187 = vector.load %arg9[%c3_172, %c0_173, %c0_174] : memref<9x128x128xbf16, #tpu.memory_space<vmem>>, vector<1x128x128xbf16>
    %188 = vector.shape_cast %187 : vector<1x128x128xbf16> to vector<128x128xbf16>
    %cst_175 = arith.constant dense<0.000000e+00> : vector<4x128xf32>
    %189 = tpu.matmul %186, %157, %cst_175 {dimension_numbers = #tpu.dot_dimension_numbers<[1], [0], [0], [1], [0, 0, 1, 1], [], []>} : vector<4x16xbf16>, vector<16x128xbf16>, vector<4x128xf32> -> vector<4x128xf32>
    %190 = arith.truncf %189 : vector<4x128xf32> to vector<4x128xbf16>
    %cst_176 = arith.constant dense<0.000000e+00> : vector<4x128xf32>
    %191 = tpu.matmul %190, %188, %cst_176 {dimension_numbers = #tpu.dot_dimension_numbers<[1], [0], [0], [1], [0, 0, 1, 1], [], []>} : vector<4x128xbf16>, vector<128x128xbf16>, vector<4x128xf32> -> vector<4x128xf32>
    %192 = arith.addf %184, %191 : vector<4x128xf32>
    %c4_177 = arith.constant 4 : index
    %c0_178 = arith.constant 0 : index
    %c0_179 = arith.constant 0 : index
    %193 = vector.load %arg8[%c4_177, %c0_178, %c0_179] : memref<9x4x16xbf16, #tpu.memory_space<vmem>>, vector<1x4x16xbf16>
    %194 = vector.shape_cast %193 : vector<1x4x16xbf16> to vector<4x16xbf16>
    %c4_180 = arith.constant 4 : index
    %c0_181 = arith.constant 0 : index
    %c0_182 = arith.constant 0 : index
    %195 = vector.load %arg9[%c4_180, %c0_181, %c0_182] : memref<9x128x128xbf16, #tpu.memory_space<vmem>>, vector<1x128x128xbf16>
    %196 = vector.shape_cast %195 : vector<1x128x128xbf16> to vector<128x128xbf16>
    %cst_183 = arith.constant dense<0.000000e+00> : vector<4x128xf32>
    %197 = tpu.matmul %194, %157, %cst_183 {dimension_numbers = #tpu.dot_dimension_numbers<[1], [0], [0], [1], [0, 0, 1, 1], [], []>} : vector<4x16xbf16>, vector<16x128xbf16>, vector<4x128xf32> -> vector<4x128xf32>
    %198 = arith.truncf %197 : vector<4x128xf32> to vector<4x128xbf16>
    %cst_184 = arith.constant dense<0.000000e+00> : vector<4x128xf32>
    %199 = tpu.matmul %198, %196, %cst_184 {dimension_numbers = #tpu.dot_dimension_numbers<[1], [0], [0], [1], [0, 0, 1, 1], [], []>} : vector<4x128xbf16>, vector<128x128xbf16>, vector<4x128xf32> -> vector<4x128xf32>
    %200 = arith.addf %192, %199 : vector<4x128xf32>
    %c5_185 = arith.constant 5 : index
    %c0_186 = arith.constant 0 : index
    %c0_187 = arith.constant 0 : index
    %201 = vector.load %arg8[%c5_185, %c0_186, %c0_187] : memref<9x4x16xbf16, #tpu.memory_space<vmem>>, vector<1x4x16xbf16>
    %202 = vector.shape_cast %201 : vector<1x4x16xbf16> to vector<4x16xbf16>
    %c5_188 = arith.constant 5 : index
    %c0_189 = arith.constant 0 : index
    %c0_190 = arith.constant 0 : index
    %203 = vector.load %arg9[%c5_188, %c0_189, %c0_190] : memref<9x128x128xbf16, #tpu.memory_space<vmem>>, vector<1x128x128xbf16>
    %204 = vector.shape_cast %203 : vector<1x128x128xbf16> to vector<128x128xbf16>
    %cst_191 = arith.constant dense<0.000000e+00> : vector<4x128xf32>
    %205 = tpu.matmul %202, %157, %cst_191 {dimension_numbers = #tpu.dot_dimension_numbers<[1], [0], [0], [1], [0, 0, 1, 1], [], []>} : vector<4x16xbf16>, vector<16x128xbf16>, vector<4x128xf32> -> vector<4x128xf32>
    %206 = arith.truncf %205 : vector<4x128xf32> to vector<4x128xbf16>
    %cst_192 = arith.constant dense<0.000000e+00> : vector<4x128xf32>
    %207 = tpu.matmul %206, %204, %cst_192 {dimension_numbers = #tpu.dot_dimension_numbers<[1], [0], [0], [1], [0, 0, 1, 1], [], []>} : vector<4x128xbf16>, vector<128x128xbf16>, vector<4x128xf32> -> vector<4x128xf32>
    %208 = arith.addf %200, %207 : vector<4x128xf32>
    %c6_193 = arith.constant 6 : index
    %c0_194 = arith.constant 0 : index
    %c0_195 = arith.constant 0 : index
    %209 = vector.load %arg8[%c6_193, %c0_194, %c0_195] : memref<9x4x16xbf16, #tpu.memory_space<vmem>>, vector<1x4x16xbf16>
    %210 = vector.shape_cast %209 : vector<1x4x16xbf16> to vector<4x16xbf16>
    %c6_196 = arith.constant 6 : index
    %c0_197 = arith.constant 0 : index
    %c0_198 = arith.constant 0 : index
    %211 = vector.load %arg9[%c6_196, %c0_197, %c0_198] : memref<9x128x128xbf16, #tpu.memory_space<vmem>>, vector<1x128x128xbf16>
    %212 = vector.shape_cast %211 : vector<1x128x128xbf16> to vector<128x128xbf16>
    %cst_199 = arith.constant dense<0.000000e+00> : vector<4x128xf32>
    %213 = tpu.matmul %210, %157, %cst_199 {dimension_numbers = #tpu.dot_dimension_numbers<[1], [0], [0], [1], [0, 0, 1, 1], [], []>} : vector<4x16xbf16>, vector<16x128xbf16>, vector<4x128xf32> -> vector<4x128xf32>
    %214 = arith.truncf %213 : vector<4x128xf32> to vector<4x128xbf16>
    %cst_200 = arith.constant dense<0.000000e+00> : vector<4x128xf32>
    %215 = tpu.matmul %214, %212, %cst_200 {dimension_numbers = #tpu.dot_dimension_numbers<[1], [0], [0], [1], [0, 0, 1, 1], [], []>} : vector<4x128xbf16>, vector<128x128xbf16>, vector<4x128xf32> -> vector<4x128xf32>
    %216 = arith.addf %208, %215 : vector<4x128xf32>
    %c7_201 = arith.constant 7 : index
    %c0_202 = arith.constant 0 : index
    %c0_203 = arith.constant 0 : index
    %217 = vector.load %arg8[%c7_201, %c0_202, %c0_203] : memref<9x4x16xbf16, #tpu.memory_space<vmem>>, vector<1x4x16xbf16>
    %218 = vector.shape_cast %217 : vector<1x4x16xbf16> to vector<4x16xbf16>
    %c7_204 = arith.constant 7 : index
    %c0_205 = arith.constant 0 : index
    %c0_206 = arith.constant 0 : index
    %219 = vector.load %arg9[%c7_204, %c0_205, %c0_206] : memref<9x128x128xbf16, #tpu.memory_space<vmem>>, vector<1x128x128xbf16>
    %220 = vector.shape_cast %219 : vector<1x128x128xbf16> to vector<128x128xbf16>
    %cst_207 = arith.constant dense<0.000000e+00> : vector<4x128xf32>
    %221 = tpu.matmul %218, %157, %cst_207 {dimension_numbers = #tpu.dot_dimension_numbers<[1], [0], [0], [1], [0, 0, 1, 1], [], []>} : vector<4x16xbf16>, vector<16x128xbf16>, vector<4x128xf32> -> vector<4x128xf32>
    %222 = arith.truncf %221 : vector<4x128xf32> to vector<4x128xbf16>
    %cst_208 = arith.constant dense<0.000000e+00> : vector<4x128xf32>
    %223 = tpu.matmul %222, %220, %cst_208 {dimension_numbers = #tpu.dot_dimension_numbers<[1], [0], [0], [1], [0, 0, 1, 1], [], []>} : vector<4x128xbf16>, vector<128x128xbf16>, vector<4x128xf32> -> vector<4x128xf32>
    %224 = arith.addf %216, %223 : vector<4x128xf32>
    %c8_209 = arith.constant 8 : index
    %c0_210 = arith.constant 0 : index
    %c0_211 = arith.constant 0 : index
    %225 = vector.load %arg8[%c8_209, %c0_210, %c0_211] : memref<9x4x16xbf16, #tpu.memory_space<vmem>>, vector<1x4x16xbf16>
    %226 = vector.shape_cast %225 : vector<1x4x16xbf16> to vector<4x16xbf16>
    %c8_212 = arith.constant 8 : index
    %c0_213 = arith.constant 0 : index
    %c0_214 = arith.constant 0 : index
    %227 = vector.load %arg9[%c8_212, %c0_213, %c0_214] : memref<9x128x128xbf16, #tpu.memory_space<vmem>>, vector<1x128x128xbf16>
    %228 = vector.shape_cast %227 : vector<1x128x128xbf16> to vector<128x128xbf16>
    %cst_215 = arith.constant dense<0.000000e+00> : vector<4x128xf32>
    %229 = tpu.matmul %226, %157, %cst_215 {dimension_numbers = #tpu.dot_dimension_numbers<[1], [0], [0], [1], [0, 0, 1, 1], [], []>} : vector<4x16xbf16>, vector<16x128xbf16>, vector<4x128xf32> -> vector<4x128xf32>
    %230 = arith.truncf %229 : vector<4x128xf32> to vector<4x128xbf16>
    %cst_216 = arith.constant dense<0.000000e+00> : vector<4x128xf32>
    %231 = tpu.matmul %230, %228, %cst_216 {dimension_numbers = #tpu.dot_dimension_numbers<[1], [0], [0], [1], [0, 0, 1, 1], [], []>} : vector<4x128xbf16>, vector<128x128xbf16>, vector<4x128xf32> -> vector<4x128xf32>
    %232 = arith.addf %224, %231 : vector<4x128xf32>
    %cst_217 = arith.constant 0.000000e+00 : f32
    %233 = vector.broadcast %cst_217 : f32 to vector<4x128xf32>
    %234 = arith.maximumf %232, %233 : vector<4x128xf32>
    %235 = arith.truncf %234 : vector<4x128xf32> to vector<4x128xbf16>
    %c0_218 = arith.constant 0 : index
    %c0_219 = arith.constant 0 : index
    %236 = vector.load %arg12[%c0_218, %c0_219] : memref<1x256xf32, #tpu.memory_space<vmem>>, vector<1x256xf32>
    %237 = vector.extract_strided_slice %235 {offsets = [0, 0], sizes = [1, 128], strides = [1, 1]} : vector<4x128xbf16> to vector<1x128xbf16>
    %c0_220 = arith.constant 0 : index
    %c0_221 = arith.constant 0 : index
    %c0_222 = arith.constant 0 : index
    %238 = vector.load %arg11[%c0_220, %c0_221, %c0_222] : memref<4x128x256xbf16, #tpu.memory_space<vmem>>, vector<1x128x256xbf16>
    %239 = vector.shape_cast %238 : vector<1x128x256xbf16> to vector<128x256xbf16>
    %cst_223 = arith.constant dense<0.000000e+00> : vector<1x256xf32>
    %240 = tpu.matmul %237, %239, %cst_223 {dimension_numbers = #tpu.dot_dimension_numbers<[1], [0], [0], [1], [0, 0, 1, 1], [], []>} : vector<1x128xbf16>, vector<128x256xbf16>, vector<1x256xf32> -> vector<1x256xf32>
    %241 = arith.addf %236, %240 : vector<1x256xf32>
    %242 = vector.extract_strided_slice %235 {offsets = [1, 0], sizes = [1, 128], strides = [1, 1]} : vector<4x128xbf16> to vector<1x128xbf16>
    %c1_224 = arith.constant 1 : index
    %c0_225 = arith.constant 0 : index
    %c0_226 = arith.constant 0 : index
    %243 = vector.load %arg11[%c1_224, %c0_225, %c0_226] : memref<4x128x256xbf16, #tpu.memory_space<vmem>>, vector<1x128x256xbf16>
    %244 = vector.shape_cast %243 : vector<1x128x256xbf16> to vector<128x256xbf16>
    %cst_227 = arith.constant dense<0.000000e+00> : vector<1x256xf32>
    %245 = tpu.matmul %242, %244, %cst_227 {dimension_numbers = #tpu.dot_dimension_numbers<[1], [0], [0], [1], [0, 0, 1, 1], [], []>} : vector<1x128xbf16>, vector<128x256xbf16>, vector<1x256xf32> -> vector<1x256xf32>
    %246 = arith.addf %241, %245 : vector<1x256xf32>
    %247 = vector.extract_strided_slice %235 {offsets = [2, 0], sizes = [1, 128], strides = [1, 1]} : vector<4x128xbf16> to vector<1x128xbf16>
    %c2_228 = arith.constant 2 : index
    %c0_229 = arith.constant 0 : index
    %c0_230 = arith.constant 0 : index
    %248 = vector.load %arg11[%c2_228, %c0_229, %c0_230] : memref<4x128x256xbf16, #tpu.memory_space<vmem>>, vector<1x128x256xbf16>
    %249 = vector.shape_cast %248 : vector<1x128x256xbf16> to vector<128x256xbf16>
    %cst_231 = arith.constant dense<0.000000e+00> : vector<1x256xf32>
    %250 = tpu.matmul %247, %249, %cst_231 {dimension_numbers = #tpu.dot_dimension_numbers<[1], [0], [0], [1], [0, 0, 1, 1], [], []>} : vector<1x128xbf16>, vector<128x256xbf16>, vector<1x256xf32> -> vector<1x256xf32>
    %251 = arith.addf %246, %250 : vector<1x256xf32>
    %252 = vector.extract_strided_slice %235 {offsets = [3, 0], sizes = [1, 128], strides = [1, 1]} : vector<4x128xbf16> to vector<1x128xbf16>
    %c3_232 = arith.constant 3 : index
    %c0_233 = arith.constant 0 : index
    %c0_234 = arith.constant 0 : index
    %253 = vector.load %arg11[%c3_232, %c0_233, %c0_234] : memref<4x128x256xbf16, #tpu.memory_space<vmem>>, vector<1x128x256xbf16>
    %254 = vector.shape_cast %253 : vector<1x128x256xbf16> to vector<128x256xbf16>
    %cst_235 = arith.constant dense<0.000000e+00> : vector<1x256xf32>
    %255 = tpu.matmul %252, %254, %cst_235 {dimension_numbers = #tpu.dot_dimension_numbers<[1], [0], [0], [1], [0, 0, 1, 1], [], []>} : vector<1x128xbf16>, vector<128x256xbf16>, vector<1x256xf32> -> vector<1x256xf32>
    %256 = arith.addf %251, %255 : vector<1x256xf32>
    %257 = vector.extract_strided_slice %256 {offsets = [0, 0], sizes = [1, 128], strides = [1, 1]} : vector<1x256xf32> to vector<1x128xf32>
    %258 = vector.extract_strided_slice %256 {offsets = [0, 128], sizes = [1, 128], strides = [1, 1]} : vector<1x256xf32> to vector<1x128xf32>
    %c0_236 = arith.constant 0 : index
    %c0_237 = arith.constant 0 : index
    %c0_238 = arith.constant 0 : index
    %259 = vector.load %arg26[%c0_236, %c0_237, %c0_238] : memref<1x1x128xf32, #tpu.memory_space<vmem>>, vector<1x1x128xf32>
    %260 = vector.shape_cast %259 : vector<1x1x128xf32> to vector<1x128xf32>
    %261 = vector.shape_cast %257 : vector<1x128xf32> to vector<1x1x128xf32>
    tpu.vector_store %arg26[%c0_236, %c0_237, %c0_238], %261 {strides = array<i32>} : memref<1x1x128xf32, #tpu.memory_space<vmem>>, vector<1x1x128xf32>,
    %c0_239 = arith.constant 0 : index
    %c0_240 = arith.constant 0 : index
    %c0_241 = arith.constant 0 : index
    %262 = vector.load %arg27[%c0_239, %c0_240, %c0_241] : memref<1x1x128xf32, #tpu.memory_space<vmem>>, vector<1x1x128xf32>
    %263 = vector.shape_cast %262 : vector<1x1x128xf32> to vector<1x128xf32>
    %264 = vector.shape_cast %258 : vector<1x128xf32> to vector<1x1x128xf32>
    tpu.vector_store %arg27[%c0_239, %c0_240, %c0_241], %264 {strides = array<i32>} : memref<1x1x128xf32, #tpu.memory_space<vmem>>, vector<1x1x128xf32>,
    %c0_242 = arith.constant 0 : index
    %c0_243 = arith.constant 0 : index
    %c0_244 = arith.constant 0 : index
    %265 = vector.load %arg13[%c0_242, %c0_243, %c0_244] : memref<1x1x128xf32, #tpu.memory_space<vmem>>, vector<1x1x128xf32>
    %266 = vector.shape_cast %265 : vector<1x1x128xf32> to vector<1x128xf32>
    %cst_245 = arith.constant 5.000000e-01 : f32
    %267 = vector.broadcast %cst_245 : f32 to vector<1x128xf32>
    %268 = arith.mulf %267, %258 : vector<1x128xf32>
    %269 = math.exp %268 : vector<1x128xf32>
    %270 = arith.mulf %266, %269 : vector<1x128xf32>
    %271 = arith.addf %257, %270 : vector<1x128xf32>
    %272 = arith.truncf %271 : vector<1x128xf32> to vector<1x128xbf16>
    %c0_246 = arith.constant 0 : index
    %c0_247 = arith.constant 0 : index
    %c0_248 = arith.constant 0 : index
    %273 = vector.load %arg14[%c0_246, %c0_247, %c0_248] : memref<4x128x128xbf16, #tpu.memory_space<vmem>>, vector<1x128x128xbf16>
    %274 = vector.shape_cast %273 : vector<1x128x128xbf16> to vector<128x128xbf16>
    %cst_249 = arith.constant dense<0.000000e+00> : vector<1x128xf32>
    %275 = tpu.matmul %272, %274, %cst_249 {dimension_numbers = #tpu.dot_dimension_numbers<[1], [0], [0], [1], [0, 0, 1, 1], [], []>} : vector<1x128xbf16>, vector<128x128xbf16>, vector<1x128xf32> -> vector<1x128xf32>
    %c0_250 = arith.constant 0 : index
    %c0_251 = arith.constant 0 : index
    %c0_252 = arith.constant 0 : index
    %276 = vector.load %arg15[%c0_250, %c0_251, %c0_252] : memref<4x1x128xf32, #tpu.memory_space<vmem>>, vector<1x1x128xf32>
    %277 = vector.shape_cast %276 : vector<1x1x128xf32> to vector<1x128xf32>
    %278 = arith.addf %275, %277 : vector<1x128xf32>
    %c0_253 = arith.constant 0 : index
    %c0_254 = arith.constant 0 : index
    %279 = vector.load %arg28[%c0_253, %c0_254] : memref<8x128xf32, #tpu.memory_space<vmem>>, vector<1x128xf32>
    tpu.vector_store %arg28[%c0_253, %c0_254], %278 {strides = array<i32>} : memref<8x128xf32, #tpu.memory_space<vmem>>, vector<1x128xf32>,
    %c1_255 = arith.constant 1 : index
    %c0_256 = arith.constant 0 : index
    %c0_257 = arith.constant 0 : index
    %280 = vector.load %arg14[%c1_255, %c0_256, %c0_257] : memref<4x128x128xbf16, #tpu.memory_space<vmem>>, vector<1x128x128xbf16>
    %281 = vector.shape_cast %280 : vector<1x128x128xbf16> to vector<128x128xbf16>
    %cst_258 = arith.constant dense<0.000000e+00> : vector<1x128xf32>
    %282 = tpu.matmul %272, %281, %cst_258 {dimension_numbers = #tpu.dot_dimension_numbers<[1], [0], [0], [1], [0, 0, 1, 1], [], []>} : vector<1x128xbf16>, vector<128x128xbf16>, vector<1x128xf32> -> vector<1x128xf32>
    %c1_259 = arith.constant 1 : index
    %c0_260 = arith.constant 0 : index
    %c0_261 = arith.constant 0 : index
    %283 = vector.load %arg15[%c1_259, %c0_260, %c0_261] : memref<4x1x128xf32, #tpu.memory_space<vmem>>, vector<1x1x128xf32>
    %284 = vector.shape_cast %283 : vector<1x1x128xf32> to vector<1x128xf32>
    %285 = arith.addf %282, %284 : vector<1x128xf32>
    %c1_262 = arith.constant 1 : index
    %c0_263 = arith.constant 0 : index
    %286 = vector.load %arg28[%c1_262, %c0_263] : memref<8x128xf32, #tpu.memory_space<vmem>>, vector<1x128xf32>
    tpu.vector_store %arg28[%c1_262, %c0_263], %285 {strides = array<i32>} : memref<8x128xf32, #tpu.memory_space<vmem>>, vector<1x128xf32>,
    %c2_264 = arith.constant 2 : index
    %c0_265 = arith.constant 0 : index
    %c0_266 = arith.constant 0 : index
    %287 = vector.load %arg14[%c2_264, %c0_265, %c0_266] : memref<4x128x128xbf16, #tpu.memory_space<vmem>>, vector<1x128x128xbf16>
    %288 = vector.shape_cast %287 : vector<1x128x128xbf16> to vector<128x128xbf16>
    %cst_267 = arith.constant dense<0.000000e+00> : vector<1x128xf32>
    %289 = tpu.matmul %272, %288, %cst_267 {dimension_numbers = #tpu.dot_dimension_numbers<[1], [0], [0], [1], [0, 0, 1, 1], [], []>} : vector<1x128xbf16>, vector<128x128xbf16>, vector<1x128xf32> -> vector<1x128xf32>
    %c2_268 = arith.constant 2 : index
    %c0_269 = arith.constant 0 : index
    %c0_270 = arith.constant 0 : index
    %290 = vector.load %arg15[%c2_268, %c0_269, %c0_270] : memref<4x1x128xf32, #tpu.memory_space<vmem>>, vector<1x1x128xf32>
    %291 = vector.shape_cast %290 : vector<1x1x128xf32> to vector<1x128xf32>
    %292 = arith.addf %289, %291 : vector<1x128xf32>
    %c2_271 = arith.constant 2 : index
    %c0_272 = arith.constant 0 : index
    %293 = vector.load %arg28[%c2_271, %c0_272] : memref<8x128xf32, #tpu.memory_space<vmem>>, vector<1x128xf32>
    tpu.vector_store %arg28[%c2_271, %c0_272], %292 {strides = array<i32>} : memref<8x128xf32, #tpu.memory_space<vmem>>, vector<1x128xf32>,
    %c3_273 = arith.constant 3 : index
    %c0_274 = arith.constant 0 : index
    %c0_275 = arith.constant 0 : index
    %294 = vector.load %arg14[%c3_273, %c0_274, %c0_275] : memref<4x128x128xbf16, #tpu.memory_space<vmem>>, vector<1x128x128xbf16>
    %295 = vector.shape_cast %294 : vector<1x128x128xbf16> to vector<128x128xbf16>
    %cst_276 = arith.constant dense<0.000000e+00> : vector<1x128xf32>
    %296 = tpu.matmul %272, %295, %cst_276 {dimension_numbers = #tpu.dot_dimension_numbers<[1], [0], [0], [1], [0, 0, 1, 1], [], []>} : vector<1x128xbf16>, vector<128x128xbf16>, vector<1x128xf32> -> vector<1x128xf32>
    %c3_277 = arith.constant 3 : index
    %c0_278 = arith.constant 0 : index
    %c0_279 = arith.constant 0 : index
    %297 = vector.load %arg15[%c3_277, %c0_278, %c0_279] : memref<4x1x128xf32, #tpu.memory_space<vmem>>, vector<1x1x128xf32>
    %298 = vector.shape_cast %297 : vector<1x1x128xf32> to vector<1x128xf32>
    %299 = arith.addf %296, %298 : vector<1x128xf32>
    %c3_280 = arith.constant 3 : index
    %c0_281 = arith.constant 0 : index
    %300 = vector.load %arg28[%c3_280, %c0_281] : memref<8x128xf32, #tpu.memory_space<vmem>>, vector<1x128xf32>
    tpu.vector_store %arg28[%c3_280, %c0_281], %299 {strides = array<i32>} : memref<8x128xf32, #tpu.memory_space<vmem>>, vector<1x128xf32>,
    %c0_282 = arith.constant 0 : index
    %c0_283 = arith.constant 0 : index
    %301 = vector.load %arg28[%c0_282, %c0_283] : memref<8x128xf32, #tpu.memory_space<vmem>>, vector<4x128xf32>
    %302 = arith.truncf %301 : vector<4x128xf32> to vector<4x128xbf16>
    %c0_284 = arith.constant 0 : index
    %c0_285 = arith.constant 0 : index
    %303 = vector.load %arg18[%c0_284, %c0_285] : memref<1x128xf32, #tpu.memory_space<vmem>>, vector<1x128xf32>
    %304 = vector.shape_cast %303 : vector<1x128xf32> to vector<1x128xf32>
    %305 = vector.broadcast %304 : vector<1x128xf32> to vector<16x128xf32>
    %c0_286 = arith.constant 0 : index
    %c0_287 = arith.constant 0 : index
    %c0_288 = arith.constant 0 : index
    %306 = vector.load %arg16[%c0_286, %c0_287, %c0_288] : memref<9x16x4xbf16, #tpu.memory_space<vmem>>, vector<1x16x4xbf16>
    %307 = vector.shape_cast %306 : vector<1x16x4xbf16> to vector<16x4xbf16>
    %c0_289 = arith.constant 0 : index
    %c0_290 = arith.constant 0 : index
    %c0_291 = arith.constant 0 : index
    %308 = vector.load %arg17[%c0_289, %c0_290, %c0_291] : memref<9x128x128xbf16, #tpu.memory_space<vmem>>, vector<1x128x128xbf16>
    %309 = vector.shape_cast %308 : vector<1x128x128xbf16> to vector<128x128xbf16>
    %cst_292 = arith.constant dense<0.000000e+00> : vector<4x128xf32>
    %310 = tpu.matmul %302, %309, %cst_292 {dimension_numbers = #tpu.dot_dimension_numbers<[1], [0], [0], [1], [0, 0, 1, 1], [], []>} : vector<4x128xbf16>, vector<128x128xbf16>, vector<4x128xf32> -> vector<4x128xf32>
    %311 = arith.truncf %310 : vector<4x128xf32> to vector<4x128xbf16>
    %cst_293 = arith.constant dense<0.000000e+00> : vector<16x128xf32>
    %312 = tpu.matmul %307, %311, %cst_293 {dimension_numbers = #tpu.dot_dimension_numbers<[1], [0], [0], [1], [0, 0, 1, 1], [], []>} : vector<16x4xbf16>, vector<4x128xbf16>, vector<16x128xf32> -> vector<16x128xf32>
    %313 = arith.addf %305, %312 : vector<16x128xf32>
    %c1_294 = arith.constant 1 : index
    %c0_295 = arith.constant 0 : index
    %c0_296 = arith.constant 0 : index
    %314 = vector.load %arg16[%c1_294, %c0_295, %c0_296] : memref<9x16x4xbf16, #tpu.memory_space<vmem>>, vector<1x16x4xbf16>
    %315 = vector.shape_cast %314 : vector<1x16x4xbf16> to vector<16x4xbf16>
    %c1_297 = arith.constant 1 : index
    %c0_298 = arith.constant 0 : index
    %c0_299 = arith.constant 0 : index
    %316 = vector.load %arg17[%c1_297, %c0_298, %c0_299] : memref<9x128x128xbf16, #tpu.memory_space<vmem>>, vector<1x128x128xbf16>
    %317 = vector.shape_cast %316 : vector<1x128x128xbf16> to vector<128x128xbf16>
    %cst_300 = arith.constant dense<0.000000e+00> : vector<4x128xf32>
    %318 = tpu.matmul %302, %317, %cst_300 {dimension_numbers = #tpu.dot_dimension_numbers<[1], [0], [0], [1], [0, 0, 1, 1], [], []>} : vector<4x128xbf16>, vector<128x128xbf16>, vector<4x128xf32> -> vector<4x128xf32>
    %319 = arith.truncf %318 : vector<4x128xf32> to vector<4x128xbf16>
    %cst_301 = arith.constant dense<0.000000e+00> : vector<16x128xf32>
    %320 = tpu.matmul %315, %319, %cst_301 {dimension_numbers = #tpu.dot_dimension_numbers<[1], [0], [0], [1], [0, 0, 1, 1], [], []>} : vector<16x4xbf16>, vector<4x128xbf16>, vector<16x128xf32> -> vector<16x128xf32>
    %321 = arith.addf %313, %320 : vector<16x128xf32>
    %c2_302 = arith.constant 2 : index
    %c0_303 = arith.constant 0 : index
    %c0_304 = arith.constant 0 : index
    %322 = vector.load %arg16[%c2_302, %c0_303, %c0_304] : memref<9x16x4xbf16, #tpu.memory_space<vmem>>, vector<1x16x4xbf16>
    %323 = vector.shape_cast %322 : vector<1x16x4xbf16> to vector<16x4xbf16>
    %c2_305 = arith.constant 2 : index
    %c0_306 = arith.constant 0 : index
    %c0_307 = arith.constant 0 : index
    %324 = vector.load %arg17[%c2_305, %c0_306, %c0_307] : memref<9x128x128xbf16, #tpu.memory_space<vmem>>, vector<1x128x128xbf16>
    %325 = vector.shape_cast %324 : vector<1x128x128xbf16> to vector<128x128xbf16>
    %cst_308 = arith.constant dense<0.000000e+00> : vector<4x128xf32>
    %326 = tpu.matmul %302, %325, %cst_308 {dimension_numbers = #tpu.dot_dimension_numbers<[1], [0], [0], [1], [0, 0, 1, 1], [], []>} : vector<4x128xbf16>, vector<128x128xbf16>, vector<4x128xf32> -> vector<4x128xf32>
    %327 = arith.truncf %326 : vector<4x128xf32> to vector<4x128xbf16>
    %cst_309 = arith.constant dense<0.000000e+00> : vector<16x128xf32>
    %328 = tpu.matmul %323, %327, %cst_309 {dimension_numbers = #tpu.dot_dimension_numbers<[1], [0], [0], [1], [0, 0, 1, 1], [], []>} : vector<16x4xbf16>, vector<4x128xbf16>, vector<16x128xf32> -> vector<16x128xf32>
    %329 = arith.addf %321, %328 : vector<16x128xf32>
    %c3_310 = arith.constant 3 : index
    %c0_311 = arith.constant 0 : index
    %c0_312 = arith.constant 0 : index
    %330 = vector.load %arg16[%c3_310, %c0_311, %c0_312] : memref<9x16x4xbf16, #tpu.memory_space<vmem>>, vector<1x16x4xbf16>
    %331 = vector.shape_cast %330 : vector<1x16x4xbf16> to vector<16x4xbf16>
    %c3_313 = arith.constant 3 : index
    %c0_314 = arith.constant 0 : index
    %c0_315 = arith.constant 0 : index
    %332 = vector.load %arg17[%c3_313, %c0_314, %c0_315] : memref<9x128x128xbf16, #tpu.memory_space<vmem>>, vector<1x128x128xbf16>
    %333 = vector.shape_cast %332 : vector<1x128x128xbf16> to vector<128x128xbf16>
    %cst_316 = arith.constant dense<0.000000e+00> : vector<4x128xf32>
    %334 = tpu.matmul %302, %333, %cst_316 {dimension_numbers = #tpu.dot_dimension_numbers<[1], [0], [0], [1], [0, 0, 1, 1], [], []>} : vector<4x128xbf16>, vector<128x128xbf16>, vector<4x128xf32> -> vector<4x128xf32>
    %335 = arith.truncf %334 : vector<4x128xf32> to vector<4x128xbf16>
    %cst_317 = arith.constant dense<0.000000e+00> : vector<16x128xf32>
    %336 = tpu.matmul %331, %335, %cst_317 {dimension_numbers = #tpu.dot_dimension_numbers<[1], [0], [0], [1], [0, 0, 1, 1], [], []>} : vector<16x4xbf16>, vector<4x128xbf16>, vector<16x128xf32> -> vector<16x128xf32>
    %337 = arith.addf %329, %336 : vector<16x128xf32>
    %c4_318 = arith.constant 4 : index
    %c0_319 = arith.constant 0 : index
    %c0_320 = arith.constant 0 : index
    %338 = vector.load %arg16[%c4_318, %c0_319, %c0_320] : memref<9x16x4xbf16, #tpu.memory_space<vmem>>, vector<1x16x4xbf16>
    %339 = vector.shape_cast %338 : vector<1x16x4xbf16> to vector<16x4xbf16>
    %c4_321 = arith.constant 4 : index
    %c0_322 = arith.constant 0 : index
    %c0_323 = arith.constant 0 : index
    %340 = vector.load %arg17[%c4_321, %c0_322, %c0_323] : memref<9x128x128xbf16, #tpu.memory_space<vmem>>, vector<1x128x128xbf16>
    %341 = vector.shape_cast %340 : vector<1x128x128xbf16> to vector<128x128xbf16>
    %cst_324 = arith.constant dense<0.000000e+00> : vector<4x128xf32>
    %342 = tpu.matmul %302, %341, %cst_324 {dimension_numbers = #tpu.dot_dimension_numbers<[1], [0], [0], [1], [0, 0, 1, 1], [], []>} : vector<4x128xbf16>, vector<128x128xbf16>, vector<4x128xf32> -> vector<4x128xf32>
    %343 = arith.truncf %342 : vector<4x128xf32> to vector<4x128xbf16>
    %cst_325 = arith.constant dense<0.000000e+00> : vector<16x128xf32>
    %344 = tpu.matmul %339, %343, %cst_325 {dimension_numbers = #tpu.dot_dimension_numbers<[1], [0], [0], [1], [0, 0, 1, 1], [], []>} : vector<16x4xbf16>, vector<4x128xbf16>, vector<16x128xf32> -> vector<16x128xf32>
    %345 = arith.addf %337, %344 : vector<16x128xf32>
    %c5_326 = arith.constant 5 : index
    %c0_327 = arith.constant 0 : index
    %c0_328 = arith.constant 0 : index
    %346 = vector.load %arg16[%c5_326, %c0_327, %c0_328] : memref<9x16x4xbf16, #tpu.memory_space<vmem>>, vector<1x16x4xbf16>
    %347 = vector.shape_cast %346 : vector<1x16x4xbf16> to vector<16x4xbf16>
    %c5_329 = arith.constant 5 : index
    %c0_330 = arith.constant 0 : index
    %c0_331 = arith.constant 0 : index
    %348 = vector.load %arg17[%c5_329, %c0_330, %c0_331] : memref<9x128x128xbf16, #tpu.memory_space<vmem>>, vector<1x128x128xbf16>
    %349 = vector.shape_cast %348 : vector<1x128x128xbf16> to vector<128x128xbf16>
    %cst_332 = arith.constant dense<0.000000e+00> : vector<4x128xf32>
    %350 = tpu.matmul %302, %349, %cst_332 {dimension_numbers = #tpu.dot_dimension_numbers<[1], [0], [0], [1], [0, 0, 1, 1], [], []>} : vector<4x128xbf16>, vector<128x128xbf16>, vector<4x128xf32> -> vector<4x128xf32>
    %351 = arith.truncf %350 : vector<4x128xf32> to vector<4x128xbf16>
    %cst_333 = arith.constant dense<0.000000e+00> : vector<16x128xf32>
    %352 = tpu.matmul %347, %351, %cst_333 {dimension_numbers = #tpu.dot_dimension_numbers<[1], [0], [0], [1], [0, 0, 1, 1], [], []>} : vector<16x4xbf16>, vector<4x128xbf16>, vector<16x128xf32> -> vector<16x128xf32>
    %353 = arith.addf %345, %352 : vector<16x128xf32>
    %c6_334 = arith.constant 6 : index
    %c0_335 = arith.constant 0 : index
    %c0_336 = arith.constant 0 : index
    %354 = vector.load %arg16[%c6_334, %c0_335, %c0_336] : memref<9x16x4xbf16, #tpu.memory_space<vmem>>, vector<1x16x4xbf16>
    %355 = vector.shape_cast %354 : vector<1x16x4xbf16> to vector<16x4xbf16>
    %c6_337 = arith.constant 6 : index
    %c0_338 = arith.constant 0 : index
    %c0_339 = arith.constant 0 : index
    %356 = vector.load %arg17[%c6_337, %c0_338, %c0_339] : memref<9x128x128xbf16, #tpu.memory_space<vmem>>, vector<1x128x128xbf16>
    %357 = vector.shape_cast %356 : vector<1x128x128xbf16> to vector<128x128xbf16>
    %cst_340 = arith.constant dense<0.000000e+00> : vector<4x128xf32>
    %358 = tpu.matmul %302, %357, %cst_340 {dimension_numbers = #tpu.dot_dimension_numbers<[1], [0], [0], [1], [0, 0, 1, 1], [], []>} : vector<4x128xbf16>, vector<128x128xbf16>, vector<4x128xf32> -> vector<4x128xf32>
    %359 = arith.truncf %358 : vector<4x128xf32> to vector<4x128xbf16>
    %cst_341 = arith.constant dense<0.000000e+00> : vector<16x128xf32>
    %360 = tpu.matmul %355, %359, %cst_341 {dimension_numbers = #tpu.dot_dimension_numbers<[1], [0], [0], [1], [0, 0, 1, 1], [], []>} : vector<16x4xbf16>, vector<4x128xbf16>, vector<16x128xf32> -> vector<16x128xf32>
    %361 = arith.addf %353, %360 : vector<16x128xf32>
    %c7_342 = arith.constant 7 : index
    %c0_343 = arith.constant 0 : index
    %c0_344 = arith.constant 0 : index
    %362 = vector.load %arg16[%c7_342, %c0_343, %c0_344] : memref<9x16x4xbf16, #tpu.memory_space<vmem>>, vector<1x16x4xbf16>
    %363 = vector.shape_cast %362 : vector<1x16x4xbf16> to vector<16x4xbf16>
    %c7_345 = arith.constant 7 : index
    %c0_346 = arith.constant 0 : index
    %c0_347 = arith.constant 0 : index
    %364 = vector.load %arg17[%c7_345, %c0_346, %c0_347] : memref<9x128x128xbf16, #tpu.memory_space<vmem>>, vector<1x128x128xbf16>
    %365 = vector.shape_cast %364 : vector<1x128x128xbf16> to vector<128x128xbf16>
    %cst_348 = arith.constant dense<0.000000e+00> : vector<4x128xf32>
    %366 = tpu.matmul %302, %365, %cst_348 {dimension_numbers = #tpu.dot_dimension_numbers<[1], [0], [0], [1], [0, 0, 1, 1], [], []>} : vector<4x128xbf16>, vector<128x128xbf16>, vector<4x128xf32> -> vector<4x128xf32>
    %367 = arith.truncf %366 : vector<4x128xf32> to vector<4x128xbf16>
    %cst_349 = arith.constant dense<0.000000e+00> : vector<16x128xf32>
    %368 = tpu.matmul %363, %367, %cst_349 {dimension_numbers = #tpu.dot_dimension_numbers<[1], [0], [0], [1], [0, 0, 1, 1], [], []>} : vector<16x4xbf16>, vector<4x128xbf16>, vector<16x128xf32> -> vector<16x128xf32>
    %369 = arith.addf %361, %368 : vector<16x128xf32>
    %c8_350 = arith.constant 8 : index
    %c0_351 = arith.constant 0 : index
    %c0_352 = arith.constant 0 : index
    %370 = vector.load %arg16[%c8_350, %c0_351, %c0_352] : memref<9x16x4xbf16, #tpu.memory_space<vmem>>, vector<1x16x4xbf16>
    %371 = vector.shape_cast %370 : vector<1x16x4xbf16> to vector<16x4xbf16>
    %c8_353 = arith.constant 8 : index
    %c0_354 = arith.constant 0 : index
    %c0_355 = arith.constant 0 : index
    %372 = vector.load %arg17[%c8_353, %c0_354, %c0_355] : memref<9x128x128xbf16, #tpu.memory_space<vmem>>, vector<1x128x128xbf16>
    %373 = vector.shape_cast %372 : vector<1x128x128xbf16> to vector<128x128xbf16>
    %cst_356 = arith.constant dense<0.000000e+00> : vector<4x128xf32>
    %374 = tpu.matmul %302, %373, %cst_356 {dimension_numbers = #tpu.dot_dimension_numbers<[1], [0], [0], [1], [0, 0, 1, 1], [], []>} : vector<4x128xbf16>, vector<128x128xbf16>, vector<4x128xf32> -> vector<4x128xf32>
    %375 = arith.truncf %374 : vector<4x128xf32> to vector<4x128xbf16>
    %cst_357 = arith.constant dense<0.000000e+00> : vector<16x128xf32>
    %376 = tpu.matmul %371, %375, %cst_357 {dimension_numbers = #tpu.dot_dimension_numbers<[1], [0], [0], [1], [0, 0, 1, 1], [], []>} : vector<16x4xbf16>, vector<4x128xbf16>, vector<16x128xf32> -> vector<16x128xf32>
    %377 = arith.addf %369, %376 : vector<16x128xf32>
    %cst_358 = arith.constant 0.000000e+00 : f32
    %378 = vector.broadcast %cst_358 : f32 to vector<16x128xf32>
    %379 = arith.maximumf %377, %378 : vector<16x128xf32>
    %380 = arith.truncf %379 : vector<16x128xf32> to vector<16x128xbf16>
    %c0_359 = arith.constant 0 : index
    %c0_360 = arith.constant 0 : index
    %381 = vector.load %arg21[%c0_359, %c0_360] : memref<1x128xf32, #tpu.memory_space<vmem>>, vector<1x128xf32>
    %382 = vector.shape_cast %381 : vector<1x128xf32> to vector<1x128xf32>
    %383 = vector.broadcast %382 : vector<1x128xf32> to vector<64x128xf32>
    %c0_361 = arith.constant 0 : index
    %c0_362 = arith.constant 0 : index
    %c0_363 = arith.constant 0 : index
    %384 = vector.load %arg19[%c0_361, %c0_362, %c0_363] : memref<9x64x16xbf16, #tpu.memory_space<vmem>>, vector<1x64x16xbf16>
    %385 = vector.shape_cast %384 : vector<1x64x16xbf16> to vector<64x16xbf16>
    %c0_364 = arith.constant 0 : index
    %c0_365 = arith.constant 0 : index
    %c0_366 = arith.constant 0 : index
    %386 = vector.load %arg20[%c0_364, %c0_365, %c0_366] : memref<9x128x128xbf16, #tpu.memory_space<vmem>>, vector<1x128x128xbf16>
    %387 = vector.shape_cast %386 : vector<1x128x128xbf16> to vector<128x128xbf16>
    %cst_367 = arith.constant dense<0.000000e+00> : vector<16x128xf32>
    %388 = tpu.matmul %380, %387, %cst_367 {dimension_numbers = #tpu.dot_dimension_numbers<[1], [0], [0], [1], [0, 0, 1, 1], [], []>} : vector<16x128xbf16>, vector<128x128xbf16>, vector<16x128xf32> -> vector<16x128xf32>
    %389 = arith.truncf %388 : vector<16x128xf32> to vector<16x128xbf16>
    %cst_368 = arith.constant dense<0.000000e+00> : vector<64x128xf32>
    %390 = tpu.matmul %385, %389, %cst_368 {dimension_numbers = #tpu.dot_dimension_numbers<[1], [0], [0], [1], [0, 0, 1, 1], [], []>} : vector<64x16xbf16>, vector<16x128xbf16>, vector<64x128xf32> -> vector<64x128xf32>
    %391 = arith.addf %383, %390 : vector<64x128xf32>
    %c1_369 = arith.constant 1 : index
    %c0_370 = arith.constant 0 : index
    %c0_371 = arith.constant 0 : index
    %392 = vector.load %arg19[%c1_369, %c0_370, %c0_371] : memref<9x64x16xbf16, #tpu.memory_space<vmem>>, vector<1x64x16xbf16>
    %393 = vector.shape_cast %392 : vector<1x64x16xbf16> to vector<64x16xbf16>
    %c1_372 = arith.constant 1 : index
    %c0_373 = arith.constant 0 : index
    %c0_374 = arith.constant 0 : index
    %394 = vector.load %arg20[%c1_372, %c0_373, %c0_374] : memref<9x128x128xbf16, #tpu.memory_space<vmem>>, vector<1x128x128xbf16>
    %395 = vector.shape_cast %394 : vector<1x128x128xbf16> to vector<128x128xbf16>
    %cst_375 = arith.constant dense<0.000000e+00> : vector<16x128xf32>
    %396 = tpu.matmul %380, %395, %cst_375 {dimension_numbers = #tpu.dot_dimension_numbers<[1], [0], [0], [1], [0, 0, 1, 1], [], []>} : vector<16x128xbf16>, vector<128x128xbf16>, vector<16x128xf32> -> vector<16x128xf32>
    %397 = arith.truncf %396 : vector<16x128xf32> to vector<16x128xbf16>
    %cst_376 = arith.constant dense<0.000000e+00> : vector<64x128xf32>
    %398 = tpu.matmul %393, %397, %cst_376 {dimension_numbers = #tpu.dot_dimension_numbers<[1], [0], [0], [1], [0, 0, 1, 1], [], []>} : vector<64x16xbf16>, vector<16x128xbf16>, vector<64x128xf32> -> vector<64x128xf32>
    %399 = arith.addf %391, %398 : vector<64x128xf32>
    %c2_377 = arith.constant 2 : index
    %c0_378 = arith.constant 0 : index
    %c0_379 = arith.constant 0 : index
    %400 = vector.load %arg19[%c2_377, %c0_378, %c0_379] : memref<9x64x16xbf16, #tpu.memory_space<vmem>>, vector<1x64x16xbf16>
    %401 = vector.shape_cast %400 : vector<1x64x16xbf16> to vector<64x16xbf16>
    %c2_380 = arith.constant 2 : index
    %c0_381 = arith.constant 0 : index
    %c0_382 = arith.constant 0 : index
    %402 = vector.load %arg20[%c2_380, %c0_381, %c0_382] : memref<9x128x128xbf16, #tpu.memory_space<vmem>>, vector<1x128x128xbf16>
    %403 = vector.shape_cast %402 : vector<1x128x128xbf16> to vector<128x128xbf16>
    %cst_383 = arith.constant dense<0.000000e+00> : vector<16x128xf32>
    %404 = tpu.matmul %380, %403, %cst_383 {dimension_numbers = #tpu.dot_dimension_numbers<[1], [0], [0], [1], [0, 0, 1, 1], [], []>} : vector<16x128xbf16>, vector<128x128xbf16>, vector<16x128xf32> -> vector<16x128xf32>
    %405 = arith.truncf %404 : vector<16x128xf32> to vector<16x128xbf16>
    %cst_384 = arith.constant dense<0.000000e+00> : vector<64x128xf32>
    %406 = tpu.matmul %401, %405, %cst_384 {dimension_numbers = #tpu.dot_dimension_numbers<[1], [0], [0], [1], [0, 0, 1, 1], [], []>} : vector<64x16xbf16>, vector<16x128xbf16>, vector<64x128xf32> -> vector<64x128xf32>
    %407 = arith.addf %399, %406 : vector<64x128xf32>
    %c3_385 = arith.constant 3 : index
    %c0_386 = arith.constant 0 : index
    %c0_387 = arith.constant 0 : index
    %408 = vector.load %arg19[%c3_385, %c0_386, %c0_387] : memref<9x64x16xbf16, #tpu.memory_space<vmem>>, vector<1x64x16xbf16>
    %409 = vector.shape_cast %408 : vector<1x64x16xbf16> to vector<64x16xbf16>
    %c3_388 = arith.constant 3 : index
    %c0_389 = arith.constant 0 : index
    %c0_390 = arith.constant 0 : index
    %410 = vector.load %arg20[%c3_388, %c0_389, %c0_390] : memref<9x128x128xbf16, #tpu.memory_space<vmem>>, vector<1x128x128xbf16>
    %411 = vector.shape_cast %410 : vector<1x128x128xbf16> to vector<128x128xbf16>
    %cst_391 = arith.constant dense<0.000000e+00> : vector<16x128xf32>
    %412 = tpu.matmul %380, %411, %cst_391 {dimension_numbers = #tpu.dot_dimension_numbers<[1], [0], [0], [1], [0, 0, 1, 1], [], []>} : vector<16x128xbf16>, vector<128x128xbf16>, vector<16x128xf32> -> vector<16x128xf32>
    %413 = arith.truncf %412 : vector<16x128xf32> to vector<16x128xbf16>
    %cst_392 = arith.constant dense<0.000000e+00> : vector<64x128xf32>
    %414 = tpu.matmul %409, %413, %cst_392 {dimension_numbers = #tpu.dot_dimension_numbers<[1], [0], [0], [1], [0, 0, 1, 1], [], []>} : vector<64x16xbf16>, vector<16x128xbf16>, vector<64x128xf32> -> vector<64x128xf32>
    %415 = arith.addf %407, %414 : vector<64x128xf32>
    %c4_393 = arith.constant 4 : index
    %c0_394 = arith.constant 0 : index
    %c0_395 = arith.constant 0 : index
    %416 = vector.load %arg19[%c4_393, %c0_394, %c0_395] : memref<9x64x16xbf16, #tpu.memory_space<vmem>>, vector<1x64x16xbf16>
    %417 = vector.shape_cast %416 : vector<1x64x16xbf16> to vector<64x16xbf16>
    %c4_396 = arith.constant 4 : index
    %c0_397 = arith.constant 0 : index
    %c0_398 = arith.constant 0 : index
    %418 = vector.load %arg20[%c4_396, %c0_397, %c0_398] : memref<9x128x128xbf16, #tpu.memory_space<vmem>>, vector<1x128x128xbf16>
    %419 = vector.shape_cast %418 : vector<1x128x128xbf16> to vector<128x128xbf16>
    %cst_399 = arith.constant dense<0.000000e+00> : vector<16x128xf32>
    %420 = tpu.matmul %380, %419, %cst_399 {dimension_numbers = #tpu.dot_dimension_numbers<[1], [0], [0], [1], [0, 0, 1, 1], [], []>} : vector<16x128xbf16>, vector<128x128xbf16>, vector<16x128xf32> -> vector<16x128xf32>
    %421 = arith.truncf %420 : vector<16x128xf32> to vector<16x128xbf16>
    %cst_400 = arith.constant dense<0.000000e+00> : vector<64x128xf32>
    %422 = tpu.matmul %417, %421, %cst_400 {dimension_numbers = #tpu.dot_dimension_numbers<[1], [0], [0], [1], [0, 0, 1, 1], [], []>} : vector<64x16xbf16>, vector<16x128xbf16>, vector<64x128xf32> -> vector<64x128xf32>
    %423 = arith.addf %415, %422 : vector<64x128xf32>
    %c5_401 = arith.constant 5 : index
    %c0_402 = arith.constant 0 : index
    %c0_403 = arith.constant 0 : index
    %424 = vector.load %arg19[%c5_401, %c0_402, %c0_403] : memref<9x64x16xbf16, #tpu.memory_space<vmem>>, vector<1x64x16xbf16>
    %425 = vector.shape_cast %424 : vector<1x64x16xbf16> to vector<64x16xbf16>
    %c5_404 = arith.constant 5 : index
    %c0_405 = arith.constant 0 : index
    %c0_406 = arith.constant 0 : index
    %426 = vector.load %arg20[%c5_404, %c0_405, %c0_406] : memref<9x128x128xbf16, #tpu.memory_space<vmem>>, vector<1x128x128xbf16>
    %427 = vector.shape_cast %426 : vector<1x128x128xbf16> to vector<128x128xbf16>
    %cst_407 = arith.constant dense<0.000000e+00> : vector<16x128xf32>
    %428 = tpu.matmul %380, %427, %cst_407 {dimension_numbers = #tpu.dot_dimension_numbers<[1], [0], [0], [1], [0, 0, 1, 1], [], []>} : vector<16x128xbf16>, vector<128x128xbf16>, vector<16x128xf32> -> vector<16x128xf32>
    %429 = arith.truncf %428 : vector<16x128xf32> to vector<16x128xbf16>
    %cst_408 = arith.constant dense<0.000000e+00> : vector<64x128xf32>
    %430 = tpu.matmul %425, %429, %cst_408 {dimension_numbers = #tpu.dot_dimension_numbers<[1], [0], [0], [1], [0, 0, 1, 1], [], []>} : vector<64x16xbf16>, vector<16x128xbf16>, vector<64x128xf32> -> vector<64x128xf32>
    %431 = arith.addf %423, %430 : vector<64x128xf32>
    %c6_409 = arith.constant 6 : index
    %c0_410 = arith.constant 0 : index
    %c0_411 = arith.constant 0 : index
    %432 = vector.load %arg19[%c6_409, %c0_410, %c0_411] : memref<9x64x16xbf16, #tpu.memory_space<vmem>>, vector<1x64x16xbf16>
    %433 = vector.shape_cast %432 : vector<1x64x16xbf16> to vector<64x16xbf16>
    %c6_412 = arith.constant 6 : index
    %c0_413 = arith.constant 0 : index
    %c0_414 = arith.constant 0 : index
    %434 = vector.load %arg20[%c6_412, %c0_413, %c0_414] : memref<9x128x128xbf16, #tpu.memory_space<vmem>>, vector<1x128x128xbf16>
    %435 = vector.shape_cast %434 : vector<1x128x128xbf16> to vector<128x128xbf16>
    %cst_415 = arith.constant dense<0.000000e+00> : vector<16x128xf32>
    %436 = tpu.matmul %380, %435, %cst_415 {dimension_numbers = #tpu.dot_dimension_numbers<[1], [0], [0], [1], [0, 0, 1, 1], [], []>} : vector<16x128xbf16>, vector<128x128xbf16>, vector<16x128xf32> -> vector<16x128xf32>
    %437 = arith.truncf %436 : vector<16x128xf32> to vector<16x128xbf16>
    %cst_416 = arith.constant dense<0.000000e+00> : vector<64x128xf32>
    %438 = tpu.matmul %433, %437, %cst_416 {dimension_numbers = #tpu.dot_dimension_numbers<[1], [0], [0], [1], [0, 0, 1, 1], [], []>} : vector<64x16xbf16>, vector<16x128xbf16>, vector<64x128xf32> -> vector<64x128xf32>
    %439 = arith.addf %431, %438 : vector<64x128xf32>
    %c7_417 = arith.constant 7 : index
    %c0_418 = arith.constant 0 : index
    %c0_419 = arith.constant 0 : index
    %440 = vector.load %arg19[%c7_417, %c0_418, %c0_419] : memref<9x64x16xbf16, #tpu.memory_space<vmem>>, vector<1x64x16xbf16>
    %441 = vector.shape_cast %440 : vector<1x64x16xbf16> to vector<64x16xbf16>
    %c7_420 = arith.constant 7 : index
    %c0_421 = arith.constant 0 : index
    %c0_422 = arith.constant 0 : index
    %442 = vector.load %arg20[%c7_420, %c0_421, %c0_422] : memref<9x128x128xbf16, #tpu.memory_space<vmem>>, vector<1x128x128xbf16>
    %443 = vector.shape_cast %442 : vector<1x128x128xbf16> to vector<128x128xbf16>
    %cst_423 = arith.constant dense<0.000000e+00> : vector<16x128xf32>
    %444 = tpu.matmul %380, %443, %cst_423 {dimension_numbers = #tpu.dot_dimension_numbers<[1], [0], [0], [1], [0, 0, 1, 1], [], []>} : vector<16x128xbf16>, vector<128x128xbf16>, vector<16x128xf32> -> vector<16x128xf32>
    %445 = arith.truncf %444 : vector<16x128xf32> to vector<16x128xbf16>
    %cst_424 = arith.constant dense<0.000000e+00> : vector<64x128xf32>
    %446 = tpu.matmul %441, %445, %cst_424 {dimension_numbers = #tpu.dot_dimension_numbers<[1], [0], [0], [1], [0, 0, 1, 1], [], []>} : vector<64x16xbf16>, vector<16x128xbf16>, vector<64x128xf32> -> vector<64x128xf32>
    %447 = arith.addf %439, %446 : vector<64x128xf32>
    %c8_425 = arith.constant 8 : index
    %c0_426 = arith.constant 0 : index
    %c0_427 = arith.constant 0 : index
    %448 = vector.load %arg19[%c8_425, %c0_426, %c0_427] : memref<9x64x16xbf16, #tpu.memory_space<vmem>>, vector<1x64x16xbf16>
    %449 = vector.shape_cast %448 : vector<1x64x16xbf16> to vector<64x16xbf16>
    %c8_428 = arith.constant 8 : index
    %c0_429 = arith.constant 0 : index
    %c0_430 = arith.constant 0 : index
    %450 = vector.load %arg20[%c8_428, %c0_429, %c0_430] : memref<9x128x128xbf16, #tpu.memory_space<vmem>>, vector<1x128x128xbf16>
    %451 = vector.shape_cast %450 : vector<1x128x128xbf16> to vector<128x128xbf16>
    %cst_431 = arith.constant dense<0.000000e+00> : vector<16x128xf32>
    %452 = tpu.matmul %380, %451, %cst_431 {dimension_numbers = #tpu.dot_dimension_numbers<[1], [0], [0], [1], [0, 0, 1, 1], [], []>} : vector<16x128xbf16>, vector<128x128xbf16>, vector<16x128xf32> -> vector<16x128xf32>
    %453 = arith.truncf %452 : vector<16x128xf32> to vector<16x128xbf16>
    %cst_432 = arith.constant dense<0.000000e+00> : vector<64x128xf32>
    %454 = tpu.matmul %449, %453, %cst_432 {dimension_numbers = #tpu.dot_dimension_numbers<[1], [0], [0], [1], [0, 0, 1, 1], [], []>} : vector<64x16xbf16>, vector<16x128xbf16>, vector<64x128xf32> -> vector<64x128xf32>
    %455 = arith.addf %447, %454 : vector<64x128xf32>
    %cst_433 = arith.constant 0.000000e+00 : f32
    %456 = vector.broadcast %cst_433 : f32 to vector<64x128xf32>
    %457 = arith.maximumf %455, %456 : vector<64x128xf32>
    %458 = arith.truncf %457 : vector<64x128xf32> to vector<64x128xbf16>
    %c0_434 = arith.constant 0 : index
    %c0_435 = arith.constant 0 : index
    %459 = vector.load %arg24[%c0_434, %c0_435] : memref<1x128xf32, #tpu.memory_space<vmem>>, vector<1x128xf32>
    %460 = vector.shape_cast %459 : vector<1x128xf32> to vector<1x128xf32>
    %461 = vector.broadcast %460 : vector<1x128xf32> to vector<256x128xf32>
    %c0_436 = arith.constant 0 : index
    %c0_437 = arith.constant 0 : index
    %c0_438 = arith.constant 0 : index
    %462 = vector.load %arg22[%c0_436, %c0_437, %c0_438] : memref<9x256x64xbf16, #tpu.memory_space<vmem>>, vector<1x256x64xbf16>
    %463 = vector.shape_cast %462 : vector<1x256x64xbf16> to vector<256x64xbf16>
    %c0_439 = arith.constant 0 : index
    %c0_440 = arith.constant 0 : index
    %c0_441 = arith.constant 0 : index
    %464 = vector.load %arg23[%c0_439, %c0_440, %c0_441] : memref<9x128x128xbf16, #tpu.memory_space<vmem>>, vector<1x128x128xbf16>
    %465 = vector.shape_cast %464 : vector<1x128x128xbf16> to vector<128x128xbf16>
    %cst_442 = arith.constant dense<0.000000e+00> : vector<64x128xf32>
    %466 = tpu.matmul %458, %465, %cst_442 {dimension_numbers = #tpu.dot_dimension_numbers<[1], [0], [0], [1], [0, 0, 1, 1], [], []>} : vector<64x128xbf16>, vector<128x128xbf16>, vector<64x128xf32> -> vector<64x128xf32>
    %467 = arith.truncf %466 : vector<64x128xf32> to vector<64x128xbf16>
    %cst_443 = arith.constant dense<0.000000e+00> : vector<256x128xf32>
    %468 = tpu.matmul %463, %467, %cst_443 {dimension_numbers = #tpu.dot_dimension_numbers<[1], [0], [0], [1], [0, 0, 1, 1], [], []>} : vector<256x64xbf16>, vector<64x128xbf16>, vector<256x128xf32> -> vector<256x128xf32>
    %469 = arith.addf %461, %468 : vector<256x128xf32>
    %c1_444 = arith.constant 1 : index
    %c0_445 = arith.constant 0 : index
    %c0_446 = arith.constant 0 : index
    %470 = vector.load %arg22[%c1_444, %c0_445, %c0_446] : memref<9x256x64xbf16, #tpu.memory_space<vmem>>, vector<1x256x64xbf16>
    %471 = vector.shape_cast %470 : vector<1x256x64xbf16> to vector<256x64xbf16>
    %c1_447 = arith.constant 1 : index
    %c0_448 = arith.constant 0 : index
    %c0_449 = arith.constant 0 : index
    %472 = vector.load %arg23[%c1_447, %c0_448, %c0_449] : memref<9x128x128xbf16, #tpu.memory_space<vmem>>, vector<1x128x128xbf16>
    %473 = vector.shape_cast %472 : vector<1x128x128xbf16> to vector<128x128xbf16>
    %cst_450 = arith.constant dense<0.000000e+00> : vector<64x128xf32>
    %474 = tpu.matmul %458, %473, %cst_450 {dimension_numbers = #tpu.dot_dimension_numbers<[1], [0], [0], [1], [0, 0, 1, 1], [], []>} : vector<64x128xbf16>, vector<128x128xbf16>, vector<64x128xf32> -> vector<64x128xf32>
    %475 = arith.truncf %474 : vector<64x128xf32> to vector<64x128xbf16>
    %cst_451 = arith.constant dense<0.000000e+00> : vector<256x128xf32>
    %476 = tpu.matmul %471, %475, %cst_451 {dimension_numbers = #tpu.dot_dimension_numbers<[1], [0], [0], [1], [0, 0, 1, 1], [], []>} : vector<256x64xbf16>, vector<64x128xbf16>, vector<256x128xf32> -> vector<256x128xf32>
    %477 = arith.addf %469, %476 : vector<256x128xf32>
    %c2_452 = arith.constant 2 : index
    %c0_453 = arith.constant 0 : index
    %c0_454 = arith.constant 0 : index
    %478 = vector.load %arg22[%c2_452, %c0_453, %c0_454] : memref<9x256x64xbf16, #tpu.memory_space<vmem>>, vector<1x256x64xbf16>
    %479 = vector.shape_cast %478 : vector<1x256x64xbf16> to vector<256x64xbf16>
    %c2_455 = arith.constant 2 : index
    %c0_456 = arith.constant 0 : index
    %c0_457 = arith.constant 0 : index
    %480 = vector.load %arg23[%c2_455, %c0_456, %c0_457] : memref<9x128x128xbf16, #tpu.memory_space<vmem>>, vector<1x128x128xbf16>
    %481 = vector.shape_cast %480 : vector<1x128x128xbf16> to vector<128x128xbf16>
    %cst_458 = arith.constant dense<0.000000e+00> : vector<64x128xf32>
    %482 = tpu.matmul %458, %481, %cst_458 {dimension_numbers = #tpu.dot_dimension_numbers<[1], [0], [0], [1], [0, 0, 1, 1], [], []>} : vector<64x128xbf16>, vector<128x128xbf16>, vector<64x128xf32> -> vector<64x128xf32>
    %483 = arith.truncf %482 : vector<64x128xf32> to vector<64x128xbf16>
    %cst_459 = arith.constant dense<0.000000e+00> : vector<256x128xf32>
    %484 = tpu.matmul %479, %483, %cst_459 {dimension_numbers = #tpu.dot_dimension_numbers<[1], [0], [0], [1], [0, 0, 1, 1], [], []>} : vector<256x64xbf16>, vector<64x128xbf16>, vector<256x128xf32> -> vector<256x128xf32>
    %485 = arith.addf %477, %484 : vector<256x128xf32>
    %c3_460 = arith.constant 3 : index
    %c0_461 = arith.constant 0 : index
    %c0_462 = arith.constant 0 : index
    %486 = vector.load %arg22[%c3_460, %c0_461, %c0_462] : memref<9x256x64xbf16, #tpu.memory_space<vmem>>, vector<1x256x64xbf16>
    %487 = vector.shape_cast %486 : vector<1x256x64xbf16> to vector<256x64xbf16>
    %c3_463 = arith.constant 3 : index
    %c0_464 = arith.constant 0 : index
    %c0_465 = arith.constant 0 : index
    %488 = vector.load %arg23[%c3_463, %c0_464, %c0_465] : memref<9x128x128xbf16, #tpu.memory_space<vmem>>, vector<1x128x128xbf16>
    %489 = vector.shape_cast %488 : vector<1x128x128xbf16> to vector<128x128xbf16>
    %cst_466 = arith.constant dense<0.000000e+00> : vector<64x128xf32>
    %490 = tpu.matmul %458, %489, %cst_466 {dimension_numbers = #tpu.dot_dimension_numbers<[1], [0], [0], [1], [0, 0, 1, 1], [], []>} : vector<64x128xbf16>, vector<128x128xbf16>, vector<64x128xf32> -> vector<64x128xf32>
    %491 = arith.truncf %490 : vector<64x128xf32> to vector<64x128xbf16>
    %cst_467 = arith.constant dense<0.000000e+00> : vector<256x128xf32>
    %492 = tpu.matmul %487, %491, %cst_467 {dimension_numbers = #tpu.dot_dimension_numbers<[1], [0], [0], [1], [0, 0, 1, 1], [], []>} : vector<256x64xbf16>, vector<64x128xbf16>, vector<256x128xf32> -> vector<256x128xf32>
    %493 = arith.addf %485, %492 : vector<256x128xf32>
    %c4_468 = arith.constant 4 : index
    %c0_469 = arith.constant 0 : index
    %c0_470 = arith.constant 0 : index
    %494 = vector.load %arg22[%c4_468, %c0_469, %c0_470] : memref<9x256x64xbf16, #tpu.memory_space<vmem>>, vector<1x256x64xbf16>
    %495 = vector.shape_cast %494 : vector<1x256x64xbf16> to vector<256x64xbf16>
    %c4_471 = arith.constant 4 : index
    %c0_472 = arith.constant 0 : index
    %c0_473 = arith.constant 0 : index
    %496 = vector.load %arg23[%c4_471, %c0_472, %c0_473] : memref<9x128x128xbf16, #tpu.memory_space<vmem>>, vector<1x128x128xbf16>
    %497 = vector.shape_cast %496 : vector<1x128x128xbf16> to vector<128x128xbf16>
    %cst_474 = arith.constant dense<0.000000e+00> : vector<64x128xf32>
    %498 = tpu.matmul %458, %497, %cst_474 {dimension_numbers = #tpu.dot_dimension_numbers<[1], [0], [0], [1], [0, 0, 1, 1], [], []>} : vector<64x128xbf16>, vector<128x128xbf16>, vector<64x128xf32> -> vector<64x128xf32>
    %499 = arith.truncf %498 : vector<64x128xf32> to vector<64x128xbf16>
    %cst_475 = arith.constant dense<0.000000e+00> : vector<256x128xf32>
    %500 = tpu.matmul %495, %499, %cst_475 {dimension_numbers = #tpu.dot_dimension_numbers<[1], [0], [0], [1], [0, 0, 1, 1], [], []>} : vector<256x64xbf16>, vector<64x128xbf16>, vector<256x128xf32> -> vector<256x128xf32>
    %501 = arith.addf %493, %500 : vector<256x128xf32>
    %c5_476 = arith.constant 5 : index
    %c0_477 = arith.constant 0 : index
    %c0_478 = arith.constant 0 : index
    %502 = vector.load %arg22[%c5_476, %c0_477, %c0_478] : memref<9x256x64xbf16, #tpu.memory_space<vmem>>, vector<1x256x64xbf16>
    %503 = vector.shape_cast %502 : vector<1x256x64xbf16> to vector<256x64xbf16>
    %c5_479 = arith.constant 5 : index
    %c0_480 = arith.constant 0 : index
    %c0_481 = arith.constant 0 : index
    %504 = vector.load %arg23[%c5_479, %c0_480, %c0_481] : memref<9x128x128xbf16, #tpu.memory_space<vmem>>, vector<1x128x128xbf16>
    %505 = vector.shape_cast %504 : vector<1x128x128xbf16> to vector<128x128xbf16>
    %cst_482 = arith.constant dense<0.000000e+00> : vector<64x128xf32>
    %506 = tpu.matmul %458, %505, %cst_482 {dimension_numbers = #tpu.dot_dimension_numbers<[1], [0], [0], [1], [0, 0, 1, 1], [], []>} : vector<64x128xbf16>, vector<128x128xbf16>, vector<64x128xf32> -> vector<64x128xf32>
    %507 = arith.truncf %506 : vector<64x128xf32> to vector<64x128xbf16>
    %cst_483 = arith.constant dense<0.000000e+00> : vector<256x128xf32>
    %508 = tpu.matmul %503, %507, %cst_483 {dimension_numbers = #tpu.dot_dimension_numbers<[1], [0], [0], [1], [0, 0, 1, 1], [], []>} : vector<256x64xbf16>, vector<64x128xbf16>, vector<256x128xf32> -> vector<256x128xf32>
    %509 = arith.addf %501, %508 : vector<256x128xf32>
    %c6_484 = arith.constant 6 : index
    %c0_485 = arith.constant 0 : index
    %c0_486 = arith.constant 0 : index
    %510 = vector.load %arg22[%c6_484, %c0_485, %c0_486] : memref<9x256x64xbf16, #tpu.memory_space<vmem>>, vector<1x256x64xbf16>
    %511 = vector.shape_cast %510 : vector<1x256x64xbf16> to vector<256x64xbf16>
    %c6_487 = arith.constant 6 : index
    %c0_488 = arith.constant 0 : index
    %c0_489 = arith.constant 0 : index
    %512 = vector.load %arg23[%c6_487, %c0_488, %c0_489] : memref<9x128x128xbf16, #tpu.memory_space<vmem>>, vector<1x128x128xbf16>
    %513 = vector.shape_cast %512 : vector<1x128x128xbf16> to vector<128x128xbf16>
    %cst_490 = arith.constant dense<0.000000e+00> : vector<64x128xf32>
    %514 = tpu.matmul %458, %513, %cst_490 {dimension_numbers = #tpu.dot_dimension_numbers<[1], [0], [0], [1], [0, 0, 1, 1], [], []>} : vector<64x128xbf16>, vector<128x128xbf16>, vector<64x128xf32> -> vector<64x128xf32>
    %515 = arith.truncf %514 : vector<64x128xf32> to vector<64x128xbf16>
    %cst_491 = arith.constant dense<0.000000e+00> : vector<256x128xf32>
    %516 = tpu.matmul %511, %515, %cst_491 {dimension_numbers = #tpu.dot_dimension_numbers<[1], [0], [0], [1], [0, 0, 1, 1], [], []>} : vector<256x64xbf16>, vector<64x128xbf16>, vector<256x128xf32> -> vector<256x128xf32>
    %517 = arith.addf %509, %516 : vector<256x128xf32>
    %c7_492 = arith.constant 7 : index
    %c0_493 = arith.constant 0 : index
    %c0_494 = arith.constant 0 : index
    %518 = vector.load %arg22[%c7_492, %c0_493, %c0_494] : memref<9x256x64xbf16, #tpu.memory_space<vmem>>, vector<1x256x64xbf16>
    %519 = vector.shape_cast %518 : vector<1x256x64xbf16> to vector<256x64xbf16>
    %c7_495 = arith.constant 7 : index
    %c0_496 = arith.constant 0 : index
    %c0_497 = arith.constant 0 : index
    %520 = vector.load %arg23[%c7_495, %c0_496, %c0_497] : memref<9x128x128xbf16, #tpu.memory_space<vmem>>, vector<1x128x128xbf16>
    %521 = vector.shape_cast %520 : vector<1x128x128xbf16> to vector<128x128xbf16>
    %cst_498 = arith.constant dense<0.000000e+00> : vector<64x128xf32>
    %522 = tpu.matmul %458, %521, %cst_498 {dimension_numbers = #tpu.dot_dimension_numbers<[1], [0], [0], [1], [0, 0, 1, 1], [], []>} : vector<64x128xbf16>, vector<128x128xbf16>, vector<64x128xf32> -> vector<64x128xf32>
    %523 = arith.truncf %522 : vector<64x128xf32> to vector<64x128xbf16>
    %cst_499 = arith.constant dense<0.000000e+00> : vector<256x128xf32>
    %524 = tpu.matmul %519, %523, %cst_499 {dimension_numbers = #tpu.dot_dimension_numbers<[1], [0], [0], [1], [0, 0, 1, 1], [], []>} : vector<256x64xbf16>, vector<64x128xbf16>, vector<256x128xf32> -> vector<256x128xf32>
    %525 = arith.addf %517, %524 : vector<256x128xf32>
    %c8_500 = arith.constant 8 : index
    %c0_501 = arith.constant 0 : index
    %c0_502 = arith.constant 0 : index
    %526 = vector.load %arg22[%c8_500, %c0_501, %c0_502] : memref<9x256x64xbf16, #tpu.memory_space<vmem>>, vector<1x256x64xbf16>
    %527 = vector.shape_cast %526 : vector<1x256x64xbf16> to vector<256x64xbf16>
    %c8_503 = arith.constant 8 : index
    %c0_504 = arith.constant 0 : index
    %c0_505 = arith.constant 0 : index
    %528 = vector.load %arg23[%c8_503, %c0_504, %c0_505] : memref<9x128x128xbf16, #tpu.memory_space<vmem>>, vector<1x128x128xbf16>
    %529 = vector.shape_cast %528 : vector<1x128x128xbf16> to vector<128x128xbf16>
    %cst_506 = arith.constant dense<0.000000e+00> : vector<64x128xf32>
    %530 = tpu.matmul %458, %529, %cst_506 {dimension_numbers = #tpu.dot_dimension_numbers<[1], [0], [0], [1], [0, 0, 1, 1], [], []>} : vector<64x128xbf16>, vector<128x128xbf16>, vector<64x128xf32> -> vector<64x128xf32>
    %531 = arith.truncf %530 : vector<64x128xf32> to vector<64x128xbf16>
    %cst_507 = arith.constant dense<0.000000e+00> : vector<256x128xf32>
    %532 = tpu.matmul %527, %531, %cst_507 {dimension_numbers = #tpu.dot_dimension_numbers<[1], [0], [0], [1], [0, 0, 1, 1], [], []>} : vector<256x64xbf16>, vector<64x128xbf16>, vector<256x128xf32> -> vector<256x128xf32>
    %533 = arith.addf %525, %532 : vector<256x128xf32>
    %cst_508 = arith.constant 0.000000e+00 : f32
    %534 = vector.broadcast %cst_508 : f32 to vector<256x128xf32>
    %535 = arith.subf %534, %533 : vector<256x128xf32>
    %536 = math.exp %535 : vector<256x128xf32>
    %cst_509 = arith.constant 1.000000e+00 : f32
    %537 = vector.broadcast %cst_509 : f32 to vector<256x128xf32>
    %538 = arith.addf %537, %536 : vector<256x128xf32>
    %cst_510 = arith.constant 1.000000e+00 : f32
    %539 = vector.broadcast %cst_510 : f32 to vector<256x128xf32>
    %540 = arith.divf %539, %538 : vector<256x128xf32>
    %c0_511 = arith.constant 0 : index
    %c0_512 = arith.constant 0 : index
    %c0_513 = arith.constant 0 : index
    %541 = vector.load %arg25[%c0_511, %c0_512, %c0_513] : memref<1x256x128xf32, #tpu.memory_space<vmem>>, vector<1x256x128xf32>
    %542 = vector.shape_cast %541 : vector<1x256x128xf32> to vector<256x128xf32>
    %543 = vector.shape_cast %540 : vector<256x128xf32> to vector<1x256x128xf32>
    tpu.vector_store %arg25[%c0_511, %c0_512, %c0_513], %543 {strides = array<i32>} : memref<1x256x128xf32, #tpu.memory_space<vmem>>, vector<1x256x128xf32>,
    return
  }
  func.func @transform_0(%arg0: i32) -> (i32, i32, i32) {
    %c0_i32 = arith.constant 0 : i32
    %c0_i32_0 = arith.constant 0 : i32
    %c0_i32_1 = arith.constant 0 : i32
    return %arg0, %c0_i32, %c0_i32_0 : i32, i32, i32
  }
  func.func @transform_1(%arg0: i32) -> (i32, i32, i32) {
    %c0_i32 = arith.constant 0 : i32
    %c0_i32_0 = arith.constant 0 : i32
    %c0_i32_1 = arith.constant 0 : i32
    %c0_i32_2 = arith.constant 0 : i32
    return %c0_i32, %c0_i32_0, %c0_i32_1 : i32, i32, i32
  }
  func.func @transform_2(%arg0: i32) -> (i32, i32, i32) {
    %c0_i32 = arith.constant 0 : i32
    %c0_i32_0 = arith.constant 0 : i32
    %c0_i32_1 = arith.constant 0 : i32
    %c0_i32_2 = arith.constant 0 : i32
    return %c0_i32, %c0_i32_0, %c0_i32_1 : i32, i32, i32
  }
  func.func @transform_3(%arg0: i32) -> (i32, i32) {
    %c0_i32 = arith.constant 0 : i32
    %c0_i32_0 = arith.constant 0 : i32
    %c0_i32_1 = arith.constant 0 : i32
    return %c0_i32, %c0_i32_0 : i32, i32
  }
  func.func @transform_4(%arg0: i32) -> (i32, i32, i32) {
    %c0_i32 = arith.constant 0 : i32
    %c0_i32_0 = arith.constant 0 : i32
    %c0_i32_1 = arith.constant 0 : i32
    %c0_i32_2 = arith.constant 0 : i32
    return %c0_i32, %c0_i32_0, %c0_i32_1 : i32, i32, i32
  }
  func.func @transform_5(%arg0: i32) -> (i32, i32, i32) {
    %c0_i32 = arith.constant 0 : i32
    %c0_i32_0 = arith.constant 0 : i32
    %c0_i32_1 = arith.constant 0 : i32
    %c0_i32_2 = arith.constant 0 : i32
    return %c0_i32, %c0_i32_0, %c0_i32_1 : i32, i32, i32
  }
  func.func @transform_6(%arg0: i32) -> (i32, i32) {
    %c0_i32 = arith.constant 0 : i32
    %c0_i32_0 = arith.constant 0 : i32
    %c0_i32_1 = arith.constant 0 : i32
    return %c0_i32, %c0_i32_0 : i32, i32
  }
  func.func @transform_7(%arg0: i32) -> (i32, i32, i32) {
    %c0_i32 = arith.constant 0 : i32
    %c0_i32_0 = arith.constant 0 : i32
    %c0_i32_1 = arith.constant 0 : i32
    %c0_i32_2 = arith.constant 0 : i32
    return %c0_i32, %c0_i32_0, %c0_i32_1 : i32, i32, i32
  }
  func.func @transform_8(%arg0: i32) -> (i32, i32, i32) {
    %c0_i32 = arith.constant 0 : i32
    %c0_i32_0 = arith.constant 0 : i32
    %c0_i32_1 = arith.constant 0 : i32
    %c0_i32_2 = arith.constant 0 : i32
    return %c0_i32, %c0_i32_0, %c0_i32_1 : i32, i32, i32
  }
  func.func @transform_9(%arg0: i32) -> (i32, i32) {
    %c0_i32 = arith.constant 0 : i32
    %c0_i32_0 = arith.constant 0 : i32
    %c0_i32_1 = arith.constant 0 : i32
    return %c0_i32, %c0_i32_0 : i32, i32
  }
  func.func @transform_10(%arg0: i32) -> (i32, i32, i32) {
    %c0_i32 = arith.constant 0 : i32
    %c0_i32_0 = arith.constant 0 : i32
    %c0_i32_1 = arith.constant 0 : i32
    %c0_i32_2 = arith.constant 0 : i32
    return %c0_i32, %c0_i32_0, %c0_i32_1 : i32, i32, i32
  }
  func.func @transform_11(%arg0: i32) -> (i32, i32) {
    %c0_i32 = arith.constant 0 : i32
    %c0_i32_0 = arith.constant 0 : i32
    %c0_i32_1 = arith.constant 0 : i32
    return %c0_i32, %c0_i32_0 : i32, i32
  }
  func.func @transform_12(%arg0: i32) -> (i32, i32, i32) {
    %c0_i32 = arith.constant 0 : i32
    %c0_i32_0 = arith.constant 0 : i32
    %c0_i32_1 = arith.constant 0 : i32
    return %arg0, %c0_i32, %c0_i32_0 : i32, i32, i32
  }
  func.func @transform_13(%arg0: i32) -> (i32, i32, i32) {
    %c0_i32 = arith.constant 0 : i32
    %c0_i32_0 = arith.constant 0 : i32
    %c0_i32_1 = arith.constant 0 : i32
    %c0_i32_2 = arith.constant 0 : i32
    return %c0_i32, %c0_i32_0, %c0_i32_1 : i32, i32, i32
  }
  func.func @transform_14(%arg0: i32) -> (i32, i32, i32) {
    %c0_i32 = arith.constant 0 : i32
    %c0_i32_0 = arith.constant 0 : i32
    %c0_i32_1 = arith.constant 0 : i32
    %c0_i32_2 = arith.constant 0 : i32
    return %c0_i32, %c0_i32_0, %c0_i32_1 : i32, i32, i32
  }
  func.func @transform_15(%arg0: i32) -> (i32, i32, i32) {
    %c0_i32 = arith.constant 0 : i32
    %c0_i32_0 = arith.constant 0 : i32
    %c0_i32_1 = arith.constant 0 : i32
    %c0_i32_2 = arith.constant 0 : i32
    return %c0_i32, %c0_i32_0, %c0_i32_1 : i32, i32, i32
  }
  func.func @transform_16(%arg0: i32) -> (i32, i32, i32) {
    %c0_i32 = arith.constant 0 : i32
    %c0_i32_0 = arith.constant 0 : i32
    %c0_i32_1 = arith.constant 0 : i32
    %c0_i32_2 = arith.constant 0 : i32
    return %c0_i32, %c0_i32_0, %c0_i32_1 : i32, i32, i32
  }
  func.func @transform_17(%arg0: i32) -> (i32, i32) {
    %c0_i32 = arith.constant 0 : i32
    %c0_i32_0 = arith.constant 0 : i32
    %c0_i32_1 = arith.constant 0 : i32
    return %c0_i32, %c0_i32_0 : i32, i32
  }
  func.func @transform_18(%arg0: i32) -> (i32, i32, i32) {
    %c0_i32 = arith.constant 0 : i32
    %c0_i32_0 = arith.constant 0 : i32
    %c0_i32_1 = arith.constant 0 : i32
    %c0_i32_2 = arith.constant 0 : i32
    return %c0_i32, %c0_i32_0, %c0_i32_1 : i32, i32, i32
  }
  func.func @transform_19(%arg0: i32) -> (i32, i32, i32) {
    %c0_i32 = arith.constant 0 : i32
    %c0_i32_0 = arith.constant 0 : i32
    %c0_i32_1 = arith.constant 0 : i32
    %c0_i32_2 = arith.constant 0 : i32
    return %c0_i32, %c0_i32_0, %c0_i32_1 : i32, i32, i32
  }
  func.func @transform_20(%arg0: i32) -> (i32, i32) {
    %c0_i32 = arith.constant 0 : i32
    %c0_i32_0 = arith.constant 0 : i32
    %c0_i32_1 = arith.constant 0 : i32
    return %c0_i32, %c0_i32_0 : i32, i32
  }
  func.func @transform_21(%arg0: i32) -> (i32, i32, i32) {
    %c0_i32 = arith.constant 0 : i32
    %c0_i32_0 = arith.constant 0 : i32
    %c0_i32_1 = arith.constant 0 : i32
    %c0_i32_2 = arith.constant 0 : i32
    return %c0_i32, %c0_i32_0, %c0_i32_1 : i32, i32, i32
  }
  func.func @transform_22(%arg0: i32) -> (i32, i32, i32) {
    %c0_i32 = arith.constant 0 : i32
    %c0_i32_0 = arith.constant 0 : i32
    %c0_i32_1 = arith.constant 0 : i32
    %c0_i32_2 = arith.constant 0 : i32
    return %c0_i32, %c0_i32_0, %c0_i32_1 : i32, i32, i32
  }
  func.func @transform_23(%arg0: i32) -> (i32, i32) {
    %c0_i32 = arith.constant 0 : i32
    %c0_i32_0 = arith.constant 0 : i32
    %c0_i32_1 = arith.constant 0 : i32
    return %c0_i32, %c0_i32_0 : i32, i32
  }
  func.func @transform_24(%arg0: i32) -> (i32, i32, i32) {
    %c0_i32 = arith.constant 0 : i32
    %c0_i32_0 = arith.constant 0 : i32
    %c0_i32_1 = arith.constant 0 : i32
    return %arg0, %c0_i32, %c0_i32_0 : i32, i32, i32
  }
  func.func @transform_25(%arg0: i32) -> (i32, i32, i32) {
    %c0_i32 = arith.constant 0 : i32
    %c0_i32_0 = arith.constant 0 : i32
    %c0_i32_1 = arith.constant 0 : i32
    return %arg0, %c0_i32, %c0_i32_0 : i32, i32, i32
  }
  func.func @transform_26(%arg0: i32) -> (i32, i32, i32) {
    %c0_i32 = arith.constant 0 : i32
    %c0_i32_0 = arith.constant 0 : i32
    %c0_i32_1 = arith.constant 0 : i32
    return %arg0, %c0_i32, %c0_i32_0 : i32, i32, i32
  }
}

</mosaic_0001>

<bundles_post_ra>
// kernel: squeeze.7
= control target key start
LH: loop header
LB: loop body
LE: loop exit
PB: predicated region body
PF: predicated region fallthrough
CT: control target
= control target key end

     0   :  { %s149_s0 = inlined_call_operand.vmem [shape: f32[2,256], index: 0, kind: input, shape index: {}]   ;;  %s150_s1 = inlined_call_operand.hbm [shape: f32[2,1,16,16], index: 1, kind: output, shape index: {}]  }
   0x1   :  { %v71_v0 = vld [vmem:[%s149_s0 + $0x2] sm:$0x3]  ;;  %v9_v1 = vld [vmem:[%s149_s0] sm:$0x3] }
   0x2   :  { %8 = vst [vmem:[#allocation2 + $0x8] sm:$0x3] %v71_v0  ;;  %10 = vst [vmem:[#allocation2] sm:$0x3] %v9_v1 }
   0x3   :  { %2 = vsyncpa [#allocation1], 0  ;;  %vm12_vm0 = vcmask 130048   ;;  %s104_s0 = smov 112   ;;  %s105_s10 = smov 80  }
   0x4   :  { %s106_s11 = smov 96   ;;  %s107_s12 = smov 64  }
   0x5   :  { %s108_s13 = smov 48   ;;  %s109_s14 = smov 32  }
   0x6   :  { %s110_s15 = smov 16   ;;  %s111_s16 = smov [#allocation0]  }
   0x7   :  { %s65_s17 = sshll.u32 %s111_s16, 4  ;;  %s66_s17 = int_to_ptr.vmem [resolvable:$true] %s65_s17 }
   0x8   :  { %s80_s18 = scalar_lea.vmem %s66_s17, 512  ;;  %p85_p1 = scmp.lt.s32.totalorder %s66_s17, %s66_s17 }
   0x9   :  { %v19_v2 = vld.sshfl [vmem:[#allocation2] sm:$0xff pattern:$0x99999180]   ;;  %p81_p0 = scmp.ne.s32.totalorder %s66_s17, %s80_s18  ;;  %p86_p2 = scmp.lt.s32.totalorder %s80_s18, %s80_s18 }
   0xa   :  { %v11_v3 = vld [vmem:[#allocation2] sm:$0x3]   ;;  %20 = vrot.lane.b32.xlu0 %v19_v2, %s104_s0  ;;  %32 = vrot.lane.b32.xlu1 %v19_v2, %s105_s10  ;;  %v15_v4 = vld [vmem:[#allocation2 + $0x8] sm:$0x3]  }
   0xb   :  { %13 = vst.msk [vmem:[#allocation0] ss:$16 sm:$0x3] %vm12_vm0, %v11_v3   ;;  %18 = vst.msk [vmem:[#allocation0 + $0x8] ss:$16 sm:$0x3] %vm12_vm0, %v15_v4   ;;  %p87_p3 = por %p86_p2, %p85_p1 }
   0xd   :  { %p88_p4 = pnand %p87_p3, %p81_p0 }
   0xe   :  { %26 = vrot.lane.b32.xlu0 %v19_v2, %s106_s11  ;;  %38 = vrot.lane.b32.xlu1 %v19_v2, %s107_s12 }
  0x12   :  { %44 = vrot.lane.b32.xlu0 %v19_v2, %s108_s13  ;;  %50 = vrot.lane.b32.xlu1 %v19_v2, %s109_s14 }
  0x16   :  { %56 = vrot.lane.b32.xlu0 %v19_v2, %s110_s15 }
  0x7c   :  { %v21_v5 = vpop.permute.xlu0 %20   ;;  %v33_v6 = vpop.permute.xlu1 %32  }
  0x7d   :  { %24 = vst.msk [vmem:[#allocation0 + $0x1] ss:$8 sm:$0xf] %vm12_vm0, %v21_v5   ;;  %36 = vst.msk [vmem:[#allocation0 + $0x3] ss:$8 sm:$0xf] %vm12_vm0, %v33_v6  }
  0x80   :  { %v27_v7 = vpop.permute.xlu0 %26   ;;  %v39_v8 = vpop.permute.xlu1 %38  }
  0x81   :  { %30 = vst.msk [vmem:[#allocation0 + $0x2] ss:$8 sm:$0xf] %vm12_vm0, %v27_v7   ;;  %42 = vst.msk [vmem:[#allocation0 + $0x4] ss:$8 sm:$0xf] %vm12_vm0, %v39_v8  }
  0x84   :  { %v45_v9 = vpop.permute.xlu0 %44   ;;  %v51_v10 = vpop.permute.xlu1 %50  }
  0x85   :  { %48 = vst.msk [vmem:[#allocation0 + $0x5] ss:$8 sm:$0xf] %vm12_vm0, %v45_v9   ;;  %54 = vst.msk [vmem:[#allocation0 + $0x6] ss:$8 sm:$0xf] %vm12_vm0, %v51_v10  }
  0x88   :  { %v57_v11 = vpop.permute.xlu0 %56  }
  0x89   :  { %60 = vst.msk [vmem:[#allocation0 + $0x7] ss:$8 sm:$0xf] %vm12_vm0, %v57_v11  }
  0x8a   :  { %91 = shalt.err (!%p88_p4)
}
  0x8b   :  { %s92_s21 = scalar_lea.hbm %s150_s1, 512 }
  0x8c   :  { %p93_p5 = scmp.ne.s32.totalorder %s150_s1, %s92_s21  ;;  %p96_p6 = scmp.lt.u32.totalorder %s92_s21, %s150_s1 }
  0x8e   :  { %p98_p7 = pnand %p96_p6, %p93_p5 }
  0x90   :  { %101 = shalt.err (!%p98_p7)
}
  0x91   :  { %68 = dma.vmem_to_hbm [thread:$0]  %s66_s17, 512, %s150_s1, [#allocation1]  }
  0x92   :  { %102 = dma.done.wait [#allocation1], 512  }
  0x93   :  { %103 = vsyncadd [#allocation1], 4294966784 }
  0x94   :  { %70 = vsyncpa [#allocation1], 1 }

// kernel: spectrogram_vae_forward.1
= control target key start
LH: loop header
LB: loop body
LE: loop exit
PB: predicated region body
PF: predicated region fallthrough
CT: control target
= control target key end

     0   :  { %s25677_s0 = inlined_call_operand.vmem [shape: bf16[2,256,8], index: 0, kind: input, shape index: {}]   ;;  %s25678_s1 = inlined_call_operand.vmem [shape: bf16[9,64,256], index: 1, kind: input, shape index: {}]   ;;  %s25679_s2 = inlined_call_operand.hbm [shape: bf16[9,8,128], index: 2, kind: input, shape index: {}]   ;;  %s25680_s3 = inlined_call_operand.hbm [shape: f32[1,128], index: 3, kind: input, shape index: {}]   ;;  %s25681_s4 = inlined_call_operand.hbm [shape: bf16[9,16,64], index: 4, kind: input, shape index: {}]   ;;  %s25682_s5 = inlined_call_operand.hbm [shape: bf16[9,128,128], index: 5, kind: input, shape index: {}]   ;;  %s25683_s6 = inlined_call_operand.hbm [shape: f32[1,128], index: 6, kind: input, shape index: {}]   ;;  %s25684_s7 = inlined_call_operand.hbm [shape: bf16[9,4,16], index: 7, kind: input, shape index: {}]   ;;  %s25685_s8 = inlined_call_operand.hbm [shape: bf16[9,128,128], index: 8, kind: input, shape index: {}]   ;;  %s25686_s9 = inlined_call_operand.hbm [shape: f32[1,128], index: 9, kind: input, shape index: {}]   ;;  %s25687_s10 = inlined_call_operand.vmem [shape: bf16[4,128,256], index: 10, kind: input, shape index: {}]   ;;  %s25688_s11 = inlined_call_operand.vmem [shape: f32[1,256], index: 11, kind: input, shape index: {}]   ;;  %s25689_s12 = inlined_call_operand.vmem [shape: f32[2,1,128], index: 12, kind: input, shape index: {}]   ;;  %s25690_s13 = inlined_call_operand.hbm [shape: bf16[4,128,128], index: 13, kind: input, shape index: {}]   ;;  %s25691_s14 = inlined_call_operand.vmem [shape: f32[4,1,128], index: 14, kind: input, shape index: {}]   ;;  %s25692_s15 = inlined_call_operand.hbm [shape: bf16[9,16,4], index: 15, kind: input, shape index: {}]   ;;  %s25693_s16 = inlined_call_operand.hbm [shape: bf16[9,128,128], index: 16, kind: input, shape index: {}]   ;;  %s25694_s17 = inlined_call_operand.vmem [shape: f32[1,128], index: 17, kind: input, shape index: {}]   ;;  %s25695_s18 = inlined_call_operand.vmem [shape: bf16[9,64,16], index: 18, kind: input, shape index: {}]   ;;  %s25696_s19 = inlined_call_operand.vmem [shape: bf16[9,128,128], index: 19, kind: input, shape index: {}]   ;;  %s25697_s20 = inlined_call_operand.vmem [shape: f32[1,128], index: 20, kind: input, shape index: {}]   ;;  %s25698_s21 = inlined_call_operand.vmem [shape: bf16[9,256,64], index: 21, kind: input, shape index: {}]   ;;  %s25699_s22 = inlined_call_operand.vmem [shape: bf16[9,128,128], index: 22, kind: input, shape index: {}]   ;;  %s25700_s23 = inlined_call_operand.vmem [shape: f32[1,128], index: 23, kind: input, shape index: {}]   ;;  %s25701_s24 = inlined_call_operand.vmem [shape: f32[2,256,128], index: 24, kind: output, shape index: {0}]   ;;  %s25702_s25 = inlined_call_operand.hbm [shape: f32[2,1,128], index: 25, kind: output, shape index: {1}]   ;;  %s25703_s26 = inlined_call_operand.hbm [shape: f32[2,1,128], index: 26, kind: output, shape index: {2}]  }
   0x1   :  { %25743 = sst [smem:[#allocation39_spill]] %s25677_s0 }
   0x2   :  { %25744 = sst [smem:[#allocation40_spill]] %s25678_s1 }
   0x3   :  { %25745 = sst [smem:[#allocation41_spill]] %s25679_s2 }
   0x4   :  { %25746 = sst [smem:[#allocation42_spill]] %s25680_s3 }
   0x5   :  { %25747 = sst [smem:[#allocation43_spill]] %s25681_s4 }
   0x6   :  { %25748 = sst [smem:[#allocation44_spill]] %s25682_s5 }
   0x7   :  { %25749 = sst [smem:[#allocation45_spill]] %s25683_s6 }
   0x8   :  { %25750 = sst [smem:[#allocation46_spill]] %s25684_s7 }
   0x9   :  { %25751 = sst [smem:[#allocation47_spill]] %s25685_s8 }
   0xa   :  { %25752 = sst [smem:[#allocation48_spill]] %s25686_s9 }
   0xb   :  { %25753 = sst [smem:[#allocation49_spill]] %s25687_s10 }
   0xc   :  { %25754 = sst [smem:[#allocation50_spill]] %s25688_s11 }
   0xd   :  { %25755 = sst [smem:[#allocation51_spill]] %s25689_s12 }
   0xe   :  { %25756 = sst [smem:[#allocation52_spill]] %s25694_s17 }
   0xf   :  { %25757 = sst [smem:[#allocation53_spill]] %s25695_s18 }
  0x10   :  { %25758 = sst [smem:[#allocation54_spill]] %s25697_s20 }
  0x11   :  { %25759 = sst [smem:[#allocation55_spill]] %s25698_s21 }
  0x12   :  { %25760 = sst [smem:[#allocation56_spill]] %s25699_s22 }
  0x13   :  { %25761 = sst [smem:[#allocation57_spill]] %s25700_s23 }
  0x14   :  { %25762 = sst [smem:[#allocation58_spill]] %s25701_s24 }
  0x15   :  { %25763 = sst [smem:[#allocation59_spill]] %s25702_s25 }
  0x16   :  { %25764 = sst [smem:[#allocation60_spill]] %s25703_s26 }
  0x17   :  { %32 = vsyncpa [#allocation4], 0 }
  0x18   :  { %33 = vsyncpa [#allocation7], 0 }
  0x19   :  { %34 = vsyncpa [#allocation10], 0 }
  0x1a   :  { %35 = vsyncpa [#allocation13], 0 }
  0x1b   :  { %36 = vsyncpa [#allocation16], 0 }
  0x1c   :  { %37 = vsyncpa [#allocation19], 0 }
  0x1d   :  { %38 = vsyncpa [#allocation5], 0 }
  0x1e   :  { %40 = vsyncpa [#allocation5 + $0x1], 0 }
  0x1f   :  { %41 = vsyncpa [#allocation23], 0 }
  0x20   :  { %43 = vsyncpa [#allocation23 + $0x1], 0  ;;  %s22218_s27 = smov 0   ;;  %s22220_s3 = smov 0  }
  0x21   :  { %s22222_s7 = smov 0   ;;  %s22224_s28 = smov 0  }
  0x22 LB: > { %25765 = sst [smem:[#allocation32_spill]] %s22048_s27  ;;  %s22239_s8 = sadd.s32 4294967295, %s22060_s28   ;;  %s22060_s28 = sphi %s22224_s28, %s25830_s28   ;;  %s22056_s7 = sphi %s22222_s7, %s25835_s7   ;;  %s22052_s3 = sphi %s22220_s3, %s25834_s3   ;;  %s22048_s27 = sphi %s22218_s27, %s25833_s27  }
  0x23   : > { %25766 = sst [smem:[#allocation33_spill]] %s22056_s7  ;;  %s15280_s4 = sadd.s32 4294967294, %s22060_s28  }
  0x24   : > { %25767 = sst [smem:[#allocation34_spill]] %s22060_s28  ;;  %s22243_s29 = sadd.s32 1, %s22060_s28  }
  0x25   : > { %25768 = sst [smem:[#allocation35_spill]] %s22243_s29  ;;  %s596_s0 = sadd.s32 1, %s22056_s7 }
  0x26   : > { %s593_s9 = ssub.s32 %s22060_s28, %s22243_s29  ;;  %p606_p0 = scmp.ne.s32.totalorder %s22056_s7, %s22052_s3 }
  0x27   : > { %p594_p1 = scmp.eq.s32.totalorder %s593_s9, 0  ;;  %p607_p2 = scmp.eq.s32.totalorder %s22239_s8, 1 }
  0x28   : > { %p612_p3 = scmp.ne.s32.totalorder %s22052_s3, %s22048_s27  ;;  %p613_p4 = scmp.eq.s32.totalorder %s15280_s4, 1 }
  0x29   : > { %s22254_s30 = scalar_select %p594_p1, %s22056_s7, %s596_s0  }
  0x2a   : > { %p22256_p5 = por %p607_p2, %p606_p0  ;;  %p22260_p6 = por %p613_p4, %p612_p3 }
  0x2b   : > { %25769 = sst [smem:[#allocation36_spill]] %s22254_s30  ;;  %p15281_p7 = scmp.ge.s32.totalorder %s22060_s28, 1 }
  0x2c   : > { %s25770_s2 = scalar_select %p22256_p5, 1, 0 }
  0x2d   : > { %s25772_s5 = scalar_select %p22260_p6, 1, 0 }
  0x2e   : > { %25771 = sst [smem:[#allocation37_spill]] %s25770_s2  ;;  %p646_p8 = scmp.lt.s32.totalorder %s22060_s28, 3 }
  0x2f   : > { %25773 = sst [smem:[#allocation38_spill]] %s25772_s5  ;;  %p25721_p9 = scmp.eq.s32.totalorder %s22239_s8, 0 }
  0x30   : > { %p22267_p10 = pnand %p15281_p7, %p646_p8  ;;  %s22062_s6 = smov [#allocation6]  }
  0x31   : > { %s675_s1 = sshll.u32 %s22062_s6, 4  ;;  %s22063_s0 = smov [#allocation9]   ;;  %s676_s1 = int_to_ptr.vmem [resolvable:$true] %s675_s1 }
  0x32   : > { %s25774_s10 = scalar_select %p22267_p10, 1, 0 }
  0x33   : > { %p20547_p11 = pneg %p22267_p10  ;;  %s698_s9 = sshll.u32 %s22063_s0, 4  ;;  %s22279_s9 = int_to_ptr.vmem [resolvable:$true] %s698_s9 }
  0x34   : > { %s22064_s30 = smov [#allocation12]   ;;  %s25776_s27 = sld [smem:[#allocation42_spill]] }
  0x35   : > { %p22275_p12 = pnand %p25721_p9, %p20547_p11  ;;  %s22281_s7 = sshll.u32 %s22064_s30, 4  ;;  %s723_s7 = int_to_ptr.vmem [resolvable:$true] %s22281_s7 }
  0x37   : > { %p22291_p0 = pneg %p22275_p12 }
  0x3a   : > { %s25777_s24 = smov %s25776_s27  ;;  %s21634_s6 = scalar_lea.hbm %s25776_s27, 16 }
  0x3b   : > { %p21635_p13 = scmp.ne.s32.totalorder %s25777_s24, %s21634_s6  ;;  %p21641_p3 = scmp.lt.u32.totalorder %s21634_s6, %s25777_s24 }
  0x3d   : > { %p21637_p1 = pnand %p22291_p0, %p21635_p13 }
  0x3f   : > { %p21638_p2 = pneg %p21637_p1 }
  0x41   : > { %p21643_p4 = pnand %p21641_p3, %p21638_p2 }
  0x43   : > { %21646 = shalt.err (!%p21643_p4)
}
  0x44   : > { %s21647_s27 = scalar_lea.vmem %s676_s1, 16  ;;  %s21654_s23 = scalar_lea.vmem %s676_s1, 32 }
  0x45   : > { %p21648_p7 = scmp.ne.s32.totalorder %s676_s1, %s21647_s27  ;;  %p21655_p9 = scmp.lt.s32.totalorder %s676_s1, %s676_s1 }
  0x46   : > { %p21656_p6 = scmp.lt.s32.totalorder %s21654_s23, %s21647_s27 }
  0x47   : > { %p21650_p8 = pnand %p21648_p7, %p22291_p0 }
  0x48   : > { %p21657_p5 = por %p21656_p6, %p21655_p9 }
  0x49   : > { %p21651_p11 = pneg %p21650_p8 }
  0x4b   : > { %p21658_p10 = pnand %p21657_p5, %p21651_p11 }
  0x4d   : > { %21661 = shalt.err (!%p21658_p10)
}
  0x4e   : > { %20553 = dma.hbm_to_vmem [thread:$0]  (!%p22275_p12), %s25777_s24, 16, %s676_s1, [#allocation7]  }
  0x4f   : > { %s25779_s0 = sld [smem:[#allocation44_spill]] }
  0x55   : > { %s21662_s30 = scalar_lea.hbm %s25779_s0, 9216 }
  0x56   : > { %p21663_p13 = scmp.ne.s32.totalorder %s25779_s0, %s21662_s30  ;;  %p21669_p5 = scmp.lt.u32.totalorder %s21662_s30, %s25779_s0 }
  0x58   : > { %p21665_p1 = pnand %p21663_p13, %p22291_p0 }
  0x5a   : > { %p21666_p6 = pneg %p21665_p1 }
  0x5c   : > { %p21671_p9 = pnand %p21669_p5, %p21666_p6 }
  0x5e   : > { %21674 = shalt.err (!%p21671_p9)
}
  0x5f   : > { %s21675_s1 = scalar_lea.vmem %s22279_s9, 9216  ;;  %p21683_p4 = scmp.lt.s32.totalorder %s22279_s9, %s22279_s9 }
  0x60   : > { %p21676_p10 = scmp.ne.s32.totalorder %s22279_s9, %s21675_s1  ;;  %p21684_p7 = scmp.lt.s32.totalorder %s21675_s1, %s21675_s1 }
  0x62   : > { %p21678_p2 = pnand %p21676_p10, %p22291_p0  ;;  %p21685_p8 = por %p21684_p7, %p21683_p4 }
  0x64   : > { %p21679_p3 = pneg %p21678_p2 }
  0x66   : > { %p21686_p11 = pnand %p21685_p8, %p21679_p3 }
  0x68   : > { %21689 = shalt.err (!%p21686_p11)
}
  0x69   : > { %s25729_s25 = smov 64   ;;  %s25731_s2 = smov 4  }
  0x6a   : > { %20559 = dma.hbm_to_vmem [thread:$0]  (!%p22275_p12), %s25779_s0, 9216, %s22279_s9, [#allocation10], %s25729_s25, %s25729_s25, %s25731_s2  }
  0x6b   : > { %s25780_s30 = sld [smem:[#allocation46_spill]] }
  0x71   : > { %s21690_s27 = scalar_lea.hbm %s25780_s30, 288 }
  0x72   : > { %p21691_p13 = scmp.ne.s32.totalorder %s25780_s30, %s21690_s27  ;;  %p21697_p5 = scmp.lt.u32.totalorder %s21690_s27, %s25780_s30 }
  0x74   : > { %p21693_p1 = pnand %p21691_p13, %p22291_p0 }
  0x76   : > { %p21694_p6 = pneg %p21693_p1 }
  0x78   : > { %p21699_p9 = pnand %p21697_p5, %p21694_p6 }
  0x7a   : > { %21702 = shalt.err (!%p21699_p9)
}
  0x7b   : > { %s21703_s28 = scalar_lea.vmem %s723_s7, 288  ;;  %p21711_p4 = scmp.lt.s32.totalorder %s723_s7, %s723_s7 }
  0x7c   : > { %p21704_p10 = scmp.ne.s32.totalorder %s723_s7, %s21703_s28  ;;  %p21712_p7 = scmp.lt.s32.totalorder %s21703_s28, %s21703_s28 }
  0x7e   : > { %p21706_p2 = pnand %p21704_p10, %p22291_p0  ;;  %p21713_p8 = por %p21712_p7, %p21711_p4 }
  0x80   : > { %p21707_p3 = pneg %p21706_p2 }
  0x82   : > { %p21714_p11 = pnand %p21713_p8, %p21707_p3 }
  0x84   : > { %21717 = shalt.err (!%p21714_p11)
}
  0x85   : > { %s22067_s9 = smov 32   ;;  %s22068_s29 = smov 2  }
  0x86   : > { %20565 = dma.hbm_to_vmem [thread:$0]  (!%p22275_p12), %s25780_s30, 288, %s723_s7, [#allocation13], %s22067_s9, %s22067_s9, %s22068_s29  }
  0x87   : > { %s22069_s5 = smov [#allocation15]   ;;  %s22070_s27 = smov [#allocation18]  }
  0x88   : > { %s749_s6 = sshll.u32 %s22069_s5, 4  ;;  %s781_s23 = sshll.u32 %s22070_s27, 4  ;;  %s750_s6 = int_to_ptr.vmem [resolvable:$true] %s749_s6  ;;  %s782_s23 = int_to_ptr.vmem [resolvable:$true] %s781_s23 }
  0x89   : > { %s25781_s28 = sld [smem:[#allocation48_spill]] }
  0x8f   : > { %s25782_s2 = smov %s25781_s28  ;;  %s21718_s0 = scalar_lea.hbm %s25781_s28, 16 }
  0x90   : > { %p21719_p13 = scmp.ne.s32.totalorder %s25782_s2, %s21718_s0  ;;  %p21725_p5 = scmp.lt.u32.totalorder %s21718_s0, %s25782_s2 }
  0x92   : > { %p21721_p1 = pnand %p21719_p13, %p22291_p0 }
  0x94   : > { %p21722_p6 = pneg %p21721_p1 }
  0x96   : > { %p21727_p9 = pnand %p21725_p5, %p21722_p6 }
  0x98   : > { %21730 = shalt.err (!%p21727_p9)
}
  0x99   : > { %s21731_s7 = scalar_lea.vmem %s750_s6, 16  ;;  %s21738_s25 = scalar_lea.vmem %s750_s6, 32 }
  0x9a   : > { %p21732_p10 = scmp.ne.s32.totalorder %s750_s6, %s21731_s7  ;;  %p21739_p4 = scmp.lt.s32.totalorder %s750_s6, %s750_s6 }
  0x9b   : > { %p21740_p7 = scmp.lt.s32.totalorder %s21738_s25, %s21731_s7 }
  0x9c   : > { %p21734_p2 = pnand %p21732_p10, %p22291_p0 }
  0x9d   : > { %p21741_p8 = por %p21740_p7, %p21739_p4 }
  0x9e   : > { %p21735_p3 = pneg %p21734_p2 }
  0xa0   : > { %p21742_p11 = pnand %p21741_p8, %p21735_p3 }
  0xa2   : > { %21745 = shalt.err (!%p21742_p11)
}
  0xa3   : > { %20571 = dma.hbm_to_vmem [thread:$0]  (!%p22275_p12), %s25782_s2, 16, %s750_s6, [#allocation16]  }
  0xa4   : > { %s21746_s0 = scalar_lea.hbm %s25692_s15, 1152 }
  0xa5   : > { %p21747_p13 = scmp.ne.s32.totalorder %s25692_s15, %s21746_s0  ;;  %p21753_p5 = scmp.lt.u32.totalorder %s21746_s0, %s25692_s15 }
  0xa7   : > { %p21749_p1 = pnand %p21747_p13, %p22291_p0 }
  0xa9   : > { %p21750_p6 = pneg %p21749_p1 }
  0xab   : > { %p21755_p9 = pnand %p21753_p5, %p21750_p6 }
  0xad   : > { %21758 = shalt.err (!%p21755_p9)
}
  0xae   : > { %s21759_s5 = scalar_lea.vmem %s782_s23, 1152  ;;  %p21767_p4 = scmp.lt.s32.totalorder %s782_s23, %s782_s23 }
  0xaf   : > { %p21760_p10 = scmp.ne.s32.totalorder %s782_s23, %s21759_s5  ;;  %p21768_p7 = scmp.lt.s32.totalorder %s21759_s5, %s21759_s5 }
  0xb1   : > { %p21762_p2 = pnand %p21760_p10, %p22291_p0  ;;  %p21769_p8 = por %p21768_p7, %p21767_p4 }
  0xb3   : > { %p21763_p3 = pneg %p21762_p2 }
  0xb5   : > { %p21770_p11 = pnand %p21769_p8, %p21763_p3 }
  0xb7   : > { %21773 = shalt.err (!%p21770_p11)
}
  0xb8   : > { %s25783_s6 = smov 4   ;;  %s25784_s27 = smov 64  }
  0xb9   : > { %20577 = dma.hbm_to_vmem [thread:$0]  (!%p22275_p12), %s25692_s15, 1152, %s782_s23, [#allocation19], %s25784_s27, %s25784_s27, %s25783_s6  }
  0xba   : > { %s22071_s7 = smov [#allocation3]   ;;  %s22072_s20 = smov [#allocation8]  }
  0xbb   : > { %s661_s25 = sshll.u32 %s22071_s7, 4  ;;  %s685_s22 = sshll.u32 %s22072_s20, 4  ;;  %s662_s25 = int_to_ptr.vmem [resolvable:$true] %s661_s25  ;;  %s686_s22 = int_to_ptr.vmem [resolvable:$true] %s685_s22 }
  0xbc   : > { %s25785_s0 = sld [smem:[#allocation41_spill]] }
  0xc2   : > { %s21774_s9 = scalar_lea.hbm %s25785_s0, 576 }
  0xc3   : > { %p21775_p13 = scmp.ne.s32.totalorder %s25785_s0, %s21774_s9  ;;  %p21781_p5 = scmp.lt.u32.totalorder %s21774_s9, %s25785_s0 }
  0xc5   : > { %p21777_p1 = pnand %p21775_p13, %p22291_p0 }
  0xc7   : > { %p21778_p6 = pneg %p21777_p1 }
  0xc9   : > { %p21783_p9 = pnand %p21781_p5, %p21778_p6 }
  0xcb   : > { %21786 = shalt.err (!%p21783_p9)
}
  0xcc   : > { %s21787_s23 = scalar_lea.vmem %s662_s25, 576  ;;  %p21795_p4 = scmp.lt.s32.totalorder %s662_s25, %s662_s25 }
  0xcd   : > { %p21788_p10 = scmp.ne.s32.totalorder %s662_s25, %s21787_s23  ;;  %p21796_p7 = scmp.lt.s32.totalorder %s21787_s23, %s21787_s23 }
  0xcf   : > { %p21790_p2 = pnand %p21788_p10, %p22291_p0  ;;  %p21797_p8 = por %p21796_p7, %p21795_p4 }
  0xd1   : > { %p21791_p3 = pneg %p21790_p2 }
  0xd3   : > { %p21798_p11 = pnand %p21797_p8, %p21791_p3 }
  0xd5   : > { %21801 = shalt.err (!%p21798_p11)
}
  0xd6   : > { %20550 = dma.hbm_to_vmem [thread:$0]  (!%p22275_p12), %s25785_s0, 576, %s662_s25, [#allocation4], %s25784_s27, %s25784_s27, %s25783_s6  }
  0xd7   : > { %s25786_s17 = sld [smem:[#allocation43_spill]] }
  0xdd   : > { %s21802_s18 = scalar_lea.hbm %s25786_s17, 1152 }
  0xde   : > { %p21803_p13 = scmp.ne.s32.totalorder %s25786_s17, %s21802_s18  ;;  %p21809_p5 = scmp.lt.u32.totalorder %s21802_s18, %s25786_s17 }
  0xe0   : > { %p21805_p1 = pnand %p21803_p13, %p22291_p0 }
  0xe2   : > { %p21806_p6 = pneg %p21805_p1 }
  0xe4   : > { %p21811_p9 = pnand %p21809_p5, %p21806_p6 }
  0xe6   : > { %21814 = shalt.err (!%p21811_p9)
}
  0xe7   : > { %s21815_s5 = scalar_lea.vmem %s686_s22, 1152  ;;  %p21823_p4 = scmp.lt.s32.totalorder %s686_s22, %s686_s22 }
  0xe8   : > { %p21816_p10 = scmp.ne.s32.totalorder %s686_s22, %s21815_s5  ;;  %p21824_p7 = scmp.lt.s32.totalorder %s21815_s5, %s21815_s5 }
  0xea   : > { %p21818_p2 = pnand %p21816_p10, %p22291_p0  ;;  %p21825_p8 = por %p21824_p7, %p21823_p4 }
  0xec   : > { %p21819_p3 = pneg %p21818_p2 }
  0xee   : > { %p21826_p11 = pnand %p21825_p8, %p21819_p3 }
  0xf0   : > { %21829 = shalt.err (!%p21826_p11)
}
  0xf1   : > { %20556 = dma.hbm_to_vmem [thread:$0]  (!%p22275_p12), %s25786_s17, 1152, %s686_s22, [#allocation7], %s25784_s27, %s25784_s27, %s25783_s6  }
  0xf2   : > { %s22073_s1 = smov [#allocation11]   ;;  %s22074_s7 = smov [#allocation14]  }
  0xf3   : > { %s712_s28 = sshll.u32 %s22073_s1, 4  ;;  %s735_s20 = sshll.u32 %s22074_s7, 4  ;;  %s713_s28 = int_to_ptr.vmem [resolvable:$true] %s712_s28  ;;  %s736_s20 = int_to_ptr.vmem [resolvable:$true] %s735_s20 }
  0xf4   : > { %s25787_s29 = sld [smem:[#allocation45_spill]] }
  0xfa   : > { %s21830_s21 = scalar_lea.hbm %s25787_s29, 16 }
  0xfb   : > { %p21831_p13 = scmp.ne.s32.totalorder %s25787_s29, %s21830_s21  ;;  %p21837_p5 = scmp.lt.u32.totalorder %s21830_s21, %s25787_s29 }
  0xfd   : > { %p21833_p1 = pnand %p21831_p13, %p22291_p0 }
  0xff   : > { %p21834_p6 = pneg %p21833_p1 }
 0x101   : > { %p21839_p9 = pnand %p21837_p5, %p21834_p6 }
 0x103   : > { %21842 = shalt.err (!%p21839_p9)
}
 0x104   : > { %s21843_s22 = scalar_lea.vmem %s713_s28, 16  ;;  %s21850_s23 = scalar_lea.vmem %s713_s28, 32 }
 0x105   : > { %p21844_p10 = scmp.ne.s32.totalorder %s713_s28, %s21843_s22  ;;  %p21851_p4 = scmp.lt.s32.totalorder %s713_s28, %s713_s28 }
 0x106   : > { %p21852_p7 = scmp.lt.s32.totalorder %s21850_s23, %s21843_s22 }
 0x107   : > { %p21846_p2 = pnand %p21844_p10, %p22291_p0 }
 0x108   : > { %p21853_p8 = por %p21852_p7, %p21851_p4 }
 0x109   : > { %p21847_p3 = pneg %p21846_p2 }
 0x10b   : > { %p21854_p11 = pnand %p21853_p8, %p21847_p3 }
 0x10d   : > { %21857 = shalt.err (!%p21854_p11)
}
 0x10e   : > { %20562 = dma.hbm_to_vmem [thread:$0]  (!%p22275_p12), %s25787_s29, 16, %s713_s28, [#allocation10]  }
 0x10f   : > { %s25788_s9 = sld [smem:[#allocation47_spill]] }
 0x115   : > { %s21858_s21 = scalar_lea.hbm %s25788_s9, 9216 }
 0x116   : > { %p21859_p13 = scmp.ne.s32.totalorder %s25788_s9, %s21858_s21  ;;  %p21865_p5 = scmp.lt.u32.totalorder %s21858_s21, %s25788_s9 }
 0x118   : > { %p21861_p1 = pnand %p21859_p13, %p22291_p0 }
 0x11a   : > { %p21862_p6 = pneg %p21861_p1 }
 0x11c   : > { %p21867_p9 = pnand %p21865_p5, %p21862_p6 }
 0x11e   : > { %21870 = shalt.err (!%p21867_p9)
}
 0x11f   : > { %s21871_s23 = scalar_lea.vmem %s736_s20, 9216  ;;  %p21879_p4 = scmp.lt.s32.totalorder %s736_s20, %s736_s20 }
 0x120   : > { %p21872_p10 = scmp.ne.s32.totalorder %s736_s20, %s21871_s23  ;;  %p21880_p7 = scmp.lt.s32.totalorder %s21871_s23, %s21871_s23 }
 0x122   : > { %p21874_p2 = pnand %p21872_p10, %p22291_p0  ;;  %p21881_p8 = por %p21880_p7, %p21879_p4 }
 0x124   : > { %p21875_p3 = pneg %p21874_p2 }
 0x126   : > { %p21882_p11 = pnand %p21881_p8, %p21875_p3 }
 0x128   : > { %21885 = shalt.err (!%p21882_p11)
}
 0x129   : > { %20568 = dma.hbm_to_vmem [thread:$0]  (!%p22275_p12), %s25788_s9, 9216, %s736_s20, [#allocation13], %s25784_s27, %s25784_s27, %s25783_s6  }
 0x12a   : > { %s22075_s7 = smov [#allocation17]   ;;  %s22076_s18 = smov [#allocation20]  }
 0x12b   : > { %s765_s0 = sshll.u32 %s22075_s7, 4  ;;  %s794_s21 = sshll.u32 %s22076_s18, 4  ;;  %s766_s0 = int_to_ptr.vmem [resolvable:$true] %s765_s0  ;;  %s795_s21 = int_to_ptr.vmem [resolvable:$true] %s794_s21 }
 0x12c   : > { %s21886_s25 = scalar_lea.hbm %s25690_s13, 4096 }
 0x12d   : > { %p21887_p13 = scmp.ne.s32.totalorder %s25690_s13, %s21886_s25  ;;  %p21893_p5 = scmp.lt.u32.totalorder %s21886_s25, %s25690_s13 }
 0x12f   : > { %p21889_p1 = pnand %p21887_p13, %p22291_p0 }
 0x131   : > { %p21890_p6 = pneg %p21889_p1 }
 0x133   : > { %p21895_p9 = pnand %p21893_p5, %p21890_p6 }
 0x135   : > { %21898 = shalt.err (!%p21895_p9)
}
 0x136   : > { %s21899_s20 = scalar_lea.vmem %s766_s0, 4096  ;;  %p21907_p4 = scmp.lt.s32.totalorder %s766_s0, %s766_s0 }
 0x137   : > { %p21900_p10 = scmp.ne.s32.totalorder %s766_s0, %s21899_s20  ;;  %p21908_p7 = scmp.lt.s32.totalorder %s21899_s20, %s21899_s20 }
 0x139   : > { %p21902_p2 = pnand %p21900_p10, %p22291_p0  ;;  %p21909_p8 = por %p21908_p7, %p21907_p4 }
 0x13b   : > { %p21903_p3 = pneg %p21902_p2 }
 0x13d   : > { %p21910_p11 = pnand %p21909_p8, %p21903_p3 }
 0x13f   : > { %21913 = shalt.err (!%p21910_p11)
}
 0x140   : > { %20574 = dma.hbm_to_vmem [thread:$0]  (!%p22275_p12), %s25690_s13, 4096, %s766_s0, [#allocation16], %s25784_s27, %s25784_s27, %s25783_s6  }
 0x141   : > { %s21914_s24 = scalar_lea.hbm %s25693_s16, 9216 }
 0x142   : > { %p21915_p13 = scmp.ne.s32.totalorder %s25693_s16, %s21914_s24  ;;  %p21921_p5 = scmp.lt.u32.totalorder %s21914_s24, %s25693_s16 }
 0x144   : > { %p21917_p1 = pnand %p21915_p13, %p22291_p0 }
 0x146   : > { %p21918_p6 = pneg %p21917_p1 }
 0x148   : > { %p21923_p9 = pnand %p21921_p5, %p21918_p6 }
 0x14a   : > { %21926 = shalt.err (!%p21923_p9)
}
 0x14b   : > { %s21927_s28 = scalar_lea.vmem %s795_s21, 9216  ;;  %p21935_p4 = scmp.lt.s32.totalorder %s795_s21, %s795_s21 }
 0x14c   : > { %p21928_p10 = scmp.ne.s32.totalorder %s795_s21, %s21927_s28  ;;  %p21936_p7 = scmp.lt.s32.totalorder %s21927_s28, %s21927_s28 }
 0x14e   : > { %p21930_p2 = pnand %p21928_p10, %p22291_p0  ;;  %p21937_p8 = por %p21936_p7, %p21935_p4 }
 0x150   : > { %p21931_p3 = pneg %p21930_p2 }
 0x152   : > { %p21938_p11 = pnand %p21937_p8, %p21931_p3 }
 0x154   : > { %21941 = shalt.err (!%p21938_p11)
}
 0x155   : > { %20580 = dma.hbm_to_vmem [thread:$0]  (!%p22275_p12), %s25693_s16, 9216, %s795_s21, [#allocation19], %s25784_s27, %s25784_s27, %s25783_s6  }
 0x156   : > { %p25789_p13 = scmp.ne.s32.totalorder %s25774_s10, 0 }
 0x157   : > { %p25790_p0 = scmp.eq.s32.totalorder (!%p25789_p13), %s22239_s8, 0 }
 0x158   : > { %845 = sbr.rel (%p25789_p13) target bundleno = 8498 (0x2132), region = 116 }
 0x15f   : > { %22015 = dma.done.wait (%p25790_p0), [#allocation4], 576   ;;  %p25791_p1 = pmov %p25790_p0 }
 0x160   : > { %p25792_p6 = pmov %p25790_p0 }
 0x161   : > { %22017 = vsyncadd (%p25791_p1), [#allocation4], 4294966720 }
 0x162   : > { %22019 = dma.done.wait (%p25792_p6), [#allocation7], 1168   ;;  %p25793_p5 = pmov %p25790_p0 }
 0x163   : > { %p25794_p9 = pmov %p25790_p0 }
 0x164   : > { %22021 = vsyncadd (%p25793_p5), [#allocation7], 4294966128 }
 0x165   : > { %22023 = dma.done.wait (%p25794_p9), [#allocation10], 9232   ;;  %p25795_p12 = pmov %p25790_p0 }
 0x166   : > { %p25796_p10 = pmov %p25790_p0 }
 0x167   : > { %22025 = vsyncadd (%p25795_p12), [#allocation10], 4294958064 }
 0x168   : > { %22027 = dma.done.wait (%p25796_p10), [#allocation13], 9504   ;;  %p25797_p2 = pmov %p25790_p0 }
 0x169   : > { %p25798_p3 = pmov %p25790_p0 }
 0x16a   : > { %22029 = vsyncadd (%p25797_p2), [#allocation13], 4294957792 }
 0x16b   : > { %22031 = dma.done.wait (%p25798_p3), [#allocation16], 4112   ;;  %p25799_p4 = pmov %p25790_p0 }
 0x16c   : > { %p25800_p7 = pmov %p25790_p0 }
 0x16d   : > { %22033 = vsyncadd (%p25799_p4), [#allocation16], 4294963184 }
 0x16e   : > { %22035 = dma.done.wait (%p25800_p7), [#allocation19], 10368   ;;  %p25801_p8 = pmov %p25790_p0 }
 0x16f   : > { %p966_p11 = scmp.lt.s32.totalorder %s22239_s8, 1  ;;  %s25802_s27 = sld [smem:[#allocation39_spill]]  ;;  %v1027_v24 = vld [vmem:[#allocation3] sm:$0xf]  ;;  %vm1246_vm0 = vcmask 1043456   ;;  %vm1233_vm1 = vcmask 64512  }
 0x170   : > { %22037 = vsyncadd (%p25801_p8), [#allocation19], 4294956928  ;;  %s25803_s7 = sld [smem:[#allocation40_spill]]  ;;  %20490 = vmatprep.subr.msk.bf16.mxu1 %vm1246_vm0, %v1027_v24  ;;  %v1248_v25 = vsel %vm1246_vm0, %v1027_v24, 0  ;;  %vm22078_vm2 = vmmov 0   ;;  %vm3029_vm3 = vcmask 523264  }
 0x171   : > { %s22542_s26 = scalar_select %p966_p11, %s22239_s8, 1  ;;  %18178 = vmatpush3.bf16.msra.mxu1 %v1248_v25  ;;  %vm4481_vm4 = vcmask 130048   ;;  %vm7037_vm5 = vcmask 1041408   ;;  %vm7033_vm6 = vcmask 31744  }
 0x172   : > { %s25809_s0 = sld [smem:[#allocation49_spill]]  ;;  %s25810_s11 = sld [smem:[#allocation50_spill]] }
 0x173   : > { %s16996_s10 = sshll.u32 %s22542_s26, 7  ;;  %s25811_s12 = sld [smem:[#allocation51_spill]] }
 0x174   : > { %s25815_s22 = sld [smem:[#allocation56_spill]]  ;;  %s25816_s20 = sld [smem:[#allocation54_spill]] }
 0x175   : > { %s22548_s21 = scalar_lea.vmem %s25802_s27, %s16996_s10  ;;  %s25812_s10 = sld [smem:[#allocation52_spill]] }
 0x176   : > { %v22551_v0 = vld [vmem:[%s22548_s21 + $0x40] sm:$0xff]   ;;  %v22558_v2 = vld [vmem:[%s22548_s21 + $0x48] sm:$0xff]   ;;  %v20666_v4 = vld [vmem:[%s22548_s21 + $0x50] sm:$0xff]   ;;  %s25804_s18 = smov %s25803_s7  ;;  %s25813_s27 = sld [smem:[#allocation53_spill]] }
 0x177   : > { %v22554_v1 = vld [vmem:[%s22548_s21] sm:$0xff]   ;;  %16998 = vmatprep.subr.bf16.mxu0 %v22551_v0  ;;  %v20665_v3 = vld [vmem:[%s22548_s21 + $0x8] sm:$0xff]   ;;  %v20667_v5 = vld [vmem:[%s22548_s21 + $0x10] sm:$0xff]   ;;  %17043 = vmatprep.subr.bf16.mxu1 %v22551_v0  ;;  %s25817_s6 = sld [smem:[#allocation55_spill]]  ;;  %s22081_s1 = smov [#allocation21]  }
 0x178   : > { %16999 = vmatpush3.bf16.msra.mxu0 %v22554_v1  ;;  %v20668_v6 = vld [vmem:[%s22548_s21 + $0x58] sm:$0xff]   ;;  %v20670_v8 = vld [vmem:[%s22548_s21 + $0x60] sm:$0xff]   ;;  %v20672_v10 = vld [vmem:[%s22548_s21 + $0x68] sm:$0xff]   ;;  %s21946_s25 = sshll.u32 %s22081_s1, 4  ;;  %s21947_s25 = int_to_ptr.vmem [resolvable:$false] %s21946_s25 }
 0x179   : > { %17000 = vmatprep.subr.bf16.mxu0 %v22558_v2  ;;  %v20669_v7 = vld [vmem:[%s22548_s21 + $0x18] sm:$0xff]   ;;  %v20671_v9 = vld [vmem:[%s22548_s21 + $0x20] sm:$0xff]   ;;  %v20673_v12 = vld [vmem:[%s22548_s21 + $0x28] sm:$0xff]   ;;  %s973_s23 = scalar_lea.vmem %s25811_s12, %s22542_s26 }
 0x17a   : > { %v20680_v11 = vld [vmem:[%s25803_s7 + $0x4] ss:$8 sps:$4 sm:$0xff]   ;;  %v20674_v13 = vld [vmem:[%s22548_s21 + $0x70] sm:$0xff]   ;;  %v20676_v15 = vld [vmem:[%s22548_s21 + $0x78] sm:$0xff]   ;;  %s23887_s7 = sand.u32 1, %s22052_s3  }
 0x17b   : > { %1196 = vmatprep.mubr.bf16.mxu0 %v20680_v11  ;;  %v20675_v14 = vld [vmem:[%s22548_s21 + $0x30] sm:$0xff]   ;;  %v20677_v16 = vld [vmem:[%s22548_s21 + $0x38] sm:$0xff]   ;;  %v20678_v17 = vld [vmem:[%s25804_s18] ss:$8 sps:$4 sm:$0xff]   ;;  %s959_s24 = scalar_lea.vmem [#allocation21], %s23887_s7  ;;  %s25738_s5 = scalar_lea.vmem [#allocation22], %s23887_s7 }
 0x17c   : > { %17001 = vmatpush3.bf16.msra.mxu0 %v20665_v3  ;;  %v20681_v18 = vld [vmem:[%s25804_s18 + $0x14] ss:$8 sps:$4 sm:$0xff]   ;;  %v20683_v19 = vld [vmem:[%s25804_s18 + $0x10] ss:$8 sps:$4 sm:$0xff]   ;;  %v20684_v20 = vld [vmem:[%s25804_s18 + $0x24] ss:$8 sps:$4 sm:$0xff]  }
 0x17d   : > { %17002 = vmatprep.subr.bf16.mxu0 %v20666_v4  ;;  %v20686_v21 = vld [vmem:[%s25804_s18 + $0x20] ss:$8 sps:$4 sm:$0xff]   ;;  %v20687_v22 = vld [vmem:[%s25804_s18 + $0x34] ss:$8 sps:$4 sm:$0xff]   ;;  %v20689_v23 = vld [vmem:[%s25804_s18 + $0x30] ss:$8 sps:$4 sm:$0xff]  }
 0x17e   : > { %v20690_v26 = vld [vmem:[%s25804_s18 + $0x80] ss:$8 sps:$4 sm:$0xff]   ;;  %v20692_v27 = vld [vmem:[%s25804_s18 + $0x84] ss:$8 sps:$4 sm:$0xff]   ;;  %v20693_v29 = vld [vmem:[%s25804_s18 + $0x94] ss:$8 sps:$4 sm:$0xff]  }
 0x17f   : > { %v22615_v28 = vld [vmem:[%s22548_s21 + $0x8] sm:$0xff]   ;;  %v20695_v30 = vld [vmem:[%s25804_s18 + $0x90] ss:$8 sps:$4 sm:$0xff]   ;;  %v22647_v37 = vld [vmem:[%s22548_s21 + $0x60] sm:$0xff]   ;;  %s15043_s28 = sshll.u32 %s959_s24, 4  ;;  %s15024_s2 = scalar_lea.sflag [#allocation5], %s23887_s7  ;;  %s15044_s28 = int_to_ptr.vmem [resolvable:$true] %s15043_s28 }
 0x180   : > { %17003 = vmatpush3.bf16.msra.mxu0 %v20667_v5  ;;  %v22625_v31 = vld [vmem:[%s22548_s21 + $0x50] sm:$0xff]   ;;  %v22633_v33 = vld [vmem:[%s22548_s21 + $0x58] sm:$0xff]   ;;  %v20699_v34 = vld [vmem:[%s25804_s18 + $0xa4] ss:$8 sps:$4 sm:$0xff]   ;;  %p21949_p5 = scmp.lt.s32.totalorder %s15044_s28, %s21947_s25 }
 0x181   : > { %17004 = vmatprep.subr.bf16.mxu0 %v20668_v6  ;;  %v22629_v32 = vld [vmem:[%s22548_s21 + $0x10] sm:$0xff]   ;;  %v20701_v35 = vld [vmem:[%s25804_s18 + $0xa0] ss:$8 sps:$4 sm:$0xff]   ;;  %v22643_v36 = vld [vmem:[%s22548_s21 + $0x18] sm:$0xff]  }
 0x182   : > { %v22651_v38 = vld [vmem:[%s22548_s21 + $0x20] sm:$0xff]   ;;  %v22655_v39 = vld [vmem:[%s22548_s21 + $0x68] sm:$0xff]   ;;  %v20705_v40 = vld [vmem:[%s25804_s18 + $0xb4] ss:$8 sps:$4 sm:$0xff]  }
 0x183   : > { %v20707_v41 = vld [vmem:[%s25804_s18 + $0xb0] ss:$8 sps:$4 sm:$0xff]   ;;  %v22665_v42 = vld [vmem:[%s22548_s21 + $0x28] sm:$0xff]   ;;  %v22691_v49 = vld [vmem:[%s22548_s21 + $0x40] sm:$0xff]  }
 0x184   : > { %17005 = vmatpush3.bf16.msra.mxu0 %v20669_v7  ;;  %v22669_v43 = vld [vmem:[%s22548_s21 + $0x70] sm:$0xff]   ;;  %v22677_v45 = vld [vmem:[%s22548_s21 + $0x78] sm:$0xff]   ;;  %v20713_v46 = vld [vmem:[%s25804_s18 + $0xc4] ss:$8 sps:$4 sm:$0xff]  }
 0x185   : > { %17006 = vmatprep.subr.bf16.mxu0 %v20670_v8  ;;  %v22673_v44 = vld [vmem:[%s22548_s21 + $0x30] sm:$0xff]   ;;  %v20711_v47 = vld [vmem:[%s25804_s18 + $0xc0] ss:$8 sps:$4 sm:$0xff]   ;;  %v22687_v48 = vld [vmem:[%s22548_s21 + $0x38] sm:$0xff]  }
 0x186   : > { %v22695_v50 = vld [vmem:[%s22548_s21] sm:$0xff]   ;;  %v22699_v51 = vld [vmem:[%s22548_s21 + $0x48] sm:$0xff]   ;;  %v20717_v52 = vld [vmem:[%s25804_s18 + $0xd4] ss:$8 sps:$4 sm:$0xff]  }
 0x187   : > { %v20719_v53 = vld [vmem:[%s25804_s18 + $0xd0] ss:$8 sps:$4 sm:$0xff]   ;;  %v20720_v54 = vld [vmem:[%s25804_s18 + $0xe4] ss:$8 sps:$4 sm:$0xff]   ;;  %v20722_v55 = vld [vmem:[%s25804_s18 + $0xe0] ss:$8 sps:$4 sm:$0xff]  }
 0x188   : > { %17007 = vmatpush3.bf16.msra.mxu0 %v20671_v9  ;;  %v20723_v56 = vld [vmem:[%s25804_s18 + $0xf4] ss:$8 sps:$4 sm:$0xff]   ;;  %v20725_v57 = vld [vmem:[%s25804_s18 + $0xf0] ss:$8 sps:$4 sm:$0xff]   ;;  %v20728_v58 = vld [vmem:[%s25804_s18 + $0x104] ss:$8 sps:$4 sm:$0xff]  }
 0x189   : > { %17008 = vmatprep.subr.bf16.mxu0 %v20672_v10  ;;  %v20726_v59 = vld [vmem:[%s25804_s18 + $0x100] ss:$8 sps:$4 sm:$0xff]   ;;  %v20729_v60 = vld [vmem:[%s25804_s18 + $0x114] ss:$8 sps:$4 sm:$0xff]   ;;  %v20731_v61 = vld [vmem:[%s25804_s18 + $0x110] ss:$8 sps:$4 sm:$0xff]  }
 0x18a   : > { %v20732_v62 = vld [vmem:[%s25804_s18 + $0x124] ss:$8 sps:$4 sm:$0xff]   ;;  %v20734_v63 = vld [vmem:[%s25804_s18 + $0x120] ss:$8 sps:$4 sm:$0xff]  }
 0x18c   : > { %17009 = vmatpush3.bf16.msra.mxu0 %v20673_v12 }
 0x18d   : > { %17010 = vmatprep.subr.bf16.mxu0 %v20674_v13 }
 0x190   : > { %17011 = vmatpush3.bf16.msra.mxu0 %v20675_v14 }
 0x191   : > { %17012 = vmatprep.subr.bf16.mxu0 %v20676_v15 }
 0x194   : > { %17013 = vmatpush3.bf16.msra.mxu0 %v20677_v16 }
 0x195   : > { %17088 = vmatprep.subr.bf16.mxu0 %v22551_v0 }
 0x197   : > { %1197 = vmatmul.mubr.bf16.vlgmr.msra.gmra.mrb[0].mxu0 %v20678_v17 }
 0x198   : > { %1204 = vmatprep.mubr.bf16.mxu0 %v20681_v18  ;;  %17089 = vmatpush3.bf16.msra.mxu0 %v22554_v1 }
 0x199   : > { %17090 = vmatprep.subr.bf16.mxu0 %v22558_v2 }
 0x19c   : > { %17091 = vmatpush3.bf16.msra.mxu0 %v20665_v3 }
 0x19d   : > { %17092 = vmatprep.subr.bf16.mxu0 %v20666_v4 }
 0x19f   : > { %1205 = vmatmul.mubr.bf16.gmra.mrb[4].mxu0 %v20683_v19 }
 0x1a0   : > { %1212 = vmatprep.mubr.bf16.mxu0 %v20684_v20  ;;  %17093 = vmatpush3.bf16.msra.mxu0 %v20667_v5 }
 0x1a1   : > { %17094 = vmatprep.subr.bf16.mxu0 %v20668_v6 }
 0x1a4   : > { %17095 = vmatpush3.bf16.msra.mxu0 %v20669_v7 }
 0x1a5   : > { %17096 = vmatprep.subr.bf16.mxu0 %v20670_v8 }
 0x1a7   : > { %1213 = vmatmul.mubr.bf16.gmra.mrb[8].mxu0 %v20686_v21 }
 0x1a8   : > { %1220 = vmatprep.mubr.bf16.mxu0 %v20687_v22  ;;  %17097 = vmatpush3.bf16.msra.mxu0 %v20671_v9 }
 0x1a9   : > { %17098 = vmatprep.subr.bf16.mxu0 %v20672_v10 }
 0x1ac   : > { %17099 = vmatpush3.bf16.msra.mxu0 %v20673_v12 }
 0x1ad   : > { %17100 = vmatprep.subr.bf16.mxu0 %v20674_v13 }
 0x1af   : > { %1221 = vmatmul.mubr.bf16.gmra.mrb[12].mxu0 %v20689_v23 }
 0x1b0   : > { %17101 = vmatpush3.bf16.msra.mxu0 %v20675_v14  ;;  %1614 = vmatprep.mubr.bf16.mxu0 %v20692_v27 }
 0x1b1   : > { %17102 = vmatprep.subr.bf16.mxu0 %v20676_v15 }
 0x1b4   : > { %17103 = vmatpush3.bf16.msra.mxu0 %v20677_v16 }
 0x1b5   : > { %17133 = vmatprep.subr.bf16.mxu0 %v22551_v0  ;;  %v20735_v0 = vld [vmem:[%s25804_s18 + $0x134] ss:$8 sps:$4 sm:$0xff]  }
 0x1b7   : > { %1615 = vmatmul.mubr.bf16.vlgmr.msra.gmra.mrb[16].mxu0 %v20690_v26 }
 0x1b8   : > { %17134 = vmatpush3.bf16.msra.mxu0 %v22554_v1  ;;  %1622 = vmatprep.mubr.bf16.mxu0 %v20693_v29  ;;  %v20737_v1 = vld [vmem:[%s25804_s18 + $0x130] ss:$8 sps:$4 sm:$0xff]   ;;  %v20698_v29 = vld [vmem:[%s25804_s18 + $0x44] ss:$8 sps:$4 sm:$0xff]  }
 0x1b9   : > { %17135 = vmatprep.subr.bf16.mxu0 %v22558_v2 }
 0x1bc   : > { %17136 = vmatpush3.bf16.msra.mxu0 %v22615_v28 }
 0x1bd   : > { %17137 = vmatprep.subr.bf16.mxu0 %v22625_v31 }
 0x1bf   : > { %1623 = vmatmul.mubr.bf16.gmra.mrb[20].mxu0 %v20695_v30 }
 0x1c0   : > { %17138 = vmatpush3.bf16.msra.mxu0 %v22629_v32  ;;  %1630 = vmatprep.mubr.bf16.mxu0 %v20699_v34  ;;  %v20708_v34 = vld [vmem:[%s25804_s18 + $0x64] ss:$8 sps:$4 sm:$0xff]  }
 0x1c1   : > { %17139 = vmatprep.subr.bf16.mxu0 %v22633_v33 }
 0x1c4   : > { %17140 = vmatpush3.bf16.msra.mxu0 %v22643_v36 }
 0x1c5   : > { %17141 = vmatprep.subr.bf16.mxu0 %v22647_v37 }
 0x1c7   : > { %1631 = vmatmul.mubr.bf16.gmra.mrb[24].mxu0 %v20701_v35  ;;  %v20710_v35 = vld [vmem:[%s25804_s18 + $0x60] ss:$8 sps:$4 sm:$0xff]  }
 0x1c8   : > { %17142 = vmatpush3.bf16.msra.mxu0 %v22651_v38  ;;  %1638 = vmatprep.mubr.bf16.mxu0 %v20705_v40 }
 0x1c9   : > { %17143 = vmatprep.subr.bf16.mxu0 %v22655_v39 }
 0x1cc   : > { %17144 = vmatpush3.bf16.msra.mxu0 %v22665_v42 }
 0x1cd   : > { %17145 = vmatprep.subr.bf16.mxu0 %v22669_v43 }
 0x1cf   : > { %1639 = vmatmul.mubr.bf16.gmra.mrb[28].mxu0 %v20707_v41 }
 0x1d0   : > { %17146 = vmatpush3.bf16.msra.mxu0 %v22673_v44  ;;  %1822 = vmatprep.mubr.bf16.mxu0 %v20713_v46 }
 0x1d1   : > { %17147 = vmatprep.subr.bf16.mxu0 %v22677_v45 }
 0x1d4   : > { %17148 = vmatpush3.bf16.msra.mxu0 %v22687_v48 }
 0x1d5   : > { %17178 = vmatprep.subr.bf16.mxu0 %v22691_v49 }
 0x1d7   : > { %1823 = vmatmul.mubr.bf16.vlgmr.msra.gmra.mrb[32].mxu0 %v20711_v47 }
 0x1d8   : > { %17179 = vmatpush3.bf16.msra.mxu0 %v22695_v50  ;;  %1830 = vmatprep.mubr.bf16.mxu0 %v20717_v52 }
 0x1d9   : > { %17180 = vmatprep.subr.bf16.mxu0 %v22699_v51 }
 0x1dc   : > { %17181 = vmatpush3.bf16.msra.mxu0 %v22615_v28 }
 0x1dd   : > { %17182 = vmatprep.subr.bf16.mxu0 %v22625_v31 }
 0x1df   : > { %1831 = vmatmul.mubr.bf16.gmra.mrb[36].mxu0 %v20719_v53 }
 0x1e0   : > { %17183 = vmatpush3.bf16.msra.mxu0 %v22629_v32  ;;  %1838 = vmatprep.mubr.bf16.mxu0 %v20720_v54  ;;  %v1333_v54 = vld [vmem:[#allocation3 + $0x4] sm:$0xf] }
 0x1e1   : > { %17184 = vmatprep.subr.bf16.mxu0 %v22633_v33 }
 0x1e4   : > { %17185 = vmatpush3.bf16.msra.mxu0 %v22643_v36 }
 0x1e5   : > { %17186 = vmatprep.subr.bf16.mxu0 %v22647_v37 }
 0x1e7   : > { %1839 = vmatmul.mubr.bf16.gmra.mrb[40].mxu0 %v20722_v55 }
 0x1e8   : > { %17187 = vmatpush3.bf16.msra.mxu0 %v22651_v38  ;;  %1846 = vmatprep.mubr.bf16.mxu0 %v20723_v56 }
 0x1e9   : > { %17188 = vmatprep.subr.bf16.mxu0 %v22655_v39 }
 0x1ec   : > { %17189 = vmatpush3.bf16.msra.mxu0 %v22665_v42 }
 0x1ed   : > { %17190 = vmatprep.subr.bf16.mxu0 %v22669_v43 }
 0x1ef   : > { %1847 = vmatmul.mubr.bf16.gmra.mrb[44].mxu0 %v20725_v57  ;;  %v1456_v57 = vsel %vm1246_vm0, %v1333_v54, 0 }
 0x1f0   : > { %17191 = vmatpush3.bf16.msra.mxu0 %v22673_v44  ;;  %2030 = vmatprep.mubr.bf16.mxu0 %v20728_v58 }
 0x1f1   : > { %17192 = vmatprep.subr.bf16.mxu0 %v22677_v45 }
 0x1f4   : > { %17193 = vmatpush3.bf16.msra.mxu0 %v22687_v48 }
 0x1f5   : > { %17268 = vmatprep.subr.bf16.mxu0 %v22691_v49 }
 0x1f7   : > { %2031 = vmatmul.mubr.bf16.vlgmr.msra.gmra.mrb[48].mxu0 %v20726_v59 }
 0x1f8   : > { %2038 = vmatprep.mubr.bf16.mxu0 %v20729_v60  ;;  %17269 = vmatpush3.bf16.msra.mxu0 %v22695_v50 }
 0x1f9   : > { %17270 = vmatprep.subr.bf16.mxu0 %v22699_v51 }
 0x1fc   : > { %17271 = vmatpush3.bf16.msra.mxu0 %v22615_v28 }
 0x1fd   : > { %17272 = vmatprep.subr.bf16.mxu0 %v22625_v31 }
 0x1ff   : > { %2039 = vmatmul.mubr.bf16.gmra.mrb[52].mxu0 %v20731_v61 }
 0x200   : > { %2046 = vmatprep.mubr.bf16.mxu0 %v20732_v62  ;;  %17273 = vmatpush3.bf16.msra.mxu0 %v22629_v32 }
 0x201   : > { %17274 = vmatprep.subr.bf16.mxu0 %v22633_v33 }
 0x204   : > { %17275 = vmatpush3.bf16.msra.mxu0 %v22643_v36 }
 0x205   : > { %17276 = vmatprep.subr.bf16.mxu0 %v22647_v37 }
 0x207   : > { %2047 = vmatmul.mubr.bf16.gmra.mrb[56].mxu0 %v20734_v63 }
 0x208   : > { %2054 = vmatprep.mubr.bf16.mxu0 %v20735_v0  ;;  %17277 = vmatpush3.bf16.msra.mxu0 %v22651_v38 }
 0x209   : > { %17278 = vmatprep.subr.bf16.mxu0 %v22655_v39 }
 0x20c   : > { %17279 = vmatpush3.bf16.msra.mxu0 %v22665_v42 }
 0x20d   : > { %17280 = vmatprep.subr.bf16.mxu0 %v22669_v43 }
 0x20f   : > { %2055 = vmatmul.mubr.bf16.gmra.mrb[60].mxu0 %v20737_v1 }
 0x210   : > { %17281 = vmatpush3.bf16.msra.mxu0 %v22673_v44 }
 0x211   : > { %17282 = vmatprep.subr.bf16.mxu0 %v22677_v45 }
 0x214   : > { %17283 = vmatpush3.bf16.msra.mxu0 %v22687_v48 }
 0x215   : > { %17313 = vmatprep.subr.bf16.mxu0 %v22691_v49 }
 0x26a   : > { %v17014_v2 = vpop.f32.mrb[0].mxu0 }
 0x26b   : > { %v17015_v3 = vpop.f32.mrb[1].mxu0 }
 0x26c   : > { %v17016_v4 = vadd.f32 %v17015_v3, %v17014_v2  ;;  %v17017_v5 = vpop.f32.mrb[2].mxu0 }
 0x26d   : > { %v17018_v6 = vpop.f32.mrb[3].mxu0 }
 0x26e   : > { %v17019_v7 = vadd.f32 %v17018_v6, %v17017_v5 }
 0x270   : > { %v1229_v8 = vpack.c.bf16 %v17019_v7, %v17016_v4 }
 0x272   : > { %v17020_v9 = vpop.f32.mrb[4].mxu0  ;;  %18179 = vmatprep.mubr.msk.bf16.mxu1 %vm1233_vm1, %v1229_v8 }
 0x273   : > { %v17021_v10 = vpop.f32.mrb[5].mxu0 }
 0x274   : > { %v17022_v11 = vadd.f32 %v17021_v10, %v17020_v9  ;;  %v17023_v12 = vpop.f32.mrb[6].mxu0 }
 0x275   : > { %v17024_v13 = vpop.f32.mrb[7].mxu0 }
 0x276   : > { %v17025_v14 = vadd.f32 %v17024_v13, %v17023_v12 }
 0x278   : > { %v1230_v15 = vpack.c.bf16 %v17025_v14, %v17022_v11 }
 0x27a   : > { %18180 = vmatmul.mubr.msk.bf16.vlgmr.msra.gmra.mrb[0].mxu1 %vm1233_vm1, %v1230_v15  ;;  %v17026_v16 = vpop.f32.mrb[8].mxu0 }
 0x27b   : > { %17044 = vmatpush3.bf16.msra.mxu1 %v22695_v50  ;;  %v17027_v17 = vpop.f32.mrb[9].mxu0 }
 0x27c   : > { %17045 = vmatprep.subr.bf16.mxu1 %v22699_v51  ;;  %v17028_v18 = vadd.f32 %v17027_v17, %v17026_v16  ;;  %v17029_v19 = vpop.f32.mrb[10].mxu0  ;;  %v22853_v17 = vld [vmem:[#allocation3 + $0x8] sm:$0xf] }
 0x27d   : > { %v17030_v20 = vpop.f32.mrb[11].mxu0 }
 0x27e   : > { %v17031_v21 = vadd.f32 %v17030_v20, %v17029_v19 }
 0x27f   : > { %17046 = vmatpush3.bf16.msra.mxu1 %v22615_v28 }
 0x280   : > { %v1231_v22 = vpack.c.bf16 %v17031_v21, %v17028_v18  ;;  %17047 = vmatprep.subr.bf16.mxu1 %v22625_v31  ;;  %v20696_v31 = vld [vmem:[%s25804_s18 + $0x40] ss:$8 sps:$4 sm:$0xff]  }
 0x282   : > { %v17032_v23 = vpop.f32.mrb[12].mxu0  ;;  %18183 = vmatprep.mubr.msk.bf16.mxu1 %vm1233_vm1, %v1231_v22 }
 0x283   : > { %17048 = vmatpush3.bf16.msra.mxu1 %v22629_v32  ;;  %v17033_v24 = vpop.f32.mrb[13].mxu0  ;;  %v20702_v32 = vld [vmem:[%s25804_s18 + $0x54] ss:$8 sps:$4 sm:$0xff]  }
 0x284   : > { %17049 = vmatprep.subr.bf16.mxu1 %v22633_v33  ;;  %v17034_v25 = vadd.f32 %v17033_v24, %v17032_v23  ;;  %v17035_v26 = vpop.f32.mrb[14].mxu0  ;;  %v20704_v33 = vld [vmem:[%s25804_s18 + $0x50] ss:$8 sps:$4 sm:$0xff]  }
 0x285   : > { %v17036_v27 = vpop.f32.mrb[15].mxu0 }
 0x286   : > { %v17037_v30 = vadd.f32 %v17036_v27, %v17035_v26 }
 0x287   : > { %17050 = vmatpush3.bf16.msra.mxu1 %v22643_v36  ;;  %v20714_v36 = vld [vmem:[%s25804_s18 + $0x74] ss:$8 sps:$4 sm:$0xff]  }
 0x288   : > { %v1232_v28 = vpack.c.bf16 %v17037_v30, %v17034_v25  ;;  %17051 = vmatprep.subr.bf16.mxu1 %v22647_v37  ;;  %v20716_v37 = vld [vmem:[%s25804_s18 + $0x70] ss:$8 sps:$4 sm:$0xff]  }
 0x28a   : > { %18184 = vmatmul.mubr.msk.bf16.gmra.mrb[4].mxu1 %vm1233_vm1, %v1232_v28 }
 0x28b   : > { %17052 = vmatpush3.bf16.msra.mxu1 %v22651_v38  ;;  %1406 = vmatprep.mubr.bf16.mxu1 %v20698_v29  ;;  %v17104_v38 = vpop.f32.mrb[16].mxu0 }
 0x28c   : > { %17053 = vmatprep.subr.bf16.mxu1 %v22655_v39  ;;  %v17105_v39 = vpop.f32.mrb[17].mxu0 }
 0x28d   : > { %v22817_v40 = vadd.f32 %v17105_v39, %v17104_v38  ;;  %v17107_v41 = vpop.f32.mrb[18].mxu0 }
 0x28f   : > { %17054 = vmatpush3.bf16.msra.mxu1 %v22665_v42  ;;  %v17108_v42 = vpop.f32.mrb[19].mxu0 }
 0x290   : > { %17055 = vmatprep.subr.bf16.mxu1 %v22669_v43  ;;  %v22819_v43 = vadd.f32 %v17108_v42, %v17107_v41 }
 0x293   : > { %17056 = vmatpush3.bf16.msra.mxu1 %v22673_v44  ;;  %v1647_v44 = vpack.c.bf16 %v22819_v43, %v22817_v40  ;;  %v20785_v40 = vld [vmem:[%s25804_s18 + $0x230] ss:$8 sps:$4 sm:$0xff]  }
 0x294   : > { %17057 = vmatprep.subr.bf16.mxu1 %v22677_v45  ;;  %v17110_v45 = vpop.f32.mrb[20].mxu0 }
 0x295   : > { %v17111_v46 = vpop.f32.mrb[21].mxu0 }
 0x296   : > { %v22823_v47 = vadd.f32 %v17111_v46, %v17110_v45 }
 0x297   : > { %17058 = vmatpush3.bf16.msra.mxu1 %v22687_v48  ;;  %v17113_v48 = vpop.f32.mrb[22].mxu0 }
 0x298   : > { %v17114_v49 = vpop.f32.mrb[23].mxu0  ;;  %20491 = vmatprep.subr.msk.bf16.mxu1 %vm1246_vm0, %v1333_v54 }
 0x299   : > { %v22825_v50 = vadd.f32 %v17114_v49, %v17113_v48 }
 0x29a   : > { %1407 = vmatmul.mubr.bf16.vlgmr.msra.gmra.mrb[8].mxu1 %v20696_v31  ;;  %v17116_v52 = vpop.f32.mrb[24].mxu0 }
 0x29b   : > { %1414 = vmatprep.mubr.bf16.mxu1 %v20702_v32  ;;  %v1648_v51 = vpack.c.bf16 %v22825_v50, %v22823_v47  ;;  %v17117_v53 = vpop.f32.mrb[25].mxu0  ;;  %18188 = vmatpush3.bf16.msra.mxu1 %v1456_v57 }
 0x29c   : > { %v22829_v55 = vadd.f32 %v17117_v53, %v17116_v52  ;;  %v17119_v56 = vpop.f32.mrb[26].mxu0  ;;  %20492 = vmatprep.subr.msk.bf16.mxu1 %vm1246_vm0, %v22853_v17 }
 0x29d   : > { %v17120_v58 = vpop.f32.mrb[27].mxu0 }
 0x29e   : > { %v22833_v59 = vadd.f32 %v17120_v58, %v17119_v56 }
 0x2a0   : > { %v1649_v60 = vpack.c.bf16 %v22833_v59, %v22829_v55  ;;  %v20747_v59 = vld [vmem:[%s25804_s18 + $0x140] ss:$8 sps:$4 sm:$0xff]  }
 0x2a2   : > { %1415 = vmatmul.mubr.bf16.gmra.mrb[12].mxu1 %v20704_v33  ;;  %v17122_v61 = vpop.f32.mrb[28].mxu0 }
 0x2a3   : > { %1422 = vmatprep.mubr.bf16.mxu1 %v20708_v34  ;;  %v17123_v62 = vpop.f32.mrb[29].mxu0 }
 0x2a4   : > { %v22837_v63 = vadd.f32 %v17123_v62, %v17122_v61  ;;  %v17125_v0 = vpop.f32.mrb[30].mxu0  ;;  %v20780_v62 = vld [vmem:[%s25804_s18 + $0x224] ss:$8 sps:$4 sm:$0xff]  }
 0x2a5   : > { %v17126_v1 = vpop.f32.mrb[31].mxu0 }
 0x2a6   : > { %v22839_v2 = vadd.f32 %v17126_v1, %v17125_v0  ;;  %v20738_v0 = vld [vmem:[%s25804_s18 + $0x180] ss:$8 sps:$4 sm:$0xff]   ;;  %v20740_v1 = vld [vmem:[%s25804_s18 + $0x184] ss:$8 sps:$4 sm:$0xff]  }
 0x2a7   : > { %2446 = vmatprep.mubr.bf16.mxu0 %v20740_v1  ;;  %v22982_v1 = vld [vmem:[%s22548_s21 + $0x38] sm:$0xff]  }
 0x2a8   : > { %v1650_v3 = vpack.c.bf16 %v22839_v2, %v22837_v63  ;;  %2447 = vmatmul.mubr.bf16.vlgmr.msra.gmra.mrb[64].mxu0 %v20738_v0  ;;  %v20756_v0 = vld [vmem:[%s25804_s18 + $0x1c0] ss:$8 sps:$4 sm:$0xff]   ;;  %v20755_v63 = vld [vmem:[%s25804_s18 + $0x150] ss:$8 sps:$4 sm:$0xff]   ;;  %v20759_v2 = vld [vmem:[%s25804_s18 + $0x164] ss:$8 sps:$4 sm:$0xff]  }
 0x2aa   : > { %1423 = vmatmul.mubr.bf16.gmra.mrb[16].mxu1 %v20710_v35  ;;  %v17149_v4 = vpop.f32.mrb[32].mxu0 }
 0x2ab   : > { %1430 = vmatprep.mubr.bf16.mxu1 %v20714_v36  ;;  %v17150_v5 = vpop.f32.mrb[33].mxu0 }
 0x2ac   : > { %v22843_v6 = vadd.f32 %v17150_v5, %v17149_v4  ;;  %v17152_v7 = vpop.f32.mrb[34].mxu0 }
 0x2ad   : > { %v17153_v8 = vpop.f32.mrb[35].mxu0 }
 0x2ae   : > { %v22845_v9 = vadd.f32 %v17153_v8, %v17152_v7  ;;  %v22898_v8 = vld [vmem:[%s22548_s21] sm:$0xff]  }
 0x2af   : > { %17314 = vmatpush3.bf16.msra.mxu0 %v22898_v8 }
 0x2b0   : > { %v1855_v10 = vpack.c.bf16 %v22845_v9, %v22843_v6  ;;  %v20765_v6 = vld [vmem:[%s25804_s18 + $0x174] ss:$8 sps:$4 sm:$0xff]   ;;  %v20767_v9 = vld [vmem:[%s25804_s18 + $0x170] ss:$8 sps:$4 sm:$0xff]  }
 0x2b2   : > { %1431 = vmatmul.mubr.bf16.gmra.mrb[20].mxu1 %v20716_v37  ;;  %v17155_v11 = vpop.f32.mrb[36].mxu0 }
 0x2b3   : > { %v17156_v12 = vpop.f32.mrb[37].mxu0 }
 0x2b4   : > { %v22849_v13 = vadd.f32 %v17156_v12, %v17155_v11  ;;  %v17158_v14 = vpop.f32.mrb[38].mxu0 }
 0x2b5   : > { %v17159_v15 = vpop.f32.mrb[39].mxu0 }
 0x2b6   : > { %v22851_v16 = vadd.f32 %v17159_v15, %v17158_v14  ;;  %v22902_v14 = vld [vmem:[%s22548_s21 + $0x48] sm:$0xff]  }
 0x2b7   : > { %17315 = vmatprep.subr.bf16.mxu0 %v22902_v14 }
 0x2b8   : > { %v1856_v18 = vpack.c.bf16 %v22851_v16, %v22849_v13 }
 0x2ba   : > { %v17161_v19 = vpop.f32.mrb[40].mxu0 }
 0x2bb   : > { %v17162_v20 = vpop.f32.mrb[41].mxu0 }
 0x2bc   : > { %v22859_v21 = vadd.f32 %v17162_v20, %v17161_v19  ;;  %v17164_v22 = vpop.f32.mrb[42].mxu0  ;;  %v22910_v20 = vld [vmem:[%s22548_s21 + $0x8] sm:$0xff]  }
 0x2bd   : > { %v17165_v23 = vpop.f32.mrb[43].mxu0  ;;  %17316 = vmatpush3.bf16.msra.mxu0 %v22910_v20 }
 0x2be   : > { %v22861_v24 = vadd.f32 %v17165_v23, %v17164_v22  ;;  %v20741_v22 = vld [vmem:[%s25804_s18 + $0x194] ss:$8 sps:$4 sm:$0xff]   ;;  %v20743_v23 = vld [vmem:[%s25804_s18 + $0x190] ss:$8 sps:$4 sm:$0xff]  }
 0x2bf   : > { %2454 = vmatprep.mubr.bf16.mxu0 %v20741_v22  ;;  %v20768_v22 = vld [vmem:[%s25804_s18 + $0x1e4] ss:$8 sps:$4 sm:$0xff]  }
 0x2c0   : > { %v1857_v25 = vpack.c.bf16 %v22861_v24, %v22859_v21  ;;  %2455 = vmatmul.mubr.bf16.gmra.mrb[68].mxu0 %v20743_v23 }
 0x2c2   : > { %v17167_v26 = vpop.f32.mrb[44].mxu0 }
 0x2c3   : > { %v17168_v27 = vpop.f32.mrb[45].mxu0 }
 0x2c4   : > { %v22865_v29 = vadd.f32 %v17168_v27, %v17167_v26  ;;  %v17170_v30 = vpop.f32.mrb[46].mxu0  ;;  %v22920_v26 = vld [vmem:[%s22548_s21 + $0x50] sm:$0xff]  }
 0x2c5   : > { %v17171_v28 = vpop.f32.mrb[47].mxu0  ;;  %17317 = vmatprep.subr.bf16.mxu0 %v22920_v26  ;;  %v22924_v27 = vld [vmem:[%s22548_s21 + $0x10] sm:$0xff]  }
 0x2c6   : > { %v22867_v31 = vadd.f32 %v17171_v28, %v17170_v30  ;;  %17318 = vmatpush3.bf16.msra.mxu0 %v22924_v27  ;;  %v22928_v30 = vld [vmem:[%s22548_s21 + $0x58] sm:$0xff]  }
 0x2c7   : > { %17319 = vmatprep.subr.bf16.mxu0 %v22928_v30  ;;  %v22932_v28 = vld [vmem:[%s22548_s21 + $0x18] sm:$0xff]  }
 0x2c8   : > { %v1858_v32 = vpack.c.bf16 %v22867_v31, %v22865_v29 }
 0x2ca   : > { %v17194_v33 = vpop.f32.mrb[48].mxu0  ;;  %17320 = vmatpush3.bf16.msra.mxu0 %v22932_v28 }
 0x2cb   : > { %v17195_v34 = vpop.f32.mrb[49].mxu0 }
 0x2cc   : > { %v22871_v35 = vadd.f32 %v17195_v34, %v17194_v33  ;;  %v17197_v36 = vpop.f32.mrb[50].mxu0  ;;  %v20744_v33 = vld [vmem:[%s25804_s18 + $0x1a4] ss:$8 sps:$4 sm:$0xff]   ;;  %v20746_v34 = vld [vmem:[%s25804_s18 + $0x1a0] ss:$8 sps:$4 sm:$0xff]  }
 0x2cd   : > { %v17198_v37 = vpop.f32.mrb[51].mxu0  ;;  %2462 = vmatprep.mubr.bf16.mxu0 %v20744_v33  ;;  %v20770_v33 = vld [vmem:[%s25804_s18 + $0x1e0] ss:$8 sps:$4 sm:$0xff]  }
 0x2ce   : > { %v22873_v38 = vadd.f32 %v17198_v37, %v17197_v36  ;;  %v22942_v36 = vld [vmem:[%s22548_s21 + $0x60] sm:$0xff]   ;;  %2463 = vmatmul.mubr.bf16.gmra.mrb[72].mxu0 %v20746_v34 }
 0x2cf   : > { %17321 = vmatprep.subr.bf16.mxu0 %v22942_v36  ;;  %v22946_v37 = vld [vmem:[%s22548_s21 + $0x20] sm:$0xff]  }
 0x2d0   : > { %17322 = vmatpush3.bf16.msra.mxu0 %v22946_v37 }
 0x2d2   : > { %v17200_v41 = vpop.f32.mrb[52].mxu0 }
 0x2d3   : > { %v17201_v42 = vpop.f32.mrb[53].mxu0 }
 0x2d4   : > { %v22877_v45 = vadd.f32 %v17201_v42, %v17200_v41  ;;  %v17203_v46 = vpop.f32.mrb[54].mxu0  ;;  %v22950_v41 = vld [vmem:[%s22548_s21 + $0x68] sm:$0xff]   ;;  %v20750_v42 = vld [vmem:[%s25804_s18 + $0x1b4] ss:$8 sps:$4 sm:$0xff]  }
 0x2d5   : > { %v17204_v48 = vpop.f32.mrb[55].mxu0  ;;  %17323 = vmatprep.subr.bf16.mxu0 %v22950_v41  ;;  %2470 = vmatprep.mubr.bf16.mxu0 %v20750_v42 }
 0x2d6   : > { %v22879_v49 = vadd.f32 %v17204_v48, %v17203_v46  ;;  %v20752_v46 = vld [vmem:[%s25804_s18 + $0x1b0] ss:$8 sps:$4 sm:$0xff]   ;;  %v22960_v48 = vld [vmem:[%s22548_s21 + $0x28] sm:$0xff]  }
 0x2d7   : > { %17324 = vmatpush3.bf16.msra.mxu0 %v22960_v48 }
 0x2d8   : > { %2471 = vmatmul.mubr.bf16.gmra.mrb[76].mxu0 %v20752_v46  ;;  %v20771_v46 = vld [vmem:[%s25804_s18 + $0x1f4] ss:$8 sps:$4 sm:$0xff]   ;;  %v25806_v47 = vpack.c.bf16 %v22879_v49, %v22877_v45 }
 0x2da   : > { %v17206_v53 = vpop.f32.mrb[56].mxu0 }
 0x2db   : > { %v17207_v54 = vpop.f32.mrb[57].mxu0 }
 0x2dc   : > { %v22883_v56 = vadd.f32 %v17207_v54, %v17206_v53  ;;  %v17209_v57 = vpop.f32.mrb[58].mxu0  ;;  %v22964_v53 = vld [vmem:[%s22548_s21 + $0x70] sm:$0xff]  }
 0x2dd   : > { %v17210_v58 = vpop.f32.mrb[59].mxu0  ;;  %17325 = vmatprep.subr.bf16.mxu0 %v22964_v53  ;;  %v22968_v54 = vld [vmem:[%s22548_s21 + $0x30] sm:$0xff]  }
 0x2de   : > { %v22885_v61 = vadd.f32 %v17210_v58, %v17209_v57  ;;  %17326 = vmatpush3.bf16.msra.mxu0 %v22968_v54  ;;  %v22972_v57 = vld [vmem:[%s22548_s21 + $0x78] sm:$0xff]   ;;  %v20758_v58 = vld [vmem:[%s25804_s18 + $0x1c4] ss:$8 sps:$4 sm:$0xff]  }
 0x2df   : > { %17327 = vmatprep.subr.bf16.mxu0 %v22972_v57  ;;  %2654 = vmatprep.mubr.bf16.mxu0 %v20758_v58 }
 0x2e0   : > { %v25807_v50 = vpack.c.bf16 %v22885_v61, %v22883_v56 }
 0x2e2   : > { %v17212_v4 = vpop.f32.mrb[60].mxu0  ;;  %17328 = vmatpush3.bf16.msra.mxu0 %v22982_v1 }
 0x2e3   : > { %v17213_v5 = vpop.f32.mrb[61].mxu0 }
 0x2e4   : > { %v22895_v7 = vadd.f32 %v17213_v5, %v17212_v4  ;;  %v17215_v11 = vpop.f32.mrb[62].mxu0  ;;  %v22986_v4 = vld [vmem:[%s22548_s21 + $0x40] sm:$0xff]   ;;  %v20762_v5 = vld [vmem:[%s25804_s18 + $0x1d4] ss:$8 sps:$4 sm:$0xff]   ;;  %s25814_s21 = smov %s25813_s27 }
 0x2e5   : > { %v17216_v12 = vpop.f32.mrb[63].mxu0  ;;  %17358 = vmatprep.subr.bf16.mxu0 %v22986_v4  ;;  %2655 = vmatmul.mubr.bf16.vlgmr.msra.gmra.mrb[80].mxu0 %v20756_v0 }
 0x2e6   : > { %v22905_v15 = vadd.f32 %v17216_v12, %v17215_v11  ;;  %17359 = vmatpush3.bf16.msra.mxu0 %v22898_v8  ;;  %v20764_v11 = vld [vmem:[%s25804_s18 + $0x1d0] ss:$8 sps:$4 sm:$0xff]   ;;  %2662 = vmatprep.mubr.bf16.mxu0 %v20762_v5 }
 0x2e7   : > { %17360 = vmatprep.subr.bf16.mxu0 %v22902_v14 }
 0x2e8   : > { %v25808_v55 = vpack.c.bf16 %v22905_v15, %v22895_v7 }
 0x2ea   : > { %17361 = vmatpush3.bf16.msra.mxu0 %v22910_v20 }
 0x2eb   : > { %17362 = vmatprep.subr.bf16.mxu0 %v22920_v26 }
 0x2ed   : > { %2663 = vmatmul.mubr.bf16.gmra.mrb[84].mxu0 %v20764_v11 }
 0x2ee   : > { %17363 = vmatpush3.bf16.msra.mxu0 %v22924_v27  ;;  %2670 = vmatprep.mubr.bf16.mxu0 %v20768_v22  ;;  %v20773_v22 = vld [vmem:[%s25804_s18 + $0x1f0] ss:$8 sps:$4 sm:$0xff]  }
 0x2ef   : > { %17364 = vmatprep.subr.bf16.mxu0 %v22928_v30 }
 0x2f2   : > { %17365 = vmatpush3.bf16.msra.mxu0 %v22932_v28 }
 0x2f3   : > { %17366 = vmatprep.subr.bf16.mxu0 %v22942_v36 }
 0x2f5   : > { %2671 = vmatmul.mubr.bf16.gmra.mrb[88].mxu0 %v20770_v33  ;;  %v20776_v33 = vld [vmem:[%s25804_s18 + $0x204] ss:$8 sps:$4 sm:$0xff]  }
 0x2f6   : > { %17367 = vmatpush3.bf16.msra.mxu0 %v22946_v37  ;;  %2678 = vmatprep.mubr.bf16.mxu0 %v20771_v46 }
 0x2f7   : > { %17368 = vmatprep.subr.bf16.mxu0 %v22950_v41 }
 0x2fa   : > { %17369 = vmatpush3.bf16.msra.mxu0 %v22960_v48 }
 0x2fb   : > { %17370 = vmatprep.subr.bf16.mxu0 %v22964_v53 }
 0x2fd   : > { %2679 = vmatmul.mubr.bf16.gmra.mrb[92].mxu0 %v20773_v22 }
 0x2fe   : > { %17371 = vmatpush3.bf16.msra.mxu0 %v22968_v54  ;;  %2862 = vmatprep.mubr.bf16.mxu0 %v20776_v33 }
 0x2ff   : > { %17372 = vmatprep.subr.bf16.mxu0 %v22972_v57 }
 0x302   : > { %17373 = vmatpush3.bf16.msra.mxu0 %v22982_v1 }
 0x36d   : > { %v17059_v12 = vpop.f32.mrb[8].mxu1 }
 0x36e   : > { %v17060_v23 = vpop.f32.mrb[9].mxu1 }
 0x36f   : > { %v17061_v34 = vadd.f32 %v17060_v23, %v17059_v12  ;;  %v17062_v42 = vpop.f32.mrb[10].mxu1 }
 0x370   : > { %v17063_v58 = vpop.f32.mrb[11].mxu1 }
 0x371   : > { %v17064_v0 = vadd.f32 %v17063_v58, %v17062_v42  ;;  %v1664_v58 = vsel %vm1246_vm0, %v22853_v17, 0  ;;  %v20777_v17 = vld [vmem:[%s25804_s18 + $0x214] ss:$8 sps:$4 sm:$0xff]  }
 0x373   : > { %v1439_v5 = vpack.c.bf16 %v17064_v0, %v17061_v34  ;;  %v1749_v0 = vld [vmem:[#allocation3 + $0xc] sm:$0xf] }
 0x375   : > { %v17065_v11 = vpop.f32.mrb[12].mxu1  ;;  %18189 = vmatprep.mubr.msk.bf16.mxu1 %vm1233_vm1, %v1439_v5 }
 0x376   : > { %v17066_v12 = vpop.f32.mrb[13].mxu1 }
 0x377   : > { %v17067_v23 = vadd.f32 %v17066_v12, %v17065_v11  ;;  %v17068_v19 = vpop.f32.mrb[14].mxu1 }
 0x378   : > { %v17069_v34 = vpop.f32.mrb[15].mxu1 }
 0x379   : > { %v17070_v42 = vadd.f32 %v17069_v34, %v17068_v19  ;;  %v20774_v19 = vld [vmem:[%s25804_s18 + $0x200] ss:$8 sps:$4 sm:$0xff]  }
 0x37a   : > { %2863 = vmatmul.mubr.bf16.vlgmr.msra.gmra.mrb[96].mxu0 %v20774_v19 }
 0x37b   : > { %v1440_v46 = vpack.c.bf16 %v17070_v42, %v17067_v23  ;;  %2870 = vmatprep.mubr.bf16.mxu0 %v20777_v17 }
 0x37d   : > { %v17071_v5 = vpop.f32.mrb[16].mxu1  ;;  %18190 = vmatmul.mubr.msk.bf16.vlgmr.msra.gmra.mrb[0].mxu1 %vm1233_vm1, %v1440_v46 }
 0x37e   : > { %v17072_v11 = vpop.f32.mrb[17].mxu1  ;;  %18198 = vmatpush3.bf16.msra.mxu1 %v1664_v58  ;;  %v20779_v58 = vld [vmem:[%s25804_s18 + $0x210] ss:$8 sps:$4 sm:$0xff]  }
 0x37f   : > { %v17073_v12 = vadd.f32 %v17072_v11, %v17071_v5  ;;  %v17074_v22 = vpop.f32.mrb[18].mxu1  ;;  %20493 = vmatprep.subr.msk.bf16.mxu1 %vm1246_vm0, %v1749_v0 }
 0x380   : > { %v17075_v23 = vpop.f32.mrb[19].mxu1 }
 0x381   : > { %v17076_v33 = vadd.f32 %v17075_v23, %v17074_v22  ;;  %v20783_v22 = vld [vmem:[%s25804_s18 + $0x234] ss:$8 sps:$4 sm:$0xff]  }
 0x382   : > { %2871 = vmatmul.mubr.bf16.gmra.mrb[100].mxu0 %v20779_v58 }
 0x383   : > { %v1441_v34 = vpack.c.bf16 %v17076_v33, %v17073_v12  ;;  %2878 = vmatprep.mubr.bf16.mxu0 %v20780_v62  ;;  %v20782_v12 = vld [vmem:[%s25804_s18 + $0x220] ss:$8 sps:$4 sm:$0xff]  }
 0x385   : > { %v17077_v42 = vpop.f32.mrb[20].mxu1  ;;  %18193 = vmatprep.mubr.msk.bf16.mxu1 %vm1233_vm1, %v1441_v34 }
 0x386   : > { %v17078_v46 = vpop.f32.mrb[21].mxu1 }
 0x387   : > { %v17079_v5 = vadd.f32 %v17078_v46, %v17077_v42  ;;  %v17080_v11 = vpop.f32.mrb[22].mxu1 }
 0x388   : > { %v17081_v52 = vpop.f32.mrb[23].mxu1 }
 0x389   : > { %v17082_v39 = vadd.f32 %v17081_v52, %v17080_v11  ;;  %v1872_v52 = vsel %vm1246_vm0, %v1749_v0, 0 }
 0x38a   : > { %2879 = vmatmul.mubr.bf16.gmra.mrb[104].mxu0 %v20782_v12 }
 0x38b   : > { %v1442_v19 = vpack.c.bf16 %v17082_v39, %v17079_v5  ;;  %2886 = vmatprep.mubr.bf16.mxu0 %v20783_v22  ;;  %v1957_v39 = vld [vmem:[#allocation3 + $0x10] sm:$0xf] }
 0x38c   : > { %v2080_v43 = vsel %vm1246_vm0, %v1957_v39, 0 }
 0x38d   : > { %18194 = vmatmul.mubr.msk.bf16.gmra.mrb[4].mxu1 %vm1233_vm1, %v1442_v19 }
 0x38e   : > { %18199 = vmatprep.mubr.msk.bf16.mxu1 %vm1233_vm1, %v1647_v44  ;;  %v25805_v44 = vpack.c.bf16 %v22873_v38, %v22871_v35 }
 0x392   : > { %2887 = vmatmul.mubr.bf16.gmra.mrb[108].mxu0 %v20785_v40  ;;  %v2373_v40 = vld [vmem:[#allocation3 + $0x18] sm:$0xf] }
 0x395   : > { %18200 = vmatmul.mubr.msk.bf16.vlgmr.msra.gmra.mrb[0].mxu1 %vm1233_vm1, %v1648_v51  ;;  %v20749_v51 = vld [vmem:[%s25804_s18 + $0x144] ss:$8 sps:$4 sm:$0xff]  }
 0x396   : > { %18203 = vmatprep.mubr.msk.bf16.mxu1 %vm1233_vm1, %v1649_v60  ;;  %18208 = vmatpush3.bf16.msra.mxu1 %v1872_v52  ;;  %v20753_v60 = vld [vmem:[%s25804_s18 + $0x154] ss:$8 sps:$4 sm:$0xff]  }
 0x397   : > { %20494 = vmatprep.subr.msk.bf16.mxu1 %vm1246_vm0, %v1957_v39 }
 0x39d   : > { %18204 = vmatmul.mubr.msk.bf16.gmra.mrb[4].mxu1 %vm1233_vm1, %v1650_v3  ;;  %v20761_v3 = vld [vmem:[%s25804_s18 + $0x160] ss:$8 sps:$4 sm:$0xff]  }
 0x39e   : > { %18209 = vmatprep.mubr.msk.bf16.mxu1 %vm1233_vm1, %v1855_v10  ;;  %v17284_v10 = vpop.f32.mrb[64].mxu0 }
 0x39f   : > { %v17285_v13 = vpop.f32.mrb[65].mxu0 }
 0x3a0   : > { %v23144_v16 = vadd.f32 %v17285_v13, %v17284_v10 }
 0x3a5   : > { %18210 = vmatmul.mubr.msk.bf16.vlgmr.msra.gmra.mrb[0].mxu1 %vm1233_vm1, %v1856_v18  ;;  %v17287_v18 = vpop.f32.mrb[66].mxu0 }
 0x3a6   : > { %18213 = vmatprep.mubr.msk.bf16.mxu1 %vm1233_vm1, %v1857_v25  ;;  %18218 = vmatpush3.bf16.msra.mxu1 %v2080_v43  ;;  %v17288_v21 = vpop.f32.mrb[67].mxu0 }
 0x3a7   : > { %17223 = vmatprep.subr.bf16.mxu1 %v22986_v4  ;;  %v23146_v24 = vadd.f32 %v17288_v21, %v17287_v18  ;;  %v17290_v29 = vpop.f32.mrb[68].mxu0 }
 0x3a8   : > { %v17291_v31 = vpop.f32.mrb[69].mxu0 }
 0x3a9   : > { %v2479_v25 = vpack.c.bf16 %v23146_v24, %v23144_v16  ;;  %v17293_v35 = vpop.f32.mrb[70].mxu0  ;;  %v22077_v24 = vmov 0.0  }
 0x3aa   : > { %v17294_v38 = vpop.f32.mrb[71].mxu0  ;;  %18279 = vmatprep.subr.bf16.mxu0 %v22077_v24  ;;  %18295 = vmatprep.mubr.msk.bf16.mxu0 %vm22078_vm2, %v22077_v24 }
 0x3ab   : > { %v23152_v45 = vadd.f32 %v17294_v38, %v17293_v35  ;;  %v17296_v56 = vpop.f32.mrb[72].mxu0 }
 0x3ac   : > { %v17297_v61 = vpop.f32.mrb[73].mxu0 }
 0x3ad   : > { %18214 = vmatmul.mubr.msk.bf16.gmra.mrb[4].mxu1 %vm1233_vm1, %v1858_v32  ;;  %v23150_v32 = vadd.f32 %v17291_v31, %v17290_v29  ;;  %v23156_v62 = vadd.f32 %v17297_v61, %v17296_v56  ;;  %v17299_v7 = vpop.f32.mrb[74].mxu0 }
 0x3ae   : > { %18219 = vmatprep.mubr.msk.bf16.mxu1 %vm1233_vm1, %v25805_v44 }
 0x3af   : > { %v2480_v49 = vpack.c.bf16 %v23152_v45, %v23150_v32 }
 0x3b5   : > { %18220 = vmatmul.mubr.msk.bf16.vlgmr.msra.gmra.mrb[0].mxu1 %vm1233_vm1, %v25806_v47 }
 0x3b6   : > { %17224 = vmatpush3.bf16.msra.mxu1 %v22898_v8  ;;  %18223 = vmatprep.mubr.msk.bf16.mxu1 %vm1233_vm1, %v25807_v50  ;;  %v17300_v8 = vpop.f32.mrb[75].mxu0 }
 0x3b7   : > { %17225 = vmatprep.subr.bf16.mxu1 %v22902_v14  ;;  %v23158_v14 = vadd.f32 %v17300_v8, %v17299_v7 }
 0x3b9   : > { %v2481_v15 = vpack.c.bf16 %v23158_v14, %v23156_v62 }
 0x3ba   : > { %17226 = vmatpush3.bf16.msra.mxu1 %v22910_v20  ;;  %v17302_v20 = vpop.f32.mrb[76].mxu0 }
 0x3bb   : > { %17227 = vmatprep.subr.bf16.mxu1 %v22920_v26  ;;  %v17303_v26 = vpop.f32.mrb[77].mxu0 }
 0x3bd   : > { %18224 = vmatmul.mubr.msk.bf16.gmra.mrb[4].mxu1 %vm1233_vm1, %v25808_v55 }
 0x3be   : > { %17228 = vmatpush3.bf16.msra.mxu1 %v22924_v27  ;;  %2238 = vmatprep.mubr.bf16.mxu1 %v20749_v51  ;;  %v2165_v27 = vld [vmem:[#allocation3 + $0x14] sm:$0xf] }
 0x3bf   : > { %17229 = vmatprep.subr.bf16.mxu1 %v22928_v30  ;;  %v23162_v30 = vadd.f32 %v17303_v26, %v17302_v20 }
 0x3c2   : > { %17230 = vmatpush3.bf16.msra.mxu1 %v22932_v28  ;;  %v17305_v28 = vpop.f32.mrb[78].mxu0 }
 0x3c3   : > { %17231 = vmatprep.subr.bf16.mxu1 %v22942_v36  ;;  %v2288_v36 = vsel %vm1246_vm0, %v2165_v27, 0 }
 0x3c6   : > { %17232 = vmatpush3.bf16.msra.mxu1 %v22946_v37  ;;  %v17306_v37 = vpop.f32.mrb[79].mxu0 }
 0x3c7   : > { %17233 = vmatprep.subr.bf16.mxu1 %v22950_v41  ;;  %v23166_v41 = vadd.f32 %v17306_v37, %v17305_v28 }
 0x3ca   : > { %17234 = vmatpush3.bf16.msra.mxu1 %v22960_v48  ;;  %v2482_v48 = vpack.c.bf16 %v23166_v41, %v23162_v30 }
 0x3cb   : > { %17235 = vmatprep.subr.bf16.mxu1 %v22964_v53  ;;  %v17329_v53 = vpop.f32.mrb[80].mxu0 }
 0x3ce   : > { %17236 = vmatpush3.bf16.msra.mxu1 %v22968_v54  ;;  %v17330_v54 = vpop.f32.mrb[81].mxu0 }
 0x3cf   : > { %17237 = vmatprep.subr.bf16.mxu1 %v22972_v57  ;;  %v23170_v57 = vadd.f32 %v17330_v54, %v17329_v53 }
 0x3d2   : > { %17238 = vmatpush3.bf16.msra.mxu1 %v22982_v1  ;;  %v17332_v1 = vpop.f32.mrb[82].mxu0 }
 0x3d3   : > { %20495 = vmatprep.subr.msk.bf16.mxu1 %vm1246_vm0, %v2165_v27  ;;  %v17333_v4 = vpop.f32.mrb[83].mxu0 }
 0x3d4   : > { %v23172_v0 = vadd.f32 %v17333_v4, %v17332_v1  ;;  %v17335_v23 = vpop.f32.mrb[84].mxu0 }
 0x3d5   : > { %2239 = vmatmul.mubr.bf16.vlgmr.msra.gmra.mrb[24].mxu1 %v20747_v59  ;;  %v17336_v33 = vpop.f32.mrb[85].mxu0 }
 0x3d6   : > { %2246 = vmatprep.mubr.bf16.mxu1 %v20753_v60  ;;  %18228 = vmatpush3.bf16.msra.mxu1 %v2288_v36  ;;  %v2687_v17 = vpack.c.bf16 %v23172_v0, %v23170_v57  ;;  %v23176_v34 = vadd.f32 %v17336_v33, %v17335_v23  ;;  %v17338_v42 = vpop.f32.mrb[86].mxu0 }
 0x3d7   : > { %v17339_v46 = vpop.f32.mrb[87].mxu0  ;;  %20496 = vmatprep.subr.msk.bf16.mxu1 %vm1246_vm0, %v2373_v40 }
 0x3d8   : > { %v23178_v58 = vadd.f32 %v17339_v46, %v17338_v42  ;;  %v17341_v11 = vpop.f32.mrb[88].mxu0 }
 0x3d9   : > { %v17342_v19 = vpop.f32.mrb[89].mxu0 }
 0x3da   : > { %v2688_v5 = vpack.c.bf16 %v23178_v58, %v23176_v34  ;;  %v23182_v12 = vadd.f32 %v17342_v19, %v17341_v11  ;;  %v17344_v22 = vpop.f32.mrb[90].mxu0 }
 0x3db   : > { %v17345_v52 = vpop.f32.mrb[91].mxu0 }
 0x3dc   : > { %v23184_v39 = vadd.f32 %v17345_v52, %v17344_v22  ;;  %v17347_v44 = vpop.f32.mrb[92].mxu0 }
 0x3dd   : > { %2247 = vmatmul.mubr.bf16.gmra.mrb[28].mxu1 %v20755_v63  ;;  %v17348_v47 = vpop.f32.mrb[93].mxu0 }
 0x3de   : > { %2254 = vmatprep.mubr.bf16.mxu1 %v20759_v2  ;;  %v2689_v43 = vpack.c.bf16 %v23184_v39, %v23182_v12  ;;  %v23189_v50 = vadd.f32 %v17348_v47, %v17347_v44  ;;  %v17350_v51 = vpop.f32.mrb[94].mxu0 }
 0x3df   : > { %v17351_v55 = vpop.f32.mrb[95].mxu0 }
 0x3e0   : > { %v23191_v59 = vadd.f32 %v17351_v55, %v17350_v51 }
 0x3e2   : > { %v2690_v60 = vpack.c.bf16 %v23191_v59, %v23189_v50 }
 0x3e5   : > { %2255 = vmatmul.mubr.bf16.gmra.mrb[32].mxu1 %v20761_v3 }
 0x3e6   : > { %2262 = vmatprep.mubr.bf16.mxu1 %v20765_v6 }
 0x3ed   : > { %2263 = vmatmul.mubr.bf16.gmra.mrb[36].mxu1 %v20767_v9 }
 0x44d   : > { %v17374_v63 = vpop.f32.mrb[96].mxu0 }
 0x44e   : > { %v17375_v2 = vpop.f32.mrb[97].mxu0 }
 0x44f   : > { %v23195_v3 = vadd.f32 %v17375_v2, %v17374_v63  ;;  %v17377_v6 = vpop.f32.mrb[98].mxu0 }
 0x450   : > { %v17378_v9 = vpop.f32.mrb[99].mxu0 }
 0x451   : > { %v23197_v10 = vadd.f32 %v17378_v9, %v17377_v6  ;;  %v2496_v9 = vsel %vm1246_vm0, %v2373_v40, 0 }
 0x453   : > { %v2895_v13 = vpack.c.bf16 %v23197_v10, %v23195_v3 }
 0x455   : > { %v17380_v18 = vpop.f32.mrb[100].mxu0 }
 0x456   : > { %v17381_v21 = vpop.f32.mrb[101].mxu0 }
 0x457   : > { %v23201_v29 = vadd.f32 %v17381_v21, %v17380_v18  ;;  %v17383_v31 = vpop.f32.mrb[102].mxu0  ;;  %v2581_v18 = vld [vmem:[#allocation3 + $0x1c] sm:$0xf] }
 0x458   : > { %v17384_v35 = vpop.f32.mrb[103].mxu0 }
 0x459   : > { %v23203_v38 = vadd.f32 %v17384_v35, %v17383_v31 }
 0x45b   : > { %v2896_v56 = vpack.c.bf16 %v23203_v38, %v23201_v29 }
 0x45d   : > { %v17386_v61 = vpop.f32.mrb[104].mxu0 }
 0x45e   : > { %v17387_v7 = vpop.f32.mrb[105].mxu0 }
 0x45f   : > { %v23207_v8 = vadd.f32 %v17387_v7, %v17386_v61  ;;  %v17389_v20 = vpop.f32.mrb[106].mxu0 }
 0x460   : > { %v17390_v26 = vpop.f32.mrb[107].mxu0 }
 0x461   : > { %v17391_v27 = vadd.f32 %v17390_v26, %v17389_v20 }
 0x463   : > { %v2897_v28 = vpack.c.bf16 %v17391_v27, %v23207_v8 }
 0x465   : > { %v17392_v36 = vpop.f32.mrb[108].mxu0 }
 0x466   : > { %v17393_v37 = vpop.f32.mrb[109].mxu0 }
 0x467   : > { %v17394_v53 = vadd.f32 %v17393_v37, %v17392_v36  ;;  %v17395_v54 = vpop.f32.mrb[110].mxu0 }
 0x468   : > { %v17396_v1 = vpop.f32.mrb[111].mxu0 }
 0x469   : > { %v17397_v4 = vadd.f32 %v17396_v1, %v17395_v54  ;;  %v2704_v1 = vsel %vm1246_vm0, %v2581_v18, 0 }
 0x46b   : > { %v2898_v23 = vpack.c.bf16 %v17397_v4, %v17394_v53  ;;  %v2789_v4 = vld [vmem:[#allocation3 + $0x20] sm:$0xf] }
 0x46c   : > { %v2912_v16 = vsel %vm1246_vm0, %v2789_v4, 0 }
 0x4a8   : > { %v17239_v33 = vpop.f32.mrb[24].mxu1 }
 0x4a9   : > { %v17240_v42 = vpop.f32.mrb[25].mxu1 }
 0x4aa   : > { %v17241_v46 = vadd.f32 %v17240_v42, %v17239_v33  ;;  %v17242_v11 = vpop.f32.mrb[26].mxu1  ;;  %v20794_v33 = vld [vmem:[#allocation9] sm:$0xff]   ;;  %v20795_v42 = vld [vmem:[#allocation9 + $0x8] sm:$0xff]  }
 0x4ab   : > { %v17243_v19 = vpop.f32.mrb[27].mxu1  ;;  %18280 = vmatpush3.bf16.msra.mxu0 %v20794_v33  ;;  %v20823_v33 = vld [vmem:[#allocation9 + $0xe0] sm:$0xff]  }
 0x4ac   : > { %v17244_v22 = vadd.f32 %v17243_v19, %v17242_v11  ;;  %18281 = vmatprep.subr.bf16.mxu0 %v22077_v24  ;;  %v20797_v11 = vld [vmem:[#allocation9 + $0x18] sm:$0xff]   ;;  %v20798_v19 = vld [vmem:[#allocation9 + $0x20] sm:$0xff]  }
 0x4ae   : > { %v2271_v52 = vpack.c.bf16 %v17244_v22, %v17241_v46  ;;  %v20796_v46 = vld [vmem:[#allocation9 + $0x10] sm:$0xff]   ;;  %v20787_v22 = vld [vmem:[#allocation8 + $0x8] sm:$0xff]  }
 0x4af   : > { %18282 = vmatpush3.bf16.msra.mxu0 %v20795_v42 }
 0x4b0   : > { %v17245_v44 = vpop.f32.mrb[28].mxu1  ;;  %18229 = vmatprep.mubr.msk.bf16.mxu1 %vm1233_vm1, %v2271_v52  ;;  %18283 = vmatprep.subr.bf16.mxu0 %v22077_v24  ;;  %v20799_v52 = vld [vmem:[#allocation9 + $0x28] sm:$0xff]  }
 0x4b1   : > { %v17246_v47 = vpop.f32.mrb[29].mxu1 }
 0x4b2   : > { %v17247_v51 = vadd.f32 %v17246_v47, %v17245_v44  ;;  %v17248_v55 = vpop.f32.mrb[30].mxu1  ;;  %v20800_v44 = vld [vmem:[#allocation9 + $0x30] sm:$0xff]   ;;  %v20788_v47 = vld [vmem:[#allocation8 + $0x10] sm:$0xff]  }
 0x4b3   : > { %v17249_v63 = vpop.f32.mrb[31].mxu1  ;;  %18284 = vmatpush3.bf16.msra.mxu0 %v20796_v46 }
 0x4b4   : > { %v17250_v2 = vadd.f32 %v17249_v63, %v17248_v55  ;;  %18285 = vmatprep.subr.bf16.mxu0 %v22077_v24  ;;  %v20790_v55 = vld [vmem:[#allocation8 + $0x20] sm:$0xff]   ;;  %v20791_v63 = vld [vmem:[#allocation8 + $0x28] sm:$0xff]  }
 0x4b6   : > { %v2272_v6 = vpack.c.bf16 %v17250_v2, %v17247_v51  ;;  %v20789_v51 = vld [vmem:[#allocation8 + $0x18] sm:$0xff]   ;;  %v20801_v2 = vld [vmem:[#allocation9 + $0x38] sm:$0xff]  }
 0x4b7   : > { %18286 = vmatpush3.bf16.msra.mxu0 %v20797_v11 }
 0x4b8   : > { %v17251_v21 = vpop.f32.mrb[32].mxu1  ;;  %18230 = vmatmul.mubr.msk.bf16.vlgmr.msra.gmra.mrb[0].mxu1 %vm1233_vm1, %v2272_v6  ;;  %18287 = vmatprep.subr.bf16.mxu0 %v22077_v24  ;;  %v20792_v6 = vld [vmem:[#allocation8 + $0x30] sm:$0xff]  }
 0x4b9   : > { %v17252_v31 = vpop.f32.mrb[33].mxu1  ;;  %18238 = vmatpush3.bf16.msra.mxu1 %v2496_v9  ;;  %v20793_v9 = vld [vmem:[#allocation8 + $0x38] sm:$0xff]  }
 0x4ba   : > { %v17253_v35 = vadd.f32 %v17252_v31, %v17251_v21  ;;  %v17254_v61 = vpop.f32.mrb[34].mxu1  ;;  %20497 = vmatprep.subr.msk.bf16.mxu1 %vm1246_vm0, %v2581_v18  ;;  %v20812_v18 = vld [vmem:[#allocation8 + $0x40] sm:$0xff]  }
 0x4bb   : > { %v17255_v7 = vpop.f32.mrb[35].mxu1  ;;  %18288 = vmatpush3.bf16.msra.mxu0 %v20798_v19  ;;  %v20824_v19 = vld [vmem:[#allocation9 + $0xe8] sm:$0xff]  }
 0x4bc   : > { %v17256_v8 = vadd.f32 %v17255_v7, %v17254_v61  ;;  %18289 = vmatprep.subr.bf16.mxu0 %v22077_v24  ;;  %v20802_v61 = vld [vmem:[#allocation9 + $0x40] sm:$0xff]  }
 0x4be   : > { %v2273_v20 = vpack.c.bf16 %v17256_v8, %v17253_v35 }
 0x4bf   : > { %18290 = vmatpush3.bf16.msra.mxu0 %v20799_v52  ;;  %v20826_v52 = vld [vmem:[#allocation9 + $0xf8] sm:$0xff]  }
 0x4c0   : > { %v17257_v26 = vpop.f32.mrb[36].mxu1  ;;  %18233 = vmatprep.mubr.msk.bf16.mxu1 %vm1233_vm1, %v2273_v20  ;;  %18291 = vmatprep.subr.bf16.mxu0 %v22077_v24  ;;  %v20803_v20 = vld [vmem:[#allocation9 + $0x48] sm:$0xff]  }
 0x4c1   : > { %v17258_v27 = vpop.f32.mrb[37].mxu1 }
 0x4c2   : > { %v17259_v36 = vadd.f32 %v17258_v27, %v17257_v26  ;;  %v17260_v37 = vpop.f32.mrb[38].mxu1  ;;  %v20804_v26 = vld [vmem:[#allocation9 + $0x50] sm:$0xff]   ;;  %v20805_v27 = vld [vmem:[#allocation9 + $0x58] sm:$0xff]  }
 0x4c3   : > { %v17261_v40 = vpop.f32.mrb[39].mxu1  ;;  %18292 = vmatpush3.bf16.msra.mxu0 %v20800_v44 }
 0x4c4   : > { %v17262_v53 = vadd.f32 %v17261_v40, %v17260_v37  ;;  %18293 = vmatprep.subr.bf16.mxu0 %v22077_v24  ;;  %v20806_v40 = vld [vmem:[#allocation9 + $0x60] sm:$0xff]  }
 0x4c6   : > { %v2274_v54 = vpack.c.bf16 %v17262_v53, %v17259_v36 }
 0x4c7   : > { %18294 = vmatpush3.bf16.msra.mxu0 %v20801_v2 }
 0x4c8   : > { %18234 = vmatmul.mubr.msk.bf16.gmra.mrb[4].mxu1 %vm1233_vm1, %v2274_v54  ;;  %18311 = vmatprep.subr.bf16.mxu0 %v22077_v24 }
 0x4c9   : > { %18239 = vmatprep.mubr.msk.bf16.mxu1 %vm1233_vm1, %v2479_v25  ;;  %v15310_v25 = vld [vmem:[#allocation6] ss:$0 sm:$0xff] }
 0x4d0   : > { %18240 = vmatmul.mubr.msk.bf16.vlgmr.msra.gmra.mrb[0].mxu1 %vm1233_vm1, %v2480_v49 }
 0x4d1   : > { %18243 = vmatprep.mubr.msk.bf16.mxu1 %vm1233_vm1, %v2481_v15  ;;  %18248 = vmatpush3.bf16.msra.mxu1 %v2704_v1 }
 0x4d2   : > { %20498 = vmatprep.subr.msk.bf16.mxu1 %vm1246_vm0, %v2789_v4  ;;  %v20807_v4 = vld [vmem:[#allocation9 + $0x68] sm:$0xff]  }
 0x4d8   : > { %18244 = vmatmul.mubr.msk.bf16.gmra.mrb[4].mxu1 %vm1233_vm1, %v2482_v48 }
 0x4d9   : > { %18249 = vmatprep.mubr.msk.bf16.mxu1 %vm1233_vm1, %v2687_v17 }
 0x4e0   : > { %18250 = vmatmul.mubr.msk.bf16.vlgmr.msra.gmra.mrb[0].mxu1 %vm1233_vm1, %v2688_v5 }
 0x4e1   : > { %18253 = vmatprep.mubr.msk.bf16.mxu1 %vm1233_vm1, %v2689_v43  ;;  %18258 = vmatpush3.bf16.msra.mxu1 %v2912_v16  ;;  %v20808_v16 = vld [vmem:[#allocation9 + $0x70] sm:$0xff]  }
 0x4e2   : > { %18267 = vmatprep.subr.bf16.mxu1 %v22077_v24 }
 0x4e8   : > { %18254 = vmatmul.mubr.msk.bf16.gmra.mrb[4].mxu1 %vm1233_vm1, %v2690_v60 }
 0x4e9   : > { %18259 = vmatprep.mubr.msk.bf16.mxu1 %vm1233_vm1, %v2895_v13 }
 0x4f0   : > { %18260 = vmatmul.mubr.msk.bf16.vlgmr.msra.gmra.mrb[0].mxu1 %vm1233_vm1, %v2896_v56 }
 0x4f1   : > { %18263 = vmatprep.mubr.msk.bf16.mxu1 %vm1233_vm1, %v2897_v28 }
 0x4f8   : > { %18264 = vmatmul.mubr.msk.bf16.gmra.mrb[4].mxu1 %vm1233_vm1, %v2898_v23  ;;  %v20786_v23 = vld [vmem:[#allocation8] sm:$0xff]  }
 0x4f9   : > { %18275 = vmatprep.mubr.msk.bf16.mxu1 %vm22078_vm2, %v22077_v24 }
 0x5c3   : > { %v18261_v32 = vpop.f32.mrb[0].mxu1 }
 0x5c4   : > { %v19957_v45 = vadd.f32 %v18261_v32, %v15310_v25  ;;  %v2948_v49 = vpop.f32.mrb[1].mxu1 }
 0x5c5   : > { %v19958_v62 = vadd.f32 %v15310_v25, %v2948_v49  ;;  %v18262_v14 = vpop.f32.mrb[2].mxu1  ;;  %v20810_v49 = vld [vmem:[#allocation9 + $0x80] sm:$0xff]  }
 0x5c6   : > { %v19959_v15 = vadd.f32 %v18262_v14, %v15310_v25  ;;  %v2951_v30 = vpop.f32.mrb[3].mxu1  ;;  %v2989_v48 = vmax.f32 %v19957_v45, 0.0 }
 0x5c7   : > { %v19960_v41 = vadd.f32 %v15310_v25, %v2951_v30  ;;  %v2987_v0 = vmax.f32 %v19958_v62, 0.0  ;;  %v20811_v30 = vld [vmem:[#allocation9 + $0x88] sm:$0xff]  }
 0x5c8   : > { %v2990_v57 = vmax.f32 %v19959_v15, 0.0 }
 0x5c9   : > { %v2988_v17 = vmax.f32 %v19960_v41, 0.0  ;;  %v20813_v41 = vld [vmem:[#allocation9 + $0x90] sm:$0xff]  }
 0x5ca   : > { %v23267_v34 = vpack.c.bf16 %v2990_v57, %v2989_v48  ;;  %v20814_v48 = vld [vmem:[#allocation9 + $0x98] sm:$0xff]  }
 0x5cb   : > { %v23269_v58 = vpack.c.bf16 %v2988_v17, %v2987_v0  ;;  %v18265_v5 = vpop.f32.mrb[4].mxu1  ;;  %v20815_v17 = vld [vmem:[#allocation9 + $0xa0] sm:$0xff]  }
 0x5cc   : > { %v19961_v12 = vadd.f32 %v18265_v5, %v15310_v25  ;;  %v2964_v39 = vpop.f32.mrb[5].mxu1 }
 0x5cd   : > { %v19962_v43 = vadd.f32 %v15310_v25, %v2964_v39  ;;  %v18266_v50 = vpop.f32.mrb[6].mxu1  ;;  %18268 = vmatpush3.bf16.msra.mxu1 %v23269_v58  ;;  %v20817_v39 = vld [vmem:[#allocation9 + $0xb0] sm:$0xff]  }
 0x5ce   : > { %v19963_v59 = vadd.f32 %v18266_v50, %v15310_v25  ;;  %v2967_v60 = vpop.f32.mrb[7].mxu1  ;;  %18269 = vmatprep.subr.bf16.mxu1 %v22077_v24  ;;  %v2993_v10 = vmax.f32 %v19961_v12, 0.0  ;;  %v20816_v12 = vld [vmem:[#allocation9 + $0xa8] sm:$0xff]  }
 0x5cf   : > { %v19964_v3 = vadd.f32 %v15310_v25, %v2967_v60  ;;  %v2991_v29 = vmax.f32 %v19962_v43, 0.0  ;;  %v20809_v25 = vld [vmem:[#allocation9 + $0x78] sm:$0xff]   ;;  %v20819_v60 = vld [vmem:[#allocation9 + $0xc0] sm:$0xff]  }
 0x5d0   : > { %v2994_v13 = vmax.f32 %v19963_v59, 0.0  ;;  %v20818_v43 = vld [vmem:[#allocation9 + $0xb8] sm:$0xff]  }
 0x5d1   : > { %v2992_v38 = vmax.f32 %v19964_v3, 0.0  ;;  %18270 = vmatpush3.bf16.msra.mxu1 %v23267_v34 }
 0x5d2   : > { %v23274_v56 = vpack.c.bf16 %v2994_v13, %v2993_v10  ;;  %18271 = vmatprep.subr.bf16.mxu1 %v22077_v24 }
 0x5d3   : > { %v23277_v28 = vpack.c.bf16 %v2992_v38, %v2991_v29  ;;  %v20820_v29 = vld [vmem:[#allocation9 + $0xc8] sm:$0xff]   ;;  %v20821_v38 = vld [vmem:[#allocation9 + $0xd0] sm:$0xff]  }
 0x5d5   : > { %18272 = vmatpush3.bf16.msra.mxu1 %v23277_v28 }
 0x5d6   : > { %18273 = vmatprep.subr.bf16.mxu1 %v22077_v24 }
 0x5d9   : > { %18274 = vmatpush3.bf16.msra.mxu1 %v23274_v56 }
 0x5da   : > { %18299 = vmatprep.subr.bf16.mxu1 %v22077_v24 }
 0x5dc   : > { %18276 = vmatmul.mubr.msk.bf16.vlgmr.msra.gmra.mrb[40].mxu1 %vm3029_vm3, %v20786_v23 }
 0x5dd   : > { %18300 = vmatpush3.bf16.msra.mxu1 %v23269_v58  ;;  %18307 = vmatprep.mubr.msk.bf16.mxu1 %vm22078_vm2, %v22077_v24 }
 0x5de   : > { %18301 = vmatprep.subr.bf16.mxu1 %v22077_v24 }
 0x5e1   : > { %18302 = vmatpush3.bf16.msra.mxu1 %v23267_v34 }
 0x5e2   : > { %18303 = vmatprep.subr.bf16.mxu1 %v22077_v24 }
 0x5e5   : > { %18304 = vmatpush3.bf16.msra.mxu1 %v23277_v28 }
 0x5e6   : > { %18305 = vmatprep.subr.bf16.mxu1 %v22077_v24 }
 0x5e9   : > { %18306 = vmatpush3.bf16.msra.mxu1 %v23274_v56 }
 0x5ea   : > { %18331 = vmatprep.subr.bf16.mxu1 %v22077_v24 }
 0x5ec   : > { %18308 = vmatmul.mubr.msk.bf16.vlgmr.msra.gmra.mrb[44].mxu1 %vm3029_vm3, %v20787_v22  ;;  %v20825_v22 = vld [vmem:[#allocation9 + $0xf0] sm:$0xff]  }
 0x5ed   : > { %18332 = vmatpush3.bf16.msra.mxu1 %v23269_v58  ;;  %18339 = vmatprep.mubr.msk.bf16.mxu1 %vm22078_vm2, %v22077_v24 }
 0x5ee   : > { %18333 = vmatprep.subr.bf16.mxu1 %v22077_v24 }
 0x5f1   : > { %18334 = vmatpush3.bf16.msra.mxu1 %v23267_v34 }
 0x5f2   : > { %18335 = vmatprep.subr.bf16.mxu1 %v22077_v24 }
 0x5f5   : > { %18336 = vmatpush3.bf16.msra.mxu1 %v23277_v28 }
 0x5f6   : > { %18337 = vmatprep.subr.bf16.mxu1 %v22077_v24 }
 0x5f9   : > { %18338 = vmatpush3.bf16.msra.mxu1 %v23274_v56 }
 0x5fa   : > { %18363 = vmatprep.subr.bf16.mxu1 %v22077_v24 }
 0x5fc   : > { %18340 = vmatmul.mubr.msk.bf16.vlgmr.msra.gmra.mrb[48].mxu1 %vm3029_vm3, %v20788_v47 }
 0x5fd   : > { %18364 = vmatpush3.bf16.msra.mxu1 %v23269_v58  ;;  %18371 = vmatprep.mubr.msk.bf16.mxu1 %vm22078_vm2, %v22077_v24 }
 0x5fe   : > { %18365 = vmatprep.subr.bf16.mxu1 %v22077_v24 }
 0x601   : > { %18366 = vmatpush3.bf16.msra.mxu1 %v23267_v34 }
 0x602   : > { %18367 = vmatprep.subr.bf16.mxu1 %v22077_v24 }
 0x605   : > { %18368 = vmatpush3.bf16.msra.mxu1 %v23277_v28 }
 0x606   : > { %18369 = vmatprep.subr.bf16.mxu1 %v22077_v24 }
 0x609   : > { %18370 = vmatpush3.bf16.msra.mxu1 %v23274_v56 }
 0x60a   : > { %18395 = vmatprep.subr.bf16.mxu1 %v22077_v24 }
 0x60c   : > { %18372 = vmatmul.mubr.msk.bf16.vlgmr.msra.gmra.mrb[52].mxu1 %vm3029_vm3, %v20789_v51  ;;  %v20827_v51 = vld [vmem:[#allocation9 + $0x100] sm:$0xff]  }
 0x60d   : > { %18396 = vmatpush3.bf16.msra.mxu1 %v23269_v58  ;;  %18403 = vmatprep.mubr.msk.bf16.mxu1 %vm22078_vm2, %v22077_v24 }
 0x60e   : > { %18397 = vmatprep.subr.bf16.mxu1 %v22077_v24 }
 0x611   : > { %18398 = vmatpush3.bf16.msra.mxu1 %v23267_v34 }
 0x612   : > { %18399 = vmatprep.subr.bf16.mxu1 %v22077_v24 }
 0x615   : > { %18400 = vmatpush3.bf16.msra.mxu1 %v23277_v28 }
 0x616   : > { %18401 = vmatprep.subr.bf16.mxu1 %v22077_v24 }
 0x619   : > { %18402 = vmatpush3.bf16.msra.mxu1 %v23274_v56 }
 0x61a   : > { %18427 = vmatprep.subr.bf16.mxu1 %v22077_v24 }
 0x61c   : > { %18404 = vmatmul.mubr.msk.bf16.vlgmr.msra.gmra.mrb[56].mxu1 %vm3029_vm3, %v20790_v55 }
 0x61d   : > { %18428 = vmatpush3.bf16.msra.mxu1 %v23269_v58  ;;  %18435 = vmatprep.mubr.msk.bf16.mxu1 %vm22078_vm2, %v22077_v24 }
 0x61e   : > { %18429 = vmatprep.subr.bf16.mxu1 %v22077_v24 }
 0x621   : > { %18430 = vmatpush3.bf16.msra.mxu1 %v23267_v34 }
 0x622   : > { %18431 = vmatprep.subr.bf16.mxu1 %v22077_v24 }
 0x625   : > { %18432 = vmatpush3.bf16.msra.mxu1 %v23277_v28 }
 0x626   : > { %18433 = vmatprep.subr.bf16.mxu1 %v22077_v24 }
 0x629   : > { %18434 = vmatpush3.bf16.msra.mxu1 %v23274_v56 }
 0x62a   : > { %18459 = vmatprep.subr.bf16.mxu1 %v22077_v24 }
 0x62c   : > { %18436 = vmatmul.mubr.msk.bf16.vlgmr.msra.gmra.mrb[60].mxu1 %vm3029_vm3, %v20791_v63 }
 0x62d   : > { %18460 = vmatpush3.bf16.msra.mxu1 %v23269_v58  ;;  %18467 = vmatprep.mubr.msk.bf16.mxu1 %vm22078_vm2, %v22077_v24 }
 0x62e   : > { %18461 = vmatprep.subr.bf16.mxu1 %v22077_v24 }
 0x631   : > { %18462 = vmatpush3.bf16.msra.mxu1 %v23267_v34 }
 0x632   : > { %18463 = vmatprep.subr.bf16.mxu1 %v22077_v24 }
 0x635   : > { %18464 = vmatpush3.bf16.msra.mxu1 %v23277_v28 }
 0x636   : > { %18465 = vmatprep.subr.bf16.mxu1 %v22077_v24 }
 0x639   : > { %18466 = vmatpush3.bf16.msra.mxu1 %v23274_v56 }
 0x63a   : > { %18491 = vmatprep.subr.bf16.mxu1 %v22077_v24 }
 0x63c   : > { %18468 = vmatmul.mubr.msk.bf16.vlgmr.msra.gmra.mrb[64].mxu1 %vm3029_vm3, %v20792_v6  ;;  %v20828_v6 = vld [vmem:[#allocation9 + $0x108] sm:$0xff]  }
 0x63d   : > { %18492 = vmatpush3.bf16.msra.mxu1 %v23269_v58  ;;  %18499 = vmatprep.mubr.msk.bf16.mxu1 %vm22078_vm2, %v22077_v24 }
 0x63e   : > { %18493 = vmatprep.subr.bf16.mxu1 %v22077_v24 }
 0x641   : > { %18494 = vmatpush3.bf16.msra.mxu1 %v23267_v34 }
 0x642   : > { %18495 = vmatprep.subr.bf16.mxu1 %v22077_v24 }
 0x645   : > { %18496 = vmatpush3.bf16.msra.mxu1 %v23277_v28 }
 0x646   : > { %18497 = vmatprep.subr.bf16.mxu1 %v22077_v24 }
 0x649   : > { %18498 = vmatpush3.bf16.msra.mxu1 %v23274_v56 }
 0x64a   : > { %18523 = vmatprep.subr.bf16.mxu1 %v22077_v24 }
 0x64c   : > { %18500 = vmatmul.mubr.msk.bf16.vlgmr.msra.gmra.mrb[68].mxu1 %vm3029_vm3, %v20793_v9  ;;  %v20829_v9 = vld [vmem:[#allocation9 + $0x110] sm:$0xff]  }
 0x64d   : > { %18524 = vmatpush3.bf16.msra.mxu1 %v23269_v58  ;;  %18531 = vmatprep.mubr.msk.bf16.mxu1 %vm22078_vm2, %v22077_v24 }
 0x64e   : > { %18525 = vmatprep.subr.bf16.mxu1 %v22077_v24 }
 0x651   : > { %18526 = vmatpush3.bf16.msra.mxu1 %v23267_v34 }
 0x652   : > { %18527 = vmatprep.subr.bf16.mxu1 %v22077_v24 }
 0x655   : > { %18528 = vmatpush3.bf16.msra.mxu1 %v23277_v28 }
 0x656   : > { %18529 = vmatprep.subr.bf16.mxu1 %v22077_v24 }
 0x659   : > { %18530 = vmatpush3.bf16.msra.mxu1 %v23274_v56  ;;  %v20822_v56 = vld [vmem:[#allocation9 + $0xd8] sm:$0xff]  }
 0x65a   : > { %18555 = vmatprep.subr.bf16.mxu1 %v22077_v24 }
 0x65c   : > { %18532 = vmatmul.mubr.msk.bf16.vlgmr.msra.gmra.mrb[72].mxu1 %vm3029_vm3, %v20812_v18  ;;  %v20830_v18 = vld [vmem:[#allocation9 + $0x118] sm:$0xff]  }
 0x65d   : > { %18557 = vmatprep.mubr.msk.bf16.mxu1 %vm22078_vm2, %v22077_v24 }
 0x6af   : > { %v3067_v21 = vpop.f32.mrb[40].mxu1 }
 0x6b0   : > { %v18277_v31 = vpop.f32.mrb[41].mxu1 }
 0x6b1   : > { %v3070_v35 = vpop.f32.mrb[42].mxu1 }
 0x6b2   : > { %v3074_v7 = vpack.c.bf16 %v3070_v35, %v3067_v21  ;;  %v18278_v8 = vpop.f32.mrb[43].mxu1  ;;  %v20831_v35 = vld [vmem:[#allocation9 + $0x120] sm:$0xff]  }
 0x6b4   : > { %18296 = vmatmul.mubr.bf16.vlgmr.msra.gmra.mrb[112].mxu0 %v3074_v7 }
 0x6b5   : > { %18312 = vmatpush3.bf16.msra.mxu0 %v20802_v61  ;;  %18327 = vmatprep.mubr.msk.bf16.mxu0 %vm22078_vm2, %v22077_v24 }
 0x6b6   : > { %18313 = vmatprep.subr.bf16.mxu0 %v22077_v24 }
 0x6b9   : > { %18314 = vmatpush3.bf16.msra.mxu0 %v20803_v20  ;;  %v20832_v20 = vld [vmem:[#allocation9 + $0x128] sm:$0xff]  }
 0x6ba   : > { %18315 = vmatprep.subr.bf16.mxu0 %v22077_v24 }
 0x6bd   : > { %18316 = vmatpush3.bf16.msra.mxu0 %v20804_v26  ;;  %v20833_v26 = vld [vmem:[#allocation9 + $0x130] sm:$0xff]  }
 0x6be   : > { %18317 = vmatprep.subr.bf16.mxu0 %v22077_v24 }
 0x6bf   : > { %v3228_v36 = vpop.f32.mrb[44].mxu1 }
 0x6c0   : > { %v18309_v37 = vpop.f32.mrb[45].mxu1 }
 0x6c1   : > { %18318 = vmatpush3.bf16.msra.mxu0 %v20805_v27  ;;  %v3231_v53 = vpop.f32.mrb[46].mxu1  ;;  %v20834_v27 = vld [vmem:[#allocation9 + $0x138] sm:$0xff]  }
 0x6c2   : > { %18319 = vmatprep.subr.bf16.mxu0 %v22077_v24  ;;  %v3235_v54 = vpack.c.bf16 %v3231_v53, %v3228_v36  ;;  %v18310_v1 = vpop.f32.mrb[47].mxu1 }
 0x6c5   : > { %18320 = vmatpush3.bf16.msra.mxu0 %v20806_v40  ;;  %v20835_v40 = vld [vmem:[#allocation9 + $0x140] sm:$0xff]  }
 0x6c6   : > { %18321 = vmatprep.subr.bf16.mxu0 %v22077_v24 }
 0x6c9   : > { %18322 = vmatpush3.bf16.msra.mxu0 %v20807_v4  ;;  %v20836_v4 = vld [vmem:[#allocation9 + $0x148] sm:$0xff]  }
 0x6ca   : > { %18323 = vmatprep.subr.bf16.mxu0 %v22077_v24 }
 0x6cd   : > { %18324 = vmatpush3.bf16.msra.mxu0 %v20808_v16  ;;  %v20837_v16 = vld [vmem:[#allocation9 + $0x150] sm:$0xff]  }
 0x6ce   : > { %18325 = vmatprep.subr.bf16.mxu0 %v22077_v24 }
 0x6cf   : > { %v3389_v32 = vpop.f32.mrb[48].mxu1 }
 0x6d0   : > { %v18341_v45 = vpop.f32.mrb[49].mxu1 }
 0x6d1   : > { %18326 = vmatpush3.bf16.msra.mxu0 %v20809_v25  ;;  %v3392_v62 = vpop.f32.mrb[50].mxu1  ;;  %v20838_v25 = vld [vmem:[#allocation9 + $0x158] sm:$0xff]   ;;  %v20840_v45 = vld [vmem:[#allocation9 + $0x168] sm:$0xff]  }
 0x6d2   : > { %18343 = vmatprep.subr.bf16.mxu0 %v22077_v24  ;;  %v3396_v14 = vpack.c.bf16 %v3392_v62, %v3389_v32  ;;  %v18342_v15 = vpop.f32.mrb[51].mxu1  ;;  %v20839_v32 = vld [vmem:[#allocation9 + $0x160] sm:$0xff]   ;;  %v20842_v62 = vld [vmem:[#allocation9 + $0x178] sm:$0xff]  }
 0x6d3   : > { %v20844_v15 = vld [vmem:[#allocation9 + $0x188] sm:$0xff]  }
 0x6d4   : > { %18328 = vmatmul.mubr.bf16.vlgmr.msra.gmra.mrb[112].mxu0 %v3235_v54 }
 0x6d5   : > { %18344 = vmatpush3.bf16.msra.mxu0 %v20810_v49  ;;  %18359 = vmatprep.mubr.msk.bf16.mxu0 %vm22078_vm2, %v22077_v24  ;;  %v20841_v49 = vld [vmem:[#allocation9 + $0x170] sm:$0xff]  }
 0x6d6   : > { %18345 = vmatprep.subr.bf16.mxu0 %v22077_v24 }
 0x6d9   : > { %18346 = vmatpush3.bf16.msra.mxu0 %v20811_v30  ;;  %v20845_v30 = vld [vmem:[#allocation9 + $0x190] sm:$0xff]  }
 0x6da   : > { %18347 = vmatprep.subr.bf16.mxu0 %v22077_v24 }
 0x6dd   : > { %18348 = vmatpush3.bf16.msra.mxu0 %v20813_v41  ;;  %v20846_v41 = vld [vmem:[#allocation9 + $0x198] sm:$0xff]  }
 0x6de   : > { %18349 = vmatprep.subr.bf16.mxu0 %v22077_v24 }
 0x6df   : > { %v3550_v57 = vpop.f32.mrb[52].mxu1 }
 0x6e0   : > { %v18373_v0 = vpop.f32.mrb[53].mxu1 }
 0x6e1   : > { %18350 = vmatpush3.bf16.msra.mxu0 %v20814_v48  ;;  %v3553_v34 = vpop.f32.mrb[54].mxu1  ;;  %v20847_v48 = vld [vmem:[#allocation9 + $0x1a0] sm:$0xff]   ;;  %v20849_v0 = vld [vmem:[#allocation9 + $0x1b0] sm:$0xff]  }
 0x6e2   : > { %18351 = vmatprep.subr.bf16.mxu0 %v22077_v24  ;;  %v3557_v58 = vpack.c.bf16 %v3553_v34, %v3550_v57  ;;  %v18374_v5 = vpop.f32.mrb[55].mxu1  ;;  %v20848_v57 = vld [vmem:[#allocation9 + $0x1a8] sm:$0xff]   ;;  %v20851_v34 = vld [vmem:[#allocation9 + $0x1c0] sm:$0xff]  }
 0x6e3   : > { %v20853_v5 = vld [vmem:[#allocation9 + $0x1d0] sm:$0xff]  }
 0x6e5   : > { %18352 = vmatpush3.bf16.msra.mxu0 %v20815_v17  ;;  %v20850_v17 = vld [vmem:[#allocation9 + $0x1b8] sm:$0xff]  }
 0x6e6   : > { %18353 = vmatprep.subr.bf16.mxu0 %v22077_v24 }
 0x6e9   : > { %18354 = vmatpush3.bf16.msra.mxu0 %v20816_v12  ;;  %v20854_v12 = vld [vmem:[#allocation9 + $0x1d8] sm:$0xff]  }
 0x6ea   : > { %18355 = vmatprep.subr.bf16.mxu0 %v22077_v24 }
 0x6ed   : > { %18356 = vmatpush3.bf16.msra.mxu0 %v20817_v39  ;;  %v20855_v39 = vld [vmem:[#allocation9 + $0x1e0] sm:$0xff]  }
 0x6ee   : > { %18357 = vmatprep.subr.bf16.mxu0 %v22077_v24 }
 0x6ef   : > { %v23401_v50 = vpop.f32.mrb[56].mxu1 }
 0x6f0   : > { %v18405_v59 = vpop.f32.mrb[57].mxu1 }
 0x6f1   : > { %18358 = vmatpush3.bf16.msra.mxu0 %v20818_v43  ;;  %v23403_v3 = vpop.f32.mrb[58].mxu1  ;;  %v20856_v43 = vld [vmem:[#allocation9 + $0x1e8] sm:$0xff]   ;;  %v20858_v59 = vld [vmem:[#allocation9 + $0x1f8] sm:$0xff]  }
 0x6f2   : > { %18375 = vmatprep.subr.bf16.mxu0 %v22077_v24  ;;  %v3718_v10 = vpack.c.bf16 %v23403_v3, %v23401_v50  ;;  %v18406_v13 = vpop.f32.mrb[59].mxu1  ;;  %v20857_v50 = vld [vmem:[#allocation9 + $0x1f0] sm:$0xff]   ;;  %v20860_v3 = vld [vmem:[#allocation9 + $0x208] sm:$0xff]  }
 0x6f3   : > { %v20862_v13 = vld [vmem:[#allocation9 + $0x218] sm:$0xff]  }
 0x6f4   : > { %18360 = vmatmul.mubr.bf16.vlgmr.msra.gmra.mrb[112].mxu0 %v3396_v14  ;;  %v20843_v14 = vld [vmem:[#allocation9 + $0x180] sm:$0xff]  }
 0x6f5   : > { %18376 = vmatpush3.bf16.msra.mxu0 %v20819_v60  ;;  %18391 = vmatprep.mubr.msk.bf16.mxu0 %vm22078_vm2, %v22077_v24  ;;  %v20859_v60 = vld [vmem:[#allocation9 + $0x200] sm:$0xff]  }
 0x6f6   : > { %18377 = vmatprep.subr.bf16.mxu0 %v22077_v24 }
 0x6f9   : > { %18378 = vmatpush3.bf16.msra.mxu0 %v20820_v29  ;;  %v20863_v29 = vld [vmem:[#allocation9 + $0x220] sm:$0xff]  }
 0x6fa   : > { %18379 = vmatprep.subr.bf16.mxu0 %v22077_v24 }
 0x6fd   : > { %18380 = vmatpush3.bf16.msra.mxu0 %v20821_v38  ;;  %v20864_v38 = vld [vmem:[#allocation9 + $0x228] sm:$0xff]  }
 0x6fe   : > { %18381 = vmatprep.subr.bf16.mxu0 %v22077_v24 }
 0x6ff   : > { %v23413_v28 = vpop.f32.mrb[60].mxu1 }
 0x700   : > { %v18437_v23 = vpop.f32.mrb[61].mxu1 }
 0x701   : > { %18382 = vmatpush3.bf16.msra.mxu0 %v20822_v56  ;;  %v23415_v42 = vpop.f32.mrb[62].mxu1  ;;  %v20865_v56 = vld [vmem:[#allocation9 + $0x230] sm:$0xff]   ;;  %v15499_v23 = vld [vmem:[#allocation11] ss:$0 sm:$0xff] }
 0x702   : > { %18383 = vmatprep.subr.bf16.mxu0 %v22077_v24  ;;  %v3879_v46 = vpack.c.bf16 %v23415_v42, %v23413_v28  ;;  %v18438_v11 = vpop.f32.mrb[63].mxu1  ;;  %v20866_v28 = vld [vmem:[#allocation9 + $0x238] sm:$0xff]  }
 0x705   : > { %18384 = vmatpush3.bf16.msra.mxu0 %v20823_v33 }
 0x706   : > { %18385 = vmatprep.subr.bf16.mxu0 %v22077_v24 }
 0x709   : > { %18386 = vmatpush3.bf16.msra.mxu0 %v20824_v19 }
 0x70a   : > { %18387 = vmatprep.subr.bf16.mxu0 %v22077_v24 }
 0x70d   : > { %18388 = vmatpush3.bf16.msra.mxu0 %v20825_v22 }
 0x70e   : > { %18389 = vmatprep.subr.bf16.mxu0 %v22077_v24 }
 0x70f   : > { %v23423_v44 = vpop.f32.mrb[64].mxu1 }
 0x710   : > { %v18469_v47 = vpop.f32.mrb[65].mxu1 }
 0x711   : > { %18390 = vmatpush3.bf16.msra.mxu0 %v20826_v52  ;;  %v23425_v55 = vpop.f32.mrb[66].mxu1 }
 0x712   : > { %18407 = vmatprep.subr.bf16.mxu0 %v22077_v24  ;;  %v4040_v63 = vpack.c.bf16 %v23425_v55, %v23423_v44  ;;  %v18470_v2 = vpop.f32.mrb[67].mxu1  ;;  %v5224_v55 = vld [vmem:[#allocation12 + $0xa] sm:$0x3] }
 0x713   : > { %v20868_v2 = vld [vmem:[#allocation14 + $0x8] sm:$0xff]  }
 0x714   : > { %18392 = vmatmul.mubr.bf16.vlgmr.msra.gmra.mrb[112].mxu0 %v3557_v58  ;;  %v20852_v58 = vld [vmem:[#allocation9 + $0x1c8] sm:$0xff]  }
 0x715   : > { %18408 = vmatpush3.bf16.msra.mxu0 %v20827_v51  ;;  %18423 = vmatprep.mubr.msk.bf16.mxu0 %vm22078_vm2, %v22077_v24  ;;  %v4464_v51 = vld [vmem:[#allocation12] sm:$0x3] }
 0x716   : > { %18409 = vmatprep.subr.bf16.mxu0 %v22077_v24 }
 0x719   : > { %18410 = vmatpush3.bf16.msra.mxu0 %v20828_v6  ;;  %v5376_v6 = vld [vmem:[#allocation12 + $0xc] sm:$0x3] }
 0x71a   : > { %18411 = vmatprep.subr.bf16.mxu0 %v22077_v24 }
 0x71d   : > { %18412 = vmatpush3.bf16.msra.mxu0 %v20829_v9  ;;  %v20869_v9 = vld [vmem:[#allocation14 + $0x10] sm:$0xff]  }
 0x71e   : > { %18413 = vmatprep.subr.bf16.mxu0 %v22077_v24 }
 0x71f   : > { %v23435_v21 = vpop.f32.mrb[68].mxu1 }
 0x720   : > { %v18501_v31 = vpop.f32.mrb[69].mxu1 }
 0x721   : > { %18414 = vmatpush3.bf16.msra.mxu0 %v20830_v18  ;;  %v23437_v61 = vpop.f32.mrb[70].mxu1  ;;  %v20870_v18 = vld [vmem:[#allocation14 + $0x18] sm:$0xff]   ;;  %v20871_v31 = vld [vmem:[#allocation14 + $0x20] sm:$0xff]  }
 0x722   : > { %18415 = vmatprep.subr.bf16.mxu0 %v22077_v24  ;;  %v4201_v7 = vpack.c.bf16 %v23437_v61, %v23435_v21  ;;  %v18502_v8 = vpop.f32.mrb[71].mxu1  ;;  %v5528_v21 = vld [vmem:[#allocation12 + $0xe] sm:$0x3]  ;;  %v20873_v61 = vld [vmem:[#allocation14 + $0x30] sm:$0xff]  }
 0x725   : > { %18416 = vmatpush3.bf16.msra.mxu0 %v20831_v35  ;;  %v20872_v35 = vld [vmem:[#allocation14 + $0x28] sm:$0xff]  }
 0x726   : > { %18417 = vmatprep.subr.bf16.mxu0 %v22077_v24 }
 0x729   : > { %18418 = vmatpush3.bf16.msra.mxu0 %v20832_v20 }
 0x72a   : > { %18419 = vmatprep.subr.bf16.mxu0 %v22077_v24 }
 0x72d   : > { %18420 = vmatpush3.bf16.msra.mxu0 %v20833_v26 }
 0x72e   : > { %18421 = vmatprep.subr.bf16.mxu0 %v22077_v24 }
 0x72f   : > { %v23445_v36 = vpop.f32.mrb[72].mxu1 }
 0x730   : > { %v18533_v37 = vpop.f32.mrb[73].mxu1 }
 0x731   : > { %18422 = vmatpush3.bf16.msra.mxu0 %v20834_v27  ;;  %v23447_v53 = vpop.f32.mrb[74].mxu1  ;;  %v4616_v37 = vld [vmem:[#allocation12 + $0x2] sm:$0x3] }
 0x732   : > { %18439 = vmatprep.subr.bf16.mxu0 %v22077_v24  ;;  %v4362_v54 = vpack.c.bf16 %v23447_v53, %v23445_v36  ;;  %v18534_v1 = vpop.f32.mrb[75].mxu1  ;;  %v20876_v53 = vld [vmem:[#allocation14 + $0x48] sm:$0xff]  }
 0x733   : > { %v20878_v1 = vld [vmem:[#allocation14 + $0x58] sm:$0xff]  }
 0x734   : > { %18424 = vmatmul.mubr.bf16.vlgmr.msra.gmra.mrb[112].mxu0 %v3718_v10  ;;  %v20861_v10 = vld [vmem:[#allocation9 + $0x210] sm:$0xff]  }
 0x735   : > { %18440 = vmatpush3.bf16.msra.mxu0 %v20835_v40  ;;  %18455 = vmatprep.mubr.msk.bf16.mxu0 %vm22078_vm2, %v22077_v24  ;;  %v20875_v40 = vld [vmem:[#allocation14 + $0x40] sm:$0xff]  }
 0x736   : > { %18441 = vmatprep.subr.bf16.mxu0 %v22077_v24 }
 0x739   : > { %18442 = vmatpush3.bf16.msra.mxu0 %v20836_v4  ;;  %v20879_v4 = vld [vmem:[#allocation14 + $0x60] sm:$0xff]  }
 0x73a   : > { %18443 = vmatprep.subr.bf16.mxu0 %v22077_v24 }
 0x73d   : > { %18444 = vmatpush3.bf16.msra.mxu0 %v20837_v16  ;;  %v20880_v16 = vld [vmem:[#allocation14 + $0x68] sm:$0xff]  }
 0x73e   : > { %18445 = vmatprep.subr.bf16.mxu0 %v22077_v24 }
 0x741   : > { %18446 = vmatpush3.bf16.msra.mxu0 %v20838_v25  ;;  %v20881_v25 = vld [vmem:[#allocation14 + $0x70] sm:$0xff]  }
 0x742   : > { %18447 = vmatprep.subr.bf16.mxu0 %v22077_v24 }
 0x745   : > { %18448 = vmatpush3.bf16.msra.mxu0 %v20839_v32  ;;  %v20882_v32 = vld [vmem:[#allocation14 + $0x78] sm:$0xff]  }
 0x746   : > { %18449 = vmatprep.subr.bf16.mxu0 %v22077_v24 }
 0x749   : > { %18450 = vmatpush3.bf16.msra.mxu0 %v20840_v45 }
 0x74a   : > { %18451 = vmatprep.subr.bf16.mxu0 %v22077_v24 }
 0x74d   : > { %18452 = vmatpush3.bf16.msra.mxu0 %v20841_v49 }
 0x74e   : > { %18453 = vmatprep.subr.bf16.mxu0 %v22077_v24 }
 0x751   : > { %18454 = vmatpush3.bf16.msra.mxu0 %v20842_v62 }
 0x752   : > { %18471 = vmatprep.subr.bf16.mxu0 %v22077_v24 }
 0x754   : > { %18456 = vmatmul.mubr.bf16.vlgmr.msra.gmra.mrb[112].mxu0 %v3879_v46 }
 0x755   : > { %18472 = vmatpush3.bf16.msra.mxu0 %v20843_v14  ;;  %18487 = vmatprep.mubr.msk.bf16.mxu0 %vm22078_vm2, %v22077_v24 }
 0x756   : > { %18473 = vmatprep.subr.bf16.mxu0 %v22077_v24 }
 0x759   : > { %18474 = vmatpush3.bf16.msra.mxu0 %v20844_v15 }
 0x75a   : > { %18475 = vmatprep.subr.bf16.mxu0 %v22077_v24 }
 0x75d   : > { %18476 = vmatpush3.bf16.msra.mxu0 %v20845_v30  ;;  %v4768_v30 = vld [vmem:[#allocation12 + $0x4] sm:$0x3] }
 0x75e   : > { %18477 = vmatprep.subr.bf16.mxu0 %v22077_v24 }
 0x761   : > { %18478 = vmatpush3.bf16.msra.mxu0 %v20846_v41  ;;  %v20883_v41 = vld [vmem:[#allocation14 + $0x80] sm:$0xff]  }
 0x762   : > { %18479 = vmatprep.subr.bf16.mxu0 %v22077_v24 }
 0x765   : > { %18480 = vmatpush3.bf16.msra.mxu0 %v20847_v48  ;;  %v20884_v48 = vld [vmem:[#allocation14 + $0x88] sm:$0xff]  }
 0x766   : > { %18481 = vmatprep.subr.bf16.mxu0 %v22077_v24 }
 0x769   : > { %18482 = vmatpush3.bf16.msra.mxu0 %v20848_v57  ;;  %v20885_v57 = vld [vmem:[#allocation14 + $0x90] sm:$0xff]  }
 0x76a   : > { %18483 = vmatprep.subr.bf16.mxu0 %v22077_v24 }
 0x76d   : > { %18484 = vmatpush3.bf16.msra.mxu0 %v20849_v0  ;;  %v20886_v0 = vld [vmem:[#allocation14 + $0x98] sm:$0xff]  }
 0x76e   : > { %18485 = vmatprep.subr.bf16.mxu0 %v22077_v24 }
 0x771   : > { %18486 = vmatpush3.bf16.msra.mxu0 %v20850_v17  ;;  %v20887_v17 = vld [vmem:[#allocation14 + $0xa0] sm:$0xff]  }
 0x772   : > { %18503 = vmatprep.subr.bf16.mxu0 %v22077_v24 }
 0x774   : > { %18488 = vmatmul.mubr.bf16.vlgmr.msra.gmra.mrb[112].mxu0 %v4040_v63  ;;  %v20867_v63 = vld [vmem:[#allocation14] sm:$0xff]  }
 0x775   : > { %18504 = vmatpush3.bf16.msra.mxu0 %v20851_v34  ;;  %18519 = vmatprep.mubr.msk.bf16.mxu0 %vm22078_vm2, %v22077_v24  ;;  %v20888_v34 = vld [vmem:[#allocation14 + $0xa8] sm:$0xff]  }
 0x776   : > { %18505 = vmatprep.subr.bf16.mxu0 %v22077_v24 }
 0x779   : > { %18506 = vmatpush3.bf16.msra.mxu0 %v20852_v58  ;;  %v20889_v58 = vld [vmem:[#allocation14 + $0xb0] sm:$0xff]  }
 0x77a   : > { %18507 = vmatprep.subr.bf16.mxu0 %v22077_v24 }
 0x77d   : > { %18508 = vmatpush3.bf16.msra.mxu0 %v20853_v5  ;;  %v20890_v5 = vld [vmem:[#allocation14 + $0xb8] sm:$0xff]  }
 0x77e   : > { %18509 = vmatprep.subr.bf16.mxu0 %v22077_v24 }
 0x781   : > { %18510 = vmatpush3.bf16.msra.mxu0 %v20854_v12 }
 0x782   : > { %18511 = vmatprep.subr.bf16.mxu0 %v22077_v24 }
 0x785   : > { %18512 = vmatpush3.bf16.msra.mxu0 %v20855_v39 }
 0x786   : > { %18513 = vmatprep.subr.bf16.mxu0 %v22077_v24 }
 0x789   : > { %18514 = vmatpush3.bf16.msra.mxu0 %v20856_v43 }
 0x78a   : > { %18515 = vmatprep.subr.bf16.mxu0 %v22077_v24 }
 0x78d   : > { %18516 = vmatpush3.bf16.msra.mxu0 %v20857_v50 }
 0x78e   : > { %18517 = vmatprep.subr.bf16.mxu0 %v22077_v24 }
 0x791   : > { %18518 = vmatpush3.bf16.msra.mxu0 %v20858_v59 }
 0x792   : > { %18535 = vmatprep.subr.bf16.mxu0 %v22077_v24 }
 0x794   : > { %18520 = vmatmul.mubr.bf16.vlgmr.msra.gmra.mrb[112].mxu0 %v4201_v7  ;;  %v20874_v7 = vld [vmem:[#allocation14 + $0x38] sm:$0xff]  }
 0x795   : > { %18536 = vmatpush3.bf16.msra.mxu0 %v20859_v60  ;;  %18551 = vmatprep.mubr.msk.bf16.mxu0 %vm22078_vm2, %v22077_v24  ;;  %v4920_v60 = vld [vmem:[#allocation12 + $0x6] sm:$0x3] }
 0x796   : > { %18537 = vmatprep.subr.bf16.mxu0 %v22077_v24 }
 0x799   : > { %18538 = vmatpush3.bf16.msra.mxu0 %v20860_v3  ;;  %v20891_v3 = vld [vmem:[#allocation14 + $0xc0] sm:$0xff]  }
 0x79a   : > { %18539 = vmatprep.subr.bf16.mxu0 %v22077_v24 }
 0x79d   : > { %18540 = vmatpush3.bf16.msra.mxu0 %v20861_v10  ;;  %v20892_v10 = vld [vmem:[#allocation14 + $0xc8] sm:$0xff]  }
 0x79e   : > { %18541 = vmatprep.subr.bf16.mxu0 %v22077_v24 }
 0x7a1   : > { %18542 = vmatpush3.bf16.msra.mxu0 %v20862_v13  ;;  %v20893_v13 = vld [vmem:[#allocation14 + $0xd0] sm:$0xff]  }
 0x7a2   : > { %18543 = vmatprep.subr.bf16.mxu0 %v22077_v24 }
 0x7a5   : > { %18544 = vmatpush3.bf16.msra.mxu0 %v20863_v29  ;;  %v20894_v29 = vld [vmem:[#allocation14 + $0xd8] sm:$0xff]  }
 0x7a6   : > { %18545 = vmatprep.subr.bf16.mxu0 %v22077_v24 }
 0x7a9   : > { %18546 = vmatpush3.bf16.msra.mxu0 %v20864_v38  ;;  %v20895_v38 = vld [vmem:[#allocation14 + $0xe0] sm:$0xff]  }
 0x7aa   : > { %18547 = vmatprep.subr.bf16.mxu0 %v22077_v24 }
 0x7ad   : > { %18548 = vmatpush3.bf16.msra.mxu0 %v20865_v56  ;;  %v20896_v56 = vld [vmem:[#allocation14 + $0xe8] sm:$0xff]  }
 0x7ae   : > { %18549 = vmatprep.subr.bf16.mxu0 %v22077_v24 }
 0x7b1   : > { %18550 = vmatpush3.bf16.msra.mxu0 %v20866_v28  ;;  %v20897_v28 = vld [vmem:[#allocation14 + $0xf0] sm:$0xff]  }
 0x7b2   : > { %18685 = vmatprep.subr.bf16.mxu0 %v22077_v24 }
 0x7b4   : > { %18552 = vmatmul.mubr.bf16.vlgmr.msra.gmra.mrb[112].mxu0 %v4362_v54  ;;  %v20877_v54 = vld [vmem:[#allocation14 + $0x50] sm:$0xff]  }
 0x7b5   : > { %18687 = vmatprep.mubr.msk.bf16.mxu0 %vm22078_vm2, %v22077_v24 }
 0x887   : > { %v4445_v33 = vpop.f32.mrb[112].mxu0 }
 0x888   : > { %v19965_v42 = vadd.f32 %v15499_v23, %v4445_v33  ;;  %v18553_v46 = vpop.f32.mrb[113].mxu0  ;;  %v5680_v33 = vld [vmem:[#allocation12 + $0x10] sm:$0x3] }
 0x889   : > { %v4448_v11 = vpop.f32.mrb[114].mxu0 }
 0x88a   : > { %v19966_v19 = vadd.f32 %v15499_v23, %v4448_v11  ;;  %v18554_v22 = vpop.f32.mrb[115].mxu0  ;;  %v4454_v52 = vmax.f32 %v19965_v42, 0.0  ;;  %v20898_v23 = vld [vmem:[#allocation14 + $0xf8] sm:$0xff]  }
 0x88c   : > { %v4455_v44 = vmax.f32 %v19966_v19, 0.0 }
 0x88e   : > { %v23509_v47 = vpack.c.bf16 %v4455_v44, %v4454_v52  ;;  %v5072_v52 = vld [vmem:[#allocation12 + $0x8] sm:$0x3]  ;;  %v20899_v44 = vld [vmem:[#allocation14 + $0x100] sm:$0xff]  }
 0x890   : > { %18556 = vmatpush3.bf16.msra.mxu1 %v23509_v47  ;;  %18686 = vmatpush3.bf16.msra.mxu0 %v23509_v47 }
 0x891   : > { %18711 = vmatprep.subr.bf16.mxu0 %v22077_v24  ;;  %18561 = vmatprep.subr.bf16.mxu1 %v22077_v24 }
 0x893   : > { %18558 = vmatmul.mubr.msk.bf16.vlgmr.msra.gmra.mrb[76].mxu1 %vm4481_vm4, %v4464_v51  ;;  %18688 = vmatmul.mubr.msk.bf16.vlgmr.msra.gmra.mrb[116].mxu0 %vm4481_vm4, %v5224_v55  ;;  %v20900_v51 = vld [vmem:[#allocation14 + $0x108] sm:$0xff]   ;;  %v20901_v55 = vld [vmem:[#allocation14 + $0x110] sm:$0xff]  }
 0x894   : > { %18712 = vmatpush3.bf16.msra.mxu0 %v23509_v47  ;;  %18713 = vmatprep.mubr.msk.bf16.mxu0 %vm22078_vm2, %v22077_v24 }
 0x895   : > { %18737 = vmatprep.subr.bf16.mxu0 %v22077_v24  ;;  %18562 = vmatpush3.bf16.msra.mxu1 %v20867_v63  ;;  %v20903_v63 = vld [vmem:[#allocation14 + $0x120] sm:$0xff]  }
 0x896   : > { %18563 = vmatprep.subr.bf16.mxu1 %v22077_v24  ;;  %18577 = vmatprep.mubr.msk.bf16.mxu1 %vm22078_vm2, %v22077_v24 }
 0x899   : > { %18564 = vmatpush3.bf16.msra.mxu1 %v20868_v2  ;;  %v20904_v2 = vld [vmem:[#allocation14 + $0x128] sm:$0xff]  }
 0x89a   : > { %18565 = vmatprep.subr.bf16.mxu1 %v22077_v24 }
 0x89b   : > { %18714 = vmatmul.mubr.msk.bf16.vlgmr.msra.gmra.mrb[120].mxu0 %vm4481_vm4, %v5376_v6  ;;  %v20905_v6 = vld [vmem:[#allocation14 + $0x130] sm:$0xff]  }
 0x89c   : > { %18738 = vmatpush3.bf16.msra.mxu0 %v23509_v47  ;;  %18739 = vmatprep.mubr.msk.bf16.mxu0 %vm22078_vm2, %v22077_v24 }
 0x89d   : > { %18763 = vmatprep.subr.bf16.mxu0 %v22077_v24  ;;  %18566 = vmatpush3.bf16.msra.mxu1 %v20869_v9  ;;  %v20906_v9 = vld [vmem:[#allocation14 + $0x138] sm:$0xff]  }
 0x89e   : > { %18567 = vmatprep.subr.bf16.mxu1 %v22077_v24 }
 0x8a1   : > { %18568 = vmatpush3.bf16.msra.mxu1 %v20870_v18 }
 0x8a2   : > { %18569 = vmatprep.subr.bf16.mxu1 %v22077_v24 }
 0x8a3   : > { %18740 = vmatmul.mubr.msk.bf16.vlgmr.msra.gmra.mrb[124].mxu0 %vm4481_vm4, %v5528_v21 }
 0x8a4   : > { %18764 = vmatpush3.bf16.msra.mxu0 %v23509_v47  ;;  %18765 = vmatprep.mubr.msk.bf16.mxu0 %vm22078_vm2, %v22077_v24 }
 0x8a5   : > { %18570 = vmatpush3.bf16.msra.mxu1 %v20871_v31 }
 0x8a6   : > { %18571 = vmatprep.subr.bf16.mxu1 %v22077_v24 }
 0x8a9   : > { %18572 = vmatpush3.bf16.msra.mxu1 %v20872_v35 }
 0x8aa   : > { %18573 = vmatprep.subr.bf16.mxu1 %v22077_v24 }
 0x8ab   : > { %18766 = vmatmul.mubr.msk.bf16.vlgmr.msra.gmra.mrb[128].mxu0 %vm4481_vm4, %v5680_v33  ;;  %v20919_v33 = vld [vmem:[#allocation14 + $0x1a0] sm:$0xff]  }
 0x8ad   : > { %18574 = vmatpush3.bf16.msra.mxu1 %v20873_v61 }
 0x8ae   : > { %18575 = vmatprep.subr.bf16.mxu1 %v22077_v24 }
 0x8b1   : > { %18576 = vmatpush3.bf16.msra.mxu1 %v20874_v7 }
 0x8b2   : > { %18581 = vmatprep.subr.bf16.mxu1 %v22077_v24 }
 0x966   : > { %v4519_v8 = vpop.f32.mrb[76].mxu1  ;;  %v23601_v18 = vpop.f32.mrb[116].mxu0 }
 0x967   : > { %v4525_v20 = vpack.c.bf16 %v4519_v8, %v4519_v8  ;;  %v18559_v26 = vpop.f32.mrb[77].mxu1  ;;  %v18689_v21 = vpop.f32.mrb[117].mxu0 }
 0x968   : > { %v4522_v27 = vpop.f32.mrb[78].mxu1  ;;  %v5282_v31 = vpop.f32.mrb[118].mxu0  ;;  %v20933_v21 = vld [vmem:[#allocation14 + $0x210] sm:$0xff]  }
 0x969   : > { %v18560_v36 = vpop.f32.mrb[79].mxu1  ;;  %18578 = vmatmul.mubr.bf16.vlgmr.msra.gmra.mrb[80].mxu1 %v4525_v20  ;;  %v18690_v35 = vpop.f32.mrb[119].mxu0  ;;  %v20934_v31 = vld [vmem:[#allocation14 + $0x218] sm:$0xff]  }
 0x96a   : > { %18582 = vmatpush3.bf16.msra.mxu1 %v23509_v47  ;;  %18583 = vmatprep.mubr.msk.bf16.mxu1 %vm22078_vm2, %v22077_v24  ;;  %v20935_v35 = vld [vmem:[#allocation14 + $0x220] sm:$0xff]  }
 0x96b   : > { %18587 = vmatprep.subr.bf16.mxu1 %v22077_v24 }
 0x96e   : > { %v23603_v61 = vpop.f32.mrb[120].mxu0 }
 0x96f   : > { %v18715_v7 = vpop.f32.mrb[121].mxu0 }
 0x970   : > { %v5434_v8 = vpop.f32.mrb[122].mxu0  ;;  %v20937_v7 = vld [vmem:[#allocation14 + $0x230] sm:$0xff]  }
 0x971   : > { %18584 = vmatmul.mubr.msk.bf16.vlgmr.msra.gmra.mrb[84].mxu1 %vm4481_vm4, %v4616_v37  ;;  %v18716_v20 = vpop.f32.mrb[123].mxu0  ;;  %v20938_v8 = vld [vmem:[#allocation14 + $0x238] sm:$0xff]  }
 0x972   : > { %18588 = vmatpush3.bf16.msra.mxu1 %v20875_v40  ;;  %18603 = vmatprep.mubr.msk.bf16.mxu1 %vm22078_vm2, %v22077_v24 }
 0x973   : > { %18589 = vmatprep.subr.bf16.mxu1 %v22077_v24 }
 0x976   : > { %18590 = vmatpush3.bf16.msra.mxu1 %v20876_v53  ;;  %v23605_v26 = vpop.f32.mrb[124].mxu0 }
 0x977   : > { %18591 = vmatprep.subr.bf16.mxu1 %v22077_v24  ;;  %v18741_v27 = vpop.f32.mrb[125].mxu0 }
 0x978   : > { %v5586_v36 = vpop.f32.mrb[126].mxu0  ;;  %v20960_v27 = vld [vmem:[%s25809_s0 + $0x70] ss:$8 sps:$4 sm:$0xff]  }
 0x979   : > { %v18742_v37 = vpop.f32.mrb[127].mxu0  ;;  %v20965_v36 = vld [vmem:[%s25809_s0 + $0x84] ss:$8 sps:$4 sm:$0xff]  }
 0x97a   : > { %18592 = vmatpush3.bf16.msra.mxu1 %v20877_v54  ;;  %v22079_v37 = vmov 0  }
 0x97b   : > { %18593 = vmatprep.subr.bf16.mxu1 %v22077_v24  ;;  %5962 = vmatprep.mubr.bf16.mxu0 %v22079_v37 }
 0x97e   : > { %18594 = vmatpush3.bf16.msra.mxu1 %v20878_v1  ;;  %v23607_v40 = vpop.f32.mrb[128].mxu0 }
 0x97f   : > { %18595 = vmatprep.subr.bf16.mxu1 %v22077_v24  ;;  %v18767_v53 = vpop.f32.mrb[129].mxu0  ;;  %v5741_v20 = vpack.c.bf16 %v23607_v40, %v23607_v40  ;;  %v15590_v40 = vld [vmem:[#allocation15] ss:$0 sm:$0xff] }
 0x980   : > { %v5738_v54 = vpop.f32.mrb[130].mxu0 }
 0x981   : > { %v18768_v1 = vpop.f32.mrb[131].mxu0 }
 0x982   : > { %18596 = vmatpush3.bf16.msra.mxu1 %v20879_v4 }
 0x983   : > { %18597 = vmatprep.subr.bf16.mxu1 %v22077_v24 }
 0x986   : > { %18598 = vmatpush3.bf16.msra.mxu1 %v20880_v16  ;;  %v20907_v16 = vld [vmem:[#allocation14 + $0x140] sm:$0xff]  }
 0x987   : > { %18599 = vmatprep.subr.bf16.mxu1 %v22077_v24 }
 0x98a   : > { %18600 = vmatpush3.bf16.msra.mxu1 %v20881_v25 }
 0x98b   : > { %18601 = vmatprep.subr.bf16.mxu1 %v22077_v24 }
 0x98e   : > { %18602 = vmatpush3.bf16.msra.mxu1 %v20882_v32 }
 0x98f   : > { %18607 = vmatprep.subr.bf16.mxu1 %v22077_v24 }
 0xa44   : > { %v4671_v45 = vpop.f32.mrb[84].mxu1 }
 0xa45   : > { %v4677_v49 = vpack.c.bf16 %v4671_v45, %v4671_v45  ;;  %v18585_v62 = vpop.f32.mrb[85].mxu1 }
 0xa46   : > { %v4674_v14 = vpop.f32.mrb[86].mxu1  ;;  %v20939_v62 = vld [vmem:[%s25809_s0] ss:$8 sps:$4 sm:$0xff]  }
 0xa47   : > { %v18586_v15 = vpop.f32.mrb[87].mxu1  ;;  %18604 = vmatmul.mubr.bf16.vlgmr.msra.gmra.mrb[80].mxu1 %v4677_v49  ;;  %v20941_v14 = vld [vmem:[%s25809_s0 + $0x4] ss:$8 sps:$4 sm:$0xff]  }
 0xa48   : > { %18608 = vmatpush3.bf16.msra.mxu1 %v23509_v47  ;;  %18609 = vmatprep.mubr.msk.bf16.mxu1 %vm22078_vm2, %v22077_v24  ;;  %v20908_v15 = vld [vmem:[#allocation14 + $0x148] sm:$0xff]  }
 0xa49   : > { %18613 = vmatprep.subr.bf16.mxu1 %v22077_v24  ;;  %5930 = vmatprep.subr.bf16.mxu0 %v20941_v14  ;;  %v20971_v14 = vld [vmem:[%s25809_s0 + $0xa4] ss:$8 sps:$4 sm:$0xff]  }
 0xa4a   : > { %5931 = vmatpush1.bf16.msra.mxu0 %v20939_v62  ;;  %v20966_v62 = vld [vmem:[%s25809_s0 + $0x90] ss:$8 sps:$4 sm:$0xff]  }
 0xa4f   : > { %18610 = vmatmul.mubr.msk.bf16.vlgmr.msra.gmra.mrb[88].mxu1 %vm4481_vm4, %v4768_v30  ;;  %v20944_v30 = vld [vmem:[%s25809_s0 + $0x14] ss:$8 sps:$4 sm:$0xff]  }
 0xa50   : > { %18614 = vmatpush3.bf16.msra.mxu1 %v20883_v41  ;;  %18629 = vmatprep.mubr.msk.bf16.mxu1 %vm22078_vm2, %v22077_v24  ;;  %v20942_v41 = vld [vmem:[%s25809_s0 + $0x10] ss:$8 sps:$4 sm:$0xff]  }
 0xa51   : > { %18615 = vmatprep.subr.bf16.mxu1 %v22077_v24  ;;  %5932 = vmatprep.subr.bf16.mxu0 %v20944_v30  ;;  %v20974_v30 = vld [vmem:[%s25809_s0 + $0xb4] ss:$8 sps:$4 sm:$0xff]  }
 0xa52   : > { %5933 = vmatpush1.bf16.msra.mxu0 %v20942_v41  ;;  %v20972_v41 = vld [vmem:[%s25809_s0 + $0xb0] ss:$8 sps:$4 sm:$0xff]  }
 0xa54   : > { %18616 = vmatpush3.bf16.msra.mxu1 %v20884_v48  ;;  %v20947_v48 = vld [vmem:[%s25809_s0 + $0x24] ss:$8 sps:$4 sm:$0xff]  }
 0xa55   : > { %18617 = vmatprep.subr.bf16.mxu1 %v22077_v24  ;;  %5934 = vmatprep.subr.bf16.mxu0 %v20947_v48  ;;  %v20977_v48 = vld [vmem:[%s25809_s0 + $0xc4] ss:$8 sps:$4 sm:$0xff]  }
 0xa58   : > { %18618 = vmatpush3.bf16.msra.mxu1 %v20885_v57  ;;  %v20909_v57 = vld [vmem:[#allocation14 + $0x150] sm:$0xff]  }
 0xa59   : > { %18619 = vmatprep.subr.bf16.mxu1 %v22077_v24 }
 0xa5c   : > { %18620 = vmatpush3.bf16.msra.mxu1 %v20886_v0  ;;  %v20945_v0 = vld [vmem:[%s25809_s0 + $0x20] ss:$8 sps:$4 sm:$0xff]  }
 0xa5d   : > { %18621 = vmatprep.subr.bf16.mxu1 %v22077_v24  ;;  %5935 = vmatpush1.bf16.msra.mxu0 %v20945_v0  ;;  %v20980_v0 = vld [vmem:[%s25809_s0 + $0xd4] ss:$8 sps:$4 sm:$0xff]  }
 0xa60   : > { %18622 = vmatpush3.bf16.msra.mxu1 %v20887_v17  ;;  %v20950_v17 = vld [vmem:[%s25809_s0 + $0x34] ss:$8 sps:$4 sm:$0xff]  }
 0xa61   : > { %18623 = vmatprep.subr.bf16.mxu1 %v22077_v24  ;;  %5936 = vmatprep.subr.bf16.mxu0 %v20950_v17  ;;  %v20978_v17 = vld [vmem:[%s25809_s0 + $0xd0] ss:$8 sps:$4 sm:$0xff]  }
 0xa64   : > { %18624 = vmatpush3.bf16.msra.mxu1 %v20888_v34  ;;  %v20910_v34 = vld [vmem:[#allocation14 + $0x158] sm:$0xff]  }
 0xa65   : > { %18625 = vmatprep.subr.bf16.mxu1 %v22077_v24 }
 0xa68   : > { %18626 = vmatpush3.bf16.msra.mxu1 %v20889_v58  ;;  %v20948_v58 = vld [vmem:[%s25809_s0 + $0x30] ss:$8 sps:$4 sm:$0xff]  }
 0xa69   : > { %18627 = vmatprep.subr.bf16.mxu1 %v22077_v24  ;;  %5937 = vmatpush1.bf16.msra.mxu0 %v20948_v58  ;;  %v20981_v58 = vld [vmem:[%s25809_s0 + $0xe0] ss:$8 sps:$4 sm:$0xff]  }
 0xa6c   : > { %18628 = vmatpush3.bf16.msra.mxu1 %v20890_v5  ;;  %v20953_v5 = vld [vmem:[%s25809_s0 + $0x44] ss:$8 sps:$4 sm:$0xff]  }
 0xa6d   : > { %18633 = vmatprep.subr.bf16.mxu1 %v22077_v24  ;;  %5938 = vmatprep.subr.bf16.mxu0 %v20953_v5  ;;  %v20986_v5 = vld [vmem:[%s25809_s0 + $0xf4] ss:$8 sps:$4 sm:$0xff]  }
 0xb22   : > { %v4823_v12 = vpop.f32.mrb[88].mxu1 }
 0xb23   : > { %v4829_v39 = vpack.c.bf16 %v4823_v12, %v4823_v12  ;;  %v18611_v43 = vpop.f32.mrb[89].mxu1  ;;  %v20911_v12 = vld [vmem:[#allocation14 + $0x160] sm:$0xff]  }
 0xb24   : > { %v4826_v50 = vpop.f32.mrb[90].mxu1  ;;  %v20956_v43 = vld [vmem:[%s25809_s0 + $0x54] ss:$8 sps:$4 sm:$0xff]  }
 0xb25   : > { %v18612_v59 = vpop.f32.mrb[91].mxu1  ;;  %18630 = vmatmul.mubr.bf16.vlgmr.msra.gmra.mrb[80].mxu1 %v4829_v39  ;;  %v20951_v39 = vld [vmem:[%s25809_s0 + $0x40] ss:$8 sps:$4 sm:$0xff]   ;;  %v20912_v50 = vld [vmem:[#allocation14 + $0x168] sm:$0xff]  }
 0xb26   : > { %18634 = vmatpush3.bf16.msra.mxu1 %v23509_v47  ;;  %18635 = vmatprep.mubr.msk.bf16.mxu1 %vm22078_vm2, %v22077_v24  ;;  %v20954_v59 = vld [vmem:[%s25809_s0 + $0x50] ss:$8 sps:$4 sm:$0xff]  }
 0xb27   : > { %18639 = vmatprep.subr.bf16.mxu1 %v22077_v24  ;;  %5939 = vmatpush1.bf16.msra.mxu0 %v20951_v39  ;;  %v20989_v39 = vld [vmem:[%s25809_s0 + $0x104] ss:$8 sps:$4 sm:$0xff]  }
 0xb28   : > { %5940 = vmatprep.subr.bf16.mxu0 %v20956_v43  ;;  %v20987_v43 = vld [vmem:[%s25809_s0 + $0x100] ss:$8 sps:$4 sm:$0xff]  }
 0xb2b   : > { %5941 = vmatpush1.bf16.msra.mxu0 %v20954_v59  ;;  %v20992_v59 = vld [vmem:[%s25809_s0 + $0x114] ss:$8 sps:$4 sm:$0xff]  }
 0xb2d   : > { %18636 = vmatmul.mubr.msk.bf16.vlgmr.msra.gmra.mrb[92].mxu1 %vm4481_vm4, %v4920_v60  ;;  %v20959_v60 = vld [vmem:[%s25809_s0 + $0x64] ss:$8 sps:$4 sm:$0xff]  }
 0xb2e   : > { %18640 = vmatpush3.bf16.msra.mxu1 %v20891_v3  ;;  %18655 = vmatprep.mubr.msk.bf16.mxu1 %vm22078_vm2, %v22077_v24  ;;  %v20913_v3 = vld [vmem:[#allocation14 + $0x170] sm:$0xff]  }
 0xb2f   : > { %18641 = vmatprep.subr.bf16.mxu1 %v22077_v24  ;;  %5942 = vmatprep.subr.bf16.mxu0 %v20959_v60  ;;  %v20990_v60 = vld [vmem:[%s25809_s0 + $0x110] ss:$8 sps:$4 sm:$0xff]  }
 0xb32   : > { %18642 = vmatpush3.bf16.msra.mxu1 %v20892_v10  ;;  %v20957_v10 = vld [vmem:[%s25809_s0 + $0x60] ss:$8 sps:$4 sm:$0xff]  }
 0xb33   : > { %18643 = vmatprep.subr.bf16.mxu1 %v22077_v24  ;;  %5943 = vmatpush1.bf16.msra.mxu0 %v20957_v10  ;;  %v20993_v10 = vld [vmem:[%s25809_s0 + $0x120] ss:$8 sps:$4 sm:$0xff]  }
 0xb36   : > { %18644 = vmatpush3.bf16.msra.mxu1 %v20893_v13  ;;  %v20914_v13 = vld [vmem:[#allocation14 + $0x178] sm:$0xff]  }
 0xb37   : > { %18645 = vmatprep.subr.bf16.mxu1 %v22077_v24 }
 0xb3a   : > { %18646 = vmatpush3.bf16.msra.mxu1 %v20894_v29  ;;  %v5285_v29 = vpack.c.bf16 %v23601_v18, %v23601_v18  ;;  %v20932_v18 = vld [vmem:[#allocation14 + $0x208] sm:$0xff]  }
 0xb3b   : > { %18647 = vmatprep.subr.bf16.mxu1 %v22077_v24 }
 0xb3e   : > { %18648 = vmatpush3.bf16.msra.mxu1 %v20895_v38  ;;  %v20915_v38 = vld [vmem:[#allocation14 + $0x180] sm:$0xff]  }
 0xb3f   : > { %18649 = vmatprep.subr.bf16.mxu1 %v22077_v24 }
 0xb42   : > { %18650 = vmatpush3.bf16.msra.mxu1 %v20896_v56  ;;  %v20916_v56 = vld [vmem:[#allocation14 + $0x188] sm:$0xff]  }
 0xb43   : > { %18651 = vmatprep.subr.bf16.mxu1 %v22077_v24 }
 0xb46   : > { %18652 = vmatpush3.bf16.msra.mxu1 %v20897_v28  ;;  %v20917_v28 = vld [vmem:[#allocation14 + $0x190] sm:$0xff]  }
 0xb47   : > { %18653 = vmatprep.subr.bf16.mxu1 %v22077_v24 }
 0xb4a   : > { %18654 = vmatpush3.bf16.msra.mxu1 %v20898_v23  ;;  %v20918_v23 = vld [vmem:[#allocation14 + $0x198] sm:$0xff]  }
 0xb4b   : > { %18659 = vmatprep.subr.bf16.mxu1 %v22077_v24 }
 0xc00   : > { %v4975_v42 = vpop.f32.mrb[92].mxu1 }
 0xc01   : > { %v4981_v46 = vpack.c.bf16 %v4975_v42, %v4975_v42  ;;  %v18637_v11 = vpop.f32.mrb[93].mxu1  ;;  %v20920_v42 = vld [vmem:[#allocation14 + $0x1a8] sm:$0xff]  }
 0xc02   : > { %v4978_v19 = vpop.f32.mrb[94].mxu1  ;;  %v20922_v11 = vld [vmem:[#allocation14 + $0x1b8] sm:$0xff]  }
 0xc03   : > { %v18638_v22 = vpop.f32.mrb[95].mxu1  ;;  %18656 = vmatmul.mubr.bf16.vlgmr.msra.gmra.mrb[80].mxu1 %v4981_v46  ;;  %v20921_v46 = vld [vmem:[#allocation14 + $0x1b0] sm:$0xff]   ;;  %v5437_v19 = vpack.c.bf16 %v23603_v61, %v23603_v61  ;;  %v20936_v61 = vld [vmem:[#allocation14 + $0x228] sm:$0xff]  }
 0xc04   : > { %18660 = vmatpush3.bf16.msra.mxu1 %v23509_v47  ;;  %18661 = vmatprep.mubr.msk.bf16.mxu1 %vm22078_vm2, %v22077_v24  ;;  %v20902_v47 = vld [vmem:[#allocation14 + $0x118] sm:$0xff]   ;;  %v20923_v22 = vld [vmem:[#allocation14 + $0x1c0] sm:$0xff]  }
 0xc05   : > { %18665 = vmatprep.subr.bf16.mxu1 %v22077_v24 }
 0xc0b   : > { %18662 = vmatmul.mubr.msk.bf16.vlgmr.msra.gmra.mrb[96].mxu1 %vm4481_vm4, %v5072_v52  ;;  %v20924_v52 = vld [vmem:[#allocation14 + $0x1c8] sm:$0xff]  }
 0xc0c   : > { %18666 = vmatpush3.bf16.msra.mxu1 %v20899_v44  ;;  %18681 = vmatprep.mubr.msk.bf16.mxu1 %vm22078_vm2, %v22077_v24  ;;  %v20925_v44 = vld [vmem:[#allocation14 + $0x1d0] sm:$0xff]  }
 0xc0d   : > { %18667 = vmatprep.subr.bf16.mxu1 %v22077_v24 }
 0xc10   : > { %18668 = vmatpush3.bf16.msra.mxu1 %v20900_v51  ;;  %v20926_v51 = vld [vmem:[#allocation14 + $0x1d8] sm:$0xff]  }
 0xc11   : > { %18669 = vmatprep.subr.bf16.mxu1 %v22077_v24 }
 0xc14   : > { %18670 = vmatpush3.bf16.msra.mxu1 %v20901_v55  ;;  %v20927_v55 = vld [vmem:[#allocation14 + $0x1e0] sm:$0xff]  }
 0xc15   : > { %18671 = vmatprep.subr.bf16.mxu1 %v22077_v24 }
 0xc18   : > { %18672 = vmatpush3.bf16.msra.mxu1 %v20902_v47  ;;  %v20928_v47 = vld [vmem:[#allocation14 + $0x1e8] sm:$0xff]  }
 0xc19   : > { %18673 = vmatprep.subr.bf16.mxu1 %v22077_v24 }
 0xc1c   : > { %18674 = vmatpush3.bf16.msra.mxu1 %v20903_v63  ;;  %v20929_v63 = vld [vmem:[#allocation14 + $0x1f0] sm:$0xff]  }
 0xc1d   : > { %18675 = vmatprep.subr.bf16.mxu1 %v22077_v24 }
 0xc20   : > { %18676 = vmatpush3.bf16.msra.mxu1 %v20904_v2  ;;  %v20930_v2 = vld [vmem:[#allocation14 + $0x1f8] sm:$0xff]  }
 0xc21   : > { %18677 = vmatprep.subr.bf16.mxu1 %v22077_v24 }
 0xc24   : > { %18678 = vmatpush3.bf16.msra.mxu1 %v20905_v6  ;;  %v5589_v6 = vpack.c.bf16 %v23605_v26, %v23605_v26  ;;  %v20962_v26 = vld [vmem:[%s25809_s0 + $0x74] ss:$8 sps:$4 sm:$0xff]  }
 0xc25   : > { %18679 = vmatprep.subr.bf16.mxu1 %v22077_v24  ;;  %5944 = vmatprep.subr.bf16.mxu0 %v20962_v26  ;;  %v21036_v26 = vld [vmem:[#allocation17 + $0x40] sm:$0xff]  }
 0xc26   : > { %5945 = vmatpush1.bf16.msra.mxu0 %v20960_v27  ;;  %v21037_v27 = vld [vmem:[#allocation17 + $0x8] sm:$0xff]  }
 0xc27   : > { %6091 = vmatprep.subr.bf16.mxu0 %v20965_v36  ;;  %v21038_v36 = vld [vmem:[#allocation17 + $0x48] sm:$0xff]  }
 0xc28   : > { %18680 = vmatpush3.bf16.msra.mxu1 %v20906_v9  ;;  %v20931_v9 = vld [vmem:[#allocation14 + $0x200] sm:$0xff]  }
 0xc29   : > { %18691 = vmatprep.subr.bf16.mxu1 %v22077_v24 }
 0xcde   : > { %v5127_v4 = vpop.f32.mrb[96].mxu1 }
 0xcdf   : > { %v5133_v25 = vpack.c.bf16 %v5127_v4, %v5127_v4  ;;  %v18663_v32 = vpop.f32.mrb[97].mxu1 }
 0xce0   : > { %v5130_v45 = vpop.f32.mrb[98].mxu1  ;;  %v20963_v32 = vld [vmem:[%s25809_s0 + $0x80] ss:$8 sps:$4 sm:$0xff]  }
 0xce1   : > { %v18664_v49 = vpop.f32.mrb[99].mxu1  ;;  %18682 = vmatmul.mubr.bf16.vlgmr.msra.gmra.mrb[80].mxu1 %v5133_v25 }
 0xce2   : > { %18692 = vmatpush3.bf16.msra.mxu1 %v20907_v16  ;;  %18707 = vmatprep.mubr.msk.bf16.mxu1 %vm22078_vm2, %v22077_v24  ;;  %v20968_v49 = vld [vmem:[%s25809_s0 + $0x94] ss:$8 sps:$4 sm:$0xff]  }
 0xce3   : > { %18693 = vmatprep.subr.bf16.mxu1 %v22077_v24 }
 0xce6   : > { %18694 = vmatpush3.bf16.msra.mxu1 %v20908_v15  ;;  %v20969_v15 = vld [vmem:[%s25809_s0 + $0xa0] ss:$8 sps:$4 sm:$0xff]  }
 0xce7   : > { %18695 = vmatprep.subr.bf16.mxu1 %v22077_v24 }
 0xcea   : > { %18696 = vmatpush3.bf16.msra.mxu1 %v20909_v57  ;;  %v20975_v57 = vld [vmem:[%s25809_s0 + $0xc0] ss:$8 sps:$4 sm:$0xff]  }
 0xceb   : > { %18697 = vmatprep.subr.bf16.mxu1 %v22077_v24 }
 0xcee   : > { %18698 = vmatpush3.bf16.msra.mxu1 %v20910_v34  ;;  %v20983_v34 = vld [vmem:[%s25809_s0 + $0xe4] ss:$8 sps:$4 sm:$0xff]  }
 0xcef   : > { %18699 = vmatprep.subr.bf16.mxu1 %v22077_v24 }
 0xcf2   : > { %18700 = vmatpush3.bf16.msra.mxu1 %v20911_v12  ;;  %v20984_v12 = vld [vmem:[%s25809_s0 + $0xf0] ss:$8 sps:$4 sm:$0xff]  }
 0xcf3   : > { %18701 = vmatprep.subr.bf16.mxu1 %v22077_v24 }
 0xcf6   : > { %18702 = vmatpush3.bf16.msra.mxu1 %v20912_v50 }
 0xcf7   : > { %18703 = vmatprep.subr.bf16.mxu1 %v22077_v24 }
 0xcfa   : > { %18704 = vmatpush3.bf16.msra.mxu1 %v20913_v3  ;;  %v20995_v3 = vld [vmem:[%s25809_s0 + $0x124] ss:$8 sps:$4 sm:$0xff]  }
 0xcfb   : > { %18705 = vmatprep.subr.bf16.mxu1 %v22077_v24 }
 0xcfe   : > { %18706 = vmatpush3.bf16.msra.mxu1 %v20914_v13  ;;  %v20998_v13 = vld [vmem:[%s25809_s0 + $0x134] ss:$8 sps:$4 sm:$0xff]  }
 0xcff   : > { %18717 = vmatprep.subr.bf16.mxu1 %v22077_v24 }
 0xd01   : > { %18708 = vmatmul.mubr.bf16.vlgmr.msra.gmra.mrb[80].mxu1 %v5285_v29  ;;  %v20996_v29 = vld [vmem:[%s25809_s0 + $0x130] ss:$8 sps:$4 sm:$0xff]  }
 0xd02   : > { %18718 = vmatpush3.bf16.msra.mxu1 %v20915_v38  ;;  %18733 = vmatprep.mubr.msk.bf16.mxu1 %vm22078_vm2, %v22077_v24  ;;  %v21001_v38 = vld [vmem:[%s25809_s0 + $0x144] ss:$8 sps:$4 sm:$0xff]  }
 0xd03   : > { %18719 = vmatprep.subr.bf16.mxu1 %v22077_v24 }
 0xd06   : > { %18720 = vmatpush3.bf16.msra.mxu1 %v20916_v56  ;;  %v20999_v56 = vld [vmem:[%s25809_s0 + $0x140] ss:$8 sps:$4 sm:$0xff]  }
 0xd07   : > { %18721 = vmatprep.subr.bf16.mxu1 %v22077_v24 }
 0xd0a   : > { %18722 = vmatpush3.bf16.msra.mxu1 %v20917_v28  ;;  %v21004_v28 = vld [vmem:[%s25809_s0 + $0x154] ss:$8 sps:$4 sm:$0xff]  }
 0xd0b   : > { %18723 = vmatprep.subr.bf16.mxu1 %v22077_v24 }
 0xd0e   : > { %18724 = vmatpush3.bf16.msra.mxu1 %v20918_v23  ;;  %v21002_v23 = vld [vmem:[%s25809_s0 + $0x150] ss:$8 sps:$4 sm:$0xff]  }
 0xd0f   : > { %18725 = vmatprep.subr.bf16.mxu1 %v22077_v24 }
 0xd12   : > { %18726 = vmatpush3.bf16.msra.mxu1 %v20919_v33  ;;  %v21007_v33 = vld [vmem:[%s25809_s0 + $0x164] ss:$8 sps:$4 sm:$0xff]  }
 0xd13   : > { %18727 = vmatprep.subr.bf16.mxu1 %v22077_v24 }
 0xd16   : > { %18728 = vmatpush3.bf16.msra.mxu1 %v20920_v42  ;;  %v21005_v42 = vld [vmem:[%s25809_s0 + $0x160] ss:$8 sps:$4 sm:$0xff]  }
 0xd17   : > { %18729 = vmatprep.subr.bf16.mxu1 %v22077_v24 }
 0xd1a   : > { %18730 = vmatpush3.bf16.msra.mxu1 %v20921_v46  ;;  %v21010_v46 = vld [vmem:[%s25809_s0 + $0x174] ss:$8 sps:$4 sm:$0xff]  }
 0xd1b   : > { %18731 = vmatprep.subr.bf16.mxu1 %v22077_v24 }
 0xd1e   : > { %18732 = vmatpush3.bf16.msra.mxu1 %v20922_v11  ;;  %v21008_v11 = vld [vmem:[%s25809_s0 + $0x170] ss:$8 sps:$4 sm:$0xff]  }
 0xd1f   : > { %18743 = vmatprep.subr.bf16.mxu1 %v22077_v24 }
 0xd21   : > { %18734 = vmatmul.mubr.bf16.vlgmr.msra.gmra.mrb[80].mxu1 %v5437_v19  ;;  %v21013_v19 = vld [vmem:[%s25809_s0 + $0x184] ss:$8 sps:$4 sm:$0xff]  }
 0xd22   : > { %18744 = vmatpush3.bf16.msra.mxu1 %v20923_v22  ;;  %18759 = vmatprep.mubr.msk.bf16.mxu1 %vm22078_vm2, %v22077_v24  ;;  %v21011_v22 = vld [vmem:[%s25809_s0 + $0x180] ss:$8 sps:$4 sm:$0xff]  }
 0xd23   : > { %18745 = vmatprep.subr.bf16.mxu1 %v22077_v24 }
 0xd26   : > { %18746 = vmatpush3.bf16.msra.mxu1 %v20924_v52 }
 0xd27   : > { %18747 = vmatprep.subr.bf16.mxu1 %v22077_v24 }
 0xd2a   : > { %18748 = vmatpush3.bf16.msra.mxu1 %v20925_v44  ;;  %v21016_v44 = vld [vmem:[%s25809_s0 + $0x194] ss:$8 sps:$4 sm:$0xff]  }
 0xd2b   : > { %18749 = vmatprep.subr.bf16.mxu1 %v22077_v24 }
 0xd2e   : > { %18750 = vmatpush3.bf16.msra.mxu1 %v20926_v51  ;;  %v21014_v51 = vld [vmem:[%s25809_s0 + $0x190] ss:$8 sps:$4 sm:$0xff]  }
 0xd2f   : > { %18751 = vmatprep.subr.bf16.mxu1 %v22077_v24 }
 0xd32   : > { %18752 = vmatpush3.bf16.msra.mxu1 %v20927_v55  ;;  %v21019_v55 = vld [vmem:[%s25809_s0 + $0x1a4] ss:$8 sps:$4 sm:$0xff]  }
 0xd33   : > { %18753 = vmatprep.subr.bf16.mxu1 %v22077_v24 }
 0xd36   : > { %18754 = vmatpush3.bf16.msra.mxu1 %v20928_v47  ;;  %v21017_v47 = vld [vmem:[%s25809_s0 + $0x1a0] ss:$8 sps:$4 sm:$0xff]  }
 0xd37   : > { %18755 = vmatprep.subr.bf16.mxu1 %v22077_v24 }
 0xd3a   : > { %18756 = vmatpush3.bf16.msra.mxu1 %v20929_v63  ;;  %v21022_v63 = vld [vmem:[%s25809_s0 + $0x1b4] ss:$8 sps:$4 sm:$0xff]  }
 0xd3b   : > { %18757 = vmatprep.subr.bf16.mxu1 %v22077_v24 }
 0xd3e   : > { %18758 = vmatpush3.bf16.msra.mxu1 %v20930_v2  ;;  %v21020_v2 = vld [vmem:[%s25809_s0 + $0x1b0] ss:$8 sps:$4 sm:$0xff]  }
 0xd3f   : > { %18769 = vmatprep.subr.bf16.mxu1 %v22077_v24 }
 0xd41   : > { %18760 = vmatmul.mubr.bf16.vlgmr.msra.gmra.mrb[80].mxu1 %v5589_v6  ;;  %v21025_v6 = vld [vmem:[%s25809_s0 + $0x1c4] ss:$8 sps:$4 sm:$0xff]  }
 0xd42   : > { %18770 = vmatpush3.bf16.msra.mxu1 %v20931_v9  ;;  %18785 = vmatprep.mubr.msk.bf16.mxu1 %vm22078_vm2, %v22077_v24  ;;  %v21023_v9 = vld [vmem:[%s25809_s0 + $0x1c0] ss:$8 sps:$4 sm:$0xff]  }
 0xd43   : > { %18771 = vmatprep.subr.bf16.mxu1 %v22077_v24 }
 0xd46   : > { %18772 = vmatpush3.bf16.msra.mxu1 %v20932_v18  ;;  %v21028_v18 = vld [vmem:[%s25809_s0 + $0x1d4] ss:$8 sps:$4 sm:$0xff]  }
 0xd47   : > { %18773 = vmatprep.subr.bf16.mxu1 %v22077_v24 }
 0xd4a   : > { %18774 = vmatpush3.bf16.msra.mxu1 %v20933_v21  ;;  %v21026_v21 = vld [vmem:[%s25809_s0 + $0x1d0] ss:$8 sps:$4 sm:$0xff]  }
 0xd4b   : > { %18775 = vmatprep.subr.bf16.mxu1 %v22077_v24 }
 0xd4e   : > { %18776 = vmatpush3.bf16.msra.mxu1 %v20934_v31  ;;  %v21031_v31 = vld [vmem:[%s25809_s0 + $0x1e4] ss:$8 sps:$4 sm:$0xff]  }
 0xd4f   : > { %18777 = vmatprep.subr.bf16.mxu1 %v22077_v24 }
 0xd52   : > { %18778 = vmatpush3.bf16.msra.mxu1 %v20935_v35  ;;  %v21029_v35 = vld [vmem:[%s25809_s0 + $0x1e0] ss:$8 sps:$4 sm:$0xff]  }
 0xd53   : > { %18779 = vmatprep.subr.bf16.mxu1 %v22077_v24 }
 0xd56   : > { %18780 = vmatpush3.bf16.msra.mxu1 %v20936_v61  ;;  %v21034_v61 = vld [vmem:[%s25809_s0 + $0x1f4] ss:$8 sps:$4 sm:$0xff]  }
 0xd57   : > { %18781 = vmatprep.subr.bf16.mxu1 %v22077_v24 }
 0xd5a   : > { %18782 = vmatpush3.bf16.msra.mxu1 %v20937_v7  ;;  %v21032_v7 = vld [vmem:[%s25809_s0 + $0x1f0] ss:$8 sps:$4 sm:$0xff]  }
 0xd5b   : > { %18783 = vmatprep.subr.bf16.mxu1 %v22077_v24 }
 0xd5e   : > { %18784 = vmatpush3.bf16.msra.mxu1 %v20938_v8 }
 0xd5f   : > { %18809 = vmatprep.subr.bf16.mxu1 %v22077_v24 }
 0xd61   : > { %18786 = vmatmul.mubr.bf16.vlgmr.msra.gmra.mrb[80].mxu1 %v5741_v20  ;;  %v21035_v20 = vld [vmem:[#allocation17] sm:$0xff]  }
 0xd62   : > { %18825 = vmatprep.mubr.msk.bf16.mxu1 %vm22078_vm2, %v22077_v24  ;;  %18810 = vmatpush3.bf16.msra.mxu1 %v21036_v26 }
 0xd63   : > { %18811 = vmatprep.subr.bf16.mxu1 %v22077_v24 }
 0xd66   : > { %18812 = vmatpush3.bf16.msra.mxu1 %v21038_v36  ;;  %v21054_v36 = vld [vmem:[#allocation17 + $0xc8] sm:$0xff]  }
 0xd67   : > { %18813 = vmatprep.subr.bf16.mxu1 %v22077_v24 }
 0xe34   : > { %v5824_v53 = vpop.f32.mrb[80].mxu1 }
 0xe35   : > { %v19967_v54 = vadd.f32 %v15590_v40, %v5824_v53  ;;  %v18787_v1 = vpop.f32.mrb[81].mxu1  ;;  %v21040_v40 = vld [vmem:[#allocation17 + $0x50] sm:$0xff]   ;;  %v21041_v53 = vld [vmem:[#allocation17 + $0x18] sm:$0xff]  }
 0xe36   : > { %v5827_v4 = vpop.f32.mrb[82].mxu1  ;;  %18814 = vmatpush3.bf16.msra.mxu1 %v21040_v40  ;;  %v21043_v1 = vld [vmem:[#allocation17 + $0x20] sm:$0xff]   ;;  %v21056_v40 = vld [vmem:[#allocation17 + $0xd0] sm:$0xff]  }
 0xe37   : > { %v5831_v16 = vmax.f32 %v19967_v54, 0.0  ;;  %v18788_v25 = vpop.f32.mrb[83].mxu1  ;;  %18815 = vmatprep.subr.bf16.mxu1 %v22077_v24  ;;  %v21042_v54 = vld [vmem:[#allocation17 + $0x58] sm:$0xff]   ;;  %v21044_v4 = vld [vmem:[#allocation17 + $0x60] sm:$0xff]  }
 0xe38   : > { %v21046_v25 = vld [vmem:[#allocation17 + $0x68] sm:$0xff]  }
 0xe39   : > { %v23714_v45 = vpack.c.bf16 %v5831_v16, %v5831_v16  ;;  %v21045_v16 = vld [vmem:[#allocation17 + $0x28] sm:$0xff]  }
 0xe3a   : > { %18816 = vmatpush3.bf16.msra.mxu1 %v21042_v54  ;;  %v21058_v54 = vld [vmem:[#allocation17 + $0xd8] sm:$0xff]  }
 0xe3b   : > { %5963 = vmatmul.mubr.bf16.vlgmr.msra.gmra.mrb[132].mxu0 %v23714_v45  ;;  %v6008_v50 = vshrl.u32 %v23714_v45, 16  ;;  %v6169_v52 = vrot.slane %v23714_v45, 1  ;;  %18817 = vmatprep.subr.bf16.mxu1 %v22077_v24  ;;  %v21048_v45 = vld [vmem:[#allocation17 + $0x70] sm:$0xff]  }
 0xe3c   : > { %6092 = vmatpush1.bf16.msra.mxu0 %v20963_v32  ;;  %6123 = vmatprep.mubr.bf16.mxu0 %v22079_v37  ;;  %v21047_v32 = vld [vmem:[#allocation17 + $0x30] sm:$0xff]  }
 0xe3d   : > { %6093 = vmatprep.subr.bf16.mxu0 %v20968_v49  ;;  %v6328_v8 = vrot.slane %v6008_v50, 1  ;;  %v21049_v49 = vld [vmem:[#allocation17 + $0x38] sm:$0xff]  }
 0xe3e   : > { %18818 = vmatpush3.bf16.msra.mxu1 %v21044_v4  ;;  %v21060_v4 = vld [vmem:[#allocation17 + $0xe0] sm:$0xff]  }
 0xe3f   : > { %18819 = vmatprep.subr.bf16.mxu1 %v22077_v24 }
 0xe40   : > { %6094 = vmatpush1.bf16.msra.mxu0 %v20966_v62  ;;  %v21050_v62 = vld [vmem:[#allocation17 + $0x78] sm:$0xff]  }
 0xe41   : > { %6095 = vmatprep.subr.bf16.mxu0 %v20971_v14 }
 0xe42   : > { %18820 = vmatpush3.bf16.msra.mxu1 %v21046_v25  ;;  %v21062_v25 = vld [vmem:[#allocation17 + $0xe8] sm:$0xff]  }
 0xe43   : > { %18821 = vmatprep.subr.bf16.mxu1 %v22077_v24 }
 0xe44   : > { %6096 = vmatpush1.bf16.msra.mxu0 %v20969_v15 }
 0xe45   : > { %6097 = vmatprep.subr.bf16.mxu0 %v20974_v30 }
 0xe46   : > { %18822 = vmatpush3.bf16.msra.mxu1 %v21048_v45  ;;  %v21064_v45 = vld [vmem:[#allocation17 + $0xf0] sm:$0xff]  }
 0xe47   : > { %18823 = vmatprep.subr.bf16.mxu1 %v22077_v24 }
 0xe48   : > { %6098 = vmatpush1.bf16.msra.mxu0 %v20972_v41 }
 0xe49   : > { %6099 = vmatprep.subr.bf16.mxu0 %v20977_v48 }
 0xe4a   : > { %18824 = vmatpush3.bf16.msra.mxu1 %v21050_v62  ;;  %v21066_v62 = vld [vmem:[#allocation17 + $0xf8] sm:$0xff]  }
 0xe4b   : > { %18849 = vmatprep.subr.bf16.mxu1 %v22077_v24 }
 0xe4c   : > { %6100 = vmatpush1.bf16.msra.mxu0 %v20975_v57  ;;  %v22080_v57 = vmov 1966171168  }
 0xe4d   : > { %6101 = vmatprep.subr.bf16.mxu0 %v20980_v0  ;;  %v5975_v0 = vunpack.c.l.s4 %v22080_v57  ;;  %v21072_v57 = vld [vmem:[#allocation20 + $0x28] sm:$0xff]  }
 0xe50   : > { %6102 = vmatpush1.bf16.msra.mxu0 %v20978_v17  ;;  %v5977_v17 = vlaneseq }
 0xe51   : > { %6103 = vmatprep.subr.bf16.mxu0 %v20983_v34  ;;  %v5976_v34 = vunpack.c.0.s8 %v5975_v0  ;;  %v21073_v0 = vld [vmem:[#allocation20 + $0x30] sm:$0xff]  }
 0xe54   : > { %6104 = vmatpush1.bf16.msra.mxu0 %v20981_v58  ;;  %v5978_v58 = vshrl.u32 %v5977_v17, 7  ;;  %v21074_v17 = vld [vmem:[#allocation20 + $0x38] sm:$0xff]  }
 0xe55   : > { %6105 = vmatprep.subr.bf16.mxu0 %v20986_v5 }
 0xe56   : > { %v5979_v5 = vsub.s32 %v5976_v34, %v5978_v58  ;;  %v6498_v34 = vld [vmem:[%s25691_s14] sm:$0x1]  ;;  %v15792_v58 = vld [vmem:[%s25691_s14 + $0x1] sm:$0x1] }
 0xe58   : > { %6106 = vmatpush1.bf16.msra.mxu0 %v20984_v12 }
 0xe59   : > { %6251 = vmatprep.subr.bf16.mxu0 %v20989_v39 }
 0xe5b   : > { %6124 = vmatmul.mubr.bf16.vlgmr.msra.gmra.mrb[136].mxu0 %v6008_v50 }
 0xe5c   : > { %6252 = vmatpush1.bf16.msra.mxu0 %v20987_v43  ;;  %6283 = vmatprep.mubr.bf16.mxu0 %v22079_v37 }
 0xe5d   : > { %6253 = vmatprep.subr.bf16.mxu0 %v20992_v59 }
 0xe60   : > { %6254 = vmatpush1.bf16.msra.mxu0 %v20990_v60 }
 0xe61   : > { %6255 = vmatprep.subr.bf16.mxu0 %v20995_v3  ;;  %v5833_v3 = vld [vmem:[%s25810_s11] sm:$0x3] }
 0xe64   : > { %6256 = vmatpush1.bf16.msra.mxu0 %v20993_v10 }
 0xe65   : > { %6257 = vmatprep.subr.bf16.mxu0 %v20998_v13 }
 0xe68   : > { %6258 = vmatpush1.bf16.msra.mxu0 %v20996_v29 }
 0xe69   : > { %6259 = vmatprep.subr.bf16.mxu0 %v21001_v38 }
 0xe6c   : > { %6260 = vmatpush1.bf16.msra.mxu0 %v20999_v56 }
 0xe6d   : > { %6261 = vmatprep.subr.bf16.mxu0 %v21004_v28 }
 0xe70   : > { %6262 = vmatpush1.bf16.msra.mxu0 %v21002_v23 }
 0xe71   : > { %6263 = vmatprep.subr.bf16.mxu0 %v21007_v33 }
 0xe74   : > { %6264 = vmatpush1.bf16.msra.mxu0 %v21005_v42 }
 0xe75   : > { %6265 = vmatprep.subr.bf16.mxu0 %v21010_v46 }
 0xe78   : > { %6266 = vmatpush1.bf16.msra.mxu0 %v21008_v11 }
 0xe79   : > { %6410 = vmatprep.subr.bf16.mxu0 %v21013_v19 }
 0xe7b   : > { %6284 = vmatmul.mubr.bf16.vlgmr.msra.gmra.mrb[140].mxu0 %v6169_v52 }
 0xe7c   : > { %6411 = vmatpush1.bf16.msra.mxu0 %v21011_v22  ;;  %6442 = vmatprep.mubr.bf16.mxu0 %v22079_v37  ;;  %v21039_v37 = vld [vmem:[#allocation17 + $0x10] sm:$0xff]  }
 0xe7d   : > { %6412 = vmatprep.subr.bf16.mxu0 %v21016_v44 }
 0xe80   : > { %6413 = vmatpush1.bf16.msra.mxu0 %v21014_v51 }
 0xe81   : > { %6414 = vmatprep.subr.bf16.mxu0 %v21019_v55 }
 0xe84   : > { %6415 = vmatpush1.bf16.msra.mxu0 %v21017_v47 }
 0xe85   : > { %6416 = vmatprep.subr.bf16.mxu0 %v21022_v63 }
 0xe88   : > { %6417 = vmatpush1.bf16.msra.mxu0 %v21020_v2 }
 0xe89   : > { %6418 = vmatprep.subr.bf16.mxu0 %v21025_v6 }
 0xe8c   : > { %6419 = vmatpush1.bf16.msra.mxu0 %v21023_v9 }
 0xe8d   : > { %6420 = vmatprep.subr.bf16.mxu0 %v21028_v18 }
 0xe90   : > { %6421 = vmatpush1.bf16.msra.mxu0 %v21026_v21 }
 0xe91   : > { %6422 = vmatprep.subr.bf16.mxu0 %v21031_v31  ;;  %v6475_v31 = vld [vmem:[%s973_s23] sm:$0x1]  ;;  %s16992_s23 = sshll.u32 %s22239_s8, 4 }
 0xe94   : > { %6423 = vmatpush1.bf16.msra.mxu0 %v21029_v35 }
 0xe95   : > { %6424 = vmatprep.subr.bf16.mxu0 %v21034_v61 }
 0xe98   : > { %6425 = vmatpush1.bf16.msra.mxu0 %v21032_v7 }
 0xe99   : > { %18789 = vmatprep.subr.bf16.mxu0 %v22077_v24 }
 0xe9b   : > { %6443 = vmatmul.mubr.bf16.vlgmr.msra.gmra.mrb[144].mxu0 %v6328_v8  ;;  %v21051_v8 = vld [vmem:[#allocation17 + $0x80] sm:$0xff]  }
 0xe9c   : > { %18805 = vmatprep.mubr.msk.bf16.mxu0 %vm22078_vm2, %v22077_v24  ;;  %18790 = vmatpush3.bf16.msra.mxu0 %v21035_v20  ;;  %v21052_v20 = vld [vmem:[#allocation17 + $0xc0] sm:$0xff]  }
 0xe9d   : > { %18791 = vmatprep.subr.bf16.mxu0 %v22077_v24 }
 0xea0   : > { %18792 = vmatpush3.bf16.msra.mxu0 %v21037_v27  ;;  %v21053_v27 = vld [vmem:[#allocation17 + $0x88] sm:$0xff]  }
 0xea1   : > { %18793 = vmatprep.subr.bf16.mxu0 %v22077_v24 }
 0xea4   : > { %18794 = vmatpush3.bf16.msra.mxu0 %v21039_v37  ;;  %v21055_v37 = vld [vmem:[#allocation17 + $0x90] sm:$0xff]  }
 0xea5   : > { %18795 = vmatprep.subr.bf16.mxu0 %v22077_v24 }
 0xea8   : > { %18796 = vmatpush3.bf16.msra.mxu0 %v21041_v53  ;;  %v21057_v53 = vld [vmem:[#allocation17 + $0x98] sm:$0xff]  }
 0xea9   : > { %18797 = vmatprep.subr.bf16.mxu0 %v22077_v24 }
 0xeac   : > { %18798 = vmatpush3.bf16.msra.mxu0 %v21043_v1  ;;  %v21059_v1 = vld [vmem:[#allocation17 + $0xa0] sm:$0xff]  }
 0xead   : > { %18799 = vmatprep.subr.bf16.mxu0 %v22077_v24 }
 0xeb0   : > { %18800 = vmatpush3.bf16.msra.mxu0 %v21045_v16  ;;  %v21061_v16 = vld [vmem:[#allocation17 + $0xa8] sm:$0xff]  }
 0xeb1   : > { %18801 = vmatprep.subr.bf16.mxu0 %v22077_v24 }
 0xeb4   : > { %18802 = vmatpush3.bf16.msra.mxu0 %v21047_v32  ;;  %v21063_v32 = vld [vmem:[#allocation17 + $0xb0] sm:$0xff]  }
 0xeb5   : > { %18803 = vmatprep.subr.bf16.mxu0 %v22077_v24 }
 0xeb8   : > { %18804 = vmatpush3.bf16.msra.mxu0 %v21049_v49  ;;  %v21065_v49 = vld [vmem:[#allocation17 + $0xb8] sm:$0xff]  }
 0xeb9   : > { %18829 = vmatprep.subr.bf16.mxu0 %v22077_v24 }
 0xf0e   : > { %v5964_v14 = vpop.f32.mrb[132].mxu0 }
 0xf0f   : > { %v5966_v15 = vpop.f32.mrb[133].mxu0 }
 0xf10   : > { %v5973_v30 = vcombine.low %v5964_v14, %v5966_v15  ;;  %v5968_v41 = vpop.f32.mrb[134].mxu0  ;;  %v21067_v14 = vld [vmem:[#allocation20] sm:$0xff]   ;;  %v21068_v15 = vld [vmem:[#allocation20 + $0x8] sm:$0xff]  }
 0xf11   : > { %v5969_v48 = vpop.f32.mrb[135].mxu0  ;;  %v21070_v41 = vld [vmem:[#allocation20 + $0x18] sm:$0xff]  }
 0xf12   : > { %v5980_v12 = vrot.slane %v5973_v30, %v5979_v5  ;;  %v21069_v30 = vld [vmem:[#allocation20 + $0x10] sm:$0xff]   ;;  %v21071_v48 = vld [vmem:[#allocation20 + $0x20] sm:$0xff]  }
 0xf14   : > { %v5987_v50 = vrot.slane %v5980_v12, %v5979_v5 }
 0xf16   : > { %v5989_v29 = vadd.f32 %v5987_v50, %v5833_v3 }
 0xf2e   : > { %v6125_v39 = vpop.f32.mrb[136].mxu0 }
 0xf2f   : > { %v6127_v43 = vpop.f32.mrb[137].mxu0 }
 0xf30   : > { %v6134_v59 = vcombine.low %v6125_v39, %v6127_v43  ;;  %v6129_v60 = vpop.f32.mrb[138].mxu0 }
 0xf31   : > { %v6130_v10 = vpop.f32.mrb[139].mxu0 }
 0xf32   : > { %v6141_v13 = vrot.slane %v6134_v59, %v5979_v5 }
 0xf34   : > { %v6148_v38 = vrot.slane %v6141_v13, %v5979_v5 }
 0xf36   : > { %v6150_v56 = vadd.f32 %v6148_v38, %v5989_v29  ;;  %v15801_v29 = vld [vmem:[%s25691_s14 + $0x2] sm:$0x1]  ;;  %v15810_v38 = vld [vmem:[%s25691_s14 + $0x3] sm:$0x1] }
 0xf4e   : > { %v6285_v28 = vpop.f32.mrb[140].mxu0 }
 0xf4f   : > { %v6287_v23 = vpop.f32.mrb[141].mxu0 }
 0xf50   : > { %v6294_v33 = vcombine.low %v6285_v28, %v6287_v23  ;;  %v6289_v42 = vpop.f32.mrb[142].mxu0 }
 0xf51   : > { %v6290_v46 = vpop.f32.mrb[143].mxu0 }
 0xf52   : > { %v6301_v11 = vrot.slane %v6294_v33, %v5979_v5 }
 0xf54   : > { %v6308_v19 = vrot.slane %v6301_v11, %v5979_v5 }
 0xf56   : > { %v6310_v22 = vadd.f32 %v6308_v19, %v6150_v56 }
 0xf6e   : > { %v6444_v52 = vpop.f32.mrb[144].mxu0 }
 0xf6f   : > { %v6446_v44 = vpop.f32.mrb[145].mxu0 }
 0xf70   : > { %v6453_v51 = vcombine.low %v6444_v52, %v6446_v44  ;;  %v6448_v55 = vpop.f32.mrb[146].mxu0 }
 0xf71   : > { %v6449_v47 = vpop.f32.mrb[147].mxu0 }
 0xf72   : > { %v6460_v63 = vrot.slane %v6453_v51, %v5979_v5  ;;  %v21075_v51 = vld [vmem:[#allocation20 + $0x80] sm:$0xff]   ;;  %v21076_v47 = vld [vmem:[#allocation20 + $0x88] sm:$0xff]  }
 0xf74   : > { %v6467_v2 = vrot.slane %v6460_v63, %v5979_v5  ;;  %v21077_v63 = vld [vmem:[#allocation20 + $0x90] sm:$0xff]  }
 0xf76   : > { %v6469_v6 = vadd.f32 %v6467_v2, %v6310_v22  ;;  %v21078_v2 = vld [vmem:[#allocation20 + $0x98] sm:$0xff]  }
 0xf78   : > { %v6472_v9 = vrot.slane %v6469_v6, 1  ;;  %6470 = vst [vmem:[%s959_s24] sm:$0x1] %v6469_v6 }
 0xf7a   : > { %v6476_v18 = vmul.f32 0.5, %v6472_v9  ;;  %6474 = vst [vmem:[%s25738_s5] sm:$0x1] %v6472_v9  ;;  %v21080_v9 = vld [vmem:[#allocation20 + $0xa8] sm:$0xff]   ;;  %s21942_s5 = scalar_lea.vmem %s15044_s28, 16 }
 0xf7b   : > { %p21943_p13 = scmp.ne.s32.totalorder %s15044_s28, %s21942_s5 }
 0xf7c   : > { %v6477_v21 = vmul.f32 1.442695, %v6476_v18  ;;  %v21081_v18 = vld [vmem:[#allocation20 + $0xb0] sm:$0xff]  }
 0xf7e   : > { %21472 = vpow2.f32 %v6477_v21  ;;  %v21082_v21 = vld [vmem:[#allocation20 + $0xb8] sm:$0xff]  }
 0xf88   : > { %v21473_v35 = vpop.eup %21472 }
 0xf89   : > { %v6479_v61 = vmul.f32 %v21473_v35, %v6475_v31  ;;  %v21083_v31 = vld [vmem:[#allocation20 + $0xc0] sm:$0xff]   ;;  %v21084_v35 = vld [vmem:[#allocation20 + $0xc8] sm:$0xff]  }
 0xf8b   : > { %v6480_v7 = vadd.f32 %v6479_v61, %v6469_v6  ;;  %v21079_v6 = vld [vmem:[#allocation20 + $0xa0] sm:$0xff]   ;;  %v21085_v61 = vld [vmem:[#allocation20 + $0xd0] sm:$0xff]  }
 0xf8d   : > { %v6481_v26 = vpack.c.bf16 %v6480_v7, %v6480_v7  ;;  %v21086_v7 = vld [vmem:[#allocation20 + $0xd8] sm:$0xff]  }
 0xf8f   : > { %18806 = vmatmul.mubr.bf16.vlgmr.msra.gmra.mrb[148].mxu0 %v6481_v26  ;;  %18826 = vmatmul.mubr.bf16.vlgmr.msra.gmra.mrb[100].mxu1 %v6481_v26 }
 0xf90   : > { %18830 = vmatpush3.bf16.msra.mxu0 %v21051_v8  ;;  %18850 = vmatpush3.bf16.msra.mxu1 %v21052_v20  ;;  %v21087_v8 = vld [vmem:[#allocation20 + $0xe0] sm:$0xff]   ;;  %v21088_v20 = vld [vmem:[#allocation20 + $0xe8] sm:$0xff]  }
 0xf91   : > { %18831 = vmatprep.subr.bf16.mxu0 %v22077_v24  ;;  %18851 = vmatprep.subr.bf16.mxu1 %v22077_v24 }
 0xf92   : > { %18845 = vmatprep.mubr.msk.bf16.mxu0 %vm22078_vm2, %v22077_v24  ;;  %18865 = vmatprep.mubr.msk.bf16.mxu1 %vm22078_vm2, %v22077_v24 }
 0xf94   : > { %18832 = vmatpush3.bf16.msra.mxu0 %v21053_v27  ;;  %18852 = vmatpush3.bf16.msra.mxu1 %v21054_v36  ;;  %v21090_v27 = vld [vmem:[#allocation20 + $0xf8] sm:$0xff]   ;;  %v21091_v36 = vld [vmem:[#allocation20 + $0x140] sm:$0xff]  }
 0xf95   : > { %18833 = vmatprep.subr.bf16.mxu0 %v22077_v24  ;;  %18853 = vmatprep.subr.bf16.mxu1 %v22077_v24 }
 0xf98   : > { %18834 = vmatpush3.bf16.msra.mxu0 %v21055_v37  ;;  %18854 = vmatpush3.bf16.msra.mxu1 %v21056_v40  ;;  %v21092_v37 = vld [vmem:[#allocation20 + $0x148] sm:$0xff]   ;;  %v21093_v40 = vld [vmem:[#allocation20 + $0x150] sm:$0xff]  }
 0xf99   : > { %18835 = vmatprep.subr.bf16.mxu0 %v22077_v24  ;;  %18855 = vmatprep.subr.bf16.mxu1 %v22077_v24 }
 0xf9c   : > { %18836 = vmatpush3.bf16.msra.mxu0 %v21057_v53  ;;  %18856 = vmatpush3.bf16.msra.mxu1 %v21058_v54  ;;  %v21094_v53 = vld [vmem:[#allocation20 + $0x158] sm:$0xff]   ;;  %v21095_v54 = vld [vmem:[#allocation20 + $0x160] sm:$0xff]  }
 0xf9d   : > { %18837 = vmatprep.subr.bf16.mxu0 %v22077_v24  ;;  %18857 = vmatprep.subr.bf16.mxu1 %v22077_v24 }
 0xfa0   : > { %18838 = vmatpush3.bf16.msra.mxu0 %v21059_v1  ;;  %18858 = vmatpush3.bf16.msra.mxu1 %v21060_v4  ;;  %v21096_v1 = vld [vmem:[#allocation20 + $0x168] sm:$0xff]   ;;  %v21097_v4 = vld [vmem:[#allocation20 + $0x170] sm:$0xff]  }
 0xfa1   : > { %18839 = vmatprep.subr.bf16.mxu0 %v22077_v24  ;;  %18859 = vmatprep.subr.bf16.mxu1 %v22077_v24 }
 0xfa4   : > { %18840 = vmatpush3.bf16.msra.mxu0 %v21061_v16  ;;  %18860 = vmatpush3.bf16.msra.mxu1 %v21062_v25  ;;  %v21098_v16 = vld [vmem:[#allocation20 + $0x178] sm:$0xff]   ;;  %v21099_v25 = vld [vmem:[#allocation20 + $0x1c0] sm:$0xff]  }
 0xfa5   : > { %18841 = vmatprep.subr.bf16.mxu0 %v22077_v24  ;;  %18861 = vmatprep.subr.bf16.mxu1 %v22077_v24 }
 0xfa8   : > { %18842 = vmatpush3.bf16.msra.mxu0 %v21063_v32  ;;  %18862 = vmatpush3.bf16.msra.mxu1 %v21064_v45  ;;  %v21100_v32 = vld [vmem:[#allocation20 + $0x1c8] sm:$0xff]   ;;  %v21101_v45 = vld [vmem:[#allocation20 + $0x1d0] sm:$0xff]  }
 0xfa9   : > { %18843 = vmatprep.subr.bf16.mxu0 %v22077_v24  ;;  %18863 = vmatprep.subr.bf16.mxu1 %v22077_v24 }
 0xfac   : > { %18844 = vmatpush3.bf16.msra.mxu0 %v21065_v49  ;;  %18864 = vmatpush3.bf16.msra.mxu1 %v21066_v62  ;;  %v21102_v49 = vld [vmem:[#allocation20 + $0x1d8] sm:$0xff]   ;;  %v21103_v62 = vld [vmem:[#allocation20 + $0x1e0] sm:$0xff]  }
 0xfad   : > { %18869 = vmatprep.subr.bf16.mxu0 %v22077_v24  ;;  %18889 = vmatprep.subr.bf16.mxu1 %v22077_v24 }
 0xfaf   : > { %18846 = vmatmul.mubr.bf16.vlgmr.msra.gmra.mrb[152].mxu0 %v6481_v26  ;;  %18866 = vmatmul.mubr.bf16.vlgmr.msra.gmra.mrb[104].mxu1 %v6481_v26  ;;  %v21089_v26 = vld [vmem:[#allocation20 + $0xf0] sm:$0xff]  }
 0xfb0   : > { %18885 = vmatprep.mubr.msk.bf16.mxu0 %vm22078_vm2, %v22077_v24  ;;  %18891 = vmatprep.mubr.msk.bf16.mxu1 %vm22078_vm2, %v22077_v24 }
 0xfb1   : > { %18870 = vmatpush3.bf16.msra.mxu0 %v21067_v14  ;;  %v21104_v14 = vld [vmem:[#allocation20 + $0x1e8] sm:$0xff]  }
 0xfb2   : > { %18871 = vmatprep.subr.bf16.mxu0 %v22077_v24 }
 0xfb5   : > { %18872 = vmatpush3.bf16.msra.mxu0 %v21068_v15  ;;  %v21105_v15 = vld [vmem:[#allocation20 + $0x1f0] sm:$0xff]  }
 0xfb6   : > { %18873 = vmatprep.subr.bf16.mxu0 %v22077_v24 }
 0xfb9   : > { %18874 = vmatpush3.bf16.msra.mxu0 %v21069_v30  ;;  %v21106_v30 = vld [vmem:[#allocation20 + $0x1f8] sm:$0xff]  }
 0xfba   : > { %18875 = vmatprep.subr.bf16.mxu0 %v22077_v24 }
 0xfbd   : > { %18876 = vmatpush3.bf16.msra.mxu0 %v21070_v41  ;;  %v21107_v41 = vld [vmem:[#allocation20 + $0x200] sm:$0xff]  }
 0xfbe   : > { %18877 = vmatprep.subr.bf16.mxu0 %v22077_v24 }
 0xfc1   : > { %18878 = vmatpush3.bf16.msra.mxu0 %v21071_v48  ;;  %v21108_v48 = vld [vmem:[#allocation20 + $0x208] sm:$0xff]  }
 0xfc2   : > { %18879 = vmatprep.subr.bf16.mxu0 %v22077_v24 }
 0xfc5   : > { %18880 = vmatpush3.bf16.msra.mxu0 %v21072_v57  ;;  %v21109_v57 = vld [vmem:[#allocation20 + $0x210] sm:$0xff]  }
 0xfc6   : > { %18881 = vmatprep.subr.bf16.mxu0 %v22077_v24 }
 0xfc9   : > { %18882 = vmatpush3.bf16.msra.mxu0 %v21073_v0  ;;  %v21110_v0 = vld [vmem:[#allocation20 + $0x218] sm:$0xff]  }
 0xfca   : > { %18883 = vmatprep.subr.bf16.mxu0 %v22077_v24 }
 0xfcd   : > { %18884 = vmatpush3.bf16.msra.mxu0 %v21074_v17  ;;  %v21111_v17 = vld [vmem:[#allocation20 + $0x220] sm:$0xff]  }
 0xfce   : > { %18921 = vmatprep.subr.bf16.mxu0 %v22077_v24 }
0x1062   : > { %v6581_v5 = vpop.f32.mrb[148].mxu0  ;;  %v6689_v12 = vpop.f32.mrb[100].mxu1 }
0x1063   : > { %v6582_v39 = vadd.f32 %v6581_v5, %v6498_v34  ;;  %v6690_v43 = vadd.f32 %v15792_v58, %v6689_v12  ;;  %v18807_v50 = vpop.f32.mrb[149].mxu0  ;;  %v18827_v59 = vpop.f32.mrb[101].mxu1  ;;  %v21112_v34 = vld [vmem:[#allocation20 + $0x228] sm:$0xff]   ;;  %v21113_v58 = vld [vmem:[#allocation20 + $0x230] sm:$0xff]   ;;  %v21114_v5 = vld [vmem:[#allocation20 + $0x238] sm:$0xff]  }
0x1064   : > { %v6584_v60 = vpop.f32.mrb[150].mxu0  ;;  %v6692_v3 = vpop.f32.mrb[102].mxu1 }
0x1065   : > { %6587 = vst [vmem:[#allocation2] sm:$0x1] %v6582_v39  ;;  %6695 = vst [vmem:[#allocation2 + $0x1] sm:$0x1] %v6690_v43  ;;  %v18808_v10 = vpop.f32.mrb[151].mxu0  ;;  %v18828_v13 = vpop.f32.mrb[103].mxu1 }
0x1066   : > { %v21115_v3 = vld [vmem:[#allocation18] sm:$0xff]   ;;  %v21116_v10 = vld [vmem:[#allocation20 + $0x40] sm:$0xff]   ;;  %v21117_v13 = vld [vmem:[#allocation20 + $0x48] sm:$0xff]  }
0x1082   : > { %v6797_v56 = vpop.f32.mrb[152].mxu0  ;;  %v6905_v28 = vpop.f32.mrb[104].mxu1 }
0x1083   : > { %v6798_v23 = vadd.f32 %v15801_v29, %v6797_v56  ;;  %v6906_v33 = vadd.f32 %v15810_v38, %v6905_v28  ;;  %v18847_v42 = vpop.f32.mrb[153].mxu0  ;;  %v18867_v46 = vpop.f32.mrb[105].mxu1  ;;  %v21118_v29 = vld [vmem:[#allocation20 + $0x50] sm:$0xff]   ;;  %v21119_v38 = vld [vmem:[#allocation20 + $0x58] sm:$0xff]   ;;  %v21120_v56 = vld [vmem:[#allocation20 + $0x60] sm:$0xff]  }
0x1084   : > { %v6800_v11 = vpop.f32.mrb[154].mxu0  ;;  %v6908_v19 = vpop.f32.mrb[106].mxu1  ;;  %v21121_v28 = vld [vmem:[#allocation20 + $0x68] sm:$0xff]   ;;  %v21123_v42 = vld [vmem:[#allocation20 + $0x78] sm:$0xff]  }
0x1085   : > { %6803 = vst [vmem:[#allocation2 + $0x2] sm:$0x1] %v6798_v23  ;;  %6911 = vst [vmem:[#allocation2 + $0x3] sm:$0x1] %v6906_v33  ;;  %v18848_v22 = vpop.f32.mrb[155].mxu0  ;;  %v18868_v52 = vpop.f32.mrb[107].mxu1 }
0x1086   : > { %v21122_v23 = vld [vmem:[#allocation20 + $0x70] sm:$0xff]  }
0x108c   : > { %v6912_v44 = vld [vmem:[#allocation2] sm:$0xf] }
0x108d   : > { %v23943_v55 = vpack.c.bf16 %v6912_v44, %v6912_v44 }
0x108f   : > { %18886 = vmatmul.mubr.bf16.vlgmr.msra.gmra.mrb[156].mxu0 %v23943_v55 }
0x1090   : > { %18922 = vmatpush3.bf16.msra.mxu0 %v21075_v51  ;;  %18937 = vmatprep.mubr.msk.bf16.mxu0 %vm22078_vm2, %v22077_v24 }
0x1091   : > { %18923 = vmatprep.subr.bf16.mxu0 %v22077_v24 }
0x1094   : > { %18924 = vmatpush3.bf16.msra.mxu0 %v21076_v47 }
0x1095   : > { %18925 = vmatprep.subr.bf16.mxu0 %v22077_v24 }
0x1098   : > { %18926 = vmatpush3.bf16.msra.mxu0 %v21077_v63 }
0x1099   : > { %18927 = vmatprep.subr.bf16.mxu0 %v22077_v24 }
0x109c   : > { %18928 = vmatpush3.bf16.msra.mxu0 %v21078_v2 }
0x109d   : > { %18929 = vmatprep.subr.bf16.mxu0 %v22077_v24 }
0x10a0   : > { %18930 = vmatpush3.bf16.msra.mxu0 %v21079_v6 }
0x10a1   : > { %18931 = vmatprep.subr.bf16.mxu0 %v22077_v24 }
0x10a4   : > { %18932 = vmatpush3.bf16.msra.mxu0 %v21080_v9 }
0x10a5   : > { %18933 = vmatprep.subr.bf16.mxu0 %v22077_v24 }
0x10a8   : > { %18934 = vmatpush3.bf16.msra.mxu0 %v21081_v18 }
0x10a9   : > { %18935 = vmatprep.subr.bf16.mxu0 %v22077_v24 }
0x10ac   : > { %18936 = vmatpush3.bf16.msra.mxu0 %v21082_v21 }
0x10ad   : > { %18947 = vmatprep.subr.bf16.mxu0 %v22077_v24 }
0x10af   : > { %18938 = vmatmul.mubr.bf16.vlgmr.msra.gmra.mrb[160].mxu0 %v23943_v55 }
0x10b0   : > { %18948 = vmatpush3.bf16.msra.mxu0 %v21083_v31  ;;  %18963 = vmatprep.mubr.msk.bf16.mxu0 %vm22078_vm2, %v22077_v24 }
0x10b1   : > { %18949 = vmatprep.subr.bf16.mxu0 %v22077_v24 }
0x10b4   : > { %18950 = vmatpush3.bf16.msra.mxu0 %v21084_v35 }
0x10b5   : > { %18951 = vmatprep.subr.bf16.mxu0 %v22077_v24 }
0x10b8   : > { %18952 = vmatpush3.bf16.msra.mxu0 %v21085_v61 }
0x10b9   : > { %18953 = vmatprep.subr.bf16.mxu0 %v22077_v24 }
0x10bc   : > { %18954 = vmatpush3.bf16.msra.mxu0 %v21086_v7 }
0x10bd   : > { %18955 = vmatprep.subr.bf16.mxu0 %v22077_v24 }
0x10c0   : > { %18956 = vmatpush3.bf16.msra.mxu0 %v21087_v8 }
0x10c1   : > { %18957 = vmatprep.subr.bf16.mxu0 %v22077_v24 }
0x10c4   : > { %18958 = vmatpush3.bf16.msra.mxu0 %v21088_v20 }
0x10c5   : > { %18959 = vmatprep.subr.bf16.mxu0 %v22077_v24 }
0x10c8   : > { %18960 = vmatpush3.bf16.msra.mxu0 %v21089_v26 }
0x10c9   : > { %18961 = vmatprep.subr.bf16.mxu0 %v22077_v24 }
0x10cc   : > { %18962 = vmatpush3.bf16.msra.mxu0 %v21090_v27 }
0x10cd   : > { %18999 = vmatprep.subr.bf16.mxu0 %v22077_v24 }
0x10cf   : > { %18964 = vmatmul.mubr.bf16.vlgmr.msra.gmra.mrb[164].mxu0 %v23943_v55 }
0x10d0   : > { %19000 = vmatpush3.bf16.msra.mxu0 %v21091_v36  ;;  %19015 = vmatprep.mubr.msk.bf16.mxu0 %vm22078_vm2, %v22077_v24 }
0x10d1   : > { %19001 = vmatprep.subr.bf16.mxu0 %v22077_v24 }
0x10d4   : > { %19002 = vmatpush3.bf16.msra.mxu0 %v21092_v37 }
0x10d5   : > { %19003 = vmatprep.subr.bf16.mxu0 %v22077_v24 }
0x10d8   : > { %19004 = vmatpush3.bf16.msra.mxu0 %v21093_v40 }
0x10d9   : > { %19005 = vmatprep.subr.bf16.mxu0 %v22077_v24 }
0x10dc   : > { %19006 = vmatpush3.bf16.msra.mxu0 %v21094_v53 }
0x10dd   : > { %19007 = vmatprep.subr.bf16.mxu0 %v22077_v24 }
0x10e0   : > { %19008 = vmatpush3.bf16.msra.mxu0 %v21095_v54  ;;  %v21124_v54 = vld [vmem:[#allocation18 + $0x8] sm:$0xff]  }
0x10e1   : > { %19009 = vmatprep.subr.bf16.mxu0 %v22077_v24 }
0x10e4   : > { %19010 = vmatpush3.bf16.msra.mxu0 %v21096_v1 }
0x10e5   : > { %19011 = vmatprep.subr.bf16.mxu0 %v22077_v24 }
0x10e8   : > { %19012 = vmatpush3.bf16.msra.mxu0 %v21097_v4 }
0x10e9   : > { %19013 = vmatprep.subr.bf16.mxu0 %v22077_v24 }
0x10ec   : > { %19014 = vmatpush3.bf16.msra.mxu0 %v21098_v16  ;;  %v21125_v16 = vld [vmem:[#allocation18 + $0x10] sm:$0xff]  }
0x10ed   : > { %19051 = vmatprep.subr.bf16.mxu0 %v22077_v24 }
0x10ef   : > { %19016 = vmatmul.mubr.bf16.vlgmr.msra.gmra.mrb[168].mxu0 %v23943_v55 }
0x10f0   : > { %19052 = vmatpush3.bf16.msra.mxu0 %v21099_v25  ;;  %19067 = vmatprep.mubr.msk.bf16.mxu0 %vm22078_vm2, %v22077_v24 }
0x10f1   : > { %19053 = vmatprep.subr.bf16.mxu0 %v22077_v24 }
0x10f4   : > { %19054 = vmatpush3.bf16.msra.mxu0 %v21100_v32  ;;  %v21126_v32 = vld [vmem:[#allocation18 + $0x18] sm:$0xff]  }
0x10f5   : > { %19055 = vmatprep.subr.bf16.mxu0 %v22077_v24 }
0x10f8   : > { %19056 = vmatpush3.bf16.msra.mxu0 %v21101_v45  ;;  %v21127_v45 = vld [vmem:[#allocation20 + $0x100] sm:$0xff]  }
0x10f9   : > { %19057 = vmatprep.subr.bf16.mxu0 %v22077_v24 }
0x10fc   : > { %19058 = vmatpush3.bf16.msra.mxu0 %v21102_v49  ;;  %v21128_v49 = vld [vmem:[#allocation20 + $0x108] sm:$0xff]  }
0x10fd   : > { %19059 = vmatprep.subr.bf16.mxu0 %v22077_v24 }
0x1100   : > { %19060 = vmatpush3.bf16.msra.mxu0 %v21103_v62  ;;  %v21129_v62 = vld [vmem:[#allocation20 + $0x110] sm:$0xff]  }
0x1101   : > { %19061 = vmatprep.subr.bf16.mxu0 %v22077_v24 }
0x1104   : > { %19062 = vmatpush3.bf16.msra.mxu0 %v21104_v14  ;;  %v21130_v14 = vld [vmem:[#allocation20 + $0x118] sm:$0xff]  }
0x1105   : > { %19063 = vmatprep.subr.bf16.mxu0 %v22077_v24 }
0x1108   : > { %19064 = vmatpush3.bf16.msra.mxu0 %v21105_v15  ;;  %v21131_v15 = vld [vmem:[#allocation20 + $0x120] sm:$0xff]  }
0x1109   : > { %19065 = vmatprep.subr.bf16.mxu0 %v22077_v24 }
0x110c   : > { %19066 = vmatpush3.bf16.msra.mxu0 %v21106_v30  ;;  %v21132_v30 = vld [vmem:[#allocation20 + $0x128] sm:$0xff]  }
0x110d   : > { %19077 = vmatprep.subr.bf16.mxu0 %v22077_v24 }
0x110f   : > { %19068 = vmatmul.mubr.bf16.vlgmr.msra.gmra.mrb[172].mxu0 %v23943_v55 }
0x1110   : > { %19078 = vmatpush3.bf16.msra.mxu0 %v21107_v41  ;;  %19093 = vmatprep.mubr.msk.bf16.mxu0 %vm22078_vm2, %v22077_v24  ;;  %v21133_v41 = vld [vmem:[#allocation20 + $0x130] sm:$0xff]  }
0x1111   : > { %19079 = vmatprep.subr.bf16.mxu0 %v22077_v24 }
0x1114   : > { %19080 = vmatpush3.bf16.msra.mxu0 %v21108_v48  ;;  %v21134_v48 = vld [vmem:[#allocation20 + $0x138] sm:$0xff]  }
0x1115   : > { %19081 = vmatprep.subr.bf16.mxu0 %v22077_v24 }
0x1118   : > { %19082 = vmatpush3.bf16.msra.mxu0 %v21109_v57 }
0x1119   : > { %19083 = vmatprep.subr.bf16.mxu0 %v22077_v24 }
0x111c   : > { %19084 = vmatpush3.bf16.msra.mxu0 %v21110_v0 }
0x111d   : > { %19085 = vmatprep.subr.bf16.mxu0 %v22077_v24 }
0x1120   : > { %19086 = vmatpush3.bf16.msra.mxu0 %v21111_v17 }
0x1121   : > { %19087 = vmatprep.subr.bf16.mxu0 %v22077_v24 }
0x1124   : > { %19088 = vmatpush3.bf16.msra.mxu0 %v21112_v34 }
0x1125   : > { %19089 = vmatprep.subr.bf16.mxu0 %v22077_v24 }
0x1128   : > { %19090 = vmatpush3.bf16.msra.mxu0 %v21113_v58 }
0x1129   : > { %19091 = vmatprep.subr.bf16.mxu0 %v22077_v24 }
0x112c   : > { %19092 = vmatpush3.bf16.msra.mxu0 %v21114_v5 }
0x112f   : > { %19094 = vmatmul.mubr.bf16.vlgmr.msra.gmra.mrb[176].mxu0 %v23943_v55 }
0x1162   : > { %v7021_v12 = vpop.f32.mrb[156].mxu0 }
0x1163   : > { %v7027_v39 = vpack.c.bf16 %v7021_v12, %v7021_v12  ;;  %v18887_v43 = vpop.f32.mrb[157].mxu0 }
0x1164   : > { %v7024_v50 = vpop.f32.mrb[158].mxu0 }
0x1165   : > { %v7039_v59 = vsel %vm7037_vm5, %v7027_v39, 0  ;;  %v18888_v60 = vpop.f32.mrb[159].mxu0  ;;  %v21135_v39 = vld [vmem:[#allocation18 + $0x20] sm:$0xff]   ;;  %v21136_v50 = vld [vmem:[#allocation18 + $0x28] sm:$0xff]  }
0x1166   : > { %18890 = vmatpush3.bf16.msra.mxu1 %v7039_v59  ;;  %v21137_v59 = vld [vmem:[#allocation20 + $0x180] sm:$0xff]   ;;  %v21138_v60 = vld [vmem:[#allocation20 + $0x188] sm:$0xff]  }
0x1167   : > { %18895 = vmatprep.subr.bf16.mxu1 %v22077_v24 }
0x1169   : > { %18892 = vmatmul.mubr.msk.bf16.vlgmr.msra.gmra.mrb[108].mxu1 %vm7033_vm6, %v21115_v3  ;;  %v21139_v3 = vld [vmem:[#allocation20 + $0x190] sm:$0xff]  }
0x116a   : > { %18896 = vmatpush3.bf16.msra.mxu1 %v21116_v10  ;;  %18911 = vmatprep.mubr.msk.bf16.mxu1 %vm22078_vm2, %v22077_v24  ;;  %v21140_v10 = vld [vmem:[#allocation20 + $0x198] sm:$0xff]  }
0x116b   : > { %18897 = vmatprep.subr.bf16.mxu1 %v22077_v24 }
0x116e   : > { %18898 = vmatpush3.bf16.msra.mxu1 %v21117_v13  ;;  %v21141_v13 = vld [vmem:[#allocation20 + $0x1a0] sm:$0xff]  }
0x116f   : > { %18899 = vmatprep.subr.bf16.mxu1 %v22077_v24 }
0x1172   : > { %18900 = vmatpush3.bf16.msra.mxu1 %v21118_v29  ;;  %v21142_v29 = vld [vmem:[#allocation20 + $0x1a8] sm:$0xff]  }
0x1173   : > { %18901 = vmatprep.subr.bf16.mxu1 %v22077_v24 }
0x1176   : > { %18902 = vmatpush3.bf16.msra.mxu1 %v21119_v38  ;;  %v21143_v38 = vld [vmem:[#allocation20 + $0x1b0] sm:$0xff]  }
0x1177   : > { %18903 = vmatprep.subr.bf16.mxu1 %v22077_v24 }
0x117a   : > { %18904 = vmatpush3.bf16.msra.mxu1 %v21120_v56  ;;  %v21144_v56 = vld [vmem:[#allocation20 + $0x1b8] sm:$0xff]  }
0x117b   : > { %18905 = vmatprep.subr.bf16.mxu1 %v22077_v24 }
0x117e   : > { %18906 = vmatpush3.bf16.msra.mxu1 %v21121_v28 }
0x117f   : > { %18907 = vmatprep.subr.bf16.mxu1 %v22077_v24 }
0x1182   : > { %v7349_v33 = vpop.f32.mrb[160].mxu0  ;;  %18908 = vmatpush3.bf16.msra.mxu1 %v21122_v23 }
0x1183   : > { %v18939_v46 = vpop.f32.mrb[161].mxu0  ;;  %18909 = vmatprep.subr.bf16.mxu1 %v22077_v24  ;;  %v7355_v37 = vpack.c.bf16 %v7349_v33, %v7349_v33 }
0x1184   : > { %v7352_v11 = vpop.f32.mrb[162].mxu0 }
0x1185   : > { %v18940_v19 = vpop.f32.mrb[163].mxu0  ;;  %v7365_v1 = vsel %vm7037_vm5, %v7355_v37, 0 }
0x1186   : > { %18910 = vmatpush3.bf16.msra.mxu1 %v21123_v42 }
0x1187   : > { %18915 = vmatprep.subr.bf16.mxu1 %v22077_v24 }
0x1189   : > { %18912 = vmatmul.mubr.bf16.vlgmr.msra.gmra.mrb[112].mxu1 %v23943_v55 }
0x118a   : > { %18917 = vmatprep.mubr.msk.bf16.mxu1 %vm22078_vm2, %v22077_v24 }
0x11a2   : > { %v7512_v22 = vpop.f32.mrb[164].mxu0 }
0x11a3   : > { %v18965_v52 = vpop.f32.mrb[165].mxu0  ;;  %v7518_v4 = vpack.c.bf16 %v7512_v22, %v7512_v22  ;;  %v21145_v22 = vld [vmem:[#allocation18 + $0x30] sm:$0xff]  }
0x11a4   : > { %v7515_v44 = vpop.f32.mrb[166].mxu0 }
0x11a5   : > { %v18966_v51 = vpop.f32.mrb[167].mxu0  ;;  %v7528_v25 = vsel %vm7037_vm5, %v7518_v4, 0  ;;  %v21146_v44 = vld [vmem:[#allocation18 + $0x38] sm:$0xff]   ;;  %v21158_v4 = vld [vmem:[%s25696_s19 + $0x90] sm:$0xff]  }
0x11c2   : > { %v24016_v47 = vpop.f32.mrb[168].mxu0 }
0x11c3   : > { %v19017_v63 = vpop.f32.mrb[169].mxu0  ;;  %v7844_v58 = vpack.c.bf16 %v24016_v47, %v24016_v47  ;;  %v21147_v47 = vld [vmem:[#allocation18 + $0x40] sm:$0xff]  }
0x11c4   : > { %v7841_v2 = vpop.f32.mrb[170].mxu0  ;;  %v21148_v63 = vld [vmem:[%s25696_s19] sm:$0xff]  }
0x11c5   : > { %v19018_v6 = vpop.f32.mrb[171].mxu0  ;;  %v7854_v43 = vsel %vm7037_vm5, %v7844_v58, 0  ;;  %v21149_v2 = vld [vmem:[%s25696_s19 + $0x8] sm:$0xff]   ;;  %v21174_v58 = vld [vmem:[%s25696_s19 + $0x150] sm:$0xff]  }
0x11c6   : > { %v21150_v6 = vld [vmem:[%s25696_s19 + $0x10] sm:$0xff]  }
0x11e2   : > { %v24018_v9 = vpop.f32.mrb[172].mxu0 }
0x11e3   : > { %v19069_v18 = vpop.f32.mrb[173].mxu0  ;;  %v8170_v46 = vpack.c.bf16 %v24018_v9, %v24018_v9  ;;  %v21151_v9 = vld [vmem:[%s25696_s19 + $0x18] sm:$0xff]  }
0x11e4   : > { %v8167_v21 = vpop.f32.mrb[174].mxu0  ;;  %v21152_v18 = vld [vmem:[%s25696_s19 + $0x20] sm:$0xff]  }
0x11e5   : > { %v19070_v31 = vpop.f32.mrb[175].mxu0  ;;  %v8180_v52 = vsel %vm7037_vm5, %v8170_v46, 0  ;;  %v21153_v21 = vld [vmem:[%s25696_s19 + $0x28] sm:$0xff]   ;;  %v21191_v46 = vld [vmem:[%s25696_s19 + $0x1d8] sm:$0xff]  }
0x11e6   : > { %v21154_v31 = vld [vmem:[%s25696_s19 + $0x30] sm:$0xff]  }
0x1202   : > { %v24020_v35 = vpop.f32.mrb[176].mxu0 }
0x1203   : > { %v19095_v61 = vpop.f32.mrb[177].mxu0 }
0x1204   : > { %v8330_v7 = vpop.f32.mrb[178].mxu0  ;;  %v15819_v61 = vld [vmem:[%s25812_s10] ss:$0 sm:$0xff]  ;;  %s25818_s10 = sld [smem:[#allocation37_spill]] }
0x1205   : > { %v19096_v8 = vpop.f32.mrb[179].mxu0 }
0x120a   : > { %p25821_p0 = scmp.ne.s32.totalorder %s25818_s10, 0 }
0x120c   : > { %p21944_p1 = pnand %p21943_p13, %p25821_p0 }
0x120e   : > { %p21945_p6 = pneg %p21944_p1 }
0x125c   : > { %v7186_v20 = vpop.f32.mrb[112].mxu1 }
0x125d   : > { %v7192_v26 = vpack.c.bf16 %v7186_v20, %v7186_v20  ;;  %v18913_v27 = vpop.f32.mrb[113].mxu1 }
0x125e   : > { %v7189_v36 = vpop.f32.mrb[114].mxu1 }
0x125f   : > { %v7202_v40 = vsel %vm7037_vm5, %v7192_v26, 0  ;;  %v18914_v53 = vpop.f32.mrb[115].mxu1 }
0x1260   : > { %18916 = vmatpush3.bf16.msra.mxu1 %v7202_v40  ;;  %v21156_v53 = vld [vmem:[%s25696_s19 + $0x80] sm:$0xff]  }
0x1261   : > { %18941 = vmatprep.subr.bf16.mxu1 %v22077_v24 }
0x1263   : > { %18918 = vmatmul.mubr.msk.bf16.vlgmr.msra.gmra.mrb[108].mxu1 %vm7033_vm6, %v21124_v54 }
0x1264   : > { %18942 = vmatpush3.bf16.msra.mxu1 %v7365_v1  ;;  %18943 = vmatprep.mubr.msk.bf16.mxu1 %vm22078_vm2, %v22077_v24  ;;  %v21157_v1 = vld [vmem:[%s25696_s19 + $0x88] sm:$0xff]  }
0x1265   : > { %18967 = vmatprep.subr.bf16.mxu1 %v22077_v24 }
0x126f   : > { %18944 = vmatmul.mubr.msk.bf16.vlgmr.msra.gmra.mrb[108].mxu1 %vm7033_vm6, %v21125_v16  ;;  %v21159_v16 = vld [vmem:[%s25696_s19 + $0x98] sm:$0xff]  }
0x1270   : > { %18968 = vmatpush3.bf16.msra.mxu1 %v7528_v25  ;;  %18969 = vmatprep.mubr.msk.bf16.mxu1 %vm22078_vm2, %v22077_v24  ;;  %v21160_v25 = vld [vmem:[%s25696_s19 + $0xa0] sm:$0xff]  }
0x1271   : > { %18973 = vmatprep.subr.bf16.mxu1 %v22077_v24 }
0x127b   : > { %18970 = vmatmul.mubr.msk.bf16.vlgmr.msra.gmra.mrb[108].mxu1 %vm7033_vm6, %v21126_v32  ;;  %v21161_v32 = vld [vmem:[%s25696_s19 + $0xa8] sm:$0xff]  }
0x127c   : > { %18974 = vmatpush3.bf16.msra.mxu1 %v21127_v45  ;;  %18989 = vmatprep.mubr.msk.bf16.mxu1 %vm22078_vm2, %v22077_v24  ;;  %v21162_v45 = vld [vmem:[%s25696_s19 + $0xb0] sm:$0xff]  }
0x127d   : > { %18975 = vmatprep.subr.bf16.mxu1 %v22077_v24 }
0x1280   : > { %18976 = vmatpush3.bf16.msra.mxu1 %v21128_v49  ;;  %v21163_v49 = vld [vmem:[%s25696_s19 + $0xb8] sm:$0xff]  }
0x1281   : > { %18977 = vmatprep.subr.bf16.mxu1 %v22077_v24 }
0x1284   : > { %18978 = vmatpush3.bf16.msra.mxu1 %v21129_v62  ;;  %v21164_v62 = vld [vmem:[%s25696_s19 + $0xc0] sm:$0xff]  }
0x1285   : > { %18979 = vmatprep.subr.bf16.mxu1 %v22077_v24 }
0x1288   : > { %18980 = vmatpush3.bf16.msra.mxu1 %v21130_v14  ;;  %v21165_v14 = vld [vmem:[%s25696_s19 + $0xc8] sm:$0xff]  }
0x1289   : > { %18981 = vmatprep.subr.bf16.mxu1 %v22077_v24 }
0x128c   : > { %18982 = vmatpush3.bf16.msra.mxu1 %v21131_v15  ;;  %v21166_v15 = vld [vmem:[%s25696_s19 + $0xd0] sm:$0xff]  }
0x128d   : > { %18983 = vmatprep.subr.bf16.mxu1 %v22077_v24 }
0x1290   : > { %18984 = vmatpush3.bf16.msra.mxu1 %v21132_v30  ;;  %v21167_v30 = vld [vmem:[%s25696_s19 + $0xd8] sm:$0xff]  }
0x1291   : > { %18985 = vmatprep.subr.bf16.mxu1 %v22077_v24 }
0x1294   : > { %18986 = vmatpush3.bf16.msra.mxu1 %v21133_v41  ;;  %v21168_v41 = vld [vmem:[%s25696_s19 + $0xe0] sm:$0xff]  }
0x1295   : > { %18987 = vmatprep.subr.bf16.mxu1 %v22077_v24 }
0x1298   : > { %18988 = vmatpush3.bf16.msra.mxu1 %v21134_v48  ;;  %v21169_v48 = vld [vmem:[%s25696_s19 + $0xe8] sm:$0xff]  }
0x1299   : > { %18993 = vmatprep.subr.bf16.mxu1 %v22077_v24 }
0x129b   : > { %18990 = vmatmul.mubr.bf16.vlgmr.msra.gmra.mrb[116].mxu1 %v23943_v55 }
0x129c   : > { %18995 = vmatprep.mubr.msk.bf16.mxu1 %vm22078_vm2, %v22077_v24 }
0x136e   : > { %v7675_v57 = vpop.f32.mrb[116].mxu1 }
0x136f   : > { %v7681_v0 = vpack.c.bf16 %v7675_v57, %v7675_v57  ;;  %v18991_v17 = vpop.f32.mrb[117].mxu1  ;;  %v21170_v57 = vld [vmem:[%s25696_s19 + $0xf0] sm:$0xff]  }
0x1370   : > { %v7678_v34 = vpop.f32.mrb[118].mxu1  ;;  %v21172_v17 = vld [vmem:[%s25696_s19 + $0x140] sm:$0xff]  }
0x1371   : > { %v7691_v5 = vsel %vm7037_vm5, %v7681_v0, 0  ;;  %v18992_v12 = vpop.f32.mrb[119].mxu1  ;;  %v21171_v0 = vld [vmem:[%s25696_s19 + $0xf8] sm:$0xff]   ;;  %v21173_v34 = vld [vmem:[%s25696_s19 + $0x148] sm:$0xff]  }
0x1372   : > { %18994 = vmatpush3.bf16.msra.mxu1 %v7691_v5  ;;  %v21175_v5 = vld [vmem:[%s25696_s19 + $0x158] sm:$0xff]   ;;  %v21176_v12 = vld [vmem:[%s25696_s19 + $0x160] sm:$0xff]  }
0x1373   : > { %19019 = vmatprep.subr.bf16.mxu1 %v22077_v24 }
0x1375   : > { %18996 = vmatmul.mubr.msk.bf16.vlgmr.msra.gmra.mrb[108].mxu1 %vm7033_vm6, %v21135_v39  ;;  %v21177_v39 = vld [vmem:[%s25696_s19 + $0x168] sm:$0xff]  }
0x1376   : > { %19020 = vmatpush3.bf16.msra.mxu1 %v7854_v43  ;;  %19021 = vmatprep.mubr.msk.bf16.mxu1 %vm22078_vm2, %v22077_v24  ;;  %v21178_v43 = vld [vmem:[%s25696_s19 + $0x170] sm:$0xff]  }
0x1377   : > { %19025 = vmatprep.subr.bf16.mxu1 %v22077_v24 }
0x1381   : > { %19022 = vmatmul.mubr.msk.bf16.vlgmr.msra.gmra.mrb[108].mxu1 %vm7033_vm6, %v21136_v50  ;;  %v21179_v50 = vld [vmem:[%s25696_s19 + $0x178] sm:$0xff]  }
0x1382   : > { %19026 = vmatpush3.bf16.msra.mxu1 %v21137_v59  ;;  %19041 = vmatprep.mubr.msk.bf16.mxu1 %vm22078_vm2, %v22077_v24  ;;  %v21196_v59 = vld [vmem:[%s25813_s27] sm:$0xff]   ;;  %s25819_s27 = sld [smem:[#allocation59_spill]] }
0x1383   : > { %19027 = vmatprep.subr.bf16.mxu1 %v22077_v24  ;;  %19125 = vmatprep.mubr.msk.bf16.mxu0 %vm4481_vm4, %v21196_v59 }
0x1386   : > { %19028 = vmatpush3.bf16.msra.mxu1 %v21138_v60  ;;  %v21180_v60 = vld [vmem:[%s25696_s19 + $0x180] sm:$0xff]  }
0x1387   : > { %19029 = vmatprep.subr.bf16.mxu1 %v22077_v24 }
0x1388   : > { %s25820_s0 = smov %s25819_s27  ;;  %s25506_s9 = scalar_lea.hbm %s25819_s27, %s16992_s23 }
0x138a   : > { %19030 = vmatpush3.bf16.msra.mxu1 %v21139_v3  ;;  %v21181_v3 = vld [vmem:[%s25696_s19 + $0x188] sm:$0xff]  }
0x138b   : > { %19031 = vmatprep.subr.bf16.mxu1 %v22077_v24 }
0x138e   : > { %19032 = vmatpush3.bf16.msra.mxu1 %v21140_v10  ;;  %v21182_v10 = vld [vmem:[%s25696_s19 + $0x190] sm:$0xff]  }
0x138f   : > { %19033 = vmatprep.subr.bf16.mxu1 %v22077_v24 }
0x1392   : > { %19034 = vmatpush3.bf16.msra.mxu1 %v21141_v13  ;;  %v21183_v13 = vld [vmem:[%s25696_s19 + $0x198] sm:$0xff]  }
0x1393   : > { %19035 = vmatprep.subr.bf16.mxu1 %v22077_v24 }
0x1396   : > { %19036 = vmatpush3.bf16.msra.mxu1 %v21142_v29  ;;  %v21184_v29 = vld [vmem:[%s25696_s19 + $0x1a0] sm:$0xff]  }
0x1397   : > { %19037 = vmatprep.subr.bf16.mxu1 %v22077_v24 }
0x139a   : > { %19038 = vmatpush3.bf16.msra.mxu1 %v21143_v38  ;;  %v21185_v38 = vld [vmem:[%s25696_s19 + $0x1a8] sm:$0xff]  }
0x139b   : > { %19039 = vmatprep.subr.bf16.mxu1 %v22077_v24 }
0x139e   : > { %19040 = vmatpush3.bf16.msra.mxu1 %v21144_v56  ;;  %v21186_v56 = vld [vmem:[%s25696_s19 + $0x1b0] sm:$0xff]  }
0x139f   : > { %19045 = vmatprep.subr.bf16.mxu1 %v22077_v24 }
0x13a1   : > { %19042 = vmatmul.mubr.bf16.vlgmr.msra.gmra.mrb[120].mxu1 %v23943_v55  ;;  %v8333_v55 = vpack.c.bf16 %v24020_v35, %v24020_v35  ;;  %v21155_v35 = vld [vmem:[%s25696_s19 + $0x38] sm:$0xff]  }
0x13a2   : > { %19047 = vmatprep.mubr.msk.bf16.mxu1 %vm22078_vm2, %v22077_v24 }
0x13a3   : > { %v8343_v51 = vsel %vm7037_vm5, %v8333_v55, 0 }
0x1474   : > { %v8001_v28 = vpop.f32.mrb[120].mxu1 }
0x1475   : > { %v8007_v23 = vpack.c.bf16 %v8001_v28, %v8001_v28  ;;  %v19043_v33 = vpop.f32.mrb[121].mxu1  ;;  %v21187_v28 = vld [vmem:[%s25696_s19 + $0x1b8] sm:$0xff]  }
0x1476   : > { %v8004_v42 = vpop.f32.mrb[122].mxu1  ;;  %v21189_v33 = vld [vmem:[%s25696_s19 + $0x1c8] sm:$0xff]  }
0x1477   : > { %v8017_v11 = vsel %vm7037_vm5, %v8007_v23, 0  ;;  %v19044_v19 = vpop.f32.mrb[123].mxu1  ;;  %v21188_v23 = vld [vmem:[%s25696_s19 + $0x1c0] sm:$0xff]   ;;  %v21190_v42 = vld [vmem:[%s25696_s19 + $0x1d0] sm:$0xff]  }
0x1478   : > { %19046 = vmatpush3.bf16.msra.mxu1 %v8017_v11  ;;  %v21192_v11 = vld [vmem:[%s25696_s19 + $0x1e0] sm:$0xff]   ;;  %v21193_v19 = vld [vmem:[%s25696_s19 + $0x1e8] sm:$0xff]  }
0x1479   : > { %19071 = vmatprep.subr.bf16.mxu1 %v22077_v24 }
0x147b   : > { %19048 = vmatmul.mubr.msk.bf16.vlgmr.msra.gmra.mrb[108].mxu1 %vm7033_vm6, %v21145_v22  ;;  %v21194_v22 = vld [vmem:[%s25696_s19 + $0x1f0] sm:$0xff]  }
0x147c   : > { %19072 = vmatpush3.bf16.msra.mxu1 %v8180_v52  ;;  %19073 = vmatprep.mubr.msk.bf16.mxu1 %vm22078_vm2, %v22077_v24  ;;  %v21195_v52 = vld [vmem:[%s25696_s19 + $0x1f8] sm:$0xff]  }
0x147d   : > { %19097 = vmatprep.subr.bf16.mxu1 %v22077_v24 }
0x1487   : > { %19074 = vmatmul.mubr.msk.bf16.vlgmr.msra.gmra.mrb[108].mxu1 %vm7033_vm6, %v21146_v44 }
0x1488   : > { %19098 = vmatpush3.bf16.msra.mxu1 %v8343_v51  ;;  %19099 = vmatprep.mubr.msk.bf16.mxu1 %vm22078_vm2, %v22077_v24 }
0x1489   : > { %19103 = vmatprep.subr.bf16.mxu1 %v22077_v24 }
0x1493   : > { %19100 = vmatmul.mubr.msk.bf16.vlgmr.msra.gmra.mrb[108].mxu1 %vm7033_vm6, %v21147_v47 }
0x1494   : > { %19104 = vmatpush3.bf16.msra.mxu1 %v21148_v63  ;;  %19119 = vmatprep.mubr.msk.bf16.mxu1 %vm22078_vm2, %v22077_v24 }
0x1495   : > { %19105 = vmatprep.subr.bf16.mxu1 %v22077_v24 }
0x1498   : > { %19106 = vmatpush3.bf16.msra.mxu1 %v21149_v2  ;;  %v21197_v2 = vld [vmem:[%s25814_s21 + $0x8] sm:$0xff]  }
0x1499   : > { %19107 = vmatprep.subr.bf16.mxu1 %v22077_v24 }
0x149c   : > { %19108 = vmatpush3.bf16.msra.mxu1 %v21150_v6  ;;  %v21198_v6 = vld [vmem:[%s25696_s19 + $0x40] sm:$0xff]  }
0x149d   : > { %19109 = vmatprep.subr.bf16.mxu1 %v22077_v24 }
0x14a0   : > { %19110 = vmatpush3.bf16.msra.mxu1 %v21151_v9  ;;  %v21204_v9 = vld [vmem:[%s25814_s21 + $0x10] sm:$0xff]  }
0x14a1   : > { %19111 = vmatprep.subr.bf16.mxu1 %v22077_v24 }
0x14a4   : > { %19112 = vmatpush3.bf16.msra.mxu1 %v21152_v18  ;;  %v21199_v18 = vld [vmem:[%s25696_s19 + $0x48] sm:$0xff]  }
0x14a5   : > { %19113 = vmatprep.subr.bf16.mxu1 %v22077_v24 }
0x14a8   : > { %19114 = vmatpush3.bf16.msra.mxu1 %v21153_v21  ;;  %v21205_v21 = vld [vmem:[%s25814_s21 + $0x18] sm:$0xff]  }
0x14a9   : > { %19115 = vmatprep.subr.bf16.mxu1 %v22077_v24 }
0x14ac   : > { %19116 = vmatpush3.bf16.msra.mxu1 %v21154_v31  ;;  %v21200_v31 = vld [vmem:[%s25696_s19 + $0x50] sm:$0xff]  }
0x14ad   : > { %19117 = vmatprep.subr.bf16.mxu1 %v22077_v24 }
0x14b0   : > { %19118 = vmatpush3.bf16.msra.mxu1 %v21155_v35  ;;  %v21201_v35 = vld [vmem:[%s25696_s19 + $0x58] sm:$0xff]  }
0x14b1   : > { %19163 = vmatprep.subr.bf16.mxu1 %v22077_v24 }
0x1566   : > { %v8379_v7 = vpop.f32.mrb[108].mxu1 }
0x1567   : > { %v19968_v8 = vadd.f32 %v15819_v61, %v8379_v7  ;;  %v19101_v20 = vpop.f32.mrb[109].mxu1  ;;  %v21203_v7 = vld [vmem:[%s25696_s19 + $0x68] sm:$0xff]  }
0x1568   : > { %v8382_v26 = vpop.f32.mrb[110].mxu1 }
0x1569   : > { %v19969_v27 = vadd.f32 %v15819_v61, %v8382_v26  ;;  %v19102_v36 = vpop.f32.mrb[111].mxu1  ;;  %v8388_v37 = vmax.f32 %v19968_v8, 0.0  ;;  %v21202_v61 = vld [vmem:[%s25696_s19 + $0x60] sm:$0xff]   ;;  %v21206_v8 = vld [vmem:[%s25696_s19 + $0x70] sm:$0xff]  }
0x156a   : > { %v21207_v36 = vld [vmem:[%s25696_s19 + $0x78] sm:$0xff]  }
0x156b   : > { %v8389_v40 = vmax.f32 %v19969_v27, 0.0 }
0x156d   : > { %v24128_v54 = vpack.c.bf16 %v8389_v40, %v8388_v37 }
0x156f   : > { %19120 = vmatmul.mubr.bf16.vlgmr.msra.gmra.mrb[124].mxu1 %v24128_v54 }
0x1570   : > { %19164 = vmatpush3.bf16.msra.mxu1 %v21156_v53  ;;  %19179 = vmatprep.mubr.msk.bf16.mxu1 %vm22078_vm2, %v22077_v24 }
0x1571   : > { %19165 = vmatprep.subr.bf16.mxu1 %v22077_v24 }
0x1574   : > { %19166 = vmatpush3.bf16.msra.mxu1 %v21157_v1 }
0x1575   : > { %19167 = vmatprep.subr.bf16.mxu1 %v22077_v24 }
0x1578   : > { %19168 = vmatpush3.bf16.msra.mxu1 %v21158_v4 }
0x1579   : > { %19169 = vmatprep.subr.bf16.mxu1 %v22077_v24 }
0x157c   : > { %19170 = vmatpush3.bf16.msra.mxu1 %v21159_v16 }
0x157d   : > { %19171 = vmatprep.subr.bf16.mxu1 %v22077_v24 }
0x1580   : > { %19172 = vmatpush3.bf16.msra.mxu1 %v21160_v25 }
0x1581   : > { %19173 = vmatprep.subr.bf16.mxu1 %v22077_v24 }
0x1584   : > { %19174 = vmatpush3.bf16.msra.mxu1 %v21161_v32 }
0x1585   : > { %19175 = vmatprep.subr.bf16.mxu1 %v22077_v24 }
0x1588   : > { %19176 = vmatpush3.bf16.msra.mxu1 %v21162_v45 }
0x1589   : > { %19177 = vmatprep.subr.bf16.mxu1 %v22077_v24 }
0x158c   : > { %19178 = vmatpush3.bf16.msra.mxu1 %v21163_v49 }
0x158d   : > { %19193 = vmatprep.subr.bf16.mxu1 %v22077_v24 }
0x158f   : > { %19180 = vmatmul.mubr.bf16.vlgmr.msra.gmra.mrb[128].mxu1 %v24128_v54 }
0x1590   : > { %19194 = vmatpush3.bf16.msra.mxu1 %v21164_v62  ;;  %19209 = vmatprep.mubr.msk.bf16.mxu1 %vm22078_vm2, %v22077_v24 }
0x1591   : > { %19195 = vmatprep.subr.bf16.mxu1 %v22077_v24 }
0x1594   : > { %19196 = vmatpush3.bf16.msra.mxu1 %v21165_v14 }
0x1595   : > { %19197 = vmatprep.subr.bf16.mxu1 %v22077_v24 }
0x1598   : > { %19198 = vmatpush3.bf16.msra.mxu1 %v21166_v15 }
0x1599   : > { %19199 = vmatprep.subr.bf16.mxu1 %v22077_v24 }
0x159c   : > { %19200 = vmatpush3.bf16.msra.mxu1 %v21167_v30 }
0x159d   : > { %19201 = vmatprep.subr.bf16.mxu1 %v22077_v24 }
0x15a0   : > { %19202 = vmatpush3.bf16.msra.mxu1 %v21168_v41 }
0x15a1   : > { %19203 = vmatprep.subr.bf16.mxu1 %v22077_v24 }
0x15a4   : > { %19204 = vmatpush3.bf16.msra.mxu1 %v21169_v48 }
0x15a5   : > { %19205 = vmatprep.subr.bf16.mxu1 %v22077_v24 }
0x15a8   : > { %19206 = vmatpush3.bf16.msra.mxu1 %v21170_v57 }
0x15a9   : > { %19207 = vmatprep.subr.bf16.mxu1 %v22077_v24 }
0x15ac   : > { %19208 = vmatpush3.bf16.msra.mxu1 %v21171_v0  ;;  %v21208_v0 = vld [vmem:[%s25814_s21 + $0x20] sm:$0xff]  }
0x15ad   : > { %19253 = vmatprep.subr.bf16.mxu1 %v22077_v24 }
0x15af   : > { %19210 = vmatmul.mubr.bf16.vlgmr.msra.gmra.mrb[132].mxu1 %v24128_v54 }
0x15b0   : > { %19254 = vmatpush3.bf16.msra.mxu1 %v21172_v17  ;;  %19269 = vmatprep.mubr.msk.bf16.mxu1 %vm22078_vm2, %v22077_v24 }
0x15b1   : > { %19255 = vmatprep.subr.bf16.mxu1 %v22077_v24 }
0x15b4   : > { %19256 = vmatpush3.bf16.msra.mxu1 %v21173_v34 }
0x15b5   : > { %19257 = vmatprep.subr.bf16.mxu1 %v22077_v24 }
0x15b8   : > { %19258 = vmatpush3.bf16.msra.mxu1 %v21174_v58 }
0x15b9   : > { %19259 = vmatprep.subr.bf16.mxu1 %v22077_v24 }
0x15bc   : > { %19260 = vmatpush3.bf16.msra.mxu1 %v21175_v5 }
0x15bd   : > { %19261 = vmatprep.subr.bf16.mxu1 %v22077_v24 }
0x15c0   : > { %19262 = vmatpush3.bf16.msra.mxu1 %v21176_v12 }
0x15c1   : > { %19263 = vmatprep.subr.bf16.mxu1 %v22077_v24 }
0x15c4   : > { %19264 = vmatpush3.bf16.msra.mxu1 %v21177_v39 }
0x15c5   : > { %19265 = vmatprep.subr.bf16.mxu1 %v22077_v24 }
0x15c8   : > { %19266 = vmatpush3.bf16.msra.mxu1 %v21178_v43 }
0x15c9   : > { %19267 = vmatprep.subr.bf16.mxu1 %v22077_v24 }
0x15cc   : > { %19268 = vmatpush3.bf16.msra.mxu1 %v21179_v50 }
0x15cd   : > { %19283 = vmatprep.subr.bf16.mxu1 %v22077_v24 }
0x15cf   : > { %19270 = vmatmul.mubr.bf16.vlgmr.msra.gmra.mrb[136].mxu1 %v24128_v54 }
0x15d0   : > { %19284 = vmatpush3.bf16.msra.mxu1 %v21180_v60  ;;  %19299 = vmatprep.mubr.msk.bf16.mxu1 %vm22078_vm2, %v22077_v24 }
0x15d1   : > { %19285 = vmatprep.subr.bf16.mxu1 %v22077_v24 }
0x15d4   : > { %19286 = vmatpush3.bf16.msra.mxu1 %v21181_v3  ;;  %v21209_v3 = vld [vmem:[%s25814_s21 + $0x28] sm:$0xff]  }
0x15d5   : > { %19287 = vmatprep.subr.bf16.mxu1 %v22077_v24 }
0x15d8   : > { %19288 = vmatpush3.bf16.msra.mxu1 %v21182_v10  ;;  %v21210_v10 = vld [vmem:[%s25814_s21 + $0x30] sm:$0xff]  }
0x15d9   : > { %19289 = vmatprep.subr.bf16.mxu1 %v22077_v24 }
0x15dc   : > { %19290 = vmatpush3.bf16.msra.mxu1 %v21183_v13  ;;  %v21211_v13 = vld [vmem:[%s25814_s21 + $0x38] sm:$0xff]  }
0x15dd   : > { %19291 = vmatprep.subr.bf16.mxu1 %v22077_v24 }
0x15e0   : > { %19292 = vmatpush3.bf16.msra.mxu1 %v21184_v29  ;;  %v21212_v29 = vld [vmem:[%s25814_s21 + $0x40] sm:$0xff]  }
0x15e1   : > { %19293 = vmatprep.subr.bf16.mxu1 %v22077_v24 }
0x15e4   : > { %19294 = vmatpush3.bf16.msra.mxu1 %v21185_v38  ;;  %v21213_v38 = vld [vmem:[%s25814_s21 + $0x48] sm:$0xff]  }
0x15e5   : > { %19295 = vmatprep.subr.bf16.mxu1 %v22077_v24 }
0x15e8   : > { %19296 = vmatpush3.bf16.msra.mxu1 %v21186_v56  ;;  %v21214_v56 = vld [vmem:[%s25814_s21 + $0x50] sm:$0xff]  }
0x15e9   : > { %19297 = vmatprep.subr.bf16.mxu1 %v22077_v24 }
0x15ec   : > { %19298 = vmatpush3.bf16.msra.mxu1 %v21187_v28  ;;  %v21215_v28 = vld [vmem:[%s25814_s21 + $0x58] sm:$0xff]  }
0x15ed   : > { %19313 = vmatprep.subr.bf16.mxu1 %v22077_v24 }
0x15ef   : > { %19300 = vmatmul.mubr.bf16.vlgmr.msra.gmra.mrb[140].mxu1 %v24128_v54 }
0x15f0   : > { %19314 = vmatpush3.bf16.msra.mxu1 %v21188_v23  ;;  %19329 = vmatprep.mubr.msk.bf16.mxu1 %vm22078_vm2, %v22077_v24  ;;  %v21216_v23 = vld [vmem:[%s25814_s21 + $0x60] sm:$0xff]  }
0x15f1   : > { %19315 = vmatprep.subr.bf16.mxu1 %v22077_v24 }
0x15f4   : > { %19316 = vmatpush3.bf16.msra.mxu1 %v21189_v33  ;;  %v21217_v33 = vld [vmem:[%s25814_s21 + $0x68] sm:$0xff]  }
0x15f5   : > { %19317 = vmatprep.subr.bf16.mxu1 %v22077_v24 }
0x15f8   : > { %19318 = vmatpush3.bf16.msra.mxu1 %v21190_v42  ;;  %v21218_v42 = vld [vmem:[%s25696_s19 + $0x100] sm:$0xff]  }
0x15f9   : > { %19319 = vmatprep.subr.bf16.mxu1 %v22077_v24 }
0x15fc   : > { %19320 = vmatpush3.bf16.msra.mxu1 %v21191_v46  ;;  %v21224_v46 = vld [vmem:[%s25814_s21 + $0x70] sm:$0xff]  }
0x15fd   : > { %19321 = vmatprep.subr.bf16.mxu1 %v22077_v24 }
0x1600   : > { %19322 = vmatpush3.bf16.msra.mxu1 %v21192_v11  ;;  %v21219_v11 = vld [vmem:[%s25696_s19 + $0x108] sm:$0xff]  }
0x1601   : > { %19323 = vmatprep.subr.bf16.mxu1 %v22077_v24 }
0x1604   : > { %19324 = vmatpush3.bf16.msra.mxu1 %v21193_v19  ;;  %v21225_v19 = vld [vmem:[%s25814_s21 + $0x78] sm:$0xff]  }
0x1605   : > { %19325 = vmatprep.subr.bf16.mxu1 %v22077_v24 }
0x1608   : > { %19326 = vmatpush3.bf16.msra.mxu1 %v21194_v22  ;;  %v21220_v22 = vld [vmem:[%s25696_s19 + $0x110] sm:$0xff]  }
0x1609   : > { %19327 = vmatprep.subr.bf16.mxu1 %v22077_v24 }
0x160c   : > { %19328 = vmatpush3.bf16.msra.mxu1 %v21195_v52  ;;  %v21221_v52 = vld [vmem:[%s25696_s19 + $0x118] sm:$0xff]  }
0x160f   : > { %19330 = vmatmul.mubr.bf16.vlgmr.msra.gmra.mrb[144].mxu1 %v24128_v54 }
0x1642   : > { %v8504_v55 = vpop.f32.mrb[124].mxu1 }
0x1643   : > { %v19121_v44 = vpop.f32.mrb[125].mxu1 }
0x1644   : > { %v8507_v51 = vpop.f32.mrb[126].mxu1  ;;  %v21223_v44 = vld [vmem:[%s25696_s19 + $0x128] sm:$0xff]  }
0x1645   : > { %v8511_v47 = vpack.c.bf16 %v8507_v51, %v8504_v55  ;;  %v19122_v63 = vpop.f32.mrb[127].mxu1  ;;  %v21222_v55 = vld [vmem:[%s25696_s19 + $0x120] sm:$0xff]   ;;  %v21226_v51 = vld [vmem:[%s25696_s19 + $0x130] sm:$0xff]  }
0x1646   : > { %v21228_v63 = vld [vmem:[%s25814_s21 + $0x80] sm:$0xff]  }
0x1647   : > { %19123 = vmatprep.subr.bf16.mxu0 %v8511_v47 }
0x1648   : > { %19124 = vmatpush3.bf16.msra.mxu0 %v8511_v47  ;;  %v21227_v47 = vld [vmem:[%s25696_s19 + $0x138] sm:$0xff]  }
0x1649   : > { %19133 = vmatprep.subr.bf16.mxu0 %v22077_v24 }
0x164b   : > { %19126 = vmatmul.mubr.msk.bf16.vlgmr.msra.gmra.mrb[180].mxu0 %vm4481_vm4, %v21197_v2 }
0x164c   : > { %19134 = vmatpush3.bf16.msra.mxu0 %v21198_v6  ;;  %19129 = vmatprep.mubr.msk.bf16.mxu0 %vm4481_vm4, %v21204_v9 }
0x164d   : > { %19135 = vmatprep.subr.bf16.mxu0 %v22077_v24 }
0x1650   : > { %19136 = vmatpush3.bf16.msra.mxu0 %v21199_v18 }
0x1651   : > { %19137 = vmatprep.subr.bf16.mxu0 %v22077_v24 }
0x1653   : > { %19130 = vmatmul.mubr.msk.bf16.gmra.mrb[184].mxu0 %vm4481_vm4, %v21205_v21 }
0x1654   : > { %19138 = vmatpush3.bf16.msra.mxu0 %v21200_v31  ;;  %19149 = vmatprep.mubr.msk.bf16.mxu0 %vm22078_vm2, %v22077_v24  ;;  %v21229_v31 = vld [vmem:[%s25814_s21 + $0x88] sm:$0xff]  }
0x1655   : > { %19139 = vmatprep.subr.bf16.mxu0 %v22077_v24 }
0x1658   : > { %19140 = vmatpush3.bf16.msra.mxu0 %v21201_v35  ;;  %v21230_v35 = vld [vmem:[%s25814_s21 + $0x90] sm:$0xff]  }
0x1659   : > { %19141 = vmatprep.subr.bf16.mxu0 %v22077_v24 }
0x165c   : > { %19142 = vmatpush3.bf16.msra.mxu0 %v21202_v61  ;;  %v21231_v61 = vld [vmem:[%s25814_s21 + $0x98] sm:$0xff]  }
0x165d   : > { %19143 = vmatprep.subr.bf16.mxu0 %v22077_v24 }
0x1660   : > { %19144 = vmatpush3.bf16.msra.mxu0 %v21203_v7  ;;  %v21232_v7 = vld [vmem:[%s25814_s21 + $0xa0] sm:$0xff]  }
0x1661   : > { %19145 = vmatprep.subr.bf16.mxu0 %v22077_v24 }
0x1662   : > { %v8946_v20 = vpop.f32.mrb[128].mxu1 }
0x1663   : > { %v19181_v26 = vpop.f32.mrb[129].mxu1 }
0x1664   : > { %v8949_v27 = vpop.f32.mrb[130].mxu1  ;;  %19146 = vmatpush3.bf16.msra.mxu0 %v21206_v8  ;;  %v21233_v8 = vld [vmem:[%s25814_s21 + $0xa8] sm:$0xff]   ;;  %v21235_v26 = vld [vmem:[%s25814_s21 + $0xb8] sm:$0xff]  }
0x1665   : > { %v8953_v37 = vpack.c.bf16 %v8949_v27, %v8946_v20  ;;  %v19182_v40 = vpop.f32.mrb[131].mxu1  ;;  %19147 = vmatprep.subr.bf16.mxu0 %v22077_v24  ;;  %v21234_v20 = vld [vmem:[%s25814_s21 + $0xb0] sm:$0xff]   ;;  %v21236_v27 = vld [vmem:[%s25814_s21 + $0xc0] sm:$0xff]  }
0x1666   : > { %v21239_v40 = vld [vmem:[%s25814_s21 + $0xd8] sm:$0xff]  }
0x1668   : > { %19148 = vmatpush3.bf16.msra.mxu0 %v21207_v36  ;;  %v21237_v36 = vld [vmem:[%s25814_s21 + $0xc8] sm:$0xff]  }
0x166b   : > { %19150 = vmatmul.mubr.bf16.vlgmr.msra.gmra.mrb[188].mxu0 %v24128_v54 }
0x166c   : > { %19155 = vmatprep.mubr.msk.bf16.mxu0 %vm4481_vm4, %v21208_v0  ;;  %v21260_v0 = vld [vmem:[%s25815_s22 + $0x20] sm:$0xff]  }
0x1682   : > { %v9167_v53 = vpop.f32.mrb[132].mxu1 }
0x1683   : > { %v19211_v1 = vpop.f32.mrb[133].mxu1 }
0x1684   : > { %v9170_v4 = vpop.f32.mrb[134].mxu1  ;;  %v21241_v1 = vld [vmem:[%s25814_s21 + $0xe8] sm:$0xff]  }
0x1685   : > { %v9174_v16 = vpack.c.bf16 %v9170_v4, %v9167_v53  ;;  %v19212_v25 = vpop.f32.mrb[135].mxu1  ;;  %v21240_v53 = vld [vmem:[%s25814_s21 + $0xe0] sm:$0xff]  }
0x1686   : > { %v21242_v4 = vld [vmem:[%s25696_s19 + $0x200] sm:$0xff]   ;;  %v21243_v25 = vld [vmem:[%s25696_s19 + $0x208] sm:$0xff]  }
0x16a2   : > { %v9609_v32 = vpop.f32.mrb[136].mxu1 }
0x16a3   : > { %v19271_v45 = vpop.f32.mrb[137].mxu1 }
0x16a4   : > { %v9612_v49 = vpop.f32.mrb[138].mxu1  ;;  %v21244_v45 = vld [vmem:[%s25696_s19 + $0x210] sm:$0xff]  }
0x16a5   : > { %v24353_v62 = vpack.c.bf16 %v9612_v49, %v9609_v32  ;;  %v19272_v14 = vpop.f32.mrb[139].mxu1  ;;  %v21249_v32 = vld [vmem:[%s25814_s21 + $0xf8] sm:$0xff]  }
0x16a6   : > { %v21245_v49 = vld [vmem:[%s25696_s19 + $0x218] sm:$0xff]   ;;  %v21247_v14 = vld [vmem:[%s25696_s19 + $0x228] sm:$0xff]  }
0x16c2   : > { %v9830_v15 = vpop.f32.mrb[140].mxu1 }
0x16c3   : > { %v19301_v30 = vpop.f32.mrb[141].mxu1 }
0x16c4   : > { %v9833_v41 = vpop.f32.mrb[142].mxu1  ;;  %v21251_v30 = vld [vmem:[%s25696_s19 + $0x238] sm:$0xff]  }
0x16c5   : > { %v24355_v48 = vpack.c.bf16 %v9833_v41, %v9830_v15  ;;  %v19302_v57 = vpop.f32.mrb[143].mxu1  ;;  %v21250_v15 = vld [vmem:[%s25696_s19 + $0x230] sm:$0xff]   ;;  %v21252_v41 = vld [vmem:[%s25814_s21 + $0x100] sm:$0xff]  }
0x16c6   : > { %v21257_v57 = vld [vmem:[%s25815_s22 + $0x8] sm:$0xff]  }
0x16e2   : > { %v10051_v17 = vpop.f32.mrb[144].mxu1 }
0x16e3   : > { %v19331_v34 = vpop.f32.mrb[145].mxu1 }
0x16e4   : > { %v10054_v58 = vpop.f32.mrb[146].mxu1 }
0x16e5   : > { %v24361_v5 = vpack.c.bf16 %v10054_v58, %v10051_v17  ;;  %v19332_v12 = vpop.f32.mrb[147].mxu1  ;;  %v21261_v17 = vld [vmem:[%s25815_s22 + $0x28] sm:$0xff]  }
0x173e   : > { %v8725_v39 = vpop.f32.mrb[188].mxu0 }
0x173f   : > { %v19151_v43 = vpop.f32.mrb[189].mxu0 }
0x1740   : > { %v8728_v50 = vpop.f32.mrb[190].mxu0  ;;  %v21253_v43 = vld [vmem:[%s25814_s21 + $0x108] sm:$0xff]  }
0x1741   : > { %v8732_v59 = vpack.c.bf16 %v8728_v50, %v8725_v39  ;;  %v19152_v60 = vpop.f32.mrb[191].mxu0  ;;  %v21254_v50 = vld [vmem:[%s25814_s21 + $0x110] sm:$0xff]  }
0x1742   : > { %v21262_v60 = vld [vmem:[%s25815_s22 + $0x30] sm:$0xff]  }
0x1743   : > { %19153 = vmatprep.subr.bf16.mxu0 %v8732_v59 }
0x1744   : > { %19154 = vmatpush3.bf16.msra.mxu0 %v8732_v59  ;;  %v21255_v59 = vld [vmem:[%s25814_s21 + $0x118] sm:$0xff]  }
0x1745   : > { %19183 = vmatprep.subr.bf16.mxu0 %v8953_v37 }
0x1747   : > { %19156 = vmatmul.mubr.msk.bf16.vlgmr.msra.gmra.mrb[180].mxu0 %vm4481_vm4, %v21209_v3  ;;  %v21263_v3 = vld [vmem:[%s25815_s22 + $0x38] sm:$0xff]  }
0x1748   : > { %19184 = vmatpush3.bf16.msra.mxu0 %v8953_v37  ;;  %19159 = vmatprep.mubr.msk.bf16.mxu0 %vm4481_vm4, %v21210_v10  ;;  %v21238_v37 = vld [vmem:[%s25814_s21 + $0xd0] sm:$0xff]   ;;  %v15910_v10 = vld [vmem:[%s25816_s20] ss:$0 sm:$0xff] }
0x1749   : > { %19213 = vmatprep.subr.bf16.mxu0 %v9174_v16 }
0x174f   : > { %19160 = vmatmul.mubr.msk.bf16.gmra.mrb[184].mxu0 %vm4481_vm4, %v21211_v13 }
0x1750   : > { %19185 = vmatprep.mubr.msk.bf16.mxu0 %vm4481_vm4, %v21212_v29 }
0x1757   : > { %19186 = vmatmul.mubr.msk.bf16.vlgmr.msra.gmra.mrb[180].mxu0 %vm4481_vm4, %v21213_v38 }
0x1758   : > { %19214 = vmatpush3.bf16.msra.mxu0 %v9174_v16  ;;  %19189 = vmatprep.mubr.msk.bf16.mxu0 %vm4481_vm4, %v21214_v56  ;;  %v21248_v16 = vld [vmem:[%s25814_s21 + $0xf0] sm:$0xff]  }
0x1759   : > { %19223 = vmatprep.subr.bf16.mxu0 %v22077_v24 }
0x175f   : > { %19190 = vmatmul.mubr.msk.bf16.gmra.mrb[184].mxu0 %vm4481_vm4, %v21215_v28 }
0x1760   : > { %19215 = vmatprep.mubr.msk.bf16.mxu0 %vm4481_vm4, %v21216_v23 }
0x1767   : > { %19216 = vmatmul.mubr.msk.bf16.vlgmr.msra.gmra.mrb[180].mxu0 %vm4481_vm4, %v21217_v33 }
0x1768   : > { %19224 = vmatpush3.bf16.msra.mxu0 %v21218_v42  ;;  %19219 = vmatprep.mubr.msk.bf16.mxu0 %vm4481_vm4, %v21224_v46 }
0x1769   : > { %19225 = vmatprep.subr.bf16.mxu0 %v22077_v24 }
0x176c   : > { %19226 = vmatpush3.bf16.msra.mxu0 %v21219_v11 }
0x176d   : > { %19227 = vmatprep.subr.bf16.mxu0 %v22077_v24 }
0x176f   : > { %19220 = vmatmul.mubr.msk.bf16.gmra.mrb[184].mxu0 %vm4481_vm4, %v21225_v19 }
0x1770   : > { %19228 = vmatpush3.bf16.msra.mxu0 %v21220_v22  ;;  %19239 = vmatprep.mubr.msk.bf16.mxu0 %vm22078_vm2, %v22077_v24 }
0x1771   : > { %19229 = vmatprep.subr.bf16.mxu0 %v22077_v24 }
0x1774   : > { %19230 = vmatpush3.bf16.msra.mxu0 %v21221_v52 }
0x1775   : > { %19231 = vmatprep.subr.bf16.mxu0 %v22077_v24 }
0x1778   : > { %19232 = vmatpush3.bf16.msra.mxu0 %v21222_v55 }
0x1779   : > { %19233 = vmatprep.subr.bf16.mxu0 %v22077_v24 }
0x177c   : > { %19234 = vmatpush3.bf16.msra.mxu0 %v21223_v44 }
0x177d   : > { %19235 = vmatprep.subr.bf16.mxu0 %v22077_v24 }
0x1780   : > { %19236 = vmatpush3.bf16.msra.mxu0 %v21226_v51 }
0x1781   : > { %19237 = vmatprep.subr.bf16.mxu0 %v22077_v24 }
0x1784   : > { %19238 = vmatpush3.bf16.msra.mxu0 %v21227_v47 }
0x1787   : > { %19240 = vmatmul.mubr.bf16.vlgmr.msra.gmra.mrb[192].mxu0 %v24128_v54 }
0x1788   : > { %19245 = vmatprep.mubr.msk.bf16.mxu0 %vm4481_vm4, %v21228_v63 }
0x185a   : > { %v9388_v2 = vpop.f32.mrb[192].mxu0 }
0x185b   : > { %v19241_v6 = vpop.f32.mrb[193].mxu0 }
0x185c   : > { %v9391_v9 = vpop.f32.mrb[194].mxu0 }
0x185d   : > { %v9395_v18 = vpack.c.bf16 %v9391_v9, %v9388_v2  ;;  %v19242_v21 = vpop.f32.mrb[195].mxu0 }
0x185f   : > { %19243 = vmatprep.subr.bf16.mxu0 %v9395_v18 }
0x1860   : > { %19244 = vmatpush3.bf16.msra.mxu0 %v9395_v18 }
0x1861   : > { %19273 = vmatprep.subr.bf16.mxu0 %v24353_v62 }
0x1863   : > { %19246 = vmatmul.mubr.msk.bf16.vlgmr.msra.gmra.mrb[180].mxu0 %vm4481_vm4, %v21229_v31 }
0x1864   : > { %19274 = vmatpush3.bf16.msra.mxu0 %v24353_v62  ;;  %19249 = vmatprep.mubr.msk.bf16.mxu0 %vm4481_vm4, %v21230_v35  ;;  %v21246_v62 = vld [vmem:[%s25696_s19 + $0x220] sm:$0xff]  }
0x1865   : > { %19303 = vmatprep.subr.bf16.mxu0 %v24355_v48 }
0x186b   : > { %19250 = vmatmul.mubr.msk.bf16.gmra.mrb[184].mxu0 %vm4481_vm4, %v21231_v61 }
0x186c   : > { %19275 = vmatprep.mubr.msk.bf16.mxu0 %vm4481_vm4, %v21232_v7 }
0x1873   : > { %19276 = vmatmul.mubr.msk.bf16.vlgmr.msra.gmra.mrb[180].mxu0 %vm4481_vm4, %v21233_v8 }
0x1874   : > { %19304 = vmatpush3.bf16.msra.mxu0 %v24355_v48  ;;  %19279 = vmatprep.mubr.msk.bf16.mxu0 %vm4481_vm4, %v21234_v20  ;;  %v21256_v48 = vld [vmem:[%s25815_s22] sm:$0xff]  }
0x1875   : > { %19333 = vmatprep.subr.bf16.mxu0 %v24361_v5  ;;  %19373 = vmatprep.subr.bf16.mxu1 %v21256_v48  ;;  %v21264_v20 = vld [vmem:[%s25817_s6] sm:$0xff]  }
0x1876   : > { %19374 = vmatpush3.bf16.msra.mxu1 %v21256_v48  ;;  %v21268_v48 = vld [vmem:[%s25817_s6 + $0x20] sm:$0xff]  }
0x1877   : > { %19375 = vmatprep.subr.bf16.mxu1 %v21257_v57 }
0x187a   : > { %19376 = vmatpush3.bf16.msra.mxu1 %v21257_v57  ;;  %v21278_v57 = vld [vmem:[%s25815_s22 + $0x58] sm:$0xff]  }
0x187b   : > { %19280 = vmatmul.mubr.msk.bf16.gmra.mrb[184].mxu0 %vm4481_vm4, %v21235_v26 }
0x187c   : > { %19305 = vmatprep.mubr.msk.bf16.mxu0 %vm4481_vm4, %v21236_v27 }
0x1883   : > { %19306 = vmatmul.mubr.msk.bf16.vlgmr.msra.gmra.mrb[180].mxu0 %vm4481_vm4, %v21237_v36 }
0x1884   : > { %19334 = vmatpush3.bf16.msra.mxu0 %v24361_v5  ;;  %19309 = vmatprep.mubr.msk.bf16.mxu0 %vm4481_vm4, %v21238_v37 }
0x1885   : > { %19343 = vmatprep.subr.bf16.mxu0 %v22077_v24 }
0x188b   : > { %19310 = vmatmul.mubr.msk.bf16.gmra.mrb[184].mxu0 %vm4481_vm4, %v21239_v40 }
0x188c   : > { %19335 = vmatprep.mubr.msk.bf16.mxu0 %vm4481_vm4, %v21240_v53 }
0x1893   : > { %19336 = vmatmul.mubr.msk.bf16.vlgmr.msra.gmra.mrb[180].mxu0 %vm4481_vm4, %v21241_v1 }
0x1894   : > { %19344 = vmatpush3.bf16.msra.mxu0 %v21242_v4  ;;  %19339 = vmatprep.mubr.msk.bf16.mxu0 %vm4481_vm4, %v21248_v16 }
0x1895   : > { %19345 = vmatprep.subr.bf16.mxu0 %v22077_v24 }
0x1898   : > { %19346 = vmatpush3.bf16.msra.mxu0 %v21243_v25 }
0x1899   : > { %19347 = vmatprep.subr.bf16.mxu0 %v22077_v24 }
0x189b   : > { %19340 = vmatmul.mubr.msk.bf16.gmra.mrb[184].mxu0 %vm4481_vm4, %v21249_v32 }
0x189c   : > { %19348 = vmatpush3.bf16.msra.mxu0 %v21244_v45  ;;  %19359 = vmatprep.mubr.msk.bf16.mxu0 %vm22078_vm2, %v22077_v24 }
0x189d   : > { %19349 = vmatprep.subr.bf16.mxu0 %v22077_v24 }
0x18a0   : > { %19350 = vmatpush3.bf16.msra.mxu0 %v21245_v49  ;;  %v21269_v49 = vld [vmem:[%s25815_s22 + $0x40] sm:$0xff]  }
0x18a1   : > { %19351 = vmatprep.subr.bf16.mxu0 %v22077_v24 }
0x18a4   : > { %19352 = vmatpush3.bf16.msra.mxu0 %v21246_v62  ;;  %v21265_v62 = vld [vmem:[%s25817_s6 + $0x8] sm:$0xff]  }
0x18a5   : > { %19353 = vmatprep.subr.bf16.mxu0 %v22077_v24 }
0x18a8   : > { %19354 = vmatpush3.bf16.msra.mxu0 %v21247_v14  ;;  %v21266_v14 = vld [vmem:[%s25817_s6 + $0x10] sm:$0xff]  }
0x18a9   : > { %19355 = vmatprep.subr.bf16.mxu0 %v22077_v24 }
0x18ac   : > { %19356 = vmatpush3.bf16.msra.mxu0 %v21250_v15  ;;  %v21272_v15 = vld [vmem:[%s25815_s22 + $0x48] sm:$0xff]  }
0x18ad   : > { %19357 = vmatprep.subr.bf16.mxu0 %v22077_v24  ;;  %v21258_v24 = vld [vmem:[%s25815_s22 + $0x10] sm:$0xff]  }
0x18ae   : > { %19377 = vmatprep.subr.bf16.mxu1 %v21258_v24 }
0x18af   : > { %19378 = vmatpush3.bf16.msra.mxu1 %v21258_v24  ;;  %v21281_v24 = vld [vmem:[%s25815_s22 + $0x60] sm:$0xff]  }
0x18b0   : > { %19358 = vmatpush3.bf16.msra.mxu0 %v21251_v30  ;;  %v21275_v30 = vld [vmem:[%s25815_s22 + $0x50] sm:$0xff]  }
0x18b3   : > { %19360 = vmatmul.mubr.bf16.vlgmr.msra.gmra.mrb[196].mxu0 %v24128_v54  ;;  %v21259_v54 = vld [vmem:[%s25815_s22 + $0x18] sm:$0xff]  }
0x18b4   : > { %19365 = vmatprep.mubr.msk.bf16.mxu0 %vm4481_vm4, %v21252_v41  ;;  %19379 = vmatprep.subr.bf16.mxu1 %v21259_v54  ;;  %v21267_v41 = vld [vmem:[%s25817_s6 + $0x18] sm:$0xff]  }
0x18b5   : > { %19380 = vmatpush3.bf16.msra.mxu1 %v21259_v54  ;;  %v21270_v54 = vld [vmem:[%s25817_s6 + $0x28] sm:$0xff]  }
0x18b6   : > { %19381 = vmatprep.subr.bf16.mxu1 %v21260_v0 }
0x18b9   : > { %19382 = vmatpush3.bf16.msra.mxu1 %v21260_v0  ;;  %v21271_v0 = vld [vmem:[%s25817_s6 + $0x30] sm:$0xff]  }
0x18ba   : > { %19383 = vmatprep.subr.bf16.mxu1 %v21261_v17 }
0x18bd   : > { %19384 = vmatpush3.bf16.msra.mxu1 %v21261_v17  ;;  %v21283_v17 = vld [vmem:[%s25815_s22 + $0x68] sm:$0xff]  }
0x18be   : > { %19385 = vmatprep.subr.bf16.mxu1 %v21262_v60 }
0x18c1   : > { %19386 = vmatpush3.bf16.msra.mxu1 %v21262_v60  ;;  %v21282_v60 = vld [vmem:[%s25817_s6 + $0x68] sm:$0xff]  }
0x18c2   : > { %19387 = vmatprep.subr.bf16.mxu1 %v21263_v3 }
0x18c5   : > { %19388 = vmatpush3.bf16.msra.mxu1 %v21263_v3  ;;  %v21284_v3 = vld [vmem:[%s25817_s6 + $0x70] sm:$0xff]  }
0x1986   : > { %v10272_v34 = vpop.f32.mrb[196].mxu0 }
0x1987   : > { %v19361_v58 = vpop.f32.mrb[197].mxu0 }
0x1988   : > { %v10275_v5 = vpop.f32.mrb[198].mxu0  ;;  %v21273_v58 = vld [vmem:[%s25817_s6 + $0x38] sm:$0xff]  }
0x1989   : > { %v10279_v12 = vpack.c.bf16 %v10275_v5, %v10272_v34  ;;  %v19362_v39 = vpop.f32.mrb[199].mxu0  ;;  %v21286_v34 = vld [vmem:[%s25815_s22 + $0x70] sm:$0xff]   ;;  %v21274_v5 = vld [vmem:[%s25817_s6 + $0x40] sm:$0xff]  }
0x198a   : > { %v21276_v39 = vld [vmem:[%s25817_s6 + $0x48] sm:$0xff]  }
0x198b   : > { %19363 = vmatprep.subr.bf16.mxu0 %v10279_v12 }
0x198c   : > { %19364 = vmatpush3.bf16.msra.mxu0 %v10279_v12  ;;  %v21287_v12 = vld [vmem:[%s25815_s22 + $0x78] sm:$0xff]  }
0x198f   : > { %19366 = vmatmul.mubr.msk.bf16.vlgmr.msra.gmra.mrb[180].mxu0 %vm4481_vm4, %v21253_v43  ;;  %v21277_v43 = vld [vmem:[%s25817_s6 + $0x50] sm:$0xff]  }
0x1990   : > { %19369 = vmatprep.mubr.msk.bf16.mxu0 %vm4481_vm4, %v21254_v50  ;;  %v21279_v50 = vld [vmem:[%s25817_s6 + $0x58] sm:$0xff]  }
0x1997   : > { %19370 = vmatmul.mubr.msk.bf16.gmra.mrb[184].mxu0 %vm4481_vm4, %v21255_v59  ;;  %v21280_v59 = vld [vmem:[%s25817_s6 + $0x60] sm:$0xff]  }
0x1a62   : > { %v19367_v13 = vpop.f32.mrb[180].mxu0 }
0x1a63   : > { %v19970_v29 = vadd.f32 %v19367_v13, %v15910_v10  ;;  %v10346_v38 = vpop.f32.mrb[181].mxu0  ;;  %v21288_v13 = vld [vmem:[%s25817_s6 + $0x80] sm:$0xff]  }
0x1a64   : > { %v19971_v56 = vadd.f32 %v15910_v10, %v10346_v38  ;;  %v19368_v28 = vpop.f32.mrb[182].mxu0 }
0x1a65   : > { %v19972_v23 = vadd.f32 %v19368_v28, %v15910_v10  ;;  %v10349_v33 = vpop.f32.mrb[183].mxu0  ;;  %v10387_v46 = vmax.f32 %v19970_v29, 0.0 }
0x1a66   : > { %v19973_v42 = vadd.f32 %v15910_v10, %v10349_v33  ;;  %v10385_v19 = vmax.f32 %v19971_v56, 0.0 }
0x1a67   : > { %v10388_v11 = vmax.f32 %v19972_v23, 0.0 }
0x1a68   : > { %v10386_v22 = vmax.f32 %v19973_v42, 0.0 }
0x1a69   : > { %v24590_v52 = vpack.c.bf16 %v10388_v11, %v10387_v46 }
0x1a6a   : > { %v24592_v55 = vpack.c.bf16 %v10386_v22, %v10385_v19  ;;  %v19371_v44 = vpop.f32.mrb[184].mxu0 }
0x1a6b   : > { %v19974_v51 = vadd.f32 %v19371_v44, %v15910_v10  ;;  %v10362_v47 = vpop.f32.mrb[185].mxu0 }
0x1a6c   : > { %v19975_v63 = vadd.f32 %v15910_v10, %v10362_v47  ;;  %v19372_v2 = vpop.f32.mrb[186].mxu0  ;;  %19389 = vmatprep.mubr.bf16.mxu1 %v24592_v55  ;;  %v21289_v47 = vld [vmem:[%s25817_s6 + $0x88] sm:$0xff]  }
0x1a6d   : > { %v19976_v6 = vadd.f32 %v19372_v2, %v15910_v10  ;;  %v10365_v9 = vpop.f32.mrb[187].mxu0  ;;  %19390 = vmatmul.mubr.bf16.vlgmr.msra.gmra.mrb[148].mxu1 %v24590_v52  ;;  %v10391_v21 = vmax.f32 %v19974_v51, 0.0  ;;  %v21293_v51 = vld [vmem:[%s25815_s22 + $0x80] sm:$0xff]   ;;  %v21296_v2 = vld [vmem:[%s25815_s22 + $0x88] sm:$0xff]  }
0x1a6e   : > { %v19977_v18 = vadd.f32 %v15910_v10, %v10365_v9  ;;  %v10389_v35 = vmax.f32 %v19975_v63, 0.0  ;;  %v21285_v10 = vld [vmem:[%s25817_s6 + $0x78] sm:$0xff]   ;;  %v21290_v63 = vld [vmem:[%s25817_s6 + $0x90] sm:$0xff]  }
0x1a6f   : > { %v10392_v31 = vmax.f32 %v19976_v6, 0.0  ;;  %v21299_v6 = vld [vmem:[%s25815_s22 + $0x90] sm:$0xff]   ;;  %v21291_v9 = vld [vmem:[%s25817_s6 + $0x98] sm:$0xff]  }
0x1a70   : > { %v10390_v61 = vmax.f32 %v19977_v18, 0.0  ;;  %v21292_v18 = vld [vmem:[%s25817_s6 + $0xa0] sm:$0xff]  }
0x1a71   : > { %v24596_v7 = vpack.c.bf16 %v10392_v31, %v10391_v21  ;;  %v21302_v21 = vld [vmem:[%s25815_s22 + $0x98] sm:$0xff]   ;;  %v21305_v31 = vld [vmem:[%s25815_s22 + $0xa0] sm:$0xff]  }
0x1a72   : > { %v24598_v8 = vpack.c.bf16 %v10390_v61, %v10389_v35  ;;  %v21294_v35 = vld [vmem:[%s25817_s6 + $0xa8] sm:$0xff]   ;;  %v21295_v61 = vld [vmem:[%s25817_s6 + $0xb0] sm:$0xff]  }
0x1a74   : > { %19393 = vmatprep.mubr.bf16.mxu1 %v24598_v8 }
0x1a75   : > { %19394 = vmatmul.mubr.bf16.gmra.mrb[152].mxu1 %v24596_v7 }
0x1a76   : > { %19405 = vmatprep.mubr.msk.bf16.mxu1 %vm3029_vm3, %v21264_v20  ;;  %v21307_v20 = vld [vmem:[%s25815_s22 + $0xa8] sm:$0xff]  }
0x1b40   : > { %v19391_v26 = vpop.f32.mrb[148].mxu1 }
0x1b41   : > { %v10534_v27 = vpop.f32.mrb[149].mxu1 }
0x1b42   : > { %v19392_v36 = vpop.f32.mrb[150].mxu1 }
0x1b43   : > { %v10566_v37 = vpack.c.bf16 %v19392_v36, %v19391_v26  ;;  %v10537_v40 = vpop.f32.mrb[151].mxu1  ;;  %v21310_v26 = vld [vmem:[%s25815_s22 + $0xb0] sm:$0xff]   ;;  %v21298_v36 = vld [vmem:[%s25817_s6 + $0xc0] sm:$0xff]  }
0x1b44   : > { %v10565_v53 = vpack.c.bf16 %v10537_v40, %v10534_v27  ;;  %v21297_v27 = vld [vmem:[%s25817_s6 + $0xb8] sm:$0xff]   ;;  %v21300_v40 = vld [vmem:[%s25817_s6 + $0xc8] sm:$0xff]  }
0x1b46   : > { %19397 = vmatprep.subr.bf16.mxu1 %v10565_v53 }
0x1b47   : > { %19398 = vmatpush3.bf16.msra.mxu1 %v10565_v53  ;;  %v21301_v53 = vld [vmem:[%s25817_s6 + $0xd0] sm:$0xff]  }
0x1b48   : > { %v19395_v1 = vpop.f32.mrb[152].mxu1  ;;  %19399 = vmatprep.subr.bf16.mxu1 %v10566_v37 }
0x1b49   : > { %v10550_v4 = vpop.f32.mrb[153].mxu1 }
0x1b4a   : > { %v19396_v16 = vpop.f32.mrb[154].mxu1 }
0x1b4b   : > { %v10568_v25 = vpack.c.bf16 %v19396_v16, %v19395_v1  ;;  %v10553_v32 = vpop.f32.mrb[155].mxu1  ;;  %19400 = vmatpush3.bf16.msra.mxu1 %v10566_v37  ;;  %v21311_v37 = vld [vmem:[%s25815_s22 + $0xb8] sm:$0xff]   ;;  %v21306_v16 = vld [vmem:[%s25817_s6 + $0xe8] sm:$0xff]  }
0x1b4c   : > { %v10567_v45 = vpack.c.bf16 %v10553_v32, %v10550_v4  ;;  %v21303_v1 = vld [vmem:[%s25817_s6 + $0xd8] sm:$0xff]   ;;  %v21304_v4 = vld [vmem:[%s25817_s6 + $0xe0] sm:$0xff]  }
0x1b4d   : > { %v21309_v32 = vld [vmem:[%s25817_s6 + $0xf8] sm:$0xff]  }
0x1b4e   : > { %19401 = vmatprep.subr.bf16.mxu1 %v10567_v45 }
0x1b4f   : > { %19402 = vmatpush3.bf16.msra.mxu1 %v10567_v45  ;;  %v21312_v45 = vld [vmem:[%s25817_s6 + $0x120] sm:$0xff]  }
0x1b50   : > { %19403 = vmatprep.subr.bf16.mxu1 %v10568_v25 }
0x1b53   : > { %19404 = vmatpush3.bf16.msra.mxu1 %v10568_v25  ;;  %v21308_v25 = vld [vmem:[%s25817_s6 + $0xf0] sm:$0xff]  }
0x1b54   : > { %19437 = vmatprep.subr.bf16.mxu1 %v21269_v49 }
0x1b56   : > { %19406 = vmatmul.mubr.msk.bf16.vlgmr.msra.gmra.mrb[156].mxu1 %vm3029_vm3, %v21265_v62 }
0x1b57   : > { %19409 = vmatprep.mubr.msk.bf16.mxu1 %vm3029_vm3, %v21266_v14  ;;  %19438 = vmatpush3.bf16.msra.mxu1 %v21269_v49 }
0x1b58   : > { %19439 = vmatprep.subr.bf16.mxu1 %v21272_v15 }
0x1b5b   : > { %19440 = vmatpush3.bf16.msra.mxu1 %v21272_v15 }
0x1b5c   : > { %19441 = vmatprep.subr.bf16.mxu1 %v21275_v30 }
0x1b5e   : > { %19410 = vmatmul.mubr.msk.bf16.gmra.mrb[160].mxu1 %vm3029_vm3, %v21267_v41 }
0x1b5f   : > { %19413 = vmatprep.mubr.msk.bf16.mxu1 %vm3029_vm3, %v21268_v48  ;;  %19442 = vmatpush3.bf16.msra.mxu1 %v21275_v30 }
0x1b60   : > { %19443 = vmatprep.subr.bf16.mxu1 %v21278_v57 }
0x1b63   : > { %19444 = vmatpush3.bf16.msra.mxu1 %v21278_v57 }
0x1b64   : > { %19445 = vmatprep.subr.bf16.mxu1 %v21281_v24 }
0x1b66   : > { %19414 = vmatmul.mubr.msk.bf16.gmra.mrb[164].mxu1 %vm3029_vm3, %v21270_v54 }
0x1b67   : > { %19417 = vmatprep.mubr.msk.bf16.mxu1 %vm3029_vm3, %v21271_v0  ;;  %19446 = vmatpush3.bf16.msra.mxu1 %v21281_v24 }
0x1b68   : > { %19447 = vmatprep.subr.bf16.mxu1 %v21283_v17 }
0x1b6b   : > { %19448 = vmatpush3.bf16.msra.mxu1 %v21283_v17 }
0x1b6c   : > { %19449 = vmatprep.subr.bf16.mxu1 %v21286_v34 }
0x1b6e   : > { %19418 = vmatmul.mubr.msk.bf16.gmra.mrb[168].mxu1 %vm3029_vm3, %v21273_v58 }
0x1b6f   : > { %19421 = vmatprep.mubr.msk.bf16.mxu1 %vm3029_vm3, %v21274_v5  ;;  %19450 = vmatpush3.bf16.msra.mxu1 %v21286_v34 }
0x1b70   : > { %19451 = vmatprep.subr.bf16.mxu1 %v21287_v12 }
0x1b73   : > { %19452 = vmatpush3.bf16.msra.mxu1 %v21287_v12 }
0x1b76   : > { %19422 = vmatmul.mubr.msk.bf16.gmra.mrb[172].mxu1 %vm3029_vm3, %v21276_v39 }
0x1b77   : > { %19425 = vmatprep.mubr.msk.bf16.mxu1 %vm3029_vm3, %v21277_v43 }
0x1b7e   : > { %19426 = vmatmul.mubr.msk.bf16.gmra.mrb[176].mxu1 %vm3029_vm3, %v21279_v50 }
0x1b7f   : > { %19429 = vmatprep.mubr.msk.bf16.mxu1 %vm3029_vm3, %v21280_v59 }
0x1b86   : > { %19430 = vmatmul.mubr.msk.bf16.gmra.mrb[180].mxu1 %vm3029_vm3, %v21282_v60  ;;  %v21317_v60 = vld [vmem:[%s25815_s22 + $0xc0] sm:$0xff]  }
0x1b87   : > { %19433 = vmatprep.mubr.msk.bf16.mxu1 %vm3029_vm3, %v21284_v3  ;;  %v21313_v3 = vld [vmem:[%s25817_s6 + $0x128] sm:$0xff]  }
0x1b8e   : > { %19434 = vmatmul.mubr.msk.bf16.gmra.mrb[184].mxu1 %vm3029_vm3, %v21285_v10  ;;  %v21314_v10 = vld [vmem:[%s25817_s6 + $0x130] sm:$0xff]  }
0x1b8f   : > { %19453 = vmatprep.mubr.bf16.mxu1 %v24592_v55 }
0x1b96   : > { %19454 = vmatmul.mubr.bf16.vlgmr.msra.gmra.mrb[188].mxu1 %v24590_v52 }
0x1b97   : > { %19457 = vmatprep.mubr.bf16.mxu1 %v24598_v8 }
0x1b9e   : > { %19458 = vmatmul.mubr.bf16.gmra.mrb[192].mxu1 %v24596_v7 }
0x1b9f   : > { %19469 = vmatprep.mubr.msk.bf16.mxu1 %vm3029_vm3, %v21288_v13  ;;  %v21319_v13 = vld [vmem:[%s25815_s22 + $0xc8] sm:$0xff]  }
0x1c69   : > { %v19455_v29 = vpop.f32.mrb[188].mxu1 }
0x1c6a   : > { %v11022_v38 = vpop.f32.mrb[189].mxu1 }
0x1c6b   : > { %v19456_v56 = vpop.f32.mrb[190].mxu1 }
0x1c6c   : > { %v11054_v28 = vpack.c.bf16 %v19456_v56, %v19455_v29  ;;  %v11025_v23 = vpop.f32.mrb[191].mxu1  ;;  %v21321_v29 = vld [vmem:[%s25815_s22 + $0xd0] sm:$0xff]   ;;  %v21316_v56 = vld [vmem:[%s25817_s6 + $0x140] sm:$0xff]  }
0x1c6d   : > { %v11053_v33 = vpack.c.bf16 %v11025_v23, %v11022_v38  ;;  %v21315_v38 = vld [vmem:[%s25817_s6 + $0x138] sm:$0xff]   ;;  %v21325_v23 = vld [vmem:[%s25815_s22 + $0xe0] sm:$0xff]  }
0x1c6f   : > { %19461 = vmatprep.subr.bf16.mxu1 %v11053_v33 }
0x1c70   : > { %19462 = vmatpush3.bf16.msra.mxu1 %v11053_v33  ;;  %v21318_v33 = vld [vmem:[%s25817_s6 + $0x148] sm:$0xff]  }
0x1c71   : > { %v19459_v42 = vpop.f32.mrb[192].mxu1  ;;  %19463 = vmatprep.subr.bf16.mxu1 %v11054_v28 }
0x1c72   : > { %v11038_v46 = vpop.f32.mrb[193].mxu1 }
0x1c73   : > { %v19460_v11 = vpop.f32.mrb[194].mxu1 }
0x1c74   : > { %v11056_v19 = vpack.c.bf16 %v19460_v11, %v19459_v42  ;;  %v11041_v22 = vpop.f32.mrb[195].mxu1  ;;  %19464 = vmatpush3.bf16.msra.mxu1 %v11054_v28  ;;  %v21323_v28 = vld [vmem:[%s25815_s22 + $0xd8] sm:$0xff]   ;;  %v21320_v42 = vld [vmem:[%s25817_s6 + $0x150] sm:$0xff]  }
0x1c75   : > { %v11055_v44 = vpack.c.bf16 %v11041_v22, %v11038_v46  ;;  %v21327_v46 = vld [vmem:[%s25815_s22 + $0xe8] sm:$0xff]   ;;  %v21329_v11 = vld [vmem:[%s25815_s22 + $0xf0] sm:$0xff]   ;;  %v21324_v22 = vld [vmem:[%s25817_s6 + $0x160] sm:$0xff]  }
0x1c77   : > { %19465 = vmatprep.subr.bf16.mxu1 %v11055_v44 }
0x1c78   : > { %19466 = vmatpush3.bf16.msra.mxu1 %v11055_v44  ;;  %v21331_v44 = vld [vmem:[%s25815_s22 + $0xf8] sm:$0xff]  }
0x1c79   : > { %19467 = vmatprep.subr.bf16.mxu1 %v11056_v19 }
0x1c7c   : > { %19468 = vmatpush3.bf16.msra.mxu1 %v11056_v19  ;;  %v21322_v19 = vld [vmem:[%s25817_s6 + $0x158] sm:$0xff]  }
0x1c7d   : > { %19501 = vmatprep.subr.bf16.mxu1 %v21293_v51 }
0x1c7f   : > { %19470 = vmatmul.mubr.msk.bf16.vlgmr.msra.gmra.mrb[156].mxu1 %vm3029_vm3, %v21289_v47  ;;  %v21326_v47 = vld [vmem:[%s25817_s6 + $0x168] sm:$0xff]  }
0x1c80   : > { %19473 = vmatprep.mubr.msk.bf16.mxu1 %vm3029_vm3, %v21290_v63  ;;  %19502 = vmatpush3.bf16.msra.mxu1 %v21293_v51  ;;  %v21332_v51 = vld [vmem:[%s25815_s22 + $0x100] sm:$0xff]   ;;  %v21328_v63 = vld [vmem:[%s25817_s6 + $0x170] sm:$0xff]  }
0x1c81   : > { %19503 = vmatprep.subr.bf16.mxu1 %v21296_v2 }
0x1c84   : > { %19504 = vmatpush3.bf16.msra.mxu1 %v21296_v2  ;;  %v21330_v2 = vld [vmem:[%s25817_s6 + $0x178] sm:$0xff]  }
0x1c85   : > { %19505 = vmatprep.subr.bf16.mxu1 %v21299_v6 }
0x1c87   : > { %19474 = vmatmul.mubr.msk.bf16.gmra.mrb[160].mxu1 %vm3029_vm3, %v21291_v9  ;;  %v21334_v9 = vld [vmem:[%s25815_s22 + $0x110] sm:$0xff]  }
0x1c88   : > { %19477 = vmatprep.mubr.msk.bf16.mxu1 %vm3029_vm3, %v21292_v18  ;;  %19506 = vmatpush3.bf16.msra.mxu1 %v21299_v6  ;;  %v21333_v6 = vld [vmem:[%s25815_s22 + $0x108] sm:$0xff]   ;;  %v21335_v18 = vld [vmem:[%s25815_s22 + $0x118] sm:$0xff]  }
0x1c89   : > { %19507 = vmatprep.subr.bf16.mxu1 %v21302_v21 }
0x1c8c   : > { %19508 = vmatpush3.bf16.msra.mxu1 %v21302_v21  ;;  %v21336_v21 = vld [vmem:[%s25815_s22 + $0x120] sm:$0xff]  }
0x1c8d   : > { %19509 = vmatprep.subr.bf16.mxu1 %v21305_v31 }
0x1c8f   : > { %19478 = vmatmul.mubr.msk.bf16.gmra.mrb[164].mxu1 %vm3029_vm3, %v21294_v35  ;;  %v21338_v35 = vld [vmem:[%s25815_s22 + $0x130] sm:$0xff]  }
0x1c90   : > { %19481 = vmatprep.mubr.msk.bf16.mxu1 %vm3029_vm3, %v21295_v61  ;;  %19510 = vmatpush3.bf16.msra.mxu1 %v21305_v31  ;;  %v21337_v31 = vld [vmem:[%s25815_s22 + $0x128] sm:$0xff]   ;;  %v21339_v61 = vld [vmem:[%s25815_s22 + $0x138] sm:$0xff]  }
0x1c91   : > { %19511 = vmatprep.subr.bf16.mxu1 %v21307_v20 }
0x1c94   : > { %19512 = vmatpush3.bf16.msra.mxu1 %v21307_v20  ;;  %v21340_v20 = vld [vmem:[%s25815_s22 + $0x140] sm:$0xff]  }
0x1c95   : > { %19513 = vmatprep.subr.bf16.mxu1 %v21310_v26 }
0x1c97   : > { %19482 = vmatmul.mubr.msk.bf16.gmra.mrb[168].mxu1 %vm3029_vm3, %v21297_v27  ;;  %v21342_v27 = vld [vmem:[%s25815_s22 + $0x150] sm:$0xff]  }
0x1c98   : > { %19485 = vmatprep.mubr.msk.bf16.mxu1 %vm3029_vm3, %v21298_v36  ;;  %19514 = vmatpush3.bf16.msra.mxu1 %v21310_v26  ;;  %v21341_v26 = vld [vmem:[%s25815_s22 + $0x148] sm:$0xff]   ;;  %v21343_v36 = vld [vmem:[%s25815_s22 + $0x158] sm:$0xff]  }
0x1c99   : > { %19515 = vmatprep.subr.bf16.mxu1 %v21311_v37 }
0x1c9c   : > { %19516 = vmatpush3.bf16.msra.mxu1 %v21311_v37  ;;  %v21344_v37 = vld [vmem:[%s25815_s22 + $0x160] sm:$0xff]  }
0x1c9f   : > { %19486 = vmatmul.mubr.msk.bf16.gmra.mrb[172].mxu1 %vm3029_vm3, %v21300_v40  ;;  %v21345_v40 = vld [vmem:[%s25815_s22 + $0x168] sm:$0xff]  }
0x1ca0   : > { %19489 = vmatprep.mubr.msk.bf16.mxu1 %vm3029_vm3, %v21301_v53  ;;  %v21346_v53 = vld [vmem:[%s25815_s22 + $0x170] sm:$0xff]  }
0x1ca7   : > { %19490 = vmatmul.mubr.msk.bf16.gmra.mrb[176].mxu1 %vm3029_vm3, %v21303_v1  ;;  %v21347_v1 = vld [vmem:[%s25815_s22 + $0x178] sm:$0xff]  }
0x1ca8   : > { %19493 = vmatprep.mubr.msk.bf16.mxu1 %vm3029_vm3, %v21304_v4  ;;  %v21348_v4 = vld [vmem:[%s25815_s22 + $0x180] sm:$0xff]  }
0x1caf   : > { %19494 = vmatmul.mubr.msk.bf16.gmra.mrb[180].mxu1 %vm3029_vm3, %v21306_v16  ;;  %v21349_v16 = vld [vmem:[%s25815_s22 + $0x188] sm:$0xff]  }
0x1cb0   : > { %19497 = vmatprep.mubr.msk.bf16.mxu1 %vm3029_vm3, %v21308_v25  ;;  %v21350_v25 = vld [vmem:[%s25815_s22 + $0x190] sm:$0xff]  }
0x1cb7   : > { %19498 = vmatmul.mubr.msk.bf16.gmra.mrb[184].mxu1 %vm3029_vm3, %v21309_v32  ;;  %v21351_v32 = vld [vmem:[%s25815_s22 + $0x198] sm:$0xff]  }
0x1cb8   : > { %19517 = vmatprep.mubr.bf16.mxu1 %v24592_v55 }
0x1cbf   : > { %19518 = vmatmul.mubr.bf16.vlgmr.msra.gmra.mrb[196].mxu1 %v24590_v52 }
0x1cc0   : > { %19521 = vmatprep.mubr.bf16.mxu1 %v24598_v8 }
0x1cc7   : > { %19522 = vmatmul.mubr.bf16.gmra.mrb[200].mxu1 %v24596_v7 }
0x1cc8   : > { %19541 = vmatprep.mubr.msk.bf16.mxu1 %vm3029_vm3, %v21312_v45  ;;  %v21352_v45 = vld [vmem:[%s25815_s22 + $0x1a0] sm:$0xff]  }
0x1d52   : > { %v24790_v49 = vpop.f32.mrb[156].mxu1 }
0x1d53   : > { %v24792_v62 = vpop.f32.mrb[157].mxu1 }
0x1d54   : > { %v24794_v14 = vpop.f32.mrb[158].mxu1 }
0x1d55   : > { %v24796_v15 = vpop.f32.mrb[159].mxu1 }
0x1d5a   : > { %v24798_v30 = vpop.f32.mrb[160].mxu1 }
0x1d5b   : > { %v24800_v41 = vpop.f32.mrb[161].mxu1 }
0x1d5c   : > { %v24802_v48 = vpop.f32.mrb[162].mxu1 }
0x1d5d   : > { %v24804_v57 = vpop.f32.mrb[163].mxu1 }
0x1d92   : > { %v19519_v24 = vpop.f32.mrb[196].mxu1 }
0x1d93   : > { %v11510_v54 = vpop.f32.mrb[197].mxu1 }
0x1d94   : > { %v19520_v0 = vpop.f32.mrb[198].mxu1 }
0x1d95   : > { %v11542_v17 = vpack.c.bf16 %v19520_v0, %v19519_v24  ;;  %v11513_v34 = vpop.f32.mrb[199].mxu1  ;;  %v21353_v24 = vld [vmem:[%s25815_s22 + $0x1a8] sm:$0xff]   ;;  %v21355_v0 = vld [vmem:[%s25815_s22 + $0x1b8] sm:$0xff]  }
0x1d96   : > { %v11541_v58 = vpack.c.bf16 %v11513_v34, %v11510_v54  ;;  %v21354_v54 = vld [vmem:[%s25815_s22 + $0x1b0] sm:$0xff]   ;;  %v21373_v34 = vld [vmem:[%s25817_s6 + $0x108] sm:$0xff]  }
0x1d98   : > { %19525 = vmatprep.subr.bf16.mxu0 %v11541_v58  ;;  %19949 = vmatprep.subr.bf16.mxu1 %v11541_v58 }
0x1d99   : > { %19526 = vmatpush3.bf16.msra.mxu0 %v11541_v58  ;;  %19953 = vmatpush3.bf16.msra.mxu1 %v11541_v58  ;;  %v21356_v58 = vld [vmem:[%s25815_s22 + $0x1c0] sm:$0xff]  }
0x1d9a   : > { %v19523_v5 = vpop.f32.mrb[200].mxu1  ;;  %19527 = vmatprep.subr.bf16.mxu0 %v11542_v17  ;;  %19950 = vmatprep.subr.bf16.mxu1 %v11542_v17 }
0x1d9b   : > { %v11526_v12 = vpop.f32.mrb[201].mxu1 }
0x1d9c   : > { %v19524_v39 = vpop.f32.mrb[202].mxu1 }
0x1d9d   : > { %v11544_v43 = vpack.c.bf16 %v19524_v39, %v19523_v5  ;;  %v11529_v50 = vpop.f32.mrb[203].mxu1  ;;  %19528 = vmatpush3.bf16.msra.mxu0 %v11542_v17  ;;  %19954 = vmatpush3.bf16.msra.mxu1 %v11542_v17  ;;  %v21372_v17 = vld [vmem:[%s25817_s6 + $0x100] sm:$0xff]   ;;  %v21357_v5 = vld [vmem:[%s25815_s22 + $0x1c8] sm:$0xff]   ;;  %v21375_v39 = vld [vmem:[%s25817_s6 + $0x118] sm:$0xff]  }
0x1d9e   : > { %v11543_v59 = vpack.c.bf16 %v11529_v50, %v11526_v12  ;;  %19533 = vmatprep.mubr.msk.bf16.mxu0 %vm3029_vm3, %v21372_v17  ;;  %v21374_v12 = vld [vmem:[%s25817_s6 + $0x110] sm:$0xff]   ;;  %v21359_v50 = vld [vmem:[%s25815_s22 + $0x1d8] sm:$0xff]  }
0x1da0   : > { %19529 = vmatprep.subr.bf16.mxu0 %v11543_v59  ;;  %19951 = vmatprep.subr.bf16.mxu1 %v11543_v59 }
0x1da1   : > { %19530 = vmatpush3.bf16.msra.mxu0 %v11543_v59  ;;  %19955 = vmatpush3.bf16.msra.mxu1 %v11543_v59  ;;  %v21376_v59 = vld [vmem:[%s25817_s6 + $0x180] sm:$0xff]  }
0x1da2   : > { %19531 = vmatprep.subr.bf16.mxu0 %v11544_v43  ;;  %19952 = vmatprep.subr.bf16.mxu1 %v11544_v43 }
0x1da5   : > { %19532 = vmatpush3.bf16.msra.mxu0 %v11544_v43  ;;  %19956 = vmatpush3.bf16.msra.mxu1 %v11544_v43  ;;  %v21358_v43 = vld [vmem:[%s25815_s22 + $0x1d0] sm:$0xff]  }
0x1da6   : > { %19565 = vmatprep.subr.bf16.mxu1 %v21317_v60 }
0x1da8   : > { %19542 = vmatmul.mubr.msk.bf16.vlgmr.msra.gmra.mrb[164].mxu1 %vm3029_vm3, %v21313_v3  ;;  %19534 = vmatmul.mubr.msk.bf16.vlgmr.msra.gmra.mrb[200].mxu0 %vm3029_vm3, %v21373_v34  ;;  %v21361_v3 = vld [vmem:[%s25815_s22 + $0x1e8] sm:$0xff]  }
0x1da9   : > { %19545 = vmatprep.mubr.msk.bf16.mxu1 %vm3029_vm3, %v21314_v10  ;;  %19566 = vmatpush3.bf16.msra.mxu1 %v21317_v60  ;;  %v21360_v60 = vld [vmem:[%s25815_s22 + $0x1e0] sm:$0xff]   ;;  %v21362_v10 = vld [vmem:[%s25815_s22 + $0x1f0] sm:$0xff]   ;;  %v21377_v34 = vld [vmem:[%s25817_s6 + $0x188] sm:$0xff]  }
0x1daa   : > { %19567 = vmatprep.subr.bf16.mxu1 %v21319_v13  ;;  %19537 = vmatprep.mubr.msk.bf16.mxu0 %vm3029_vm3, %v21374_v12  ;;  %v21380_v12 = vld [vmem:[%s25817_s6 + $0x1a0] sm:$0xff]  }
0x1dad   : > { %19568 = vmatpush3.bf16.msra.mxu1 %v21319_v13  ;;  %v21363_v13 = vld [vmem:[%s25815_s22 + $0x1f8] sm:$0xff]  }
0x1dae   : > { %19569 = vmatprep.subr.bf16.mxu1 %v21321_v29 }
0x1db0   : > { %19546 = vmatmul.mubr.msk.bf16.gmra.mrb[168].mxu1 %vm3029_vm3, %v21315_v38  ;;  %19538 = vmatmul.mubr.msk.bf16.gmra.mrb[204].mxu0 %vm3029_vm3, %v21375_v39  ;;  %v21365_v38 = vld [vmem:[%s25815_s22 + $0x208] sm:$0xff]  }
0x1db1   : > { %19549 = vmatprep.mubr.msk.bf16.mxu1 %vm3029_vm3, %v21316_v56  ;;  %19570 = vmatpush3.bf16.msra.mxu1 %v21321_v29  ;;  %v21364_v29 = vld [vmem:[%s25815_s22 + $0x200] sm:$0xff]   ;;  %v21366_v56 = vld [vmem:[%s25815_s22 + $0x210] sm:$0xff]  }
0x1db2   : > { %19571 = vmatprep.subr.bf16.mxu1 %v21323_v28  ;;  %19597 = vmatprep.mubr.msk.bf16.mxu0 %vm3029_vm3, %v21376_v59  ;;  %v21381_v59 = vld [vmem:[%s25817_s6 + $0x1a8] sm:$0xff]  }
0x1db5   : > { %19572 = vmatpush3.bf16.msra.mxu1 %v21323_v28  ;;  %v21367_v28 = vld [vmem:[%s25815_s22 + $0x218] sm:$0xff]  }
0x1db6   : > { %19573 = vmatprep.subr.bf16.mxu1 %v21325_v23 }
0x1db8   : > { %19550 = vmatmul.mubr.msk.bf16.gmra.mrb[172].mxu1 %vm3029_vm3, %v21318_v33  ;;  %v21369_v33 = vld [vmem:[%s25815_s22 + $0x228] sm:$0xff]  }
0x1db9   : > { %19553 = vmatprep.mubr.msk.bf16.mxu1 %vm3029_vm3, %v21320_v42  ;;  %19574 = vmatpush3.bf16.msra.mxu1 %v21325_v23  ;;  %v21368_v23 = vld [vmem:[%s25815_s22 + $0x220] sm:$0xff]   ;;  %v21370_v42 = vld [vmem:[%s25815_s22 + $0x230] sm:$0xff]  }
0x1dba   : > { %19575 = vmatprep.subr.bf16.mxu1 %v21327_v46 }
0x1dbd   : > { %19576 = vmatpush3.bf16.msra.mxu1 %v21327_v46 }
0x1dbe   : > { %19577 = vmatprep.subr.bf16.mxu1 %v21329_v11 }
0x1dc0   : > { %19554 = vmatmul.mubr.msk.bf16.gmra.mrb[176].mxu1 %vm3029_vm3, %v21322_v19 }
0x1dc1   : > { %19557 = vmatprep.mubr.msk.bf16.mxu1 %vm3029_vm3, %v21324_v22  ;;  %19578 = vmatpush3.bf16.msra.mxu1 %v21329_v11 }
0x1dc2   : > { %19579 = vmatprep.subr.bf16.mxu1 %v21331_v44 }
0x1dc5   : > { %19580 = vmatpush3.bf16.msra.mxu1 %v21331_v44 }
0x1dc6   : > { %19629 = vmatprep.subr.bf16.mxu1 %v21332_v51 }
0x1dc8   : > { %19558 = vmatmul.mubr.msk.bf16.gmra.mrb[180].mxu1 %vm3029_vm3, %v21326_v47 }
0x1dc9   : > { %19561 = vmatprep.mubr.msk.bf16.mxu1 %vm3029_vm3, %v21328_v63 }
0x1dd0   : > { %19562 = vmatmul.mubr.msk.bf16.gmra.mrb[184].mxu1 %vm3029_vm3, %v21330_v2 }
0x1dd1   : > { %19581 = vmatprep.mubr.bf16.mxu1 %v24592_v55 }
0x1dd8   : > { %19582 = vmatmul.mubr.bf16.vlgmr.msra.gmra.mrb[204].mxu1 %v24590_v52 }
0x1dd9   : > { %19630 = vmatpush3.bf16.msra.mxu1 %v21332_v51  ;;  %19585 = vmatprep.mubr.bf16.mxu1 %v24598_v8 }
0x1dda   : > { %19631 = vmatprep.subr.bf16.mxu1 %v21333_v6 }
0x1ddd   : > { %19632 = vmatpush3.bf16.msra.mxu1 %v21333_v6 }
0x1dde   : > { %19633 = vmatprep.subr.bf16.mxu1 %v21334_v9 }
0x1de0   : > { %19586 = vmatmul.mubr.bf16.gmra.mrb[208].mxu1 %v24596_v7 }
0x1de1   : > { %19634 = vmatpush3.bf16.msra.mxu1 %v21334_v9  ;;  %19645 = vmatprep.mubr.bf16.mxu1 %v24592_v55 }
0x1de2   : > { %19635 = vmatprep.subr.bf16.mxu1 %v21335_v18 }
0x1de5   : > { %19636 = vmatpush3.bf16.msra.mxu1 %v21335_v18 }
0x1de6   : > { %19637 = vmatprep.subr.bf16.mxu1 %v21336_v21 }
0x1de9   : > { %19638 = vmatpush3.bf16.msra.mxu1 %v21336_v21 }
0x1dea   : > { %19639 = vmatprep.subr.bf16.mxu1 %v21337_v31 }
0x1ded   : > { %19640 = vmatpush3.bf16.msra.mxu1 %v21337_v31 }
0x1dee   : > { %19641 = vmatprep.subr.bf16.mxu1 %v21338_v35 }
0x1df1   : > { %19642 = vmatpush3.bf16.msra.mxu1 %v21338_v35 }
0x1df2   : > { %19643 = vmatprep.subr.bf16.mxu1 %v21339_v61 }
0x1df5   : > { %19644 = vmatpush3.bf16.msra.mxu1 %v21339_v61 }
0x1df6   : > { %19693 = vmatprep.subr.bf16.mxu1 %v21340_v20 }
0x1df8   : > { %19646 = vmatmul.mubr.bf16.vlgmr.msra.gmra.mrb[212].mxu1 %v24590_v52 }
0x1df9   : > { %19649 = vmatprep.mubr.bf16.mxu1 %v24598_v8  ;;  %19694 = vmatpush3.bf16.msra.mxu1 %v21340_v20 }
0x1dfa   : > { %19695 = vmatprep.subr.bf16.mxu1 %v21341_v26 }
0x1dfd   : > { %19696 = vmatpush3.bf16.msra.mxu1 %v21341_v26 }
0x1dfe   : > { %19697 = vmatprep.subr.bf16.mxu1 %v21342_v27 }
0x1e00   : > { %19650 = vmatmul.mubr.bf16.gmra.mrb[216].mxu1 %v24596_v7 }
0x1e01   : > { %19698 = vmatpush3.bf16.msra.mxu1 %v21342_v27  ;;  %19709 = vmatprep.mubr.bf16.mxu1 %v24592_v55 }
0x1e02   : > { %19699 = vmatprep.subr.bf16.mxu1 %v21343_v36 }
0x1e05   : > { %19700 = vmatpush3.bf16.msra.mxu1 %v21343_v36 }
0x1e06   : > { %19701 = vmatprep.subr.bf16.mxu1 %v21344_v37 }
0x1e09   : > { %19702 = vmatpush3.bf16.msra.mxu1 %v21344_v37 }
0x1e0a   : > { %19703 = vmatprep.subr.bf16.mxu1 %v21345_v40 }
0x1e0d   : > { %19704 = vmatpush3.bf16.msra.mxu1 %v21345_v40 }
0x1e0e   : > { %19705 = vmatprep.subr.bf16.mxu1 %v21346_v53 }
0x1e11   : > { %19706 = vmatpush3.bf16.msra.mxu1 %v21346_v53 }
0x1e12   : > { %19707 = vmatprep.subr.bf16.mxu1 %v21347_v1 }
0x1e15   : > { %19708 = vmatpush3.bf16.msra.mxu1 %v21347_v1 }
0x1e16   : > { %19757 = vmatprep.subr.bf16.mxu1 %v21348_v4 }
0x1e18   : > { %19710 = vmatmul.mubr.bf16.vlgmr.msra.gmra.mrb[220].mxu1 %v24590_v52 }
0x1e19   : > { %19713 = vmatprep.mubr.bf16.mxu1 %v24598_v8  ;;  %19758 = vmatpush3.bf16.msra.mxu1 %v21348_v4 }
0x1e1a   : > { %19759 = vmatprep.subr.bf16.mxu1 %v21349_v16 }
0x1e1d   : > { %19760 = vmatpush3.bf16.msra.mxu1 %v21349_v16 }
0x1e1e   : > { %19761 = vmatprep.subr.bf16.mxu1 %v21350_v25 }
0x1e20   : > { %19714 = vmatmul.mubr.bf16.gmra.mrb[224].mxu1 %v24596_v7 }
0x1e21   : > { %19762 = vmatpush3.bf16.msra.mxu1 %v21350_v25  ;;  %19773 = vmatprep.mubr.bf16.mxu1 %v24592_v55 }
0x1e22   : > { %19763 = vmatprep.subr.bf16.mxu1 %v21351_v32 }
0x1e25   : > { %19764 = vmatpush3.bf16.msra.mxu1 %v21351_v32 }
0x1e26   : > { %19765 = vmatprep.subr.bf16.mxu1 %v21352_v45 }
0x1e29   : > { %19766 = vmatpush3.bf16.msra.mxu1 %v21352_v45 }
0x1e2a   : > { %19767 = vmatprep.subr.bf16.mxu1 %v21353_v24 }
0x1e2d   : > { %19768 = vmatpush3.bf16.msra.mxu1 %v21353_v24 }
0x1e2e   : > { %19769 = vmatprep.subr.bf16.mxu1 %v21354_v54 }
0x1e31   : > { %19770 = vmatpush3.bf16.msra.mxu1 %v21354_v54 }
0x1e32   : > { %19771 = vmatprep.subr.bf16.mxu1 %v21355_v0 }
0x1e35   : > { %19772 = vmatpush3.bf16.msra.mxu1 %v21355_v0 }
0x1e36   : > { %19821 = vmatprep.subr.bf16.mxu1 %v21356_v58 }
0x1e38   : > { %19774 = vmatmul.mubr.bf16.vlgmr.msra.gmra.mrb[228].mxu1 %v24590_v52 }
0x1e39   : > { %19777 = vmatprep.mubr.bf16.mxu1 %v24598_v8  ;;  %19822 = vmatpush3.bf16.msra.mxu1 %v21356_v58  ;;  %v21378_v58 = vld [vmem:[%s25817_s6 + $0x190] sm:$0xff]  }
0x1e3a   : > { %19823 = vmatprep.subr.bf16.mxu1 %v21357_v5 }
0x1e3d   : > { %19824 = vmatpush3.bf16.msra.mxu1 %v21357_v5  ;;  %v21379_v5 = vld [vmem:[%s25817_s6 + $0x198] sm:$0xff]  }
0x1e3e   : > { %19825 = vmatprep.subr.bf16.mxu1 %v21358_v43 }
0x1e40   : > { %19778 = vmatmul.mubr.bf16.gmra.mrb[232].mxu1 %v24596_v7 }
0x1e41   : > { %19826 = vmatpush3.bf16.msra.mxu1 %v21358_v43  ;;  %19837 = vmatprep.mubr.bf16.mxu1 %v24592_v55 }
0x1e42   : > { %19827 = vmatprep.subr.bf16.mxu1 %v21359_v50 }
0x1e45   : > { %19828 = vmatpush3.bf16.msra.mxu1 %v21359_v50 }
0x1e46   : > { %19829 = vmatprep.subr.bf16.mxu1 %v21360_v60 }
0x1e49   : > { %19830 = vmatpush3.bf16.msra.mxu1 %v21360_v60 }
0x1e4a   : > { %19831 = vmatprep.subr.bf16.mxu1 %v21361_v3 }
0x1e4d   : > { %19832 = vmatpush3.bf16.msra.mxu1 %v21361_v3 }
0x1e4e   : > { %19833 = vmatprep.subr.bf16.mxu1 %v21362_v10 }
0x1e51   : > { %19834 = vmatpush3.bf16.msra.mxu1 %v21362_v10  ;;  %v21382_v10 = vld [vmem:[%s25817_s6 + $0x1b0] sm:$0xff]  }
0x1e52   : > { %19835 = vmatprep.subr.bf16.mxu1 %v21363_v13 }
0x1e55   : > { %19836 = vmatpush3.bf16.msra.mxu1 %v21363_v13 }
0x1e56   : > { %19885 = vmatprep.subr.bf16.mxu1 %v21364_v29 }
0x1e58   : > { %19838 = vmatmul.mubr.bf16.vlgmr.msra.gmra.mrb[236].mxu1 %v24590_v52 }
0x1e59   : > { %19841 = vmatprep.mubr.bf16.mxu1 %v24598_v8  ;;  %19886 = vmatpush3.bf16.msra.mxu1 %v21364_v29 }
0x1e5a   : > { %19887 = vmatprep.subr.bf16.mxu1 %v21365_v38 }
0x1e5d   : > { %19888 = vmatpush3.bf16.msra.mxu1 %v21365_v38 }
0x1e5e   : > { %19889 = vmatprep.subr.bf16.mxu1 %v21366_v56 }
0x1e60   : > { %19842 = vmatmul.mubr.bf16.gmra.mrb[240].mxu1 %v24596_v7 }
0x1e61   : > { %19890 = vmatpush3.bf16.msra.mxu1 %v21366_v56  ;;  %19901 = vmatprep.mubr.bf16.mxu1 %v24592_v55  ;;  %v21371_v55 = vld [vmem:[%s25815_s22 + $0x238] sm:$0xff]  }
0x1e62   : > { %19891 = vmatprep.subr.bf16.mxu1 %v21367_v28 }
0x1e65   : > { %19892 = vmatpush3.bf16.msra.mxu1 %v21367_v28  ;;  %v21383_v28 = vld [vmem:[%s25817_s6 + $0x1b8] sm:$0xff]  }
0x1e66   : > { %19893 = vmatprep.subr.bf16.mxu1 %v21368_v23 }
0x1e69   : > { %19894 = vmatpush3.bf16.msra.mxu1 %v21368_v23 }
0x1e6a   : > { %19895 = vmatprep.subr.bf16.mxu1 %v21369_v33 }
0x1e6d   : > { %19896 = vmatpush3.bf16.msra.mxu1 %v21369_v33 }
0x1e6e   : > { %19897 = vmatprep.subr.bf16.mxu1 %v21370_v42 }
0x1e71   : > { %19898 = vmatpush3.bf16.msra.mxu1 %v21370_v42  ;;  %v21384_v42 = vld [vmem:[%s25817_s6 + $0x1c0] sm:$0xff]  }
0x1e72   : > { %19899 = vmatprep.subr.bf16.mxu1 %v21371_v55 }
0x1e75   : > { %19900 = vmatpush3.bf16.msra.mxu1 %v21371_v55 }
0x1e78   : > { %19902 = vmatmul.mubr.bf16.vlgmr.msra.gmra.mrb[244].mxu1 %v24590_v52 }
0x1e79   : > { %19905 = vmatprep.mubr.bf16.mxu1 %v24598_v8 }
0x1e7b   : > { %v25037_v46 = vpop.f32.mrb[164].mxu1 }
0x1e7c   : > { %v25039_v11 = vpop.f32.mrb[165].mxu1 }
0x1e7d   : > { %v25041_v19 = vpop.f32.mrb[166].mxu1 }
0x1e7e   : > { %v25043_v22 = vpop.f32.mrb[167].mxu1 }
0x1e80   : > { %19906 = vmatmul.mubr.bf16.gmra.mrb[248].mxu1 %v24596_v7 }
0x1e83   : > { %v25046_v44 = vpop.f32.mrb[168].mxu1 }
0x1e84   : > { %v25048_v51 = vpop.f32.mrb[169].mxu1 }
0x1e85   : > { %v25050_v47 = vpop.f32.mrb[170].mxu1 }
0x1e86   : > { %v25052_v63 = vpop.f32.mrb[171].mxu1 }
0x1e8b   : > { %v25054_v52 = vpop.f32.mrb[172].mxu1 }
0x1e8c   : > { %v25056_v8 = vpop.f32.mrb[173].mxu1 }
0x1e8d   : > { %v25058_v2 = vpop.f32.mrb[174].mxu1 }
0x1e8e   : > { %v25060_v6 = vpop.f32.mrb[175].mxu1 }
0x1e93   : > { %v25062_v9 = vpop.f32.mrb[176].mxu1 }
0x1e94   : > { %v25064_v18 = vpop.f32.mrb[177].mxu1 }
0x1e95   : > { %v25066_v7 = vpop.f32.mrb[178].mxu1 }
0x1e96   : > { %v25068_v21 = vpop.f32.mrb[179].mxu1 }
0x1e9b   : > { %v25070_v31 = vpop.f32.mrb[180].mxu1 }
0x1e9c   : > { %v25072_v35 = vpop.f32.mrb[181].mxu1 }
0x1e9d   : > { %v25074_v61 = vpop.f32.mrb[182].mxu1 }
0x1e9e   : > { %v25076_v20 = vpop.f32.mrb[183].mxu1 }
0x1ea3   : > { %v25078_v26 = vpop.f32.mrb[184].mxu1 }
0x1ea4   : > { %v25080_v27 = vpop.f32.mrb[185].mxu1 }
0x1ea5   : > { %v25082_v36 = vpop.f32.mrb[186].mxu1 }
0x1ea6   : > { %v25084_v37 = vpop.f32.mrb[187].mxu1 }
0x1eab   : > { %v19583_v40 = vpop.f32.mrb[204].mxu1 }
0x1eac   : > { %v11998_v53 = vpop.f32.mrb[205].mxu1 }
0x1ead   : > { %v19584_v1 = vpop.f32.mrb[206].mxu1 }
0x1eae   : > { %v12030_v4 = vpack.c.bf16 %v19584_v1, %v19583_v40  ;;  %v12001_v16 = vpop.f32.mrb[207].mxu1  ;;  %v21385_v40 = vld [vmem:[%s25817_s6 + $0x1c8] sm:$0xff]   ;;  %v21387_v1 = vld [vmem:[%s25817_s6 + $0x1d8] sm:$0xff]  }
0x1eaf   : > { %v12029_v25 = vpack.c.bf16 %v12001_v16, %v11998_v53  ;;  %v21386_v53 = vld [vmem:[%s25817_s6 + $0x1d0] sm:$0xff]  }
0x1eb1   : > { %19589 = vmatprep.subr.bf16.mxu0 %v12029_v25 }
0x1eb2   : > { %19590 = vmatpush3.bf16.msra.mxu0 %v12029_v25 }
0x1eb3   : > { %v19587_v32 = vpop.f32.mrb[208].mxu1  ;;  %19591 = vmatprep.subr.bf16.mxu0 %v12030_v4 }
0x1eb4   : > { %v12014_v45 = vpop.f32.mrb[209].mxu1 }
0x1eb5   : > { %v19588_v24 = vpop.f32.mrb[210].mxu1 }
0x1eb6   : > { %v12032_v54 = vpack.c.bf16 %v19588_v24, %v19587_v32  ;;  %v12017_v0 = vpop.f32.mrb[211].mxu1  ;;  %19592 = vmatpush3.bf16.msra.mxu0 %v12030_v4  ;;  %v21388_v4 = vld [vmem:[%s25817_s6 + $0x1e0] sm:$0xff]  }
0x1eb7   : > { %v12031_v17 = vpack.c.bf16 %v12017_v0, %v12014_v45  ;;  %v21389_v45 = vld [vmem:[%s25817_s6 + $0x1e8] sm:$0xff]   ;;  %v21390_v0 = vld [vmem:[%s25817_s6 + $0x1f0] sm:$0xff]  }
0x1eb9   : > { %19593 = vmatprep.subr.bf16.mxu0 %v12031_v17 }
0x1eba   : > { %19594 = vmatpush3.bf16.msra.mxu0 %v12031_v17 }
0x1ebb   : > { %19595 = vmatprep.subr.bf16.mxu0 %v12032_v54 }
0x1ebe   : > { %19596 = vmatpush3.bf16.msra.mxu0 %v12032_v54 }
0x1ec1   : > { %19598 = vmatmul.mubr.msk.bf16.vlgmr.msra.gmra.mrb[200].mxu0 %vm3029_vm3, %v21377_v34 }
0x1ec2   : > { %19601 = vmatprep.mubr.msk.bf16.mxu0 %vm3029_vm3, %v21378_v58 }
0x1ec9   : > { %19602 = vmatmul.mubr.msk.bf16.gmra.mrb[204].mxu0 %vm3029_vm3, %v21379_v5 }
0x1eca   : > { %19605 = vmatprep.mubr.msk.bf16.mxu0 %vm3029_vm3, %v21380_v12  ;;  %v21391_v12 = vld [vmem:[%s25817_s6 + $0x1f8] sm:$0xff]  }
0x1ecb   : > { %v19647_v39 = vpop.f32.mrb[212].mxu1 }
0x1ecc   : > { %v12486_v43 = vpop.f32.mrb[213].mxu1 }
0x1ecd   : > { %v19648_v50 = vpop.f32.mrb[214].mxu1 }
0x1ece   : > { %v12518_v60 = vpack.c.bf16 %v19648_v50, %v19647_v39  ;;  %v12489_v3 = vpop.f32.mrb[215].mxu1  ;;  %v21392_v50 = vld [vmem:[%s25817_s6 + $0x200] sm:$0xff]  }
0x1ecf   : > { %v12517_v13 = vpack.c.bf16 %v12489_v3, %v12486_v43  ;;  %v21394_v3 = vld [vmem:[%s25817_s6 + $0x210] sm:$0xff]  }
0x1ed1   : > { %19653 = vmatprep.subr.bf16.mxu0 %v12517_v13  ;;  %19606 = vmatmul.mubr.msk.bf16.gmra.mrb[208].mxu0 %vm3029_vm3, %v21381_v59 }
0x1ed2   : > { %19654 = vmatpush3.bf16.msra.mxu0 %v12517_v13  ;;  %19609 = vmatprep.mubr.msk.bf16.mxu0 %vm3029_vm3, %v21382_v10  ;;  %v21395_v10 = vld [vmem:[%s25817_s6 + $0x218] sm:$0xff]   ;;  %v21396_v13 = vld [vmem:[%s25817_s6 + $0x220] sm:$0xff]  }
0x1ed3   : > { %v19651_v29 = vpop.f32.mrb[216].mxu1  ;;  %19655 = vmatprep.subr.bf16.mxu0 %v12518_v60 }
0x1ed4   : > { %v12502_v38 = vpop.f32.mrb[217].mxu1 }
0x1ed5   : > { %v19652_v56 = vpop.f32.mrb[218].mxu1 }
0x1ed6   : > { %v12520_v23 = vpack.c.bf16 %v19652_v56, %v19651_v29  ;;  %v12505_v33 = vpop.f32.mrb[219].mxu1  ;;  %19656 = vmatpush3.bf16.msra.mxu0 %v12518_v60  ;;  %v21393_v60 = vld [vmem:[%s25817_s6 + $0x208] sm:$0xff]  }
0x1ed7   : > { %v12519_v55 = vpack.c.bf16 %v12505_v33, %v12502_v38 }
0x1ed9   : > { %19657 = vmatprep.subr.bf16.mxu0 %v12519_v55  ;;  %19610 = vmatmul.mubr.msk.bf16.gmra.mrb[212].mxu0 %vm3029_vm3, %v21383_v28  ;;  %v21397_v28 = vld [vmem:[%s25817_s6 + $0x228] sm:$0xff]  }
0x1eda   : > { %19658 = vmatpush3.bf16.msra.mxu0 %v12519_v55  ;;  %19613 = vmatprep.mubr.msk.bf16.mxu0 %vm3029_vm3, %v21384_v42  ;;  %v21398_v42 = vld [vmem:[%s25817_s6 + $0x230] sm:$0xff]  }
0x1edb   : > { %19659 = vmatprep.subr.bf16.mxu0 %v12520_v23 }
0x1ede   : > { %19660 = vmatpush3.bf16.msra.mxu0 %v12520_v23 }
0x1ee1   : > { %19614 = vmatmul.mubr.msk.bf16.gmra.mrb[216].mxu0 %vm3029_vm3, %v21385_v40 }
0x1ee2   : > { %19617 = vmatprep.mubr.msk.bf16.mxu0 %vm3029_vm3, %v21386_v53 }
0x1ee9   : > { %19618 = vmatmul.mubr.msk.bf16.gmra.mrb[220].mxu0 %vm3029_vm3, %v21387_v1 }
0x1eea   : > { %19621 = vmatprep.mubr.msk.bf16.mxu0 %vm3029_vm3, %v21388_v4  ;;  %v21399_v4 = vld [vmem:[%s25817_s6 + $0x238] sm:$0xff]  }
0x1eeb   : > { %v19711_v16 = vpop.f32.mrb[220].mxu1 }
0x1eec   : > { %v12974_v25 = vpop.f32.mrb[221].mxu1 }
0x1eed   : > { %v19712_v32 = vpop.f32.mrb[222].mxu1 }
0x1eee   : > { %v13006_v24 = vpack.c.bf16 %v19712_v32, %v19711_v16  ;;  %v12977_v54 = vpop.f32.mrb[223].mxu1  ;;  %v21400_v32 = vld [vmem:[%s25817_s6 + $0x240] sm:$0xff]  }
0x1eef   : > { %v13005_v17 = vpack.c.bf16 %v12977_v54, %v12974_v25  ;;  %v21402_v54 = vld [vmem:[%s25817_s6 + $0x250] sm:$0xff]  }
0x1ef1   : > { %19717 = vmatprep.subr.bf16.mxu0 %v13005_v17  ;;  %19622 = vmatmul.mubr.msk.bf16.gmra.mrb[224].mxu0 %vm3029_vm3, %v21389_v45 }
0x1ef2   : > { %19625 = vmatprep.mubr.msk.bf16.mxu0 %vm3029_vm3, %v21390_v0  ;;  %v21403_v0 = vld [vmem:[%s25817_s6 + $0x258] sm:$0xff]  }
0x1ef3   : > { %v19715_v34 = vpop.f32.mrb[224].mxu1 }
0x1ef4   : > { %v12990_v58 = vpop.f32.mrb[225].mxu1 }
0x1ef5   : > { %v19716_v5 = vpop.f32.mrb[226].mxu1 }
0x1ef6   : > { %v13008_v39 = vpack.c.bf16 %v19716_v5, %v19715_v34  ;;  %v12993_v43 = vpop.f32.mrb[227].mxu1 }
0x1ef7   : > { %v13007_v59 = vpack.c.bf16 %v12993_v43, %v12990_v58 }
0x1ef9   : > { %19626 = vmatmul.mubr.msk.bf16.gmra.mrb[228].mxu0 %vm3029_vm3, %v21391_v12  ;;  %v21405_v12 = vld [vmem:[%s25817_s6 + $0x268] sm:$0xff]  }
0x1efa   : > { %19661 = vmatprep.mubr.msk.bf16.mxu0 %vm3029_vm3, %v21392_v50  ;;  %v21406_v50 = vld [vmem:[%s25817_s6 + $0x270] sm:$0xff]  }
0x1f01   : > { %19662 = vmatmul.mubr.msk.bf16.vlgmr.msra.gmra.mrb[200].mxu0 %vm3029_vm3, %v21393_v60 }
0x1f02   : > { %19718 = vmatpush3.bf16.msra.mxu0 %v13005_v17  ;;  %19665 = vmatprep.mubr.msk.bf16.mxu0 %vm3029_vm3, %v21394_v3  ;;  %v21404_v17 = vld [vmem:[%s25817_s6 + $0x260] sm:$0xff]  }
0x1f03   : > { %19719 = vmatprep.subr.bf16.mxu0 %v13006_v24 }
0x1f06   : > { %19720 = vmatpush3.bf16.msra.mxu0 %v13006_v24  ;;  %v21401_v24 = vld [vmem:[%s25817_s6 + $0x248] sm:$0xff]  }
0x1f07   : > { %19721 = vmatprep.subr.bf16.mxu0 %v13007_v59 }
0x1f09   : > { %19666 = vmatmul.mubr.msk.bf16.gmra.mrb[204].mxu0 %vm3029_vm3, %v21395_v10 }
0x1f0a   : > { %19722 = vmatpush3.bf16.msra.mxu0 %v13007_v59  ;;  %19669 = vmatprep.mubr.msk.bf16.mxu0 %vm3029_vm3, %v21396_v13  ;;  %v21407_v13 = vld [vmem:[%s25817_s6 + $0x278] sm:$0xff]  }
0x1f0b   : > { %19723 = vmatprep.subr.bf16.mxu0 %v13008_v39  ;;  %v19775_v29 = vpop.f32.mrb[228].mxu1 }
0x1f0c   : > { %v13462_v38 = vpop.f32.mrb[229].mxu1 }
0x1f0d   : > { %v19776_v56 = vpop.f32.mrb[230].mxu1 }
0x1f0e   : > { %v13494_v23 = vpack.c.bf16 %v19776_v56, %v19775_v29  ;;  %19724 = vmatpush3.bf16.msra.mxu0 %v13008_v39  ;;  %v13465_v33 = vpop.f32.mrb[231].mxu1  ;;  %v21408_v56 = vld [vmem:[%s25817_s6 + $0x280] sm:$0xff]  }
0x1f0f   : > { %v13493_v55 = vpack.c.bf16 %v13465_v33, %v13462_v38  ;;  %v21409_v33 = vld [vmem:[%s25817_s6 + $0x288] sm:$0xff]  }
0x1f11   : > { %19781 = vmatprep.subr.bf16.mxu0 %v13493_v55  ;;  %19670 = vmatmul.mubr.msk.bf16.gmra.mrb[208].mxu0 %vm3029_vm3, %v21397_v28 }
0x1f12   : > { %19673 = vmatprep.mubr.msk.bf16.mxu0 %vm3029_vm3, %v21398_v42  ;;  %v21410_v42 = vld [vmem:[%s25817_s6 + $0x290] sm:$0xff]  }
0x1f13   : > { %v19779_v40 = vpop.f32.mrb[232].mxu1 }
0x1f14   : > { %v13478_v53 = vpop.f32.mrb[233].mxu1 }
0x1f15   : > { %v19780_v1 = vpop.f32.mrb[234].mxu1 }
0x1f16   : > { %v13496_v16 = vpack.c.bf16 %v19780_v1, %v19779_v40  ;;  %v13481_v25 = vpop.f32.mrb[235].mxu1  ;;  %v21411_v40 = vld [vmem:[%s25817_s6 + $0x298] sm:$0xff]  }
0x1f17   : > { %v13495_v45 = vpack.c.bf16 %v13481_v25, %v13478_v53  ;;  %v21412_v53 = vld [vmem:[%s25817_s6 + $0x2a0] sm:$0xff]   ;;  %v21413_v25 = vld [vmem:[%s25817_s6 + $0x2a8] sm:$0xff]  }
0x1f19   : > { %19674 = vmatmul.mubr.msk.bf16.gmra.mrb[212].mxu0 %vm3029_vm3, %v21399_v4 }
0x1f1a   : > { %19677 = vmatprep.mubr.msk.bf16.mxu0 %vm3029_vm3, %v21400_v32 }
0x1f21   : > { %19678 = vmatmul.mubr.msk.bf16.gmra.mrb[216].mxu0 %vm3029_vm3, %v21401_v24  ;;  %v21414_v24 = vld [vmem:[%s25817_s6 + $0x2b0] sm:$0xff]  }
0x1f22   : > { %19681 = vmatprep.mubr.msk.bf16.mxu0 %vm3029_vm3, %v21402_v54 }
0x1f29   : > { %19682 = vmatmul.mubr.msk.bf16.gmra.mrb[220].mxu0 %vm3029_vm3, %v21403_v0 }
0x1f2a   : > { %19685 = vmatprep.mubr.msk.bf16.mxu0 %vm3029_vm3, %v21404_v17 }
0x1f2b   : > { %v19839_v34 = vpop.f32.mrb[236].mxu1 }
0x1f2c   : > { %v13950_v58 = vpop.f32.mrb[237].mxu1 }
0x1f2d   : > { %v19840_v5 = vpop.f32.mrb[238].mxu1 }
0x1f2e   : > { %v25201_v39 = vpack.c.bf16 %v19840_v5, %v19839_v34  ;;  %v13953_v43 = vpop.f32.mrb[239].mxu1  ;;  %v21416_v5 = vld [vmem:[%s25817_s6 + $0x2c0] sm:$0xff]  }
0x1f2f   : > { %v25206_v59 = vpack.c.bf16 %v13953_v43, %v13950_v58  ;;  %v21417_v43 = vld [vmem:[%s25817_s6 + $0x2c8] sm:$0xff]  }
0x1f31   : > { %19686 = vmatmul.mubr.msk.bf16.gmra.mrb[224].mxu0 %vm3029_vm3, %v21405_v12 }
0x1f32   : > { %19689 = vmatprep.mubr.msk.bf16.mxu0 %vm3029_vm3, %v21406_v50  ;;  %v21418_v50 = vld [vmem:[%s25817_s6 + $0x2d0] sm:$0xff]  }
0x1f33   : > { %v19843_v60 = vpop.f32.mrb[240].mxu1 }
0x1f34   : > { %v13966_v3 = vpop.f32.mrb[241].mxu1 }
0x1f35   : > { %v19844_v10 = vpop.f32.mrb[242].mxu1 }
0x1f36   : > { %v25213_v29 = vpack.c.bf16 %v19844_v10, %v19843_v60  ;;  %v13969_v38 = vpop.f32.mrb[243].mxu1  ;;  %v21419_v60 = vld [vmem:[%s25817_s6 + $0x2d8] sm:$0xff]   ;;  %v21421_v10 = vld [vmem:[%s25817_s6 + $0x2e8] sm:$0xff]  }
0x1f37   : > { %v25218_v28 = vpack.c.bf16 %v13969_v38, %v13966_v3  ;;  %v21420_v3 = vld [vmem:[%s25817_s6 + $0x2e0] sm:$0xff]   ;;  %v21423_v38 = vld [vmem:[%s25817_s6 + $0x2f8] sm:$0xff]  }
0x1f39   : > { %19690 = vmatmul.mubr.msk.bf16.gmra.mrb[228].mxu0 %vm3029_vm3, %v21407_v13  ;;  %v21422_v13 = vld [vmem:[%s25817_s6 + $0x2f0] sm:$0xff]  }
0x1f3a   : > { %19725 = vmatprep.mubr.msk.bf16.mxu0 %vm3029_vm3, %v21408_v56  ;;  %v21424_v56 = vld [vmem:[%s25817_s6 + $0x300] sm:$0xff]  }
0x1f41   : > { %19726 = vmatmul.mubr.msk.bf16.vlgmr.msra.gmra.mrb[200].mxu0 %vm3029_vm3, %v21409_v33  ;;  %v21425_v33 = vld [vmem:[%s25817_s6 + $0x308] sm:$0xff]  }
0x1f42   : > { %19782 = vmatpush3.bf16.msra.mxu0 %v13493_v55  ;;  %19729 = vmatprep.mubr.msk.bf16.mxu0 %vm3029_vm3, %v21410_v42  ;;  %v21426_v42 = vld [vmem:[%s25817_s6 + $0x310] sm:$0xff]  }
0x1f43   : > { %19783 = vmatprep.subr.bf16.mxu0 %v13494_v23 }
0x1f46   : > { %19784 = vmatpush3.bf16.msra.mxu0 %v13494_v23 }
0x1f47   : > { %19785 = vmatprep.subr.bf16.mxu0 %v13495_v45 }
0x1f49   : > { %19730 = vmatmul.mubr.msk.bf16.gmra.mrb[204].mxu0 %vm3029_vm3, %v21411_v40  ;;  %v21427_v40 = vld [vmem:[%s25817_s6 + $0x318] sm:$0xff]  }
0x1f4a   : > { %19786 = vmatpush3.bf16.msra.mxu0 %v13495_v45  ;;  %19733 = vmatprep.mubr.msk.bf16.mxu0 %vm3029_vm3, %v21412_v53  ;;  %v21428_v53 = vld [vmem:[%s25817_s6 + $0x320] sm:$0xff]  }
0x1f4b   : > { %19787 = vmatprep.subr.bf16.mxu0 %v13496_v16  ;;  %v19903_v55 = vpop.f32.mrb[244].mxu1 }
0x1f4c   : > { %v14438_v1 = vpop.f32.mrb[245].mxu1 }
0x1f4d   : > { %v19904_v4 = vpop.f32.mrb[246].mxu1 }
0x1f4e   : > { %v25241_v32 = vpack.c.bf16 %v19904_v4, %v19903_v55  ;;  %19788 = vmatpush3.bf16.msra.mxu0 %v13496_v16  ;;  %v14441_v23 = vpop.f32.mrb[247].mxu1  ;;  %v21415_v16 = vld [vmem:[%s25817_s6 + $0x2b8] sm:$0xff]   ;;  %v21432_v55 = vld [vmem:[%s25817_s6 + $0x340] sm:$0xff]  }
0x1f4f   : > { %v25246_v54 = vpack.c.bf16 %v14441_v23, %v14438_v1  ;;  %19845 = vmatprep.subr.bf16.mxu0 %v25206_v59  ;;  %v21434_v1 = vld [vmem:[%s25817_s6 + $0x350] sm:$0xff]   ;;  %v21435_v4 = vld [vmem:[%s25817_s6 + $0x358] sm:$0xff]   ;;  %v21437_v23 = vld [vmem:[%s25817_s6 + $0x368] sm:$0xff]  }
0x1f51   : > { %19734 = vmatmul.mubr.msk.bf16.gmra.mrb[208].mxu0 %vm3029_vm3, %v21413_v25  ;;  %v21436_v25 = vld [vmem:[%s25817_s6 + $0x360] sm:$0xff]  }
0x1f52   : > { %19737 = vmatprep.mubr.msk.bf16.mxu0 %vm3029_vm3, %v21414_v24  ;;  %v21438_v24 = vld [vmem:[%s25817_s6 + $0x370] sm:$0xff]  }
0x1f53   : > { %v19907_v45 = vpop.f32.mrb[248].mxu1 }
0x1f54   : > { %v14454_v0 = vpop.f32.mrb[249].mxu1 }
0x1f55   : > { %v19908_v17 = vpop.f32.mrb[250].mxu1 }
0x1f56   : > { %v25254_v34 = vpack.c.bf16 %v19908_v17, %v19907_v45  ;;  %v14457_v58 = vpop.f32.mrb[251].mxu1  ;;  %v21439_v45 = vld [vmem:[%s25817_s6 + $0x378] sm:$0xff]   ;;  %v21441_v17 = vld [vmem:[%s25817_s6 + $0x388] sm:$0xff]  }
0x1f57   : > { %v25259_v12 = vpack.c.bf16 %v14457_v58, %v14454_v0  ;;  %v21440_v0 = vld [vmem:[%s25817_s6 + $0x380] sm:$0xff]   ;;  %v21443_v58 = vld [vmem:[%s25817_s6 + $0x398] sm:$0xff]  }
0x1f59   : > { %19738 = vmatmul.mubr.msk.bf16.gmra.mrb[212].mxu0 %vm3029_vm3, %v21415_v16  ;;  %v21442_v16 = vld [vmem:[%s25817_s6 + $0x390] sm:$0xff]  }
0x1f5a   : > { %19741 = vmatprep.mubr.msk.bf16.mxu0 %vm3029_vm3, %v21416_v5  ;;  %v21444_v5 = vld [vmem:[%s25817_s6 + $0x3a0] sm:$0xff]  }
0x1f61   : > { %19742 = vmatmul.mubr.msk.bf16.gmra.mrb[216].mxu0 %vm3029_vm3, %v21417_v43  ;;  %v21448_v43 = vld [vmem:[%s25817_s6 + $0x3c0] sm:$0xff]  }
0x1f62   : > { %19745 = vmatprep.mubr.msk.bf16.mxu0 %vm3029_vm3, %v21418_v50  ;;  %v21450_v50 = vld [vmem:[%s25817_s6 + $0x3d0] sm:$0xff]  }
0x1f69   : > { %19746 = vmatmul.mubr.msk.bf16.gmra.mrb[220].mxu0 %vm3029_vm3, %v21419_v60  ;;  %v21451_v60 = vld [vmem:[%s25817_s6 + $0x3d8] sm:$0xff]  }
0x1f6a   : > { %19749 = vmatprep.mubr.msk.bf16.mxu0 %vm3029_vm3, %v21420_v3  ;;  %v21452_v3 = vld [vmem:[%s25817_s6 + $0x3e0] sm:$0xff]  }
0x1f71   : > { %19750 = vmatmul.mubr.msk.bf16.gmra.mrb[224].mxu0 %vm3029_vm3, %v21421_v10  ;;  %v21453_v10 = vld [vmem:[%s25817_s6 + $0x3e8] sm:$0xff]  }
0x1f72   : > { %19753 = vmatprep.mubr.msk.bf16.mxu0 %vm3029_vm3, %v21422_v13  ;;  %v21454_v13 = vld [vmem:[%s25817_s6 + $0x3f0] sm:$0xff]  }
0x1f79   : > { %19754 = vmatmul.mubr.msk.bf16.gmra.mrb[228].mxu0 %vm3029_vm3, %v21423_v38  ;;  %v21455_v38 = vld [vmem:[%s25817_s6 + $0x3f8] sm:$0xff]  }
0x1f7a   : > { %19789 = vmatprep.mubr.msk.bf16.mxu0 %vm3029_vm3, %v21424_v56  ;;  %v21456_v56 = vld [vmem:[%s25817_s6 + $0x400] sm:$0xff]  }
0x1f81   : > { %19790 = vmatmul.mubr.msk.bf16.vlgmr.msra.gmra.mrb[200].mxu0 %vm3029_vm3, %v21425_v33  ;;  %v21457_v33 = vld [vmem:[%s25817_s6 + $0x408] sm:$0xff]  }
0x1f82   : > { %19846 = vmatpush3.bf16.msra.mxu0 %v25206_v59  ;;  %19793 = vmatprep.mubr.msk.bf16.mxu0 %vm3029_vm3, %v21426_v42  ;;  %v21429_v59 = vld [vmem:[%s25817_s6 + $0x328] sm:$0xff]   ;;  %v21458_v42 = vld [vmem:[%s25817_s6 + $0x410] sm:$0xff]  }
0x1f83   : > { %19847 = vmatprep.subr.bf16.mxu0 %v25201_v39 }
0x1f86   : > { %19848 = vmatpush3.bf16.msra.mxu0 %v25201_v39  ;;  %v21430_v39 = vld [vmem:[%s25817_s6 + $0x330] sm:$0xff]  }
0x1f87   : > { %19849 = vmatprep.subr.bf16.mxu0 %v25218_v28 }
0x1f89   : > { %19794 = vmatmul.mubr.msk.bf16.gmra.mrb[204].mxu0 %vm3029_vm3, %v21427_v40  ;;  %v21459_v40 = vld [vmem:[%s25817_s6 + $0x418] sm:$0xff]  }
0x1f8a   : > { %19850 = vmatpush3.bf16.msra.mxu0 %v25218_v28  ;;  %19797 = vmatprep.mubr.msk.bf16.mxu0 %vm3029_vm3, %v21428_v53  ;;  %v21431_v28 = vld [vmem:[%s25817_s6 + $0x338] sm:$0xff]   ;;  %v21460_v53 = vld [vmem:[%s25817_s6 + $0x420] sm:$0xff]  }
0x1f8b   : > { %19851 = vmatprep.subr.bf16.mxu0 %v25213_v29 }
0x1f8e   : > { %19852 = vmatpush3.bf16.msra.mxu0 %v25213_v29  ;;  %v21433_v29 = vld [vmem:[%s25817_s6 + $0x348] sm:$0xff]  }
0x1f8f   : > { %19909 = vmatprep.subr.bf16.mxu0 %v25246_v54 }
0x1f91   : > { %19798 = vmatmul.mubr.msk.bf16.gmra.mrb[208].mxu0 %vm3029_vm3, %v21429_v59  ;;  %v21461_v59 = vld [vmem:[%s25817_s6 + $0x428] sm:$0xff]  }
0x1f92   : > { %19801 = vmatprep.mubr.msk.bf16.mxu0 %vm3029_vm3, %v21430_v39  ;;  %v21462_v39 = vld [vmem:[%s25817_s6 + $0x430] sm:$0xff]  }
0x1f99   : > { %19802 = vmatmul.mubr.msk.bf16.gmra.mrb[212].mxu0 %vm3029_vm3, %v21431_v28  ;;  %v21463_v28 = vld [vmem:[%s25817_s6 + $0x438] sm:$0xff]  }
0x1f9a   : > { %19805 = vmatprep.mubr.msk.bf16.mxu0 %vm3029_vm3, %v21432_v55  ;;  %v21464_v55 = vld [vmem:[%s25817_s6 + $0x440] sm:$0xff]  }
0x1fa1   : > { %19806 = vmatmul.mubr.msk.bf16.gmra.mrb[216].mxu0 %vm3029_vm3, %v21433_v29  ;;  %v21465_v29 = vld [vmem:[%s25817_s6 + $0x448] sm:$0xff]  }
0x1fa2   : > { %19809 = vmatprep.mubr.msk.bf16.mxu0 %vm3029_vm3, %v21434_v1  ;;  %v21466_v1 = vld [vmem:[%s25817_s6 + $0x450] sm:$0xff]  }
0x1fa9   : > { %19810 = vmatmul.mubr.msk.bf16.gmra.mrb[220].mxu0 %vm3029_vm3, %v21435_v4  ;;  %v21467_v4 = vld [vmem:[%s25817_s6 + $0x458] sm:$0xff]  }
0x1faa   : > { %19813 = vmatprep.mubr.msk.bf16.mxu0 %vm3029_vm3, %v21436_v25  ;;  %v21468_v25 = vld [vmem:[%s25817_s6 + $0x460] sm:$0xff]  }
0x1fb1   : > { %19814 = vmatmul.mubr.msk.bf16.gmra.mrb[224].mxu0 %vm3029_vm3, %v21437_v23  ;;  %v21469_v23 = vld [vmem:[%s25817_s6 + $0x468] sm:$0xff]  }
0x1fb2   : > { %19817 = vmatprep.mubr.msk.bf16.mxu0 %vm3029_vm3, %v21438_v24  ;;  %v21470_v24 = vld [vmem:[%s25817_s6 + $0x470] sm:$0xff]  }
0x1fb9   : > { %19818 = vmatmul.mubr.msk.bf16.gmra.mrb[228].mxu0 %vm3029_vm3, %v21439_v45  ;;  %v21471_v45 = vld [vmem:[%s25817_s6 + $0x478] sm:$0xff]  }
0x1fba   : > { %19853 = vmatprep.mubr.msk.bf16.mxu0 %vm3029_vm3, %v21440_v0 }
0x1fc1   : > { %19854 = vmatmul.mubr.msk.bf16.vlgmr.msra.gmra.mrb[200].mxu0 %vm3029_vm3, %v21441_v17 }
0x1fc2   : > { %19910 = vmatpush3.bf16.msra.mxu0 %v25246_v54  ;;  %19857 = vmatprep.mubr.msk.bf16.mxu0 %vm3029_vm3, %v21442_v16  ;;  %v21445_v54 = vld [vmem:[%s25817_s6 + $0x3a8] sm:$0xff]  }
0x1fc3   : > { %19911 = vmatprep.subr.bf16.mxu0 %v25241_v32 }
0x1fc6   : > { %19912 = vmatpush3.bf16.msra.mxu0 %v25241_v32  ;;  %v21446_v32 = vld [vmem:[%s25817_s6 + $0x3b0] sm:$0xff]  }
0x1fc7   : > { %19913 = vmatprep.subr.bf16.mxu0 %v25259_v12 }
0x1fc9   : > { %19858 = vmatmul.mubr.msk.bf16.gmra.mrb[204].mxu0 %vm3029_vm3, %v21443_v58 }
0x1fca   : > { %19914 = vmatpush3.bf16.msra.mxu0 %v25259_v12  ;;  %19861 = vmatprep.mubr.msk.bf16.mxu0 %vm3029_vm3, %v21444_v5  ;;  %v21447_v12 = vld [vmem:[%s25817_s6 + $0x3b8] sm:$0xff]  }
0x1fcb   : > { %19915 = vmatprep.subr.bf16.mxu0 %v25254_v34 }
0x1fce   : > { %19916 = vmatpush3.bf16.msra.mxu0 %v25254_v34  ;;  %v21449_v34 = vld [vmem:[%s25817_s6 + $0x3c8] sm:$0xff]   ;;  %s21948_s6 = scalar_lea.vmem %s21947_s25, 32 }
0x1fcf   : > { %p21950_p9 = scmp.lt.s32.totalorder %s21948_s6, %s21942_s5 }
0x1fd1   : > { %19862 = vmatmul.mubr.msk.bf16.gmra.mrb[208].mxu0 %vm3029_vm3, %v21445_v54  ;;  %p21951_p12 = por %p21950_p9, %p21949_p5 }
0x1fd2   : > { %19865 = vmatprep.mubr.msk.bf16.mxu0 %vm3029_vm3, %v21446_v32 }
0x1fd3   : > { %p21952_p10 = pnand %p21951_p12, %p21945_p6 }
0x1fd9   : > { %19866 = vmatmul.mubr.msk.bf16.gmra.mrb[212].mxu0 %vm3029_vm3, %v21447_v12 }
0x1fda   : > { %19869 = vmatprep.mubr.msk.bf16.mxu0 %vm3029_vm3, %v21448_v43 }
0x1fe1   : > { %19870 = vmatmul.mubr.msk.bf16.gmra.mrb[216].mxu0 %vm3029_vm3, %v21449_v34 }
0x1fe2   : > { %19873 = vmatprep.mubr.msk.bf16.mxu0 %vm3029_vm3, %v21450_v50 }
0x1fe9   : > { %19874 = vmatmul.mubr.msk.bf16.gmra.mrb[220].mxu0 %vm3029_vm3, %v21451_v60 }
0x1fea   : > { %19877 = vmatprep.mubr.msk.bf16.mxu0 %vm3029_vm3, %v21452_v3 }
0x1ff1   : > { %19878 = vmatmul.mubr.msk.bf16.gmra.mrb[224].mxu0 %vm3029_vm3, %v21453_v10 }
0x1ff2   : > { %19881 = vmatprep.mubr.msk.bf16.mxu0 %vm3029_vm3, %v21454_v13 }
0x1ff9   : > { %19882 = vmatmul.mubr.msk.bf16.gmra.mrb[228].mxu0 %vm3029_vm3, %v21455_v38 }
0x1ffa   : > { %19917 = vmatprep.mubr.msk.bf16.mxu0 %vm3029_vm3, %v21456_v56 }
0x2001   : > { %19918 = vmatmul.mubr.msk.bf16.vlgmr.msra.gmra.mrb[200].mxu0 %vm3029_vm3, %v21457_v33 }
0x2002   : > { %19921 = vmatprep.mubr.msk.bf16.mxu0 %vm3029_vm3, %v21458_v42 }
0x2009   : > { %19922 = vmatmul.mubr.msk.bf16.gmra.mrb[204].mxu0 %vm3029_vm3, %v21459_v40 }
0x200a   : > { %19925 = vmatprep.mubr.msk.bf16.mxu0 %vm3029_vm3, %v21460_v53 }
0x2011   : > { %19926 = vmatmul.mubr.msk.bf16.gmra.mrb[208].mxu0 %vm3029_vm3, %v21461_v59 }
0x2012   : > { %19929 = vmatprep.mubr.msk.bf16.mxu0 %vm3029_vm3, %v21462_v39 }
0x2019   : > { %19930 = vmatmul.mubr.msk.bf16.gmra.mrb[212].mxu0 %vm3029_vm3, %v21463_v28 }
0x201a   : > { %19933 = vmatprep.mubr.msk.bf16.mxu0 %vm3029_vm3, %v21464_v55 }
0x2021   : > { %19934 = vmatmul.mubr.msk.bf16.gmra.mrb[216].mxu0 %vm3029_vm3, %v21465_v29 }
0x2022   : > { %19937 = vmatprep.mubr.msk.bf16.mxu0 %vm3029_vm3, %v21466_v1 }
0x2029   : > { %19938 = vmatmul.mubr.msk.bf16.gmra.mrb[220].mxu0 %vm3029_vm3, %v21467_v4 }
0x202a   : > { %19941 = vmatprep.mubr.msk.bf16.mxu0 %vm3029_vm3, %v21468_v25 }
0x2031   : > { %19942 = vmatmul.mubr.msk.bf16.gmra.mrb[224].mxu0 %vm3029_vm3, %v21469_v23 }
0x2032   : > { %19945 = vmatprep.mubr.msk.bf16.mxu0 %vm3029_vm3, %v21470_v24 }
0x2039   : > { %19946 = vmatmul.mubr.msk.bf16.gmra.mrb[228].mxu0 %vm3029_vm3, %v21471_v45 }
0x203a   : > { %21955 = shalt.err (!%p21952_p10)
}
0x203b   : > { %s21956_s24 = scalar_lea.hbm %s25506_s9, 16  ;;  %s21960_s27 = scalar_lea.hbm %s25820_s0, 32 }
0x203c   : > { %p21957_p2 = scmp.ne.s32.totalorder %s25506_s9, %s21956_s24  ;;  %p21961_p7 = scmp.lt.u32.totalorder %s25506_s9, %s25820_s0 }
0x203d   : > { %p21962_p8 = scmp.lt.u32.totalorder %s21960_s27, %s21956_s24  ;;  %p21964_p13 = scmp.lt.u32.totalorder %s21956_s24, %s25506_s9 }
0x203e   : > { %p21958_p3 = pnand %p21957_p2, %p25821_p0 }
0x203f   : > { %p21963_p11 = por %p21962_p8, %p21961_p7 }
0x2040   : > { %p21959_p4 = pneg %p21958_p3 }
0x2041   : > { %p21965_p1 = por %p21964_p13, %p21963_p11 }
0x2043   : > { %p21966_p6 = pnand %p21965_p1, %p21959_p4 }
0x2045   : > { %21969 = shalt.err (!%p21966_p6)
}
0x2046   : > { %20543 = dma.vmem_to_hbm [thread:$0]  (%p25821_p0), %s15044_s28, 16, %s25506_s9, %s15024_s2  }
0x2047   : > { %s25822_s20 = sld [smem:[#allocation60_spill]]  ;;  %s25823_s27 = scalar_lea.vmem [#allocation22], %s23887_s7 }
0x2048   : > { %s15056_s1 = sshll.u32 %s25823_s27, 4  ;;  %s15028_s24 = scalar_lea.sflag [#allocation23], %s23887_s7  ;;  %s15057_s1 = int_to_ptr.vmem [resolvable:$true] %s15056_s1 }
0x2049   : > { %s21970_s25 = scalar_lea.vmem %s15057_s1, 16  ;;  %s22082_s0 = smov [#allocation22]  }
0x204a   : > { %p21971_p5 = scmp.ne.s32.totalorder %s15057_s1, %s21970_s25  ;;  %s21974_s11 = sshll.u32 %s22082_s0, 4  ;;  %s21975_s11 = int_to_ptr.vmem [resolvable:$false] %s21974_s11 }
0x204b   : > { %s21976_s12 = scalar_lea.vmem %s21975_s11, 32  ;;  %p21977_p10 = scmp.lt.s32.totalorder %s15057_s1, %s21975_s11 }
0x204c   : > { %p21972_p9 = pnand %p21971_p5, %p25821_p0  ;;  %p21978_p2 = scmp.lt.s32.totalorder %s21976_s12, %s21970_s25 }
0x204d   : > { %s25531_s4 = scalar_lea.hbm %s25822_s20, %s16992_s23 }
0x204e   : > { %p21973_p12 = pneg %p21972_p9  ;;  %p21979_p3 = por %p21978_p2, %p21977_p10 }
0x2050   : > { %p21980_p4 = pnand %p21979_p3, %p21973_p12 }
0x2052   : > { %21983 = shalt.err (!%p21980_p4)
}
0x2053   : > { %s21984_s8 = scalar_lea.hbm %s25531_s4, 16  ;;  %s21988_s0 = scalar_lea.hbm %s25822_s20, 32 }
0x2054   : > { %p21985_p7 = scmp.ne.s32.totalorder %s25531_s4, %s21984_s8  ;;  %p21989_p13 = scmp.lt.u32.totalorder %s25531_s4, %s25822_s20 }
0x2055   : > { %p21990_p1 = scmp.lt.u32.totalorder %s21988_s0, %s21984_s8  ;;  %p21992_p5 = scmp.lt.u32.totalorder %s21984_s8, %s25531_s4 }
0x2056   : > { %p21986_p8 = pnand %p21985_p7, %p25821_p0 }
0x2057   : > { %p21991_p6 = por %p21990_p1, %p21989_p13 }
0x2058   : > { %p21987_p11 = pneg %p21986_p8 }
0x2059   : > { %p21993_p9 = por %p21992_p5, %p21991_p6 }
0x205b   : > { %p21994_p12 = pnand %p21993_p9, %p21987_p11 }
0x205d   : > { %21997 = shalt.err (!%p21994_p12)
}
0x205e   : > { %20544 = dma.vmem_to_hbm [thread:$0]  (%p25821_p0), %s15057_s1, 16, %s25531_s4, %s15028_s24  }
0x205f   : > { %s25824_s2 = sld [smem:[#allocation57_spill]]  ;;  %s16997_s10 = sshll.u32 %s22542_s26, 8 }
0x2060   : > { %s25825_s5 = sld [smem:[#allocation58_spill]] }
0x2065   : > { %v25556_v0 = vld [vmem:[%s25824_s2] ss:$0 sm:$0xff] }
0x2066   : > { %v19978_v17 = vadd.f32 %v24790_v49, %v25556_v0  ;;  %v19980_v16 = vadd.f32 %v25556_v0, %v24792_v62  ;;  %v19982_v5 = vadd.f32 %v24794_v14, %v25556_v0  ;;  %v19984_v12 = vadd.f32 %v25556_v0, %v24796_v15  ;;  %s25594_s4 = scalar_lea.vmem %s25825_s5, %s16997_s10 }
0x2067   : > { %v19986_v33 = vadd.f32 %v24798_v30, %v25556_v0  ;;  %v19988_v42 = vadd.f32 %v25556_v0, %v24800_v41  ;;  %v19990_v53 = vadd.f32 %v24802_v48, %v25556_v0  ;;  %v19992_v28 = vadd.f32 %v25556_v0, %v24804_v57 }
0x2068   : > { %v19994_v48 = vadd.f32 %v25037_v46, %v25556_v0  ;;  %v19996_v57 = vadd.f32 %v25556_v0, %v25039_v11 }
0x20d4   : > { %v19919_v58 = vpop.f32.mrb[200].mxu0 }
0x20d5   : > { %v19979_v54 = vadd.f32 %v19978_v17, %v19919_v58  ;;  %v14635_v32 = vpop.f32.mrb[201].mxu0 }
0x20d6   : > { %v19981_v43 = vadd.f32 %v19980_v16, %v14635_v32  ;;  %v19920_v34 = vpop.f32.mrb[202].mxu0  ;;  %v19998_v32 = vadd.f32 %v25041_v19, %v25556_v0 }
0x20d7   : > { %v14796_v50 = vsub.f32 0.0, %v19979_v54  ;;  %v19983_v60 = vadd.f32 %v19982_v5, %v19920_v34  ;;  %v14638_v3 = vpop.f32.mrb[203].mxu0 }
0x20d8   : > { %v14794_v10 = vsub.f32 0.0, %v19981_v43  ;;  %v19985_v13 = vadd.f32 %v19984_v12, %v14638_v3 }
0x20d9   : > { %v14830_v49 = vmul.f32 1.442695, %v14796_v50  ;;  %v14797_v38 = vsub.f32 0.0, %v19983_v60  ;;  %v20000_v50 = vadd.f32 %v25556_v0, %v25043_v22 }
0x20da   : > { %v14826_v56 = vmul.f32 1.442695, %v14794_v10  ;;  %v14795_v62 = vsub.f32 0.0, %v19985_v13 }
0x20db   : > { %21474 = vpow2.f32 %v14830_v49  ;;  %v14832_v14 = vmul.f32 1.442695, %v14797_v38 }
0x20dc   : > { %21476 = vpow2.f32 %v14826_v56  ;;  %v14828_v15 = vmul.f32 1.442695, %v14795_v62  ;;  %v19923_v40 = vpop.f32.mrb[204].mxu0 }
0x20dd   : > { %21478 = vpow2.f32 %v14832_v14  ;;  %v19987_v59 = vadd.f32 %v19986_v33, %v19923_v40  ;;  %v14651_v39 = vpop.f32.mrb[205].mxu0 }
0x20de   : > { %21480 = vpow2.f32 %v14828_v15  ;;  %v19989_v55 = vadd.f32 %v19988_v42, %v14651_v39  ;;  %v19924_v30 = vpop.f32.mrb[206].mxu0  ;;  %v20004_v39 = vadd.f32 %v25556_v0, %v25048_v51 }
0x20df   : > { %v14800_v29 = vsub.f32 0.0, %v19987_v59  ;;  %v19991_v1 = vadd.f32 %v19990_v53, %v19924_v30  ;;  %v14654_v4 = vpop.f32.mrb[207].mxu0  ;;  %v20002_v53 = vadd.f32 %v25046_v44, %v25556_v0  ;;  %v20008_v44 = vadd.f32 %v25556_v0, %v25052_v63 }
0x20e0   : > { %v14798_v25 = vsub.f32 0.0, %v19989_v55  ;;  %v19993_v41 = vadd.f32 %v19992_v28, %v14654_v4 }
0x20e1   : > { %v14838_v23 = vmul.f32 1.442695, %v14800_v29  ;;  %v14801_v24 = vsub.f32 0.0, %v19991_v1  ;;  %v20006_v29 = vadd.f32 %v25050_v47, %v25556_v0 }
0x20e2   : > { %v14834_v45 = vmul.f32 1.442695, %v14798_v25  ;;  %v14799_v17 = vsub.f32 0.0, %v19993_v41 }
0x20e3   : > { %21482 = vpow2.f32 %v14838_v23  ;;  %v14840_v16 = vmul.f32 1.442695, %v14801_v24 }
0x20e4   : > { %21484 = vpow2.f32 %v14834_v45  ;;  %v14836_v58 = vmul.f32 1.442695, %v14799_v17  ;;  %v19927_v5 = vpop.f32.mrb[208].mxu0 }
0x20e5   : > { %v21475_v54 = vpop.eup %21474  ;;  %21486 = vpow2.f32 %v14840_v16  ;;  %v19995_v12 = vadd.f32 %v19994_v48, %v19927_v5  ;;  %v14667_v43 = vpop.f32.mrb[209].mxu0 }
0x20e6   : > { %v21477_v34 = vpop.eup %21476  ;;  %v14892_v46 = vadd.f32 1.0, %v21475_v54  ;;  %21488 = vpow2.f32 %v14836_v58  ;;  %v19997_v60 = vadd.f32 %v19996_v57, %v14667_v43  ;;  %v19928_v3 = vpop.f32.mrb[210].mxu0 }
0x20e7   : > { %v21479_v10 = vpop.eup %21478  ;;  %v14890_v11 = vadd.f32 1.0, %v21477_v34  ;;  %v14804_v13 = vsub.f32 0.0, %v19995_v12  ;;  %v19999_v49 = vadd.f32 %v19998_v32, %v19928_v3  ;;  %v14670_v38 = vpop.f32.mrb[211].mxu0 }
0x20e8   : > { %v21481_v56 = vpop.eup %21480  ;;  %21490 = vrcp.f32 %v14892_v46  ;;  %v14893_v62 = vadd.f32 1.0, %v21479_v10  ;;  %v14802_v19 = vsub.f32 0.0, %v19997_v60  ;;  %v20001_v33 = vadd.f32 %v20000_v50, %v14670_v38 }
0x20e9   : > { %21492 = vrcp.f32 %v14890_v11  ;;  %v14891_v14 = vadd.f32 1.0, %v21481_v56  ;;  %v14846_v42 = vmul.f32 1.442695, %v14804_v13  ;;  %v14805_v15 = vsub.f32 0.0, %v19999_v49 }
0x20ea   : > { %21494 = vrcp.f32 %v14893_v62  ;;  %v14842_v22 = vmul.f32 1.442695, %v14802_v19  ;;  %v14803_v40 = vsub.f32 0.0, %v20001_v33  ;;  %v20010_v46 = vadd.f32 %v25054_v52, %v25556_v0 }
0x20eb   : > { %21496 = vrcp.f32 %v14891_v14  ;;  %v14848_v59 = vmul.f32 1.442695, %v14805_v15  ;;  %v20012_v10 = vadd.f32 %v25556_v0, %v25056_v8  ;;  %v20014_v38 = vadd.f32 %v25058_v2, %v25556_v0 }
0x20ec   : > { %21498 = vpow2.f32 %v14846_v42  ;;  %v14844_v28 = vmul.f32 1.442695, %v14803_v40  ;;  %v19931_v55 = vpop.f32.mrb[212].mxu0  ;;  %v20016_v19 = vadd.f32 %v25556_v0, %v25060_v6 }
0x20ed   : > { %v21483_v30 = vpop.eup %21482  ;;  %21500 = vpow2.f32 %v14842_v22  ;;  %v20003_v1 = vadd.f32 %v20002_v53, %v19931_v55  ;;  %v14683_v4 = vpop.f32.mrb[213].mxu0 }
0x20ee   : > { %v21485_v25 = vpop.eup %21484  ;;  %v14896_v41 = vadd.f32 1.0, %v21483_v30  ;;  %21502 = vpow2.f32 %v14848_v59  ;;  %v20005_v23 = vadd.f32 %v20004_v39, %v14683_v4  ;;  %v19932_v24 = vpop.f32.mrb[214].mxu0 }
0x20ef   : > { %v21487_v51 = vpop.eup %21486  ;;  %v14894_v45 = vadd.f32 1.0, %v21485_v25  ;;  %21504 = vpow2.f32 %v14844_v28  ;;  %v14808_v17 = vsub.f32 0.0, %v20003_v1  ;;  %v20007_v48 = vadd.f32 %v20006_v29, %v19932_v24  ;;  %v14686_v16 = vpop.f32.mrb[215].mxu0 }
0x20f0   : > { %v21489_v57 = vpop.eup %21488  ;;  %21506 = vrcp.f32 %v14896_v41  ;;  %v14897_v47 = vadd.f32 1.0, %v21487_v51  ;;  %v14806_v63 = vsub.f32 0.0, %v20005_v23  ;;  %v20009_v58 = vadd.f32 %v20008_v44, %v14686_v16 }
0x20f1   : > { %21508 = vrcp.f32 %v14894_v45  ;;  %v14895_v5 = vadd.f32 1.0, %v21489_v57  ;;  %v14854_v54 = vmul.f32 1.442695, %v14808_v17  ;;  %v14809_v32 = vsub.f32 0.0, %v20007_v48 }
0x20f2   : > { %v21491_v12 = vpop.eup %21490  ;;  %21510 = vrcp.f32 %v14897_v47  ;;  %v14850_v43 = vmul.f32 1.442695, %v14806_v63  ;;  %v14807_v34 = vsub.f32 0.0, %v20009_v58  ;;  %v20018_v41 = vadd.f32 %v25062_v9, %v25556_v0 }
0x20f3   : > { %v21493_v50 = vpop.eup %21492  ;;  %14988 = vst [vmem:[%s25594_s4 + $0x10] sm:$0xff] %v21491_v12  ;;  %21512 = vrcp.f32 %v14895_v5  ;;  %v14856_v60 = vmul.f32 1.442695, %v14809_v32  ;;  %v20020_v51 = vadd.f32 %v25556_v0, %v25064_v18  ;;  %v20022_v16 = vadd.f32 %v25066_v7, %v25556_v0 }
0x20f4   : > { %v21495_v3 = vpop.eup %21494  ;;  %14986 = vst [vmem:[%s25594_s4] sm:$0xff] %v21493_v50  ;;  %21514 = vpow2.f32 %v14854_v54  ;;  %v14852_v11 = vmul.f32 1.442695, %v14807_v34  ;;  %v19935_v13 = vpop.f32.mrb[216].mxu0  ;;  %v20024_v63 = vadd.f32 %v25556_v0, %v25068_v21 }
0x20f5   : > { %v21497_v49 = vpop.eup %21496  ;;  %14989 = vst [vmem:[%s25594_s4 + $0x18] sm:$0xff] %v21495_v3  ;;  %21516 = vpow2.f32 %v14850_v43  ;;  %v20011_v56 = vadd.f32 %v20010_v46, %v19935_v13  ;;  %v14699_v52 = vpop.f32.mrb[217].mxu0 }
0x20f6   : > { %v21499_v62 = vpop.eup %21498  ;;  %14987 = vst [vmem:[%s25594_s4 + $0x8] sm:$0xff] %v21497_v49  ;;  %21518 = vpow2.f32 %v14856_v60  ;;  %v20013_v33 = vadd.f32 %v20012_v10, %v14699_v52  ;;  %v19936_v8 = vpop.f32.mrb[218].mxu0 }
0x20f7   : > { %v21501_v14 = vpop.eup %21500  ;;  %v14900_v42 = vadd.f32 1.0, %v21499_v62  ;;  %21520 = vpow2.f32 %v14852_v11  ;;  %v14812_v15 = vsub.f32 0.0, %v20011_v56  ;;  %v20015_v22 = vadd.f32 %v20014_v38, %v19936_v8  ;;  %v14702_v40 = vpop.f32.mrb[219].mxu0 }
0x20f8   : > { %v21503_v53 = vpop.eup %21502  ;;  %v14898_v2 = vadd.f32 1.0, %v21501_v14  ;;  %v14810_v59 = vsub.f32 0.0, %v20013_v33  ;;  %v20017_v39 = vadd.f32 %v20016_v19, %v14702_v40  ;;  %v20026_v56 = vadd.f32 %v25070_v31, %v25556_v0 }
0x20f9   : > { %v21505_v28 = vpop.eup %21504  ;;  %21522 = vrcp.f32 %v14900_v42  ;;  %v14901_v55 = vadd.f32 1.0, %v21503_v53  ;;  %v14862_v6 = vmul.f32 1.442695, %v14812_v15  ;;  %v14813_v30 = vsub.f32 0.0, %v20015_v22 }
0x20fa   : > { %v21507_v29 = vpop.eup %21506  ;;  %21524 = vrcp.f32 %v14898_v2  ;;  %v14899_v1 = vadd.f32 1.0, %v21505_v28  ;;  %v14858_v4 = vmul.f32 1.442695, %v14810_v59  ;;  %v14811_v25 = vsub.f32 0.0, %v20017_v39 }
0x20fb   : > { %v21509_v44 = vpop.eup %21508  ;;  %14992 = vst [vmem:[%s25594_s4 + $0x30] sm:$0xff] %v21507_v29  ;;  %21526 = vrcp.f32 %v14901_v55  ;;  %v14864_v23 = vmul.f32 1.442695, %v14813_v30  ;;  %v20028_v19 = vadd.f32 %v25556_v0, %v25072_v35  ;;  %v20030_v42 = vadd.f32 %v25074_v61, %v25556_v0 }
0x20fc   : > { %v21511_v24 = vpop.eup %21510  ;;  %14990 = vst [vmem:[%s25594_s4 + $0x20] sm:$0xff] %v21509_v44  ;;  %21528 = vrcp.f32 %v14899_v1  ;;  %v14860_v45 = vmul.f32 1.442695, %v14811_v25  ;;  %v19939_v17 = vpop.f32.mrb[220].mxu0  ;;  %v20032_v40 = vadd.f32 %v25556_v0, %v25076_v20 }
0x20fd   : > { %v21513_v48 = vpop.eup %21512  ;;  %14993 = vst [vmem:[%s25594_s4 + $0x38] sm:$0xff] %v21511_v24  ;;  %21530 = vpow2.f32 %v14862_v6  ;;  %v20019_v57 = vadd.f32 %v20018_v41, %v19939_v17  ;;  %v14715_v9 = vpop.f32.mrb[221].mxu0  ;;  %v20034_v24 = vadd.f32 %v25078_v26, %v25556_v0 }
0x20fe   : > { %v21515_v47 = vpop.eup %21514  ;;  %14991 = vst [vmem:[%s25594_s4 + $0x28] sm:$0xff] %v21513_v48  ;;  %21532 = vpow2.f32 %v14858_v4  ;;  %v20021_v58 = vadd.f32 %v20020_v51, %v14715_v9  ;;  %v19940_v18 = vpop.f32.mrb[222].mxu0  ;;  %v20036_v48 = vadd.f32 %v25556_v0, %v25080_v27 }
0x20ff   : > { %v21517_v5 = vpop.eup %21516  ;;  %v14904_v54 = vadd.f32 1.0, %v21515_v47  ;;  %21534 = vpow2.f32 %v14864_v23  ;;  %v14816_v32 = vsub.f32 0.0, %v20019_v57  ;;  %v20023_v12 = vadd.f32 %v20022_v16, %v19940_v18  ;;  %v14718_v43 = vpop.f32.mrb[223].mxu0 }
0x2100   : > { %v21519_v34 = vpop.eup %21518  ;;  %v14902_v7 = vadd.f32 1.0, %v21517_v5  ;;  %21536 = vpow2.f32 %v14860_v45  ;;  %v14814_v50 = vsub.f32 0.0, %v20021_v58  ;;  %v20025_v46 = vadd.f32 %v20024_v63, %v14718_v43 }
0x2101   : > { %v21521_v60 = vpop.eup %21520  ;;  %21538 = vrcp.f32 %v14904_v54  ;;  %v14905_v3 = vadd.f32 1.0, %v21519_v34  ;;  %v14870_v21 = vmul.f32 1.442695, %v14816_v32  ;;  %v14817_v10 = vsub.f32 0.0, %v20023_v12 }
0x2102   : > { %21540 = vrcp.f32 %v14902_v7  ;;  %v14903_v11 = vadd.f32 1.0, %v21521_v60  ;;  %v14866_v13 = vmul.f32 1.442695, %v14814_v50  ;;  %v14815_v49 = vsub.f32 0.0, %v20025_v46 }
0x2103   : > { %v21523_v38 = vpop.eup %21522  ;;  %21542 = vrcp.f32 %v14905_v3  ;;  %v14872_v52 = vmul.f32 1.442695, %v14817_v10  ;;  %v20038_v47 = vadd.f32 %v25082_v36, %v25556_v0  ;;  %v20040_v5 = vadd.f32 %v25556_v0, %v25084_v37 }
0x2104   : > { %v21525_v62 = vpop.eup %21524  ;;  %14996 = vst [vmem:[%s25594_s4 + $0x50] sm:$0xff] %v21523_v38  ;;  %21544 = vrcp.f32 %v14903_v11  ;;  %v14868_v33 = vmul.f32 1.442695, %v14815_v49  ;;  %v19943_v8 = vpop.f32.mrb[224].mxu0 }
0x2105   : > { %v21527_v14 = vpop.eup %21526  ;;  %14994 = vst [vmem:[%s25594_s4 + $0x40] sm:$0xff] %v21525_v62  ;;  %21546 = vpow2.f32 %v14870_v21  ;;  %v20027_v15 = vadd.f32 %v20026_v56, %v19943_v8  ;;  %v14731_v31 = vpop.f32.mrb[225].mxu0 }
0x2106   : > { %v21529_v22 = vpop.eup %21528  ;;  %14997 = vst [vmem:[%s25594_s4 + $0x58] sm:$0xff] %v21527_v14  ;;  %21548 = vpow2.f32 %v14866_v13  ;;  %v20029_v35 = vadd.f32 %v20028_v19, %v14731_v31  ;;  %v19944_v53 = vpop.f32.mrb[226].mxu0 }
0x2107   : > { %v21531_v2 = vpop.eup %21530  ;;  %14995 = vst [vmem:[%s25594_s4 + $0x48] sm:$0xff] %v21529_v22  ;;  %21550 = vpow2.f32 %v14872_v52  ;;  %v14820_v59 = vsub.f32 0.0, %v20027_v15  ;;  %v20031_v39 = vadd.f32 %v20030_v42, %v19944_v53  ;;  %v14734_v28 = vpop.f32.mrb[227].mxu0 }
0x2108   : > { %v21533_v55 = vpop.eup %21532  ;;  %v14908_v61 = vadd.f32 1.0, %v21531_v2  ;;  %21552 = vpow2.f32 %v14868_v33  ;;  %v14818_v6 = vsub.f32 0.0, %v20029_v35  ;;  %v20033_v30 = vadd.f32 %v20032_v40, %v14734_v28 }
0x2109   : > { %v21535_v29 = vpop.eup %21534  ;;  %v14906_v1 = vadd.f32 1.0, %v21533_v55  ;;  %v14821_v4 = vsub.f32 0.0, %v20031_v39  ;;  %v14878_v44 = vmul.f32 1.442695, %v14820_v59 }
0x210a   : > { %v21537_v20 = vpop.eup %21536  ;;  %21554 = vrcp.f32 %v14908_v61  ;;  %v14909_v25 = vadd.f32 1.0, %v21535_v29  ;;  %v14819_v41 = vsub.f32 0.0, %v20033_v30  ;;  %v14874_v45 = vmul.f32 1.442695, %v14818_v6 }
0x210b   : > { %v21539_v23 = vpop.eup %21538  ;;  %21556 = vrcp.f32 %v14906_v1  ;;  %v14907_v51 = vadd.f32 1.0, %v21537_v20  ;;  %v14880_v16 = vmul.f32 1.442695, %v14821_v4 }
0x210c   : > { %v21541_v17 = vpop.eup %21540  ;;  %15000 = vst [vmem:[%s25594_s4 + $0x70] sm:$0xff] %v21539_v23  ;;  %21558 = vrcp.f32 %v14909_v25  ;;  %v19947_v57 = vpop.f32.mrb[228].mxu0  ;;  %v14876_v26 = vmul.f32 1.442695, %v14819_v41 }
0x210d   : > { %v21543_v9 = vpop.eup %21542  ;;  %14998 = vst [vmem:[%s25594_s4 + $0x60] sm:$0xff] %v21541_v17  ;;  %21560 = vrcp.f32 %v14907_v51  ;;  %v20035_v63 = vadd.f32 %v20034_v24, %v19947_v57  ;;  %v14747_v58 = vpop.f32.mrb[229].mxu0 }
0x210e   : > { %v21545_v18 = vpop.eup %21544  ;;  %15001 = vst [vmem:[%s25594_s4 + $0x78] sm:$0xff] %v21543_v9  ;;  %21562 = vpow2.f32 %v14878_v44  ;;  %v20037_v27 = vadd.f32 %v20036_v48, %v14747_v58  ;;  %v19948_v54 = vpop.f32.mrb[230].mxu0 }
0x210f   : > { %v21547_v32 = vpop.eup %21546  ;;  %14999 = vst [vmem:[%s25594_s4 + $0x68] sm:$0xff] %v21545_v18  ;;  %21564 = vpow2.f32 %v14874_v45  ;;  %v14824_v12 = vsub.f32 0.0, %v20035_v63  ;;  %v20039_v43 = vadd.f32 %v20038_v47, %v19948_v54  ;;  %v14750_v34 = vpop.f32.mrb[231].mxu0 }
0x2110   : > { %v21549_v36 = vpop.eup %21548  ;;  %v14912_v7 = vadd.f32 1.0, %v21547_v32  ;;  %21566 = vpow2.f32 %v14880_v16  ;;  %v14822_v50 = vsub.f32 0.0, %v20037_v27  ;;  %v20041_v46 = vadd.f32 %v20040_v5, %v14750_v34 }
0x2111   : > { %v21551_v60 = vpop.eup %21550  ;;  %v14910_v3 = vadd.f32 1.0, %v21549_v36  ;;  %21568 = vpow2.f32 %v14876_v26  ;;  %v14825_v37 = vsub.f32 0.0, %v20039_v43  ;;  %v14886_v10 = vmul.f32 1.442695, %v14824_v12 }
0x2112   : > { %v21553_v0 = vpop.eup %21552  ;;  %21570 = vrcp.f32 %v14912_v7  ;;  %v14913_v21 = vadd.f32 1.0, %v21551_v60  ;;  %v14823_v11 = vsub.f32 0.0, %v20041_v46  ;;  %v14882_v49 = vmul.f32 1.442695, %v14822_v50 }
0x2113   : > { %21572 = vrcp.f32 %v14910_v3  ;;  %v14911_v13 = vadd.f32 1.0, %v21553_v0  ;;  %v14888_v56 = vmul.f32 1.442695, %v14825_v37 }
0x2114   : > { %v21555_v38 = vpop.eup %21554  ;;  %21574 = vrcp.f32 %v14913_v21  ;;  %v14884_v62 = vmul.f32 1.442695, %v14823_v11 }
0x2115   : > { %v21557_v52 = vpop.eup %21556  ;;  %15004 = vst [vmem:[%s25594_s4 + $0x90] sm:$0xff] %v21555_v38  ;;  %21576 = vrcp.f32 %v14911_v13 }
0x2116   : > { %v21559_v19 = vpop.eup %21558  ;;  %15002 = vst [vmem:[%s25594_s4 + $0x80] sm:$0xff] %v21557_v52  ;;  %21578 = vpow2.f32 %v14886_v10 }
0x2117   : > { %v21561_v33 = vpop.eup %21560  ;;  %15005 = vst [vmem:[%s25594_s4 + $0x98] sm:$0xff] %v21559_v19  ;;  %21580 = vpow2.f32 %v14882_v49 }
0x2118   : > { %v21563_v8 = vpop.eup %21562  ;;  %15003 = vst [vmem:[%s25594_s4 + $0x88] sm:$0xff] %v21561_v33  ;;  %21582 = vpow2.f32 %v14888_v56 }
0x2119   : > { %v21565_v14 = vpop.eup %21564  ;;  %v14916_v42 = vadd.f32 1.0, %v21563_v8  ;;  %21584 = vpow2.f32 %v14884_v62 }
0x211a   : > { %v21567_v15 = vpop.eup %21566  ;;  %v14914_v31 = vadd.f32 1.0, %v21565_v14 }
0x211b   : > { %v21569_v22 = vpop.eup %21568  ;;  %21586 = vrcp.f32 %v14916_v42  ;;  %v14917_v40 = vadd.f32 1.0, %v21567_v15 }
0x211c   : > { %v21571_v35 = vpop.eup %21570  ;;  %21588 = vrcp.f32 %v14914_v31  ;;  %v14915_v53 = vadd.f32 1.0, %v21569_v22 }
0x211d   : > { %v21573_v2 = vpop.eup %21572  ;;  %15008 = vst [vmem:[%s25594_s4 + $0xb0] sm:$0xff] %v21571_v35  ;;  %21590 = vrcp.f32 %v14917_v40 }
0x211e   : > { %v21575_v59 = vpop.eup %21574  ;;  %15006 = vst [vmem:[%s25594_s4 + $0xa0] sm:$0xff] %v21573_v2  ;;  %21592 = vrcp.f32 %v14915_v53 }
0x211f   : > { %v21577_v39 = vpop.eup %21576  ;;  %15009 = vst [vmem:[%s25594_s4 + $0xb8] sm:$0xff] %v21575_v59 }
0x2120   : > { %v21579_v28 = vpop.eup %21578  ;;  %15007 = vst [vmem:[%s25594_s4 + $0xa8] sm:$0xff] %v21577_v39 }
0x2121   : > { %v21581_v55 = vpop.eup %21580  ;;  %v14920_v61 = vadd.f32 1.0, %v21579_v28 }
0x2122   : > { %v21583_v6 = vpop.eup %21582  ;;  %v14918_v30 = vadd.f32 1.0, %v21581_v55 }
0x2123   : > { %v21585_v29 = vpop.eup %21584  ;;  %21594 = vrcp.f32 %v14920_v61  ;;  %v14921_v1 = vadd.f32 1.0, %v21583_v6 }
0x2124   : > { %21596 = vrcp.f32 %v14918_v30  ;;  %v14919_v4 = vadd.f32 1.0, %v21585_v29 }
0x2125   : > { %v21587_v20 = vpop.eup %21586  ;;  %21598 = vrcp.f32 %v14921_v1 }
0x2126   : > { %v21589_v25 = vpop.eup %21588  ;;  %15012 = vst [vmem:[%s25594_s4 + $0xd0] sm:$0xff] %v21587_v20  ;;  %21600 = vrcp.f32 %v14919_v4 }
0x2127   : > { %v21591_v44 = vpop.eup %21590  ;;  %15010 = vst [vmem:[%s25594_s4 + $0xc0] sm:$0xff] %v21589_v25 }
0x2128   : > { %v21593_v41 = vpop.eup %21592  ;;  %15013 = vst [vmem:[%s25594_s4 + $0xd8] sm:$0xff] %v21591_v44 }
0x2129   : > { %15011 = vst [vmem:[%s25594_s4 + $0xc8] sm:$0xff] %v21593_v41 }
0x212d   : > { %v21595_v23 = vpop.eup %21594 }
0x212e   : > { %v21597_v24 = vpop.eup %21596  ;;  %15016 = vst [vmem:[%s25594_s4 + $0xf0] sm:$0xff] %v21595_v23 }
0x212f   : > { %v21599_v51 = vpop.eup %21598  ;;  %15014 = vst [vmem:[%s25594_s4 + $0xe0] sm:$0xff] %v21597_v24 }
0x2130   : > { %v21601_v45 = vpop.eup %21600  ;;  %15017 = vst [vmem:[%s25594_s4 + $0xf8] sm:$0xff] %v21599_v51 }
0x2131   : > { %15015 = vst [vmem:[%s25594_s4 + $0xe8] sm:$0xff] %v21601_v45 }
0x2132 PF: > { %s25826_s27 = sld [smem:[#allocation34_spill]]  ;;  %s25827_s1 = sld [smem:[#allocation32_spill]] }
0x2133   : > { %s25828_s24 = sld [smem:[#allocation38_spill]] }
0x2138   : > { %p20610_p0 = scmp.ge.s32.totalorder %s25826_s27, 2  ;;  %s15076_s25 = sand.u32 1, %s25827_s1  }
0x2139   : > { %p25829_p10 = scmp.ne.s32.totalorder %s25828_s24, 0  ;;  %s15077_s8 = scalar_lea.sflag [#allocation5], %s15076_s25 }
0x213b   : > { %p20582_p2 = pnand %p20610_p0, %p25829_p10 }
0x213d   : > { %22039 = dma.done.wait (!%p20582_p2), %s15077_s8, 16  }
0x213e   : > { %22041 = vsyncadd (!%p20582_p2), %s15077_s8, 4294967280  ;;  %s15085_s9 = scalar_lea.sflag [#allocation23], %s15076_s25 }
0x213f   : > { %22043 = dma.done.wait (!%p20582_p2), %s15085_s9, 16  }
0x2140   : > { %22045 = vsyncadd (!%p20582_p2), %s15085_s9, 4294967280  ;;  %s25830_s28 = sld [smem:[#allocation35_spill]]  ;;  %s25831_s7 = sld [smem:[#allocation33_spill]] }
0x2141   : > { %s25832_s0 = sld [smem:[#allocation36_spill]]  ;;  %s25833_s27 = smov %s22052_s3 }
0x2146   : > { %p46_p3 = scmp.ge.s32.totalorder %s25830_s28, 4   ;;  %s25834_s3 = smov %s25831_s7 }
0x2147   : > { %s25835_s7 = smov %s25832_s0 }
0x2148   :  { %48 = sbr.rel (!%p46_p3) target bundleno = 34 (0x22), region = 333 }
0x214f   :  { %15089 = vsyncpa [#allocation4], 1 }
0x2150   :  { %15091 = vsyncpa [#allocation4 + $0x1], 1 }
0x2151   :  { %15092 = vsyncpa [#allocation7], 1 }
0x2152   :  { %15093 = vsyncpa [#allocation10], 1 }
0x2153   :  { %15094 = vsyncpa [#allocation13], 1 }
0x2154   :  { %15095 = vsyncpa [#allocation16], 1 }
0x2155   :  { %15096 = vsyncpa [#allocation19], 1 }
0x2156   :  { %15097 = vsyncpa [#allocation5], 1 }
0x2157   :  { %15099 = vsyncpa [#allocation5 + $0x1], 1 }
0x2158   :  { %15100 = vsyncpa [#allocation23], 1 }
0x2159   :  { %15102 = vsyncpa [#allocation23 + $0x1], 1 }

</bundles_post_ra>
